<compile_context>
chip_gen: v7x
topology: tpu7x:2x2x1
jax: 0.10.0
libtpu: 0.0.40
codegen_flags: <defaults>
</compile_context>

<pallas_src>
import functools

import jax
import jax.numpy as jnp
from jax.experimental import pallas as pl
from jax.experimental.pallas import tpu as pltpu


def _round_up(x, m):
    return (x + m - 1) // m * m


# ----------------------------------------------------------------------------
# The fused kernel: one batch image per grid step.
# ----------------------------------------------------------------------------
def _up_block_kernel(up_ref, down_ref, wup_ref, bup_ref,
                     w1_ref, s1_ref, b1_ref,
                     w2_ref, s2_ref, b2_ref,
                     o_ref,
                     cat_ref, mid_ref, acc_ref,
                     *, H, W, Ho, Wo, Wp, M, Cup):
    # Zero the padded flat slabs (halo rows/cols + garbage columns + any
    # channel padding).  Scratch persists across grid steps -> re-init here.
    cat_ref[...] = jnp.zeros_like(cat_ref)
    mid_ref[...] = jnp.zeros_like(mid_ref)

    # ---- ConvTranspose2d(k=2, s=2); interleave fused into the slab write ----
    # One GEMM per output-row parity a.  rhs columns are ordered (b, cout), so
    # a row-major reshape turns GEMM row m=(h,w) into the two upsampled pixels
    # (2w+0, 2w+1) of upsampled row 2h+a.
    x_up = up_ref[0]                                     # (H*W, Cin)  bf16
    strips = []
    for a in range(2):
        y = jnp.dot(x_up, wup_ref[a], preferred_element_type=jnp.float32)
        y = y.reshape(2 * H * W, Cup) + bup_ref[...]     # rows ordered (h, w, b)
        strips.append(y.astype(cat_ref.dtype))

    # Fused torch.cat([upsampled, down_x], channel=1): each padded slab row is
    # written exactly once, full lane width, into the pre-zeroed slab.
    for r in range(Ho):
        a, h = r % 2, r // 2
        up_row = strips[a][2 * h * W:2 * h * W + 2 * W, :]          # (Wo, Cup)
        row = jnp.concatenate([up_row, down_ref[0, r]], axis=-1)    # (Wo, Ccat)
        cat_ref[pl.ds((r + 1) * Wp + 1, Wo), :] = row

    # ---- conv_block_1: implicit-im2col 3x3 conv, folded BN + ReLU ----------
    # K = Cup + Cdown per tap (256 at default sizes -> full-depth MXU).
    acc_ref[...] = jnp.zeros_like(acc_ref)
    for di in range(3):
        for dj in range(3):
            acc_ref[...] += jnp.dot(cat_ref[pl.ds(di * Wp + dj, M), :],
                                    w1_ref[di, dj],
                                    preferred_element_type=jnp.float32)
    y1 = jnp.maximum(acc_ref[...] * s1_ref[...] + b1_ref[...], 0.0)
    y1 = y1.astype(mid_ref.dtype)
    # Store only the valid columns back into the (pre-zeroed) padded mid slab,
    # so cb2 reads a correctly zero-padded input with no HBM round trip.
    for i in range(Ho):
        mid_ref[pl.ds((i + 1) * Wp + 1, Wo), :] = y1[i * Wp:i * Wp + Wo, :]

    # ---- conv_block_2 -------------------------------------------------------
    acc_ref[...] = jnp.zeros_like(acc_ref)
    for di in range(3):
        for dj in range(3):
            acc_ref[...] += jnp.dot(mid_ref[pl.ds(di * Wp + dj, M), :],
                                    w2_ref[di, dj],
                                    preferred_element_type=jnp.float32)
    y2 = jnp.maximum(acc_ref[...] * s2_ref[...] + b2_ref[...], 0.0)
    for i in range(Ho):
        o_ref[0, i] = y2[i * Wp:i * Wp + Wo, :]


# ----------------------------------------------------------------------------
# Parameters (deterministic, synthetic) and BN folding.
# ----------------------------------------------------------------------------
class KeyGen:
    def __init__(self, seed):
        self._base = jax.random.PRNGKey(seed)
        self._n = 0

    def __call__(self):
        self._n += 1
        return jax.random.fold_in(self._base, self._n)


def init_conv(kg, kh, kw, cin, cout, bias=True):
    std = (2.0 / (kh * kw * cin)) ** 0.5
    p = {'w': jax.random.normal(kg(), (kh, kw, cin, cout), jnp.float32) * std}
    p['b'] = (0.01 * jax.random.normal(kg(), (cout,), jnp.float32)) if bias else None
    return p


def init_bn(kg, c):
    return {
        'gamma': 1.0 + 0.1 * jax.random.normal(kg(), (c,), jnp.float32),
        'beta': 0.1 * jax.random.normal(kg(), (c,), jnp.float32),
        'mean': 0.1 * jax.random.normal(kg(), (c,), jnp.float32),
        'var': 1.0 + 0.5 * jax.random.uniform(kg(), (c,), jnp.float32),
    }


def init_conv_block(kg, cin, cout):
    return {'conv': init_conv(kg, 3, 3, cin, cout, bias=True), 'bn': init_bn(kg, cout)}


def init_up_block(seed, in_ch, out_ch, up_in=None, up_out=None):
    kg = KeyGen(seed)
    up_in = in_ch if up_in is None else up_in
    up_out = out_ch if up_out is None else up_out
    std = (1.0 / (up_in * 4)) ** 0.5
    return {
        'up': {'w': jax.random.normal(kg(), (up_in, up_out, 2, 2), jnp.float32) * std,
               'b': 0.01 * jax.random.normal(kg(), (up_out,), jnp.float32)},
        'cb1': init_conv_block(kg, in_ch, out_ch),
        'cb2': init_conv_block(kg, out_ch, out_ch),
    }


def _fold_bn(conv_p, bn_p, eps=1e-5):
    scale = bn_p['gamma'] / jnp.sqrt(bn_p['var'] + eps)
    cb = conv_p['b'] if conv_p['b'] is not None else 0.0
    bias = (cb - bn_p['mean']) * scale + bn_p['beta']
    return scale, bias


# ----------------------------------------------------------------------------
# Forward pass wrapper: weight prep (XLA, parameter-sized) + one pallas_call.
# ----------------------------------------------------------------------------
def up_block_forward(params, up_x_nchw, down_x_nchw):
    up_x = jnp.transpose(up_x_nchw, (0, 2, 3, 1))      # NCHW -> NHWC
    down_x = jnp.transpose(down_x_nchw, (0, 2, 3, 1))

    N, H, W, Cin = up_x.shape
    _, Ho, Wo, Cd = down_x.shape
    assert Ho == 2 * H and Wo == 2 * W

    wup = params['up']['w']                              # (Cin, Cup, 2, 2)
    Cup = wup.shape[1]
    w1 = params['cb1']['conv']['w']                      # (3, 3, Cup + Cd, Co)
    w2 = params['cb2']['conv']['w']                      # (3, 3, Co, Co)
    Co = w1.shape[-1]
    assert w1.shape[2] == Cup + Cd

    # Channel padding to lane multiples (no-ops at the default sizes).
    Cinp = _round_up(Cin, 128)
    Cupp = _round_up(Cup, 128)
    Cdp = _round_up(Cd, 128)
    Copp = _round_up(Co, 128)
    Ccatp = Cupp + Cdp

    # Flat im2col slab geometry (shared by cb1 and cb2): pad=1 each side,
    # Wp rounded to a sublane multiple so di*Wp row shifts stay aligned.
    Wp = _round_up(Wo + 2, 8)
    Hp = Ho + 3
    M = Ho * Wp

    # --- activations: bf16, channel-padded; up_x spatially flattened (free) ---
    up_flat = jnp.pad(up_x.astype(jnp.bfloat16),
                      ((0, 0), (0, 0), (0, 0), (0, Cinp - Cin))).reshape(N, H * W, Cinp)
    down_p = jnp.pad(down_x.astype(jnp.bfloat16),
                     ((0, 0), (0, 0), (0, 0), (0, Cdp - Cd)))

    # --- ConvTranspose weight -> (a, cin, (b, cout)), bf16 ---
    wupr = jnp.transpose(wup, (2, 0, 3, 1))              # (a, ci, b, co)
    wupr = jnp.pad(wupr, ((0, 0), (0, Cinp - Cin), (0, 0), (0, Cupp - Cup)))
    wupr = wupr.reshape(2, Cinp, 2 * Cupp).astype(jnp.bfloat16)
    bup = jnp.pad(params['up']['b'].astype(jnp.float32),
                  (0, Cupp - Cup)).reshape(1, Cupp)

    # --- cb1 weights: split cin into [upsample | skip] halves, pad each ---
    s1, b1 = _fold_bn(params['cb1']['conv'], params['cb1']['bn'])
    w1u = jnp.pad(w1[:, :, :Cup, :], ((0, 0), (0, 0), (0, Cupp - Cup), (0, Copp - Co)))
    w1d = jnp.pad(w1[:, :, Cup:, :], ((0, 0), (0, 0), (0, Cdp - Cd), (0, Copp - Co)))
    w1p = jnp.concatenate([w1u, w1d], axis=2).astype(jnp.bfloat16)    # (3,3,Ccatp,Copp)
    s1p = jnp.pad(s1.astype(jnp.float32), (0, Copp - Co)).reshape(1, Copp)
    b1p = jnp.pad(b1.astype(jnp.float32), (0, Copp - Co)).reshape(1, Copp)

    s2, b2 = _fold_bn(params['cb2']['conv'], params['cb2']['bn'])
    w2p = jnp.pad(w2, ((0, 0), (0, 0), (0, Copp - Co), (0, Copp - Co))).astype(jnp.bfloat16)
    s2p = jnp.pad(s2.astype(jnp.float32), (0, Copp - Co)).reshape(1, Copp)
    b2p = jnp.pad(b2.astype(jnp.float32), (0, Copp - Co)).reshape(1, Copp)

    kernel = functools.partial(_up_block_kernel, H=H, W=W, Ho=Ho, Wo=Wo,
                               Wp=Wp, M=M, Cup=Cupp)

    flops = N * (8 * H * W * Cinp * Cupp
                 + 18 * M * Ccatp * Copp
                 + 18 * M * Copp * Copp)
    bytes_acc = (up_flat.size * 2 + down_p.size * 2
                 + wupr.size * 2 + w1p.size * 2 + w2p.size * 2
                 + N * Ho * Wo * Copp * 4)

    out = pl.pallas_call(
        kernel,
        out_shape=jax.ShapeDtypeStruct((N, Ho, Wo, Copp), jnp.float32),
        grid_spec=pltpu.PrefetchScalarGridSpec(
            num_scalar_prefetch=0,
            grid=(N,),
            in_specs=[
                pl.BlockSpec((1, H * W, Cinp), lambda n: (n, 0, 0)),
                pl.BlockSpec((1, Ho, Wo, Cdp), lambda n: (n, 0, 0, 0)),
                pl.BlockSpec((2, Cinp, 2 * Cupp), lambda n: (0, 0, 0)),
                pl.BlockSpec((1, Cupp), lambda n: (0, 0)),
                pl.BlockSpec((3, 3, Ccatp, Copp), lambda n: (0, 0, 0, 0)),
                pl.BlockSpec((1, Copp), lambda n: (0, 0)),
                pl.BlockSpec((1, Copp), lambda n: (0, 0)),
                pl.BlockSpec((3, 3, Copp, Copp), lambda n: (0, 0, 0, 0)),
                pl.BlockSpec((1, Copp), lambda n: (0, 0)),
                pl.BlockSpec((1, Copp), lambda n: (0, 0)),
            ],
            out_specs=pl.BlockSpec((1, Ho, Wo, Copp), lambda n: (n, 0, 0, 0)),
            scratch_shapes=[
                pltpu.VMEM((Hp * Wp, Ccatp), jnp.bfloat16),   # concat input slab
                pltpu.VMEM((Hp * Wp, Copp), jnp.bfloat16),    # cb1 output slab
                pltpu.VMEM((M, Copp), jnp.float32),           # f32 accumulator
            ],
        ),
        compiler_params=pltpu.CompilerParams(
            dimension_semantics=("parallel",)),
        cost_estimate=pl.CostEstimate(flops=flops, transcendentals=0,
                                      bytes_accessed=bytes_acc),
    )(up_flat, down_p, wupr, bup, w1p, s1p, b1p, w2p, s2p, b2p)

    if Copp != Co:
        out = out[..., :Co]
    return jnp.transpose(out, (0, 3, 1, 2))               # NHWC -> NCHW


# ----------------------------------------------------------------------------
if __name__ == "__main__":
    in_channels, out_channels = 256, 128   # up: 256 -> 128; skip carries the other 128
    batch, spatial = 2, 8                  # up_x 8x8 -> 16x16 / skip 16x16

    params = init_up_block(seed=0, in_ch=in_channels, out_ch=out_channels)

    key = jax.random.PRNGKey(0)
    k1, k2 = jax.random.split(key)
    up_x = jax.random.normal(k1, (batch, in_channels, spatial, spatial), jnp.float32)
    down_x = jax.random.normal(
        k2, (batch, in_channels - out_channels, 2 * spatial, 2 * spatial), jnp.float32)

    fwd = jax.jit(up_block_forward)
    out = jax.block_until_ready(fwd(params, up_x, down_x))

    assert out.shape == (batch, out_channels, 2 * spatial, 2 * spatial), out.shape
    assert bool(jnp.all(jnp.isfinite(out)))
    print("KERNEL_OK")
</pallas_src>

<mosaic_0001>
module attributes {stable_mosaic.version = 11 : i64} {
  func.func @_up_block_kernel(%arg0: i32, %arg1: memref<1x64x256xbf16, #tpu.memory_space<vmem>>, %arg2: memref<1x16x16x128xbf16, #tpu.memory_space<vmem>>, %arg3: memref<2x256x256xbf16, #tpu.memory_space<vmem>>, %arg4: memref<1x128xf32, #tpu.memory_space<vmem>>, %arg5: memref<3x3x256x128xbf16, #tpu.memory_space<vmem>>, %arg6: memref<1x128xf32, #tpu.memory_space<vmem>>, %arg7: memref<1x128xf32, #tpu.memory_space<vmem>>, %arg8: memref<3x3x128x128xbf16, #tpu.memory_space<vmem>>, %arg9: memref<1x128xf32, #tpu.memory_space<vmem>>, %arg10: memref<1x128xf32, #tpu.memory_space<vmem>>, %arg11: memref<1x16x16x128xf32, #tpu.memory_space<vmem>>, %arg12: memref<456x256xbf16, #tpu.memory_space<vmem>>, %arg13: memref<456x128xbf16, #tpu.memory_space<vmem>>, %arg14: memref<384x128xf32, #tpu.memory_space<vmem>>) attributes {dimension_semantics = [#tpu.dimension_semantics<parallel>], iteration_bounds = array<i64: 2>, scalar_prefetch = 0 : i64, scratch_operands = 3 : i64, tpu.core_type = #tpu.core_type<tc>, window_params = [{transform_indices = @transform_0, window_bounds = array<i64: 1, 64, 256>}, {transform_indices = @transform_1, window_bounds = array<i64: 1, 16, 16, 128>}, {pipeline_mode = #tpu.pipeline_mode<synchronous>, transform_indices = @transform_2, window_bounds = array<i64: 2, 256, 256>}, {pipeline_mode = #tpu.pipeline_mode<synchronous>, transform_indices = @transform_3, window_bounds = array<i64: 1, 128>}, {pipeline_mode = #tpu.pipeline_mode<synchronous>, transform_indices = @transform_4, window_bounds = array<i64: 3, 3, 256, 128>}, {pipeline_mode = #tpu.pipeline_mode<synchronous>, transform_indices = @transform_5, window_bounds = array<i64: 1, 128>}, {pipeline_mode = #tpu.pipeline_mode<synchronous>, transform_indices = @transform_6, window_bounds = array<i64: 1, 128>}, {pipeline_mode = #tpu.pipeline_mode<synchronous>, transform_indices = @transform_7, window_bounds = array<i64: 3, 3, 128, 128>}, {pipeline_mode = #tpu.pipeline_mode<synchronous>, transform_indices = @transform_8, window_bounds = array<i64: 1, 128>}, {pipeline_mode = #tpu.pipeline_mode<synchronous>, transform_indices = @transform_9, window_bounds = array<i64: 1, 128>}, {transform_indices = @transform_10, window_bounds = array<i64: 1, 16, 16, 128>}]} {
    %cst = arith.constant 0.000000e+00 : bf16
    %0 = vector.broadcast %cst : bf16 to vector<456x256xbf16>
    %c0 = arith.constant 0 : index
    %c0_0 = arith.constant 0 : index
    %1 = vector.load %arg12[%c0, %c0_0] : memref<456x256xbf16, #tpu.memory_space<vmem>>, vector<456x256xbf16>
    tpu.vector_store %arg12[%c0, %c0_0], %0 {strides = array<i32>} : memref<456x256xbf16, #tpu.memory_space<vmem>>, vector<456x256xbf16>,
    %cst_1 = arith.constant 0.000000e+00 : bf16
    %2 = vector.broadcast %cst_1 : bf16 to vector<456x128xbf16>
    %c0_2 = arith.constant 0 : index
    %c0_3 = arith.constant 0 : index
    %3 = vector.load %arg13[%c0_2, %c0_3] : memref<456x128xbf16, #tpu.memory_space<vmem>>, vector<456x128xbf16>
    tpu.vector_store %arg13[%c0_2, %c0_3], %2 {strides = array<i32>} : memref<456x128xbf16, #tpu.memory_space<vmem>>, vector<456x128xbf16>,
    %c0_4 = arith.constant 0 : index
    %c0_5 = arith.constant 0 : index
    %c0_6 = arith.constant 0 : index
    %4 = vector.load %arg1[%c0_4, %c0_5, %c0_6] : memref<1x64x256xbf16, #tpu.memory_space<vmem>>, vector<1x64x256xbf16>
    %5 = vector.shape_cast %4 : vector<1x64x256xbf16> to vector<64x256xbf16>
    %c0_7 = arith.constant 0 : index
    %c0_8 = arith.constant 0 : index
    %c0_9 = arith.constant 0 : index
    %6 = vector.load %arg3[%c0_7, %c0_8, %c0_9] : memref<2x256x256xbf16, #tpu.memory_space<vmem>>, vector<1x256x256xbf16>
    %7 = vector.shape_cast %6 : vector<1x256x256xbf16> to vector<256x256xbf16>
    %cst_10 = arith.constant dense<0.000000e+00> : vector<64x256xf32>
    %8 = tpu.matmul %5, %7, %cst_10 {dimension_numbers = #tpu.dot_dimension_numbers<[1], [0], [0], [1], [0, 0, 1, 1], [], []>} : vector<64x256xbf16>, vector<256x256xbf16>, vector<64x256xf32> -> vector<64x256xf32>
    %9 = vector.shape_cast %8 : vector<64x256xf32> to vector<128x128xf32>
    %c0_11 = arith.constant 0 : index
    %c0_12 = arith.constant 0 : index
    %10 = vector.load %arg4[%c0_11, %c0_12] : memref<1x128xf32, #tpu.memory_space<vmem>>, vector<1x128xf32>
    %11 = vector.broadcast %10 : vector<1x128xf32> to vector<128x128xf32>
    %12 = arith.addf %9, %11 : vector<128x128xf32>
    %13 = arith.truncf %12 : vector<128x128xf32> to vector<128x128xbf16>
    %c1 = arith.constant 1 : index
    %c0_13 = arith.constant 0 : index
    %c0_14 = arith.constant 0 : index
    %14 = vector.load %arg3[%c1, %c0_13, %c0_14] : memref<2x256x256xbf16, #tpu.memory_space<vmem>>, vector<1x256x256xbf16>
    %15 = vector.shape_cast %14 : vector<1x256x256xbf16> to vector<256x256xbf16>
    %cst_15 = arith.constant dense<0.000000e+00> : vector<64x256xf32>
    %16 = tpu.matmul %5, %15, %cst_15 {dimension_numbers = #tpu.dot_dimension_numbers<[1], [0], [0], [1], [0, 0, 1, 1], [], []>} : vector<64x256xbf16>, vector<256x256xbf16>, vector<64x256xf32> -> vector<64x256xf32>
    %17 = vector.shape_cast %16 : vector<64x256xf32> to vector<128x128xf32>
    %c0_16 = arith.constant 0 : index
    %c0_17 = arith.constant 0 : index
    %18 = vector.load %arg4[%c0_16, %c0_17] : memref<1x128xf32, #tpu.memory_space<vmem>>, vector<1x128xf32>
    %19 = vector.broadcast %18 : vector<1x128xf32> to vector<128x128xf32>
    %20 = arith.addf %17, %19 : vector<128x128xf32>
    %21 = arith.truncf %20 : vector<128x128xf32> to vector<128x128xbf16>
    %22 = vector.extract_strided_slice %13 {offsets = [0, 0], sizes = [16, 128], strides = [1, 1]} : vector<128x128xbf16> to vector<16x128xbf16>
    %c0_18 = arith.constant 0 : index
    %c0_19 = arith.constant 0 : index
    %c0_20 = arith.constant 0 : index
    %c0_21 = arith.constant 0 : index
    %23 = vector.load %arg2[%c0_18, %c0_19, %c0_20, %c0_21] : memref<1x16x16x128xbf16, #tpu.memory_space<vmem>>, vector<1x1x16x128xbf16>
    %24 = vector.shape_cast %23 : vector<1x1x16x128xbf16> to vector<16x128xbf16>
    %25 = tpu.concatenate %22, %24 in 1 : vector<16x128xbf16>, vector<16x128xbf16> -> vector<16x256xbf16>
    %c25 = arith.constant 25 : index
    %c0_22 = arith.constant 0 : index
    %26 = vector.load %arg12[%c25, %c0_22] : memref<456x256xbf16, #tpu.memory_space<vmem>>, vector<16x256xbf16>
    tpu.vector_store %arg12[%c25, %c0_22], %25 {strides = array<i32>} : memref<456x256xbf16, #tpu.memory_space<vmem>>, vector<16x256xbf16>,
    %27 = vector.extract_strided_slice %21 {offsets = [0, 0], sizes = [16, 128], strides = [1, 1]} : vector<128x128xbf16> to vector<16x128xbf16>
    %c0_23 = arith.constant 0 : index
    %c1_24 = arith.constant 1 : index
    %c0_25 = arith.constant 0 : index
    %c0_26 = arith.constant 0 : index
    %28 = vector.load %arg2[%c0_23, %c1_24, %c0_25, %c0_26] : memref<1x16x16x128xbf16, #tpu.memory_space<vmem>>, vector<1x1x16x128xbf16>
    %29 = vector.shape_cast %28 : vector<1x1x16x128xbf16> to vector<16x128xbf16>
    %30 = tpu.concatenate %27, %29 in 1 : vector<16x128xbf16>, vector<16x128xbf16> -> vector<16x256xbf16>
    %c49 = arith.constant 49 : index
    %c0_27 = arith.constant 0 : index
    %31 = vector.load %arg12[%c49, %c0_27] : memref<456x256xbf16, #tpu.memory_space<vmem>>, vector<16x256xbf16>
    tpu.vector_store %arg12[%c49, %c0_27], %30 {strides = array<i32>} : memref<456x256xbf16, #tpu.memory_space<vmem>>, vector<16x256xbf16>,
    %32 = vector.extract_strided_slice %13 {offsets = [16, 0], sizes = [16, 128], strides = [1, 1]} : vector<128x128xbf16> to vector<16x128xbf16>
    %c0_28 = arith.constant 0 : index
    %c2 = arith.constant 2 : index
    %c0_29 = arith.constant 0 : index
    %c0_30 = arith.constant 0 : index
    %33 = vector.load %arg2[%c0_28, %c2, %c0_29, %c0_30] : memref<1x16x16x128xbf16, #tpu.memory_space<vmem>>, vector<1x1x16x128xbf16>
    %34 = vector.shape_cast %33 : vector<1x1x16x128xbf16> to vector<16x128xbf16>
    %35 = tpu.concatenate %32, %34 in 1 : vector<16x128xbf16>, vector<16x128xbf16> -> vector<16x256xbf16>
    %c73 = arith.constant 73 : index
    %c0_31 = arith.constant 0 : index
    %36 = vector.load %arg12[%c73, %c0_31] : memref<456x256xbf16, #tpu.memory_space<vmem>>, vector<16x256xbf16>
    tpu.vector_store %arg12[%c73, %c0_31], %35 {strides = array<i32>} : memref<456x256xbf16, #tpu.memory_space<vmem>>, vector<16x256xbf16>,
    %37 = vector.extract_strided_slice %21 {offsets = [16, 0], sizes = [16, 128], strides = [1, 1]} : vector<128x128xbf16> to vector<16x128xbf16>
    %c0_32 = arith.constant 0 : index
    %c3 = arith.constant 3 : index
    %c0_33 = arith.constant 0 : index
    %c0_34 = arith.constant 0 : index
    %38 = vector.load %arg2[%c0_32, %c3, %c0_33, %c0_34] : memref<1x16x16x128xbf16, #tpu.memory_space<vmem>>, vector<1x1x16x128xbf16>
    %39 = vector.shape_cast %38 : vector<1x1x16x128xbf16> to vector<16x128xbf16>
    %40 = tpu.concatenate %37, %39 in 1 : vector<16x128xbf16>, vector<16x128xbf16> -> vector<16x256xbf16>
    %c97 = arith.constant 97 : index
    %c0_35 = arith.constant 0 : index
    %41 = vector.load %arg12[%c97, %c0_35] : memref<456x256xbf16, #tpu.memory_space<vmem>>, vector<16x256xbf16>
    tpu.vector_store %arg12[%c97, %c0_35], %40 {strides = array<i32>} : memref<456x256xbf16, #tpu.memory_space<vmem>>, vector<16x256xbf16>,
    %42 = vector.extract_strided_slice %13 {offsets = [32, 0], sizes = [16, 128], strides = [1, 1]} : vector<128x128xbf16> to vector<16x128xbf16>
    %c0_36 = arith.constant 0 : index
    %c4 = arith.constant 4 : index
    %c0_37 = arith.constant 0 : index
    %c0_38 = arith.constant 0 : index
    %43 = vector.load %arg2[%c0_36, %c4, %c0_37, %c0_38] : memref<1x16x16x128xbf16, #tpu.memory_space<vmem>>, vector<1x1x16x128xbf16>
    %44 = vector.shape_cast %43 : vector<1x1x16x128xbf16> to vector<16x128xbf16>
    %45 = tpu.concatenate %42, %44 in 1 : vector<16x128xbf16>, vector<16x128xbf16> -> vector<16x256xbf16>
    %c121 = arith.constant 121 : index
    %c0_39 = arith.constant 0 : index
    %46 = vector.load %arg12[%c121, %c0_39] : memref<456x256xbf16, #tpu.memory_space<vmem>>, vector<16x256xbf16>
    tpu.vector_store %arg12[%c121, %c0_39], %45 {strides = array<i32>} : memref<456x256xbf16, #tpu.memory_space<vmem>>, vector<16x256xbf16>,
    %47 = vector.extract_strided_slice %21 {offsets = [32, 0], sizes = [16, 128], strides = [1, 1]} : vector<128x128xbf16> to vector<16x128xbf16>
    %c0_40 = arith.constant 0 : index
    %c5 = arith.constant 5 : index
    %c0_41 = arith.constant 0 : index
    %c0_42 = arith.constant 0 : index
    %48 = vector.load %arg2[%c0_40, %c5, %c0_41, %c0_42] : memref<1x16x16x128xbf16, #tpu.memory_space<vmem>>, vector<1x1x16x128xbf16>
    %49 = vector.shape_cast %48 : vector<1x1x16x128xbf16> to vector<16x128xbf16>
    %50 = tpu.concatenate %47, %49 in 1 : vector<16x128xbf16>, vector<16x128xbf16> -> vector<16x256xbf16>
    %c145 = arith.constant 145 : index
    %c0_43 = arith.constant 0 : index
    %51 = vector.load %arg12[%c145, %c0_43] : memref<456x256xbf16, #tpu.memory_space<vmem>>, vector<16x256xbf16>
    tpu.vector_store %arg12[%c145, %c0_43], %50 {strides = array<i32>} : memref<456x256xbf16, #tpu.memory_space<vmem>>, vector<16x256xbf16>,
    %52 = vector.extract_strided_slice %13 {offsets = [48, 0], sizes = [16, 128], strides = [1, 1]} : vector<128x128xbf16> to vector<16x128xbf16>
    %c0_44 = arith.constant 0 : index
    %c6 = arith.constant 6 : index
    %c0_45 = arith.constant 0 : index
    %c0_46 = arith.constant 0 : index
    %53 = vector.load %arg2[%c0_44, %c6, %c0_45, %c0_46] : memref<1x16x16x128xbf16, #tpu.memory_space<vmem>>, vector<1x1x16x128xbf16>
    %54 = vector.shape_cast %53 : vector<1x1x16x128xbf16> to vector<16x128xbf16>
    %55 = tpu.concatenate %52, %54 in 1 : vector<16x128xbf16>, vector<16x128xbf16> -> vector<16x256xbf16>
    %c169 = arith.constant 169 : index
    %c0_47 = arith.constant 0 : index
    %56 = vector.load %arg12[%c169, %c0_47] : memref<456x256xbf16, #tpu.memory_space<vmem>>, vector<16x256xbf16>
    tpu.vector_store %arg12[%c169, %c0_47], %55 {strides = array<i32>} : memref<456x256xbf16, #tpu.memory_space<vmem>>, vector<16x256xbf16>,
    %57 = vector.extract_strided_slice %21 {offsets = [48, 0], sizes = [16, 128], strides = [1, 1]} : vector<128x128xbf16> to vector<16x128xbf16>
    %c0_48 = arith.constant 0 : index
    %c7 = arith.constant 7 : index
    %c0_49 = arith.constant 0 : index
    %c0_50 = arith.constant 0 : index
    %58 = vector.load %arg2[%c0_48, %c7, %c0_49, %c0_50] : memref<1x16x16x128xbf16, #tpu.memory_space<vmem>>, vector<1x1x16x128xbf16>
    %59 = vector.shape_cast %58 : vector<1x1x16x128xbf16> to vector<16x128xbf16>
    %60 = tpu.concatenate %57, %59 in 1 : vector<16x128xbf16>, vector<16x128xbf16> -> vector<16x256xbf16>
    %c193 = arith.constant 193 : index
    %c0_51 = arith.constant 0 : index
    %61 = vector.load %arg12[%c193, %c0_51] : memref<456x256xbf16, #tpu.memory_space<vmem>>, vector<16x256xbf16>
    tpu.vector_store %arg12[%c193, %c0_51], %60 {strides = array<i32>} : memref<456x256xbf16, #tpu.memory_space<vmem>>, vector<16x256xbf16>,
    %62 = vector.extract_strided_slice %13 {offsets = [64, 0], sizes = [16, 128], strides = [1, 1]} : vector<128x128xbf16> to vector<16x128xbf16>
    %c0_52 = arith.constant 0 : index
    %c8 = arith.constant 8 : index
    %c0_53 = arith.constant 0 : index
    %c0_54 = arith.constant 0 : index
    %63 = vector.load %arg2[%c0_52, %c8, %c0_53, %c0_54] : memref<1x16x16x128xbf16, #tpu.memory_space<vmem>>, vector<1x1x16x128xbf16>
    %64 = vector.shape_cast %63 : vector<1x1x16x128xbf16> to vector<16x128xbf16>
    %65 = tpu.concatenate %62, %64 in 1 : vector<16x128xbf16>, vector<16x128xbf16> -> vector<16x256xbf16>
    %c217 = arith.constant 217 : index
    %c0_55 = arith.constant 0 : index
    %66 = vector.load %arg12[%c217, %c0_55] : memref<456x256xbf16, #tpu.memory_space<vmem>>, vector<16x256xbf16>
    tpu.vector_store %arg12[%c217, %c0_55], %65 {strides = array<i32>} : memref<456x256xbf16, #tpu.memory_space<vmem>>, vector<16x256xbf16>,
    %67 = vector.extract_strided_slice %21 {offsets = [64, 0], sizes = [16, 128], strides = [1, 1]} : vector<128x128xbf16> to vector<16x128xbf16>
    %c0_56 = arith.constant 0 : index
    %c9 = arith.constant 9 : index
    %c0_57 = arith.constant 0 : index
    %c0_58 = arith.constant 0 : index
    %68 = vector.load %arg2[%c0_56, %c9, %c0_57, %c0_58] : memref<1x16x16x128xbf16, #tpu.memory_space<vmem>>, vector<1x1x16x128xbf16>
    %69 = vector.shape_cast %68 : vector<1x1x16x128xbf16> to vector<16x128xbf16>
    %70 = tpu.concatenate %67, %69 in 1 : vector<16x128xbf16>, vector<16x128xbf16> -> vector<16x256xbf16>
    %c241 = arith.constant 241 : index
    %c0_59 = arith.constant 0 : index
    %71 = vector.load %arg12[%c241, %c0_59] : memref<456x256xbf16, #tpu.memory_space<vmem>>, vector<16x256xbf16>
    tpu.vector_store %arg12[%c241, %c0_59], %70 {strides = array<i32>} : memref<456x256xbf16, #tpu.memory_space<vmem>>, vector<16x256xbf16>,
    %72 = vector.extract_strided_slice %13 {offsets = [80, 0], sizes = [16, 128], strides = [1, 1]} : vector<128x128xbf16> to vector<16x128xbf16>
    %c0_60 = arith.constant 0 : index
    %c10 = arith.constant 10 : index
    %c0_61 = arith.constant 0 : index
    %c0_62 = arith.constant 0 : index
    %73 = vector.load %arg2[%c0_60, %c10, %c0_61, %c0_62] : memref<1x16x16x128xbf16, #tpu.memory_space<vmem>>, vector<1x1x16x128xbf16>
    %74 = vector.shape_cast %73 : vector<1x1x16x128xbf16> to vector<16x128xbf16>
    %75 = tpu.concatenate %72, %74 in 1 : vector<16x128xbf16>, vector<16x128xbf16> -> vector<16x256xbf16>
    %c265 = arith.constant 265 : index
    %c0_63 = arith.constant 0 : index
    %76 = vector.load %arg12[%c265, %c0_63] : memref<456x256xbf16, #tpu.memory_space<vmem>>, vector<16x256xbf16>
    tpu.vector_store %arg12[%c265, %c0_63], %75 {strides = array<i32>} : memref<456x256xbf16, #tpu.memory_space<vmem>>, vector<16x256xbf16>,
    %77 = vector.extract_strided_slice %21 {offsets = [80, 0], sizes = [16, 128], strides = [1, 1]} : vector<128x128xbf16> to vector<16x128xbf16>
    %c0_64 = arith.constant 0 : index
    %c11 = arith.constant 11 : index
    %c0_65 = arith.constant 0 : index
    %c0_66 = arith.constant 0 : index
    %78 = vector.load %arg2[%c0_64, %c11, %c0_65, %c0_66] : memref<1x16x16x128xbf16, #tpu.memory_space<vmem>>, vector<1x1x16x128xbf16>
    %79 = vector.shape_cast %78 : vector<1x1x16x128xbf16> to vector<16x128xbf16>
    %80 = tpu.concatenate %77, %79 in 1 : vector<16x128xbf16>, vector<16x128xbf16> -> vector<16x256xbf16>
    %c289 = arith.constant 289 : index
    %c0_67 = arith.constant 0 : index
    %81 = vector.load %arg12[%c289, %c0_67] : memref<456x256xbf16, #tpu.memory_space<vmem>>, vector<16x256xbf16>
    tpu.vector_store %arg12[%c289, %c0_67], %80 {strides = array<i32>} : memref<456x256xbf16, #tpu.memory_space<vmem>>, vector<16x256xbf16>,
    %82 = vector.extract_strided_slice %13 {offsets = [96, 0], sizes = [16, 128], strides = [1, 1]} : vector<128x128xbf16> to vector<16x128xbf16>
    %c0_68 = arith.constant 0 : index
    %c12 = arith.constant 12 : index
    %c0_69 = arith.constant 0 : index
    %c0_70 = arith.constant 0 : index
    %83 = vector.load %arg2[%c0_68, %c12, %c0_69, %c0_70] : memref<1x16x16x128xbf16, #tpu.memory_space<vmem>>, vector<1x1x16x128xbf16>
    %84 = vector.shape_cast %83 : vector<1x1x16x128xbf16> to vector<16x128xbf16>
    %85 = tpu.concatenate %82, %84 in 1 : vector<16x128xbf16>, vector<16x128xbf16> -> vector<16x256xbf16>
    %c313 = arith.constant 313 : index
    %c0_71 = arith.constant 0 : index
    %86 = vector.load %arg12[%c313, %c0_71] : memref<456x256xbf16, #tpu.memory_space<vmem>>, vector<16x256xbf16>
    tpu.vector_store %arg12[%c313, %c0_71], %85 {strides = array<i32>} : memref<456x256xbf16, #tpu.memory_space<vmem>>, vector<16x256xbf16>,
    %87 = vector.extract_strided_slice %21 {offsets = [96, 0], sizes = [16, 128], strides = [1, 1]} : vector<128x128xbf16> to vector<16x128xbf16>
    %c0_72 = arith.constant 0 : index
    %c13 = arith.constant 13 : index
    %c0_73 = arith.constant 0 : index
    %c0_74 = arith.constant 0 : index
    %88 = vector.load %arg2[%c0_72, %c13, %c0_73, %c0_74] : memref<1x16x16x128xbf16, #tpu.memory_space<vmem>>, vector<1x1x16x128xbf16>
    %89 = vector.shape_cast %88 : vector<1x1x16x128xbf16> to vector<16x128xbf16>
    %90 = tpu.concatenate %87, %89 in 1 : vector<16x128xbf16>, vector<16x128xbf16> -> vector<16x256xbf16>
    %c337 = arith.constant 337 : index
    %c0_75 = arith.constant 0 : index
    %91 = vector.load %arg12[%c337, %c0_75] : memref<456x256xbf16, #tpu.memory_space<vmem>>, vector<16x256xbf16>
    tpu.vector_store %arg12[%c337, %c0_75], %90 {strides = array<i32>} : memref<456x256xbf16, #tpu.memory_space<vmem>>, vector<16x256xbf16>,
    %92 = vector.extract_strided_slice %13 {offsets = [112, 0], sizes = [16, 128], strides = [1, 1]} : vector<128x128xbf16> to vector<16x128xbf16>
    %c0_76 = arith.constant 0 : index
    %c14 = arith.constant 14 : index
    %c0_77 = arith.constant 0 : index
    %c0_78 = arith.constant 0 : index
    %93 = vector.load %arg2[%c0_76, %c14, %c0_77, %c0_78] : memref<1x16x16x128xbf16, #tpu.memory_space<vmem>>, vector<1x1x16x128xbf16>
    %94 = vector.shape_cast %93 : vector<1x1x16x128xbf16> to vector<16x128xbf16>
    %95 = tpu.concatenate %92, %94 in 1 : vector<16x128xbf16>, vector<16x128xbf16> -> vector<16x256xbf16>
    %c361 = arith.constant 361 : index
    %c0_79 = arith.constant 0 : index
    %96 = vector.load %arg12[%c361, %c0_79] : memref<456x256xbf16, #tpu.memory_space<vmem>>, vector<16x256xbf16>
    tpu.vector_store %arg12[%c361, %c0_79], %95 {strides = array<i32>} : memref<456x256xbf16, #tpu.memory_space<vmem>>, vector<16x256xbf16>,
    %97 = vector.extract_strided_slice %21 {offsets = [112, 0], sizes = [16, 128], strides = [1, 1]} : vector<128x128xbf16> to vector<16x128xbf16>
    %c0_80 = arith.constant 0 : index
    %c15 = arith.constant 15 : index
    %c0_81 = arith.constant 0 : index
    %c0_82 = arith.constant 0 : index
    %98 = vector.load %arg2[%c0_80, %c15, %c0_81, %c0_82] : memref<1x16x16x128xbf16, #tpu.memory_space<vmem>>, vector<1x1x16x128xbf16>
    %99 = vector.shape_cast %98 : vector<1x1x16x128xbf16> to vector<16x128xbf16>
    %100 = tpu.concatenate %97, %99 in 1 : vector<16x128xbf16>, vector<16x128xbf16> -> vector<16x256xbf16>
    %c385 = arith.constant 385 : index
    %c0_83 = arith.constant 0 : index
    %101 = vector.load %arg12[%c385, %c0_83] : memref<456x256xbf16, #tpu.memory_space<vmem>>, vector<16x256xbf16>
    tpu.vector_store %arg12[%c385, %c0_83], %100 {strides = array<i32>} : memref<456x256xbf16, #tpu.memory_space<vmem>>, vector<16x256xbf16>,
    %cst_84 = arith.constant 0.000000e+00 : f32
    %102 = vector.broadcast %cst_84 : f32 to vector<384x128xf32>
    %c0_85 = arith.constant 0 : index
    %c0_86 = arith.constant 0 : index
    %103 = vector.load %arg14[%c0_85, %c0_86] : memref<384x128xf32, #tpu.memory_space<vmem>>, vector<384x128xf32>
    tpu.vector_store %arg14[%c0_85, %c0_86], %102 {strides = array<i32>} : memref<384x128xf32, #tpu.memory_space<vmem>>, vector<384x128xf32>,
    %c0_87 = arith.constant 0 : index
    %c0_88 = arith.constant 0 : index
    %104 = vector.load %arg14[%c0_87, %c0_88] : memref<384x128xf32, #tpu.memory_space<vmem>>, vector<384x128xf32>
    %c0_89 = arith.constant 0 : index
    %c0_90 = arith.constant 0 : index
    %105 = vector.load %arg12[%c0_89, %c0_90] : memref<456x256xbf16, #tpu.memory_space<vmem>>, vector<384x256xbf16>
    %c0_91 = arith.constant 0 : index
    %c0_92 = arith.constant 0 : index
    %c0_93 = arith.constant 0 : index
    %c0_94 = arith.constant 0 : index
    %106 = vector.load %arg5[%c0_91, %c0_92, %c0_93, %c0_94] : memref<3x3x256x128xbf16, #tpu.memory_space<vmem>>, vector<1x1x256x128xbf16>
    %107 = vector.shape_cast %106 : vector<1x1x256x128xbf16> to vector<256x128xbf16>
    %cst_95 = arith.constant dense<0.000000e+00> : vector<384x128xf32>
    %108 = tpu.matmul %105, %107, %cst_95 {dimension_numbers = #tpu.dot_dimension_numbers<[1], [0], [0], [1], [0, 0, 1, 1], [], []>} : vector<384x256xbf16>, vector<256x128xbf16>, vector<384x128xf32> -> vector<384x128xf32>
    %109 = arith.addf %104, %108 : vector<384x128xf32>
    %c0_96 = arith.constant 0 : index
    %c0_97 = arith.constant 0 : index
    %110 = vector.load %arg14[%c0_96, %c0_97] : memref<384x128xf32, #tpu.memory_space<vmem>>, vector<384x128xf32>
    tpu.vector_store %arg14[%c0_96, %c0_97], %109 {strides = array<i32>} : memref<384x128xf32, #tpu.memory_space<vmem>>, vector<384x128xf32>,
    %c0_98 = arith.constant 0 : index
    %c0_99 = arith.constant 0 : index
    %111 = vector.load %arg14[%c0_98, %c0_99] : memref<384x128xf32, #tpu.memory_space<vmem>>, vector<384x128xf32>
    %c1_100 = arith.constant 1 : index
    %c0_101 = arith.constant 0 : index
    %112 = vector.load %arg12[%c1_100, %c0_101] : memref<456x256xbf16, #tpu.memory_space<vmem>>, vector<384x256xbf16>
    %c0_102 = arith.constant 0 : index
    %c1_103 = arith.constant 1 : index
    %c0_104 = arith.constant 0 : index
    %c0_105 = arith.constant 0 : index
    %113 = vector.load %arg5[%c0_102, %c1_103, %c0_104, %c0_105] : memref<3x3x256x128xbf16, #tpu.memory_space<vmem>>, vector<1x1x256x128xbf16>
    %114 = vector.shape_cast %113 : vector<1x1x256x128xbf16> to vector<256x128xbf16>
    %cst_106 = arith.constant dense<0.000000e+00> : vector<384x128xf32>
    %115 = tpu.matmul %112, %114, %cst_106 {dimension_numbers = #tpu.dot_dimension_numbers<[1], [0], [0], [1], [0, 0, 1, 1], [], []>} : vector<384x256xbf16>, vector<256x128xbf16>, vector<384x128xf32> -> vector<384x128xf32>
    %116 = arith.addf %111, %115 : vector<384x128xf32>
    %c0_107 = arith.constant 0 : index
    %c0_108 = arith.constant 0 : index
    %117 = vector.load %arg14[%c0_107, %c0_108] : memref<384x128xf32, #tpu.memory_space<vmem>>, vector<384x128xf32>
    tpu.vector_store %arg14[%c0_107, %c0_108], %116 {strides = array<i32>} : memref<384x128xf32, #tpu.memory_space<vmem>>, vector<384x128xf32>,
    %c0_109 = arith.constant 0 : index
    %c0_110 = arith.constant 0 : index
    %118 = vector.load %arg14[%c0_109, %c0_110] : memref<384x128xf32, #tpu.memory_space<vmem>>, vector<384x128xf32>
    %c2_111 = arith.constant 2 : index
    %c0_112 = arith.constant 0 : index
    %119 = vector.load %arg12[%c2_111, %c0_112] : memref<456x256xbf16, #tpu.memory_space<vmem>>, vector<384x256xbf16>
    %c0_113 = arith.constant 0 : index
    %c2_114 = arith.constant 2 : index
    %c0_115 = arith.constant 0 : index
    %c0_116 = arith.constant 0 : index
    %120 = vector.load %arg5[%c0_113, %c2_114, %c0_115, %c0_116] : memref<3x3x256x128xbf16, #tpu.memory_space<vmem>>, vector<1x1x256x128xbf16>
    %121 = vector.shape_cast %120 : vector<1x1x256x128xbf16> to vector<256x128xbf16>
    %cst_117 = arith.constant dense<0.000000e+00> : vector<384x128xf32>
    %122 = tpu.matmul %119, %121, %cst_117 {dimension_numbers = #tpu.dot_dimension_numbers<[1], [0], [0], [1], [0, 0, 1, 1], [], []>} : vector<384x256xbf16>, vector<256x128xbf16>, vector<384x128xf32> -> vector<384x128xf32>
    %123 = arith.addf %118, %122 : vector<384x128xf32>
    %c0_118 = arith.constant 0 : index
    %c0_119 = arith.constant 0 : index
    %124 = vector.load %arg14[%c0_118, %c0_119] : memref<384x128xf32, #tpu.memory_space<vmem>>, vector<384x128xf32>
    tpu.vector_store %arg14[%c0_118, %c0_119], %123 {strides = array<i32>} : memref<384x128xf32, #tpu.memory_space<vmem>>, vector<384x128xf32>,
    %c0_120 = arith.constant 0 : index
    %c0_121 = arith.constant 0 : index
    %125 = vector.load %arg14[%c0_120, %c0_121] : memref<384x128xf32, #tpu.memory_space<vmem>>, vector<384x128xf32>
    %c24 = arith.constant 24 : index
    %c0_122 = arith.constant 0 : index
    %126 = vector.load %arg12[%c24, %c0_122] : memref<456x256xbf16, #tpu.memory_space<vmem>>, vector<384x256xbf16>
    %c1_123 = arith.constant 1 : index
    %c0_124 = arith.constant 0 : index
    %c0_125 = arith.constant 0 : index
    %c0_126 = arith.constant 0 : index
    %127 = vector.load %arg5[%c1_123, %c0_124, %c0_125, %c0_126] : memref<3x3x256x128xbf16, #tpu.memory_space<vmem>>, vector<1x1x256x128xbf16>
    %128 = vector.shape_cast %127 : vector<1x1x256x128xbf16> to vector<256x128xbf16>
    %cst_127 = arith.constant dense<0.000000e+00> : vector<384x128xf32>
    %129 = tpu.matmul %126, %128, %cst_127 {dimension_numbers = #tpu.dot_dimension_numbers<[1], [0], [0], [1], [0, 0, 1, 1], [], []>} : vector<384x256xbf16>, vector<256x128xbf16>, vector<384x128xf32> -> vector<384x128xf32>
    %130 = arith.addf %125, %129 : vector<384x128xf32>
    %c0_128 = arith.constant 0 : index
    %c0_129 = arith.constant 0 : index
    %131 = vector.load %arg14[%c0_128, %c0_129] : memref<384x128xf32, #tpu.memory_space<vmem>>, vector<384x128xf32>
    tpu.vector_store %arg14[%c0_128, %c0_129], %130 {strides = array<i32>} : memref<384x128xf32, #tpu.memory_space<vmem>>, vector<384x128xf32>,
    %c0_130 = arith.constant 0 : index
    %c0_131 = arith.constant 0 : index
    %132 = vector.load %arg14[%c0_130, %c0_131] : memref<384x128xf32, #tpu.memory_space<vmem>>, vector<384x128xf32>
    %c25_132 = arith.constant 25 : index
    %c0_133 = arith.constant 0 : index
    %133 = vector.load %arg12[%c25_132, %c0_133] : memref<456x256xbf16, #tpu.memory_space<vmem>>, vector<384x256xbf16>
    %c1_134 = arith.constant 1 : index
    %c1_135 = arith.constant 1 : index
    %c0_136 = arith.constant 0 : index
    %c0_137 = arith.constant 0 : index
    %134 = vector.load %arg5[%c1_134, %c1_135, %c0_136, %c0_137] : memref<3x3x256x128xbf16, #tpu.memory_space<vmem>>, vector<1x1x256x128xbf16>
    %135 = vector.shape_cast %134 : vector<1x1x256x128xbf16> to vector<256x128xbf16>
    %cst_138 = arith.constant dense<0.000000e+00> : vector<384x128xf32>
    %136 = tpu.matmul %133, %135, %cst_138 {dimension_numbers = #tpu.dot_dimension_numbers<[1], [0], [0], [1], [0, 0, 1, 1], [], []>} : vector<384x256xbf16>, vector<256x128xbf16>, vector<384x128xf32> -> vector<384x128xf32>
    %137 = arith.addf %132, %136 : vector<384x128xf32>
    %c0_139 = arith.constant 0 : index
    %c0_140 = arith.constant 0 : index
    %138 = vector.load %arg14[%c0_139, %c0_140] : memref<384x128xf32, #tpu.memory_space<vmem>>, vector<384x128xf32>
    tpu.vector_store %arg14[%c0_139, %c0_140], %137 {strides = array<i32>} : memref<384x128xf32, #tpu.memory_space<vmem>>, vector<384x128xf32>,
    %c0_141 = arith.constant 0 : index
    %c0_142 = arith.constant 0 : index
    %139 = vector.load %arg14[%c0_141, %c0_142] : memref<384x128xf32, #tpu.memory_space<vmem>>, vector<384x128xf32>
    %c26 = arith.constant 26 : index
    %c0_143 = arith.constant 0 : index
    %140 = vector.load %arg12[%c26, %c0_143] : memref<456x256xbf16, #tpu.memory_space<vmem>>, vector<384x256xbf16>
    %c1_144 = arith.constant 1 : index
    %c2_145 = arith.constant 2 : index
    %c0_146 = arith.constant 0 : index
    %c0_147 = arith.constant 0 : index
    %141 = vector.load %arg5[%c1_144, %c2_145, %c0_146, %c0_147] : memref<3x3x256x128xbf16, #tpu.memory_space<vmem>>, vector<1x1x256x128xbf16>
    %142 = vector.shape_cast %141 : vector<1x1x256x128xbf16> to vector<256x128xbf16>
    %cst_148 = arith.constant dense<0.000000e+00> : vector<384x128xf32>
    %143 = tpu.matmul %140, %142, %cst_148 {dimension_numbers = #tpu.dot_dimension_numbers<[1], [0], [0], [1], [0, 0, 1, 1], [], []>} : vector<384x256xbf16>, vector<256x128xbf16>, vector<384x128xf32> -> vector<384x128xf32>
    %144 = arith.addf %139, %143 : vector<384x128xf32>
    %c0_149 = arith.constant 0 : index
    %c0_150 = arith.constant 0 : index
    %145 = vector.load %arg14[%c0_149, %c0_150] : memref<384x128xf32, #tpu.memory_space<vmem>>, vector<384x128xf32>
    tpu.vector_store %arg14[%c0_149, %c0_150], %144 {strides = array<i32>} : memref<384x128xf32, #tpu.memory_space<vmem>>, vector<384x128xf32>,
    %c0_151 = arith.constant 0 : index
    %c0_152 = arith.constant 0 : index
    %146 = vector.load %arg14[%c0_151, %c0_152] : memref<384x128xf32, #tpu.memory_space<vmem>>, vector<384x128xf32>
    %c48 = arith.constant 48 : index
    %c0_153 = arith.constant 0 : index
    %147 = vector.load %arg12[%c48, %c0_153] : memref<456x256xbf16, #tpu.memory_space<vmem>>, vector<384x256xbf16>
    %c2_154 = arith.constant 2 : index
    %c0_155 = arith.constant 0 : index
    %c0_156 = arith.constant 0 : index
    %c0_157 = arith.constant 0 : index
    %148 = vector.load %arg5[%c2_154, %c0_155, %c0_156, %c0_157] : memref<3x3x256x128xbf16, #tpu.memory_space<vmem>>, vector<1x1x256x128xbf16>
    %149 = vector.shape_cast %148 : vector<1x1x256x128xbf16> to vector<256x128xbf16>
    %cst_158 = arith.constant dense<0.000000e+00> : vector<384x128xf32>
    %150 = tpu.matmul %147, %149, %cst_158 {dimension_numbers = #tpu.dot_dimension_numbers<[1], [0], [0], [1], [0, 0, 1, 1], [], []>} : vector<384x256xbf16>, vector<256x128xbf16>, vector<384x128xf32> -> vector<384x128xf32>
    %151 = arith.addf %146, %150 : vector<384x128xf32>
    %c0_159 = arith.constant 0 : index
    %c0_160 = arith.constant 0 : index
    %152 = vector.load %arg14[%c0_159, %c0_160] : memref<384x128xf32, #tpu.memory_space<vmem>>, vector<384x128xf32>
    tpu.vector_store %arg14[%c0_159, %c0_160], %151 {strides = array<i32>} : memref<384x128xf32, #tpu.memory_space<vmem>>, vector<384x128xf32>,
    %c0_161 = arith.constant 0 : index
    %c0_162 = arith.constant 0 : index
    %153 = vector.load %arg14[%c0_161, %c0_162] : memref<384x128xf32, #tpu.memory_space<vmem>>, vector<384x128xf32>
    %c49_163 = arith.constant 49 : index
    %c0_164 = arith.constant 0 : index
    %154 = vector.load %arg12[%c49_163, %c0_164] : memref<456x256xbf16, #tpu.memory_space<vmem>>, vector<384x256xbf16>
    %c2_165 = arith.constant 2 : index
    %c1_166 = arith.constant 1 : index
    %c0_167 = arith.constant 0 : index
    %c0_168 = arith.constant 0 : index
    %155 = vector.load %arg5[%c2_165, %c1_166, %c0_167, %c0_168] : memref<3x3x256x128xbf16, #tpu.memory_space<vmem>>, vector<1x1x256x128xbf16>
    %156 = vector.shape_cast %155 : vector<1x1x256x128xbf16> to vector<256x128xbf16>
    %cst_169 = arith.constant dense<0.000000e+00> : vector<384x128xf32>
    %157 = tpu.matmul %154, %156, %cst_169 {dimension_numbers = #tpu.dot_dimension_numbers<[1], [0], [0], [1], [0, 0, 1, 1], [], []>} : vector<384x256xbf16>, vector<256x128xbf16>, vector<384x128xf32> -> vector<384x128xf32>
    %158 = arith.addf %153, %157 : vector<384x128xf32>
    %c0_170 = arith.constant 0 : index
    %c0_171 = arith.constant 0 : index
    %159 = vector.load %arg14[%c0_170, %c0_171] : memref<384x128xf32, #tpu.memory_space<vmem>>, vector<384x128xf32>
    tpu.vector_store %arg14[%c0_170, %c0_171], %158 {strides = array<i32>} : memref<384x128xf32, #tpu.memory_space<vmem>>, vector<384x128xf32>,
    %c0_172 = arith.constant 0 : index
    %c0_173 = arith.constant 0 : index
    %160 = vector.load %arg14[%c0_172, %c0_173] : memref<384x128xf32, #tpu.memory_space<vmem>>, vector<384x128xf32>
    %c50 = arith.constant 50 : index
    %c0_174 = arith.constant 0 : index
    %161 = vector.load %arg12[%c50, %c0_174] : memref<456x256xbf16, #tpu.memory_space<vmem>>, vector<384x256xbf16>
    %c2_175 = arith.constant 2 : index
    %c2_176 = arith.constant 2 : index
    %c0_177 = arith.constant 0 : index
    %c0_178 = arith.constant 0 : index
    %162 = vector.load %arg5[%c2_175, %c2_176, %c0_177, %c0_178] : memref<3x3x256x128xbf16, #tpu.memory_space<vmem>>, vector<1x1x256x128xbf16>
    %163 = vector.shape_cast %162 : vector<1x1x256x128xbf16> to vector<256x128xbf16>
    %cst_179 = arith.constant dense<0.000000e+00> : vector<384x128xf32>
    %164 = tpu.matmul %161, %163, %cst_179 {dimension_numbers = #tpu.dot_dimension_numbers<[1], [0], [0], [1], [0, 0, 1, 1], [], []>} : vector<384x256xbf16>, vector<256x128xbf16>, vector<384x128xf32> -> vector<384x128xf32>
    %165 = arith.addf %160, %164 : vector<384x128xf32>
    %c0_180 = arith.constant 0 : index
    %c0_181 = arith.constant 0 : index
    %166 = vector.load %arg14[%c0_180, %c0_181] : memref<384x128xf32, #tpu.memory_space<vmem>>, vector<384x128xf32>
    tpu.vector_store %arg14[%c0_180, %c0_181], %165 {strides = array<i32>} : memref<384x128xf32, #tpu.memory_space<vmem>>, vector<384x128xf32>,
    %c0_182 = arith.constant 0 : index
    %c0_183 = arith.constant 0 : index
    %167 = vector.load %arg14[%c0_182, %c0_183] : memref<384x128xf32, #tpu.memory_space<vmem>>, vector<384x128xf32>
    %c0_184 = arith.constant 0 : index
    %c0_185 = arith.constant 0 : index
    %168 = vector.load %arg6[%c0_184, %c0_185] : memref<1x128xf32, #tpu.memory_space<vmem>>, vector<1x128xf32>
    %169 = vector.broadcast %168 : vector<1x128xf32> to vector<384x128xf32>
    %170 = arith.mulf %167, %169 : vector<384x128xf32>
    %c0_186 = arith.constant 0 : index
    %c0_187 = arith.constant 0 : index
    %171 = vector.load %arg7[%c0_186, %c0_187] : memref<1x128xf32, #tpu.memory_space<vmem>>, vector<1x128xf32>
    %172 = vector.broadcast %171 : vector<1x128xf32> to vector<384x128xf32>
    %173 = arith.addf %170, %172 : vector<384x128xf32>
    %cst_188 = arith.constant 0.000000e+00 : f32
    %174 = vector.broadcast %cst_188 : f32 to vector<384x128xf32>
    %175 = arith.maximumf %173, %174 : vector<384x128xf32>
    %176 = arith.truncf %175 : vector<384x128xf32> to vector<384x128xbf16>
    %177 = vector.extract_strided_slice %176 {offsets = [0, 0], sizes = [16, 128], strides = [1, 1]} : vector<384x128xbf16> to vector<16x128xbf16>
    %c25_189 = arith.constant 25 : index
    %c0_190 = arith.constant 0 : index
    %178 = vector.load %arg13[%c25_189, %c0_190] : memref<456x128xbf16, #tpu.memory_space<vmem>>, vector<16x128xbf16>
    tpu.vector_store %arg13[%c25_189, %c0_190], %177 {strides = array<i32>} : memref<456x128xbf16, #tpu.memory_space<vmem>>, vector<16x128xbf16>,
    %179 = vector.extract_strided_slice %176 {offsets = [24, 0], sizes = [16, 128], strides = [1, 1]} : vector<384x128xbf16> to vector<16x128xbf16>
    %c49_191 = arith.constant 49 : index
    %c0_192 = arith.constant 0 : index
    %180 = vector.load %arg13[%c49_191, %c0_192] : memref<456x128xbf16, #tpu.memory_space<vmem>>, vector<16x128xbf16>
    tpu.vector_store %arg13[%c49_191, %c0_192], %179 {strides = array<i32>} : memref<456x128xbf16, #tpu.memory_space<vmem>>, vector<16x128xbf16>,
    %181 = vector.extract_strided_slice %176 {offsets = [48, 0], sizes = [16, 128], strides = [1, 1]} : vector<384x128xbf16> to vector<16x128xbf16>
    %c73_193 = arith.constant 73 : index
    %c0_194 = arith.constant 0 : index
    %182 = vector.load %arg13[%c73_193, %c0_194] : memref<456x128xbf16, #tpu.memory_space<vmem>>, vector<16x128xbf16>
    tpu.vector_store %arg13[%c73_193, %c0_194], %181 {strides = array<i32>} : memref<456x128xbf16, #tpu.memory_space<vmem>>, vector<16x128xbf16>,
    %183 = vector.extract_strided_slice %176 {offsets = [72, 0], sizes = [16, 128], strides = [1, 1]} : vector<384x128xbf16> to vector<16x128xbf16>
    %c97_195 = arith.constant 97 : index
    %c0_196 = arith.constant 0 : index
    %184 = vector.load %arg13[%c97_195, %c0_196] : memref<456x128xbf16, #tpu.memory_space<vmem>>, vector<16x128xbf16>
    tpu.vector_store %arg13[%c97_195, %c0_196], %183 {strides = array<i32>} : memref<456x128xbf16, #tpu.memory_space<vmem>>, vector<16x128xbf16>,
    %185 = vector.extract_strided_slice %176 {offsets = [96, 0], sizes = [16, 128], strides = [1, 1]} : vector<384x128xbf16> to vector<16x128xbf16>
    %c121_197 = arith.constant 121 : index
    %c0_198 = arith.constant 0 : index
    %186 = vector.load %arg13[%c121_197, %c0_198] : memref<456x128xbf16, #tpu.memory_space<vmem>>, vector<16x128xbf16>
    tpu.vector_store %arg13[%c121_197, %c0_198], %185 {strides = array<i32>} : memref<456x128xbf16, #tpu.memory_space<vmem>>, vector<16x128xbf16>,
    %187 = vector.extract_strided_slice %176 {offsets = [120, 0], sizes = [16, 128], strides = [1, 1]} : vector<384x128xbf16> to vector<16x128xbf16>
    %c145_199 = arith.constant 145 : index
    %c0_200 = arith.constant 0 : index
    %188 = vector.load %arg13[%c145_199, %c0_200] : memref<456x128xbf16, #tpu.memory_space<vmem>>, vector<16x128xbf16>
    tpu.vector_store %arg13[%c145_199, %c0_200], %187 {strides = array<i32>} : memref<456x128xbf16, #tpu.memory_space<vmem>>, vector<16x128xbf16>,
    %189 = vector.extract_strided_slice %176 {offsets = [144, 0], sizes = [16, 128], strides = [1, 1]} : vector<384x128xbf16> to vector<16x128xbf16>
    %c169_201 = arith.constant 169 : index
    %c0_202 = arith.constant 0 : index
    %190 = vector.load %arg13[%c169_201, %c0_202] : memref<456x128xbf16, #tpu.memory_space<vmem>>, vector<16x128xbf16>
    tpu.vector_store %arg13[%c169_201, %c0_202], %189 {strides = array<i32>} : memref<456x128xbf16, #tpu.memory_space<vmem>>, vector<16x128xbf16>,
    %191 = vector.extract_strided_slice %176 {offsets = [168, 0], sizes = [16, 128], strides = [1, 1]} : vector<384x128xbf16> to vector<16x128xbf16>
    %c193_203 = arith.constant 193 : index
    %c0_204 = arith.constant 0 : index
    %192 = vector.load %arg13[%c193_203, %c0_204] : memref<456x128xbf16, #tpu.memory_space<vmem>>, vector<16x128xbf16>
    tpu.vector_store %arg13[%c193_203, %c0_204], %191 {strides = array<i32>} : memref<456x128xbf16, #tpu.memory_space<vmem>>, vector<16x128xbf16>,
    %193 = vector.extract_strided_slice %176 {offsets = [192, 0], sizes = [16, 128], strides = [1, 1]} : vector<384x128xbf16> to vector<16x128xbf16>
    %c217_205 = arith.constant 217 : index
    %c0_206 = arith.constant 0 : index
    %194 = vector.load %arg13[%c217_205, %c0_206] : memref<456x128xbf16, #tpu.memory_space<vmem>>, vector<16x128xbf16>
    tpu.vector_store %arg13[%c217_205, %c0_206], %193 {strides = array<i32>} : memref<456x128xbf16, #tpu.memory_space<vmem>>, vector<16x128xbf16>,
    %195 = vector.extract_strided_slice %176 {offsets = [216, 0], sizes = [16, 128], strides = [1, 1]} : vector<384x128xbf16> to vector<16x128xbf16>
    %c241_207 = arith.constant 241 : index
    %c0_208 = arith.constant 0 : index
    %196 = vector.load %arg13[%c241_207, %c0_208] : memref<456x128xbf16, #tpu.memory_space<vmem>>, vector<16x128xbf16>
    tpu.vector_store %arg13[%c241_207, %c0_208], %195 {strides = array<i32>} : memref<456x128xbf16, #tpu.memory_space<vmem>>, vector<16x128xbf16>,
    %197 = vector.extract_strided_slice %176 {offsets = [240, 0], sizes = [16, 128], strides = [1, 1]} : vector<384x128xbf16> to vector<16x128xbf16>
    %c265_209 = arith.constant 265 : index
    %c0_210 = arith.constant 0 : index
    %198 = vector.load %arg13[%c265_209, %c0_210] : memref<456x128xbf16, #tpu.memory_space<vmem>>, vector<16x128xbf16>
    tpu.vector_store %arg13[%c265_209, %c0_210], %197 {strides = array<i32>} : memref<456x128xbf16, #tpu.memory_space<vmem>>, vector<16x128xbf16>,
    %199 = vector.extract_strided_slice %176 {offsets = [264, 0], sizes = [16, 128], strides = [1, 1]} : vector<384x128xbf16> to vector<16x128xbf16>
    %c289_211 = arith.constant 289 : index
    %c0_212 = arith.constant 0 : index
    %200 = vector.load %arg13[%c289_211, %c0_212] : memref<456x128xbf16, #tpu.memory_space<vmem>>, vector<16x128xbf16>
    tpu.vector_store %arg13[%c289_211, %c0_212], %199 {strides = array<i32>} : memref<456x128xbf16, #tpu.memory_space<vmem>>, vector<16x128xbf16>,
    %201 = vector.extract_strided_slice %176 {offsets = [288, 0], sizes = [16, 128], strides = [1, 1]} : vector<384x128xbf16> to vector<16x128xbf16>
    %c313_213 = arith.constant 313 : index
    %c0_214 = arith.constant 0 : index
    %202 = vector.load %arg13[%c313_213, %c0_214] : memref<456x128xbf16, #tpu.memory_space<vmem>>, vector<16x128xbf16>
    tpu.vector_store %arg13[%c313_213, %c0_214], %201 {strides = array<i32>} : memref<456x128xbf16, #tpu.memory_space<vmem>>, vector<16x128xbf16>,
    %203 = vector.extract_strided_slice %176 {offsets = [312, 0], sizes = [16, 128], strides = [1, 1]} : vector<384x128xbf16> to vector<16x128xbf16>
    %c337_215 = arith.constant 337 : index
    %c0_216 = arith.constant 0 : index
    %204 = vector.load %arg13[%c337_215, %c0_216] : memref<456x128xbf16, #tpu.memory_space<vmem>>, vector<16x128xbf16>
    tpu.vector_store %arg13[%c337_215, %c0_216], %203 {strides = array<i32>} : memref<456x128xbf16, #tpu.memory_space<vmem>>, vector<16x128xbf16>,
    %205 = vector.extract_strided_slice %176 {offsets = [336, 0], sizes = [16, 128], strides = [1, 1]} : vector<384x128xbf16> to vector<16x128xbf16>
    %c361_217 = arith.constant 361 : index
    %c0_218 = arith.constant 0 : index
    %206 = vector.load %arg13[%c361_217, %c0_218] : memref<456x128xbf16, #tpu.memory_space<vmem>>, vector<16x128xbf16>
    tpu.vector_store %arg13[%c361_217, %c0_218], %205 {strides = array<i32>} : memref<456x128xbf16, #tpu.memory_space<vmem>>, vector<16x128xbf16>,
    %207 = vector.extract_strided_slice %176 {offsets = [360, 0], sizes = [16, 128], strides = [1, 1]} : vector<384x128xbf16> to vector<16x128xbf16>
    %c385_219 = arith.constant 385 : index
    %c0_220 = arith.constant 0 : index
    %208 = vector.load %arg13[%c385_219, %c0_220] : memref<456x128xbf16, #tpu.memory_space<vmem>>, vector<16x128xbf16>
    tpu.vector_store %arg13[%c385_219, %c0_220], %207 {strides = array<i32>} : memref<456x128xbf16, #tpu.memory_space<vmem>>, vector<16x128xbf16>,
    %cst_221 = arith.constant 0.000000e+00 : f32
    %209 = vector.broadcast %cst_221 : f32 to vector<384x128xf32>
    %c0_222 = arith.constant 0 : index
    %c0_223 = arith.constant 0 : index
    %210 = vector.load %arg14[%c0_222, %c0_223] : memref<384x128xf32, #tpu.memory_space<vmem>>, vector<384x128xf32>
    tpu.vector_store %arg14[%c0_222, %c0_223], %209 {strides = array<i32>} : memref<384x128xf32, #tpu.memory_space<vmem>>, vector<384x128xf32>,
    %c0_224 = arith.constant 0 : index
    %c0_225 = arith.constant 0 : index
    %211 = vector.load %arg14[%c0_224, %c0_225] : memref<384x128xf32, #tpu.memory_space<vmem>>, vector<384x128xf32>
    %c0_226 = arith.constant 0 : index
    %c0_227 = arith.constant 0 : index
    %212 = vector.load %arg13[%c0_226, %c0_227] : memref<456x128xbf16, #tpu.memory_space<vmem>>, vector<384x128xbf16>
    %c0_228 = arith.constant 0 : index
    %c0_229 = arith.constant 0 : index
    %c0_230 = arith.constant 0 : index
    %c0_231 = arith.constant 0 : index
    %213 = vector.load %arg8[%c0_228, %c0_229, %c0_230, %c0_231] : memref<3x3x128x128xbf16, #tpu.memory_space<vmem>>, vector<1x1x128x128xbf16>
    %214 = vector.shape_cast %213 : vector<1x1x128x128xbf16> to vector<128x128xbf16>
    %cst_232 = arith.constant dense<0.000000e+00> : vector<384x128xf32>
    %215 = tpu.matmul %212, %214, %cst_232 {dimension_numbers = #tpu.dot_dimension_numbers<[1], [0], [0], [1], [0, 0, 1, 1], [], []>} : vector<384x128xbf16>, vector<128x128xbf16>, vector<384x128xf32> -> vector<384x128xf32>
    %216 = arith.addf %211, %215 : vector<384x128xf32>
    %c0_233 = arith.constant 0 : index
    %c0_234 = arith.constant 0 : index
    %217 = vector.load %arg14[%c0_233, %c0_234] : memref<384x128xf32, #tpu.memory_space<vmem>>, vector<384x128xf32>
    tpu.vector_store %arg14[%c0_233, %c0_234], %216 {strides = array<i32>} : memref<384x128xf32, #tpu.memory_space<vmem>>, vector<384x128xf32>,
    %c0_235 = arith.constant 0 : index
    %c0_236 = arith.constant 0 : index
    %218 = vector.load %arg14[%c0_235, %c0_236] : memref<384x128xf32, #tpu.memory_space<vmem>>, vector<384x128xf32>
    %c1_237 = arith.constant 1 : index
    %c0_238 = arith.constant 0 : index
    %219 = vector.load %arg13[%c1_237, %c0_238] : memref<456x128xbf16, #tpu.memory_space<vmem>>, vector<384x128xbf16>
    %c0_239 = arith.constant 0 : index
    %c1_240 = arith.constant 1 : index
    %c0_241 = arith.constant 0 : index
    %c0_242 = arith.constant 0 : index
    %220 = vector.load %arg8[%c0_239, %c1_240, %c0_241, %c0_242] : memref<3x3x128x128xbf16, #tpu.memory_space<vmem>>, vector<1x1x128x128xbf16>
    %221 = vector.shape_cast %220 : vector<1x1x128x128xbf16> to vector<128x128xbf16>
    %cst_243 = arith.constant dense<0.000000e+00> : vector<384x128xf32>
    %222 = tpu.matmul %219, %221, %cst_243 {dimension_numbers = #tpu.dot_dimension_numbers<[1], [0], [0], [1], [0, 0, 1, 1], [], []>} : vector<384x128xbf16>, vector<128x128xbf16>, vector<384x128xf32> -> vector<384x128xf32>
    %223 = arith.addf %218, %222 : vector<384x128xf32>
    %c0_244 = arith.constant 0 : index
    %c0_245 = arith.constant 0 : index
    %224 = vector.load %arg14[%c0_244, %c0_245] : memref<384x128xf32, #tpu.memory_space<vmem>>, vector<384x128xf32>
    tpu.vector_store %arg14[%c0_244, %c0_245], %223 {strides = array<i32>} : memref<384x128xf32, #tpu.memory_space<vmem>>, vector<384x128xf32>,
    %c0_246 = arith.constant 0 : index
    %c0_247 = arith.constant 0 : index
    %225 = vector.load %arg14[%c0_246, %c0_247] : memref<384x128xf32, #tpu.memory_space<vmem>>, vector<384x128xf32>
    %c2_248 = arith.constant 2 : index
    %c0_249 = arith.constant 0 : index
    %226 = vector.load %arg13[%c2_248, %c0_249] : memref<456x128xbf16, #tpu.memory_space<vmem>>, vector<384x128xbf16>
    %c0_250 = arith.constant 0 : index
    %c2_251 = arith.constant 2 : index
    %c0_252 = arith.constant 0 : index
    %c0_253 = arith.constant 0 : index
    %227 = vector.load %arg8[%c0_250, %c2_251, %c0_252, %c0_253] : memref<3x3x128x128xbf16, #tpu.memory_space<vmem>>, vector<1x1x128x128xbf16>
    %228 = vector.shape_cast %227 : vector<1x1x128x128xbf16> to vector<128x128xbf16>
    %cst_254 = arith.constant dense<0.000000e+00> : vector<384x128xf32>
    %229 = tpu.matmul %226, %228, %cst_254 {dimension_numbers = #tpu.dot_dimension_numbers<[1], [0], [0], [1], [0, 0, 1, 1], [], []>} : vector<384x128xbf16>, vector<128x128xbf16>, vector<384x128xf32> -> vector<384x128xf32>
    %230 = arith.addf %225, %229 : vector<384x128xf32>
    %c0_255 = arith.constant 0 : index
    %c0_256 = arith.constant 0 : index
    %231 = vector.load %arg14[%c0_255, %c0_256] : memref<384x128xf32, #tpu.memory_space<vmem>>, vector<384x128xf32>
    tpu.vector_store %arg14[%c0_255, %c0_256], %230 {strides = array<i32>} : memref<384x128xf32, #tpu.memory_space<vmem>>, vector<384x128xf32>,
    %c0_257 = arith.constant 0 : index
    %c0_258 = arith.constant 0 : index
    %232 = vector.load %arg14[%c0_257, %c0_258] : memref<384x128xf32, #tpu.memory_space<vmem>>, vector<384x128xf32>
    %c24_259 = arith.constant 24 : index
    %c0_260 = arith.constant 0 : index
    %233 = vector.load %arg13[%c24_259, %c0_260] : memref<456x128xbf16, #tpu.memory_space<vmem>>, vector<384x128xbf16>
    %c1_261 = arith.constant 1 : index
    %c0_262 = arith.constant 0 : index
    %c0_263 = arith.constant 0 : index
    %c0_264 = arith.constant 0 : index
    %234 = vector.load %arg8[%c1_261, %c0_262, %c0_263, %c0_264] : memref<3x3x128x128xbf16, #tpu.memory_space<vmem>>, vector<1x1x128x128xbf16>
    %235 = vector.shape_cast %234 : vector<1x1x128x128xbf16> to vector<128x128xbf16>
    %cst_265 = arith.constant dense<0.000000e+00> : vector<384x128xf32>
    %236 = tpu.matmul %233, %235, %cst_265 {dimension_numbers = #tpu.dot_dimension_numbers<[1], [0], [0], [1], [0, 0, 1, 1], [], []>} : vector<384x128xbf16>, vector<128x128xbf16>, vector<384x128xf32> -> vector<384x128xf32>
    %237 = arith.addf %232, %236 : vector<384x128xf32>
    %c0_266 = arith.constant 0 : index
    %c0_267 = arith.constant 0 : index
    %238 = vector.load %arg14[%c0_266, %c0_267] : memref<384x128xf32, #tpu.memory_space<vmem>>, vector<384x128xf32>
    tpu.vector_store %arg14[%c0_266, %c0_267], %237 {strides = array<i32>} : memref<384x128xf32, #tpu.memory_space<vmem>>, vector<384x128xf32>,
    %c0_268 = arith.constant 0 : index
    %c0_269 = arith.constant 0 : index
    %239 = vector.load %arg14[%c0_268, %c0_269] : memref<384x128xf32, #tpu.memory_space<vmem>>, vector<384x128xf32>
    %c25_270 = arith.constant 25 : index
    %c0_271 = arith.constant 0 : index
    %240 = vector.load %arg13[%c25_270, %c0_271] : memref<456x128xbf16, #tpu.memory_space<vmem>>, vector<384x128xbf16>
    %c1_272 = arith.constant 1 : index
    %c1_273 = arith.constant 1 : index
    %c0_274 = arith.constant 0 : index
    %c0_275 = arith.constant 0 : index
    %241 = vector.load %arg8[%c1_272, %c1_273, %c0_274, %c0_275] : memref<3x3x128x128xbf16, #tpu.memory_space<vmem>>, vector<1x1x128x128xbf16>
    %242 = vector.shape_cast %241 : vector<1x1x128x128xbf16> to vector<128x128xbf16>
    %cst_276 = arith.constant dense<0.000000e+00> : vector<384x128xf32>
    %243 = tpu.matmul %240, %242, %cst_276 {dimension_numbers = #tpu.dot_dimension_numbers<[1], [0], [0], [1], [0, 0, 1, 1], [], []>} : vector<384x128xbf16>, vector<128x128xbf16>, vector<384x128xf32> -> vector<384x128xf32>
    %244 = arith.addf %239, %243 : vector<384x128xf32>
    %c0_277 = arith.constant 0 : index
    %c0_278 = arith.constant 0 : index
    %245 = vector.load %arg14[%c0_277, %c0_278] : memref<384x128xf32, #tpu.memory_space<vmem>>, vector<384x128xf32>
    tpu.vector_store %arg14[%c0_277, %c0_278], %244 {strides = array<i32>} : memref<384x128xf32, #tpu.memory_space<vmem>>, vector<384x128xf32>,
    %c0_279 = arith.constant 0 : index
    %c0_280 = arith.constant 0 : index
    %246 = vector.load %arg14[%c0_279, %c0_280] : memref<384x128xf32, #tpu.memory_space<vmem>>, vector<384x128xf32>
    %c26_281 = arith.constant 26 : index
    %c0_282 = arith.constant 0 : index
    %247 = vector.load %arg13[%c26_281, %c0_282] : memref<456x128xbf16, #tpu.memory_space<vmem>>, vector<384x128xbf16>
    %c1_283 = arith.constant 1 : index
    %c2_284 = arith.constant 2 : index
    %c0_285 = arith.constant 0 : index
    %c0_286 = arith.constant 0 : index
    %248 = vector.load %arg8[%c1_283, %c2_284, %c0_285, %c0_286] : memref<3x3x128x128xbf16, #tpu.memory_space<vmem>>, vector<1x1x128x128xbf16>
    %249 = vector.shape_cast %248 : vector<1x1x128x128xbf16> to vector<128x128xbf16>
    %cst_287 = arith.constant dense<0.000000e+00> : vector<384x128xf32>
    %250 = tpu.matmul %247, %249, %cst_287 {dimension_numbers = #tpu.dot_dimension_numbers<[1], [0], [0], [1], [0, 0, 1, 1], [], []>} : vector<384x128xbf16>, vector<128x128xbf16>, vector<384x128xf32> -> vector<384x128xf32>
    %251 = arith.addf %246, %250 : vector<384x128xf32>
    %c0_288 = arith.constant 0 : index
    %c0_289 = arith.constant 0 : index
    %252 = vector.load %arg14[%c0_288, %c0_289] : memref<384x128xf32, #tpu.memory_space<vmem>>, vector<384x128xf32>
    tpu.vector_store %arg14[%c0_288, %c0_289], %251 {strides = array<i32>} : memref<384x128xf32, #tpu.memory_space<vmem>>, vector<384x128xf32>,
    %c0_290 = arith.constant 0 : index
    %c0_291 = arith.constant 0 : index
    %253 = vector.load %arg14[%c0_290, %c0_291] : memref<384x128xf32, #tpu.memory_space<vmem>>, vector<384x128xf32>
    %c48_292 = arith.constant 48 : index
    %c0_293 = arith.constant 0 : index
    %254 = vector.load %arg13[%c48_292, %c0_293] : memref<456x128xbf16, #tpu.memory_space<vmem>>, vector<384x128xbf16>
    %c2_294 = arith.constant 2 : index
    %c0_295 = arith.constant 0 : index
    %c0_296 = arith.constant 0 : index
    %c0_297 = arith.constant 0 : index
    %255 = vector.load %arg8[%c2_294, %c0_295, %c0_296, %c0_297] : memref<3x3x128x128xbf16, #tpu.memory_space<vmem>>, vector<1x1x128x128xbf16>
    %256 = vector.shape_cast %255 : vector<1x1x128x128xbf16> to vector<128x128xbf16>
    %cst_298 = arith.constant dense<0.000000e+00> : vector<384x128xf32>
    %257 = tpu.matmul %254, %256, %cst_298 {dimension_numbers = #tpu.dot_dimension_numbers<[1], [0], [0], [1], [0, 0, 1, 1], [], []>} : vector<384x128xbf16>, vector<128x128xbf16>, vector<384x128xf32> -> vector<384x128xf32>
    %258 = arith.addf %253, %257 : vector<384x128xf32>
    %c0_299 = arith.constant 0 : index
    %c0_300 = arith.constant 0 : index
    %259 = vector.load %arg14[%c0_299, %c0_300] : memref<384x128xf32, #tpu.memory_space<vmem>>, vector<384x128xf32>
    tpu.vector_store %arg14[%c0_299, %c0_300], %258 {strides = array<i32>} : memref<384x128xf32, #tpu.memory_space<vmem>>, vector<384x128xf32>,
    %c0_301 = arith.constant 0 : index
    %c0_302 = arith.constant 0 : index
    %260 = vector.load %arg14[%c0_301, %c0_302] : memref<384x128xf32, #tpu.memory_space<vmem>>, vector<384x128xf32>
    %c49_303 = arith.constant 49 : index
    %c0_304 = arith.constant 0 : index
    %261 = vector.load %arg13[%c49_303, %c0_304] : memref<456x128xbf16, #tpu.memory_space<vmem>>, vector<384x128xbf16>
    %c2_305 = arith.constant 2 : index
    %c1_306 = arith.constant 1 : index
    %c0_307 = arith.constant 0 : index
    %c0_308 = arith.constant 0 : index
    %262 = vector.load %arg8[%c2_305, %c1_306, %c0_307, %c0_308] : memref<3x3x128x128xbf16, #tpu.memory_space<vmem>>, vector<1x1x128x128xbf16>
    %263 = vector.shape_cast %262 : vector<1x1x128x128xbf16> to vector<128x128xbf16>
    %cst_309 = arith.constant dense<0.000000e+00> : vector<384x128xf32>
    %264 = tpu.matmul %261, %263, %cst_309 {dimension_numbers = #tpu.dot_dimension_numbers<[1], [0], [0], [1], [0, 0, 1, 1], [], []>} : vector<384x128xbf16>, vector<128x128xbf16>, vector<384x128xf32> -> vector<384x128xf32>
    %265 = arith.addf %260, %264 : vector<384x128xf32>
    %c0_310 = arith.constant 0 : index
    %c0_311 = arith.constant 0 : index
    %266 = vector.load %arg14[%c0_310, %c0_311] : memref<384x128xf32, #tpu.memory_space<vmem>>, vector<384x128xf32>
    tpu.vector_store %arg14[%c0_310, %c0_311], %265 {strides = array<i32>} : memref<384x128xf32, #tpu.memory_space<vmem>>, vector<384x128xf32>,
    %c0_312 = arith.constant 0 : index
    %c0_313 = arith.constant 0 : index
    %267 = vector.load %arg14[%c0_312, %c0_313] : memref<384x128xf32, #tpu.memory_space<vmem>>, vector<384x128xf32>
    %c50_314 = arith.constant 50 : index
    %c0_315 = arith.constant 0 : index
    %268 = vector.load %arg13[%c50_314, %c0_315] : memref<456x128xbf16, #tpu.memory_space<vmem>>, vector<384x128xbf16>
    %c2_316 = arith.constant 2 : index
    %c2_317 = arith.constant 2 : index
    %c0_318 = arith.constant 0 : index
    %c0_319 = arith.constant 0 : index
    %269 = vector.load %arg8[%c2_316, %c2_317, %c0_318, %c0_319] : memref<3x3x128x128xbf16, #tpu.memory_space<vmem>>, vector<1x1x128x128xbf16>
    %270 = vector.shape_cast %269 : vector<1x1x128x128xbf16> to vector<128x128xbf16>
    %cst_320 = arith.constant dense<0.000000e+00> : vector<384x128xf32>
    %271 = tpu.matmul %268, %270, %cst_320 {dimension_numbers = #tpu.dot_dimension_numbers<[1], [0], [0], [1], [0, 0, 1, 1], [], []>} : vector<384x128xbf16>, vector<128x128xbf16>, vector<384x128xf32> -> vector<384x128xf32>
    %272 = arith.addf %267, %271 : vector<384x128xf32>
    %c0_321 = arith.constant 0 : index
    %c0_322 = arith.constant 0 : index
    %273 = vector.load %arg14[%c0_321, %c0_322] : memref<384x128xf32, #tpu.memory_space<vmem>>, vector<384x128xf32>
    tpu.vector_store %arg14[%c0_321, %c0_322], %272 {strides = array<i32>} : memref<384x128xf32, #tpu.memory_space<vmem>>, vector<384x128xf32>,
    %c0_323 = arith.constant 0 : index
    %c0_324 = arith.constant 0 : index
    %274 = vector.load %arg14[%c0_323, %c0_324] : memref<384x128xf32, #tpu.memory_space<vmem>>, vector<384x128xf32>
    %c0_325 = arith.constant 0 : index
    %c0_326 = arith.constant 0 : index
    %275 = vector.load %arg9[%c0_325, %c0_326] : memref<1x128xf32, #tpu.memory_space<vmem>>, vector<1x128xf32>
    %276 = vector.broadcast %275 : vector<1x128xf32> to vector<384x128xf32>
    %277 = arith.mulf %274, %276 : vector<384x128xf32>
    %c0_327 = arith.constant 0 : index
    %c0_328 = arith.constant 0 : index
    %278 = vector.load %arg10[%c0_327, %c0_328] : memref<1x128xf32, #tpu.memory_space<vmem>>, vector<1x128xf32>
    %279 = vector.broadcast %278 : vector<1x128xf32> to vector<384x128xf32>
    %280 = arith.addf %277, %279 : vector<384x128xf32>
    %cst_329 = arith.constant 0.000000e+00 : f32
    %281 = vector.broadcast %cst_329 : f32 to vector<384x128xf32>
    %282 = arith.maximumf %280, %281 : vector<384x128xf32>
    %283 = vector.extract_strided_slice %282 {offsets = [0, 0], sizes = [16, 128], strides = [1, 1]} : vector<384x128xf32> to vector<16x128xf32>
    %c0_330 = arith.constant 0 : index
    %c0_331 = arith.constant 0 : index
    %c0_332 = arith.constant 0 : index
    %c0_333 = arith.constant 0 : index
    %284 = vector.load %arg11[%c0_330, %c0_331, %c0_332, %c0_333] : memref<1x16x16x128xf32, #tpu.memory_space<vmem>>, vector<1x1x16x128xf32>
    %285 = vector.shape_cast %284 : vector<1x1x16x128xf32> to vector<16x128xf32>
    %286 = vector.shape_cast %283 : vector<16x128xf32> to vector<1x1x16x128xf32>
    tpu.vector_store %arg11[%c0_330, %c0_331, %c0_332, %c0_333], %286 {strides = array<i32>} : memref<1x16x16x128xf32, #tpu.memory_space<vmem>>, vector<1x1x16x128xf32>,
    %287 = vector.extract_strided_slice %282 {offsets = [24, 0], sizes = [16, 128], strides = [1, 1]} : vector<384x128xf32> to vector<16x128xf32>
    %c0_334 = arith.constant 0 : index
    %c1_335 = arith.constant 1 : index
    %c0_336 = arith.constant 0 : index
    %c0_337 = arith.constant 0 : index
    %288 = vector.load %arg11[%c0_334, %c1_335, %c0_336, %c0_337] : memref<1x16x16x128xf32, #tpu.memory_space<vmem>>, vector<1x1x16x128xf32>
    %289 = vector.shape_cast %288 : vector<1x1x16x128xf32> to vector<16x128xf32>
    %290 = vector.shape_cast %287 : vector<16x128xf32> to vector<1x1x16x128xf32>
    tpu.vector_store %arg11[%c0_334, %c1_335, %c0_336, %c0_337], %290 {strides = array<i32>} : memref<1x16x16x128xf32, #tpu.memory_space<vmem>>, vector<1x1x16x128xf32>,
    %291 = vector.extract_strided_slice %282 {offsets = [48, 0], sizes = [16, 128], strides = [1, 1]} : vector<384x128xf32> to vector<16x128xf32>
    %c0_338 = arith.constant 0 : index
    %c2_339 = arith.constant 2 : index
    %c0_340 = arith.constant 0 : index
    %c0_341 = arith.constant 0 : index
    %292 = vector.load %arg11[%c0_338, %c2_339, %c0_340, %c0_341] : memref<1x16x16x128xf32, #tpu.memory_space<vmem>>, vector<1x1x16x128xf32>
    %293 = vector.shape_cast %292 : vector<1x1x16x128xf32> to vector<16x128xf32>
    %294 = vector.shape_cast %291 : vector<16x128xf32> to vector<1x1x16x128xf32>
    tpu.vector_store %arg11[%c0_338, %c2_339, %c0_340, %c0_341], %294 {strides = array<i32>} : memref<1x16x16x128xf32, #tpu.memory_space<vmem>>, vector<1x1x16x128xf32>,
    %295 = vector.extract_strided_slice %282 {offsets = [72, 0], sizes = [16, 128], strides = [1, 1]} : vector<384x128xf32> to vector<16x128xf32>
    %c0_342 = arith.constant 0 : index
    %c3_343 = arith.constant 3 : index
    %c0_344 = arith.constant 0 : index
    %c0_345 = arith.constant 0 : index
    %296 = vector.load %arg11[%c0_342, %c3_343, %c0_344, %c0_345] : memref<1x16x16x128xf32, #tpu.memory_space<vmem>>, vector<1x1x16x128xf32>
    %297 = vector.shape_cast %296 : vector<1x1x16x128xf32> to vector<16x128xf32>
    %298 = vector.shape_cast %295 : vector<16x128xf32> to vector<1x1x16x128xf32>
    tpu.vector_store %arg11[%c0_342, %c3_343, %c0_344, %c0_345], %298 {strides = array<i32>} : memref<1x16x16x128xf32, #tpu.memory_space<vmem>>, vector<1x1x16x128xf32>,
    %299 = vector.extract_strided_slice %282 {offsets = [96, 0], sizes = [16, 128], strides = [1, 1]} : vector<384x128xf32> to vector<16x128xf32>
    %c0_346 = arith.constant 0 : index
    %c4_347 = arith.constant 4 : index
    %c0_348 = arith.constant 0 : index
    %c0_349 = arith.constant 0 : index
    %300 = vector.load %arg11[%c0_346, %c4_347, %c0_348, %c0_349] : memref<1x16x16x128xf32, #tpu.memory_space<vmem>>, vector<1x1x16x128xf32>
    %301 = vector.shape_cast %300 : vector<1x1x16x128xf32> to vector<16x128xf32>
    %302 = vector.shape_cast %299 : vector<16x128xf32> to vector<1x1x16x128xf32>
    tpu.vector_store %arg11[%c0_346, %c4_347, %c0_348, %c0_349], %302 {strides = array<i32>} : memref<1x16x16x128xf32, #tpu.memory_space<vmem>>, vector<1x1x16x128xf32>,
    %303 = vector.extract_strided_slice %282 {offsets = [120, 0], sizes = [16, 128], strides = [1, 1]} : vector<384x128xf32> to vector<16x128xf32>
    %c0_350 = arith.constant 0 : index
    %c5_351 = arith.constant 5 : index
    %c0_352 = arith.constant 0 : index
    %c0_353 = arith.constant 0 : index
    %304 = vector.load %arg11[%c0_350, %c5_351, %c0_352, %c0_353] : memref<1x16x16x128xf32, #tpu.memory_space<vmem>>, vector<1x1x16x128xf32>
    %305 = vector.shape_cast %304 : vector<1x1x16x128xf32> to vector<16x128xf32>
    %306 = vector.shape_cast %303 : vector<16x128xf32> to vector<1x1x16x128xf32>
    tpu.vector_store %arg11[%c0_350, %c5_351, %c0_352, %c0_353], %306 {strides = array<i32>} : memref<1x16x16x128xf32, #tpu.memory_space<vmem>>, vector<1x1x16x128xf32>,
    %307 = vector.extract_strided_slice %282 {offsets = [144, 0], sizes = [16, 128], strides = [1, 1]} : vector<384x128xf32> to vector<16x128xf32>
    %c0_354 = arith.constant 0 : index
    %c6_355 = arith.constant 6 : index
    %c0_356 = arith.constant 0 : index
    %c0_357 = arith.constant 0 : index
    %308 = vector.load %arg11[%c0_354, %c6_355, %c0_356, %c0_357] : memref<1x16x16x128xf32, #tpu.memory_space<vmem>>, vector<1x1x16x128xf32>
    %309 = vector.shape_cast %308 : vector<1x1x16x128xf32> to vector<16x128xf32>
    %310 = vector.shape_cast %307 : vector<16x128xf32> to vector<1x1x16x128xf32>
    tpu.vector_store %arg11[%c0_354, %c6_355, %c0_356, %c0_357], %310 {strides = array<i32>} : memref<1x16x16x128xf32, #tpu.memory_space<vmem>>, vector<1x1x16x128xf32>,
    %311 = vector.extract_strided_slice %282 {offsets = [168, 0], sizes = [16, 128], strides = [1, 1]} : vector<384x128xf32> to vector<16x128xf32>
    %c0_358 = arith.constant 0 : index
    %c7_359 = arith.constant 7 : index
    %c0_360 = arith.constant 0 : index
    %c0_361 = arith.constant 0 : index
    %312 = vector.load %arg11[%c0_358, %c7_359, %c0_360, %c0_361] : memref<1x16x16x128xf32, #tpu.memory_space<vmem>>, vector<1x1x16x128xf32>
    %313 = vector.shape_cast %312 : vector<1x1x16x128xf32> to vector<16x128xf32>
    %314 = vector.shape_cast %311 : vector<16x128xf32> to vector<1x1x16x128xf32>
    tpu.vector_store %arg11[%c0_358, %c7_359, %c0_360, %c0_361], %314 {strides = array<i32>} : memref<1x16x16x128xf32, #tpu.memory_space<vmem>>, vector<1x1x16x128xf32>,
    %315 = vector.extract_strided_slice %282 {offsets = [192, 0], sizes = [16, 128], strides = [1, 1]} : vector<384x128xf32> to vector<16x128xf32>
    %c0_362 = arith.constant 0 : index
    %c8_363 = arith.constant 8 : index
    %c0_364 = arith.constant 0 : index
    %c0_365 = arith.constant 0 : index
    %316 = vector.load %arg11[%c0_362, %c8_363, %c0_364, %c0_365] : memref<1x16x16x128xf32, #tpu.memory_space<vmem>>, vector<1x1x16x128xf32>
    %317 = vector.shape_cast %316 : vector<1x1x16x128xf32> to vector<16x128xf32>
    %318 = vector.shape_cast %315 : vector<16x128xf32> to vector<1x1x16x128xf32>
    tpu.vector_store %arg11[%c0_362, %c8_363, %c0_364, %c0_365], %318 {strides = array<i32>} : memref<1x16x16x128xf32, #tpu.memory_space<vmem>>, vector<1x1x16x128xf32>,
    %319 = vector.extract_strided_slice %282 {offsets = [216, 0], sizes = [16, 128], strides = [1, 1]} : vector<384x128xf32> to vector<16x128xf32>
    %c0_366 = arith.constant 0 : index
    %c9_367 = arith.constant 9 : index
    %c0_368 = arith.constant 0 : index
    %c0_369 = arith.constant 0 : index
    %320 = vector.load %arg11[%c0_366, %c9_367, %c0_368, %c0_369] : memref<1x16x16x128xf32, #tpu.memory_space<vmem>>, vector<1x1x16x128xf32>
    %321 = vector.shape_cast %320 : vector<1x1x16x128xf32> to vector<16x128xf32>
    %322 = vector.shape_cast %319 : vector<16x128xf32> to vector<1x1x16x128xf32>
    tpu.vector_store %arg11[%c0_366, %c9_367, %c0_368, %c0_369], %322 {strides = array<i32>} : memref<1x16x16x128xf32, #tpu.memory_space<vmem>>, vector<1x1x16x128xf32>,
    %323 = vector.extract_strided_slice %282 {offsets = [240, 0], sizes = [16, 128], strides = [1, 1]} : vector<384x128xf32> to vector<16x128xf32>
    %c0_370 = arith.constant 0 : index
    %c10_371 = arith.constant 10 : index
    %c0_372 = arith.constant 0 : index
    %c0_373 = arith.constant 0 : index
    %324 = vector.load %arg11[%c0_370, %c10_371, %c0_372, %c0_373] : memref<1x16x16x128xf32, #tpu.memory_space<vmem>>, vector<1x1x16x128xf32>
    %325 = vector.shape_cast %324 : vector<1x1x16x128xf32> to vector<16x128xf32>
    %326 = vector.shape_cast %323 : vector<16x128xf32> to vector<1x1x16x128xf32>
    tpu.vector_store %arg11[%c0_370, %c10_371, %c0_372, %c0_373], %326 {strides = array<i32>} : memref<1x16x16x128xf32, #tpu.memory_space<vmem>>, vector<1x1x16x128xf32>,
    %327 = vector.extract_strided_slice %282 {offsets = [264, 0], sizes = [16, 128], strides = [1, 1]} : vector<384x128xf32> to vector<16x128xf32>
    %c0_374 = arith.constant 0 : index
    %c11_375 = arith.constant 11 : index
    %c0_376 = arith.constant 0 : index
    %c0_377 = arith.constant 0 : index
    %328 = vector.load %arg11[%c0_374, %c11_375, %c0_376, %c0_377] : memref<1x16x16x128xf32, #tpu.memory_space<vmem>>, vector<1x1x16x128xf32>
    %329 = vector.shape_cast %328 : vector<1x1x16x128xf32> to vector<16x128xf32>
    %330 = vector.shape_cast %327 : vector<16x128xf32> to vector<1x1x16x128xf32>
    tpu.vector_store %arg11[%c0_374, %c11_375, %c0_376, %c0_377], %330 {strides = array<i32>} : memref<1x16x16x128xf32, #tpu.memory_space<vmem>>, vector<1x1x16x128xf32>,
    %331 = vector.extract_strided_slice %282 {offsets = [288, 0], sizes = [16, 128], strides = [1, 1]} : vector<384x128xf32> to vector<16x128xf32>
    %c0_378 = arith.constant 0 : index
    %c12_379 = arith.constant 12 : index
    %c0_380 = arith.constant 0 : index
    %c0_381 = arith.constant 0 : index
    %332 = vector.load %arg11[%c0_378, %c12_379, %c0_380, %c0_381] : memref<1x16x16x128xf32, #tpu.memory_space<vmem>>, vector<1x1x16x128xf32>
    %333 = vector.shape_cast %332 : vector<1x1x16x128xf32> to vector<16x128xf32>
    %334 = vector.shape_cast %331 : vector<16x128xf32> to vector<1x1x16x128xf32>
    tpu.vector_store %arg11[%c0_378, %c12_379, %c0_380, %c0_381], %334 {strides = array<i32>} : memref<1x16x16x128xf32, #tpu.memory_space<vmem>>, vector<1x1x16x128xf32>,
    %335 = vector.extract_strided_slice %282 {offsets = [312, 0], sizes = [16, 128], strides = [1, 1]} : vector<384x128xf32> to vector<16x128xf32>
    %c0_382 = arith.constant 0 : index
    %c13_383 = arith.constant 13 : index
    %c0_384 = arith.constant 0 : index
    %c0_385 = arith.constant 0 : index
    %336 = vector.load %arg11[%c0_382, %c13_383, %c0_384, %c0_385] : memref<1x16x16x128xf32, #tpu.memory_space<vmem>>, vector<1x1x16x128xf32>
    %337 = vector.shape_cast %336 : vector<1x1x16x128xf32> to vector<16x128xf32>
    %338 = vector.shape_cast %335 : vector<16x128xf32> to vector<1x1x16x128xf32>
    tpu.vector_store %arg11[%c0_382, %c13_383, %c0_384, %c0_385], %338 {strides = array<i32>} : memref<1x16x16x128xf32, #tpu.memory_space<vmem>>, vector<1x1x16x128xf32>,
    %339 = vector.extract_strided_slice %282 {offsets = [336, 0], sizes = [16, 128], strides = [1, 1]} : vector<384x128xf32> to vector<16x128xf32>
    %c0_386 = arith.constant 0 : index
    %c14_387 = arith.constant 14 : index
    %c0_388 = arith.constant 0 : index
    %c0_389 = arith.constant 0 : index
    %340 = vector.load %arg11[%c0_386, %c14_387, %c0_388, %c0_389] : memref<1x16x16x128xf32, #tpu.memory_space<vmem>>, vector<1x1x16x128xf32>
    %341 = vector.shape_cast %340 : vector<1x1x16x128xf32> to vector<16x128xf32>
    %342 = vector.shape_cast %339 : vector<16x128xf32> to vector<1x1x16x128xf32>
    tpu.vector_store %arg11[%c0_386, %c14_387, %c0_388, %c0_389], %342 {strides = array<i32>} : memref<1x16x16x128xf32, #tpu.memory_space<vmem>>, vector<1x1x16x128xf32>,
    %343 = vector.extract_strided_slice %282 {offsets = [360, 0], sizes = [16, 128], strides = [1, 1]} : vector<384x128xf32> to vector<16x128xf32>
    %c0_390 = arith.constant 0 : index
    %c15_391 = arith.constant 15 : index
    %c0_392 = arith.constant 0 : index
    %c0_393 = arith.constant 0 : index
    %344 = vector.load %arg11[%c0_390, %c15_391, %c0_392, %c0_393] : memref<1x16x16x128xf32, #tpu.memory_space<vmem>>, vector<1x1x16x128xf32>
    %345 = vector.shape_cast %344 : vector<1x1x16x128xf32> to vector<16x128xf32>
    %346 = vector.shape_cast %343 : vector<16x128xf32> to vector<1x1x16x128xf32>
    tpu.vector_store %arg11[%c0_390, %c15_391, %c0_392, %c0_393], %346 {strides = array<i32>} : memref<1x16x16x128xf32, #tpu.memory_space<vmem>>, vector<1x1x16x128xf32>,
    return
  }
  func.func @transform_0(%arg0: i32) -> (i32, i32, i32) {
    %c0_i32 = arith.constant 0 : i32
    %c0_i32_0 = arith.constant 0 : i32
    %c0_i32_1 = arith.constant 0 : i32
    return %arg0, %c0_i32, %c0_i32_0 : i32, i32, i32
  }
  func.func @transform_1(%arg0: i32) -> (i32, i32, i32, i32) {
    %c0_i32 = arith.constant 0 : i32
    %c0_i32_0 = arith.constant 0 : i32
    %c0_i32_1 = arith.constant 0 : i32
    %c0_i32_2 = arith.constant 0 : i32
    return %arg0, %c0_i32, %c0_i32_0, %c0_i32_1 : i32, i32, i32, i32
  }
  func.func @transform_2(%arg0: i32) -> (i32, i32, i32) {
    %c0_i32 = arith.constant 0 : i32
    %c0_i32_0 = arith.constant 0 : i32
    %c0_i32_1 = arith.constant 0 : i32
    %c0_i32_2 = arith.constant 0 : i32
    return %c0_i32, %c0_i32_0, %c0_i32_1 : i32, i32, i32
  }
  func.func @transform_3(%arg0: i32) -> (i32, i32) {
    %c0_i32 = arith.constant 0 : i32
    %c0_i32_0 = arith.constant 0 : i32
    %c0_i32_1 = arith.constant 0 : i32
    return %c0_i32, %c0_i32_0 : i32, i32
  }
  func.func @transform_4(%arg0: i32) -> (i32, i32, i32, i32) {
    %c0_i32 = arith.constant 0 : i32
    %c0_i32_0 = arith.constant 0 : i32
    %c0_i32_1 = arith.constant 0 : i32
    %c0_i32_2 = arith.constant 0 : i32
    %c0_i32_3 = arith.constant 0 : i32
    return %c0_i32, %c0_i32_0, %c0_i32_1, %c0_i32_2 : i32, i32, i32, i32
  }
  func.func @transform_5(%arg0: i32) -> (i32, i32) {
    %c0_i32 = arith.constant 0 : i32
    %c0_i32_0 = arith.constant 0 : i32
    %c0_i32_1 = arith.constant 0 : i32
    return %c0_i32, %c0_i32_0 : i32, i32
  }
  func.func @transform_6(%arg0: i32) -> (i32, i32) {
    %c0_i32 = arith.constant 0 : i32
    %c0_i32_0 = arith.constant 0 : i32
    %c0_i32_1 = arith.constant 0 : i32
    return %c0_i32, %c0_i32_0 : i32, i32
  }
  func.func @transform_7(%arg0: i32) -> (i32, i32, i32, i32) {
    %c0_i32 = arith.constant 0 : i32
    %c0_i32_0 = arith.constant 0 : i32
    %c0_i32_1 = arith.constant 0 : i32
    %c0_i32_2 = arith.constant 0 : i32
    %c0_i32_3 = arith.constant 0 : i32
    return %c0_i32, %c0_i32_0, %c0_i32_1, %c0_i32_2 : i32, i32, i32, i32
  }
  func.func @transform_8(%arg0: i32) -> (i32, i32) {
    %c0_i32 = arith.constant 0 : i32
    %c0_i32_0 = arith.constant 0 : i32
    %c0_i32_1 = arith.constant 0 : i32
    return %c0_i32, %c0_i32_0 : i32, i32
  }
  func.func @transform_9(%arg0: i32) -> (i32, i32) {
    %c0_i32 = arith.constant 0 : i32
    %c0_i32_0 = arith.constant 0 : i32
    %c0_i32_1 = arith.constant 0 : i32
    return %c0_i32, %c0_i32_0 : i32, i32
  }
  func.func @transform_10(%arg0: i32) -> (i32, i32, i32, i32) {
    %c0_i32 = arith.constant 0 : i32
    %c0_i32_0 = arith.constant 0 : i32
    %c0_i32_1 = arith.constant 0 : i32
    %c0_i32_2 = arith.constant 0 : i32
    return %arg0, %c0_i32, %c0_i32_0, %c0_i32_1 : i32, i32, i32, i32
  }
}

</mosaic_0001>

<bundles_post_ra>
// kernel: up_block_forward.1
= control target key start
LH: loop header
LB: loop body
LE: loop exit
PB: predicated region body
PF: predicated region fallthrough
CT: control target
= control target key end

     0   :  { %15 = vsyncpa [#allocation6], 0  ;;  %s26748_s0 = inlined_call_operand.vmem [shape: bf16[2,64,256], index: 0, kind: input, shape index: {}]   ;;  %s26749_s1 = inlined_call_operand.vmem [shape: bf16[2,16,16,128], index: 1, kind: input, shape index: {}]   ;;  %s26750_s2 = inlined_call_operand.vmem [shape: bf16[2,256,256], index: 2, kind: input, shape index: {}]   ;;  %s26751_s3 = inlined_call_operand.vmem [shape: f32[1,128], index: 3, kind: input, shape index: {}]   ;;  %s26752_s4 = inlined_call_operand.vmem [shape: bf16[3,3,256,128], index: 4, kind: input, shape index: {}]   ;;  %s26753_s5 = inlined_call_operand.vmem [shape: f32[1,128], index: 5, kind: input, shape index: {}]   ;;  %s26754_s6 = inlined_call_operand.vmem [shape: f32[1,128], index: 6, kind: input, shape index: {}]   ;;  %s26755_s7 = inlined_call_operand.vmem [shape: bf16[3,3,128,128], index: 7, kind: input, shape index: {}]   ;;  %s26756_s8 = inlined_call_operand.vmem [shape: f32[1,128], index: 8, kind: input, shape index: {}]   ;;  %s26757_s9 = inlined_call_operand.vmem [shape: f32[1,128], index: 9, kind: input, shape index: {}]   ;;  %s26758_s10 = inlined_call_operand.hbm [shape: f32[2,16,16,128], index: 10, kind: output, shape index: {}]  }
   0x1   :  { %17 = vsyncpa [#allocation6 + $0x1], 0  ;;  %s22831_s13 = smov 0   ;;  %s22833_s14 = smov 0  }
   0x2   :  { %s22835_s15 = smov 0   ;;  %s22837_s16 = smov 0  }
   0x3 LB: > { %26810 = sst [smem:[#allocation8_spill]] %s22765_s15  ;;  %s22852_s17 = sadd.s32 4294967295, %s22769_s16   ;;  %s22769_s16 = sphi %s22837_s16, %s27022_s16   ;;  %s22765_s15 = sphi %s22835_s15, %s27019_s15   ;;  %s22761_s14 = sphi %s22833_s14, %s27021_s14   ;;  %s22757_s13 = sphi %s22831_s13, %s27020_s13  }
   0x4   : > { %s18182_s18 = sadd.s32 4294967294, %s22769_s16   ;;  %s22856_s19 = sadd.s32 1, %s22769_s16  }
   0x5   : > { %s250_s20 = sadd.s32 1, %s22765_s15  ;;  %s247_s21 = ssub.s32 %s22769_s16, %s22856_s19 }
   0x6   : > { %p260_p0 = scmp.ne.s32.totalorder %s22765_s15, %s22761_s14  ;;  %p248_p1 = scmp.eq.s32.totalorder %s247_s21, 0 }
   0x7   : > { %p261_p2 = scmp.eq.s32.totalorder %s22852_s17, 1  ;;  %p266_p3 = scmp.ne.s32.totalorder %s22761_s14, %s22757_s13 }
   0x8   : > { %p267_p4 = scmp.eq.s32.totalorder %s18182_s18, 1  ;;  %p18185_p7 = scmp.ge.s32.totalorder %s22769_s16, 1 }
   0x9   : > { %s22867_s22 = scalar_select %p248_p1, %s22765_s15, %s250_s20  }
   0xa   : > { %p22869_p5 = por %p261_p2, %p260_p0  ;;  %p22873_p6 = por %p267_p4, %p266_p3 }
   0xb   : > { %26811 = sst [smem:[#allocation9_spill]] %s22867_s22  ;;  %p325_p8 = scmp.lt.s32.totalorder %s22769_s16, 3 }
   0xd   : > { %p326_p9 = pnand %p18185_p7, %p325_p8 }
   0xf   : > { %329 = sbr.rel (%p326_p9) target bundleno = 2845 (0xb1d), region = 60 }
  0x16   : > { %v22882_v0 = vld [vmem:[%s26750_s2 + $0x4] ss:$8 sps:$4 sm:$0xff]   ;;  %v22771_v2 = vmov 0   ;;  %v21745_v3 = vld [vmem:[%s26750_s2] ss:$8 sps:$4 sm:$0xff]   ;;  %p368_p10 = scmp.lt.s32.totalorder %s22852_s17, 1 }
  0x17   : > { %v22887_v1 = vld [vmem:[%s26750_s2 + $0x104] ss:$8 sps:$4 sm:$0xff]   ;;  %379 = vst [vmem:[#allocation2] sm:$0xff] %v22771_v2  ;;  %384 = vst [vmem:[#allocation2 + $0x28] sm:$0xff] %v22771_v2  ;;  %733 = vmatprep.subr.bf16.mxu0 %v22882_v0  ;;  %v21746_v4 = vld [vmem:[%s26750_s2 + $0x100] ss:$8 sps:$4 sm:$0xff]  }
  0x18   : > { %387 = vst [vmem:[#allocation2 + $0x40] sm:$0xff] %v22771_v2  ;;  %390 = vst [vmem:[#allocation2 + $0x58] sm:$0xff] %v22771_v2  ;;  %1190 = vmatprep.subr.bf16.mxu1 %v22887_v1  ;;  %v21747_v5 = vld [vmem:[%s26750_s2 + $0x14] ss:$8 sps:$4 sm:$0xff]   ;;  %734 = vmatpush1.bf16.msra.mxu0 %v21745_v3  ;;  %v21751_v7 = vld [vmem:[%s26750_s2 + $0x10] ss:$8 sps:$4 sm:$0xff]  }
  0x19   : > { %393 = vst [vmem:[#allocation2 + $0x70] sm:$0xff] %v22771_v2  ;;  %396 = vst [vmem:[#allocation2 + $0x88] sm:$0xff] %v22771_v2  ;;  %1191 = vmatpush1.bf16.msra.mxu1 %v21746_v4  ;;  %v21749_v6 = vld [vmem:[%s26750_s2 + $0x114] ss:$8 sps:$4 sm:$0xff]   ;;  %735 = vmatprep.subr.bf16.mxu0 %v21747_v5  ;;  %v21752_v8 = vld [vmem:[%s26750_s2 + $0x110] ss:$8 sps:$4 sm:$0xff]  }
  0x1a   : > { %399 = vst [vmem:[#allocation2 + $0xa0] sm:$0xff] %v22771_v2  ;;  %402 = vst [vmem:[#allocation2 + $0xb8] sm:$0xff] %v22771_v2  ;;  %1192 = vmatprep.subr.bf16.mxu1 %v21749_v6  ;;  %v21753_v9 = vld [vmem:[%s26750_s2 + $0x24] ss:$8 sps:$4 sm:$0xff]   ;;  %v21757_v11 = vld [vmem:[%s26750_s2 + $0x20] ss:$8 sps:$4 sm:$0xff]  }
  0x1b   : > { %405 = vst [vmem:[#allocation2 + $0xd0] sm:$0xff] %v22771_v2  ;;  %408 = vst [vmem:[#allocation2 + $0xe8] sm:$0xff] %v22771_v2  ;;  %v21755_v10 = vld [vmem:[%s26750_s2 + $0x124] ss:$8 sps:$4 sm:$0xff]   ;;  %v21758_v12 = vld [vmem:[%s26750_s2 + $0x120] ss:$8 sps:$4 sm:$0xff]  }
  0x1c   : > { %411 = vst [vmem:[#allocation2 + $0x100] sm:$0xff] %v22771_v2  ;;  %414 = vst [vmem:[#allocation2 + $0x118] sm:$0xff] %v22771_v2  ;;  %736 = vmatpush1.bf16.msra.mxu0 %v21751_v7  ;;  %v21759_v13 = vld [vmem:[%s26750_s2 + $0x34] ss:$8 sps:$4 sm:$0xff]   ;;  %v21763_v15 = vld [vmem:[%s26750_s2 + $0x30] ss:$8 sps:$4 sm:$0xff]  }
  0x1d   : > { %417 = vst [vmem:[#allocation2 + $0x130] sm:$0xff] %v22771_v2  ;;  %420 = vst [vmem:[#allocation2 + $0x148] sm:$0xff] %v22771_v2  ;;  %1193 = vmatpush1.bf16.msra.mxu1 %v21752_v8  ;;  %737 = vmatprep.subr.bf16.mxu0 %v21753_v9  ;;  %v21761_v14 = vld [vmem:[%s26750_s2 + $0x134] ss:$8 sps:$4 sm:$0xff]   ;;  %v21764_v16 = vld [vmem:[%s26750_s2 + $0x130] ss:$8 sps:$4 sm:$0xff]  }
  0x1e   : > { %423 = vst [vmem:[#allocation2 + $0x160] sm:$0xff] %v22771_v2  ;;  %426 = vst [vmem:[#allocation2 + $0x178] sm:$0xff] %v22771_v2  ;;  %1194 = vmatprep.subr.bf16.mxu1 %v21755_v10  ;;  %v21765_v17 = vld [vmem:[%s26750_s2 + $0x44] ss:$8 sps:$4 sm:$0xff]   ;;  %v21769_v19 = vld [vmem:[%s26750_s2 + $0x40] ss:$8 sps:$4 sm:$0xff]  }
  0x1f   : > { %429 = vst [vmem:[#allocation2 + $0x190] sm:$0xff] %v22771_v2  ;;  %430 = vst [vmem:[#allocation2 + $0x198] sm:$0xff] %v22771_v2  ;;  %v21767_v18 = vld [vmem:[%s26750_s2 + $0x144] ss:$8 sps:$4 sm:$0xff]   ;;  %v21770_v20 = vld [vmem:[%s26750_s2 + $0x140] ss:$8 sps:$4 sm:$0xff]  }
  0x20   : > { %433 = vst [vmem:[#allocation2 + $0x1b0] sm:$0xff] %v22771_v2  ;;  %436 = vst [vmem:[#allocation3] sm:$0xf] %v22771_v2  ;;  %738 = vmatpush1.bf16.msra.mxu0 %v21757_v11  ;;  %v21771_v21 = vld [vmem:[%s26750_s2 + $0x54] ss:$8 sps:$4 sm:$0xff]   ;;  %s23075_s21 = scalar_select %p368_p10, %s22852_s17, 1 }
  0x21   : > { %437 = vst [vmem:[#allocation3 + $0x4] sm:$0xf] %v22771_v2  ;;  %438 = vst [vmem:[#allocation3 + $0x8] sm:$0xf] %v22771_v2  ;;  %1195 = vmatpush1.bf16.msra.mxu1 %v21758_v12  ;;  %739 = vmatprep.subr.bf16.mxu0 %v21759_v13  ;;  %v21773_v22 = vld [vmem:[%s26750_s2 + $0x154] ss:$8 sps:$4 sm:$0xff]  }
  0x22   : > { %439 = vst [vmem:[#allocation3 + $0xc] sm:$0xf] %v22771_v2  ;;  %440 = vst [vmem:[#allocation3 + $0x10] sm:$0xf] %v22771_v2  ;;  %1196 = vmatprep.subr.bf16.mxu1 %v21761_v14  ;;  %v21775_v23 = vld [vmem:[%s26750_s2 + $0x50] ss:$8 sps:$4 sm:$0xff]  }
  0x23   : > { %441 = vst [vmem:[#allocation3 + $0x14] sm:$0xf] %v22771_v2  ;;  %442 = vst [vmem:[#allocation3 + $0x18] sm:$0xf] %v22771_v2  ;;  %v21776_v24 = vld [vmem:[%s26750_s2 + $0x150] ss:$8 sps:$4 sm:$0xff]  }
  0x24   : > { %443 = vst [vmem:[#allocation3 + $0x1c] sm:$0xf] %v22771_v2  ;;  %444 = vst [vmem:[#allocation3 + $0x20] sm:$0xf] %v22771_v2  ;;  %740 = vmatpush1.bf16.msra.mxu0 %v21763_v15  ;;  %v21777_v25 = vld [vmem:[%s26750_s2 + $0x64] ss:$8 sps:$4 sm:$0xff]  }
  0x25   : > { %445 = vst [vmem:[#allocation3 + $0x24] sm:$0xf] %v22771_v2  ;;  %446 = vst [vmem:[#allocation3 + $0x28] sm:$0xf] %v22771_v2  ;;  %1197 = vmatpush1.bf16.msra.mxu1 %v21764_v16  ;;  %741 = vmatprep.subr.bf16.mxu0 %v21765_v17  ;;  %v21779_v26 = vld [vmem:[%s26750_s2 + $0x164] ss:$8 sps:$4 sm:$0xff]  }
  0x26   : > { %447 = vst [vmem:[#allocation3 + $0x2c] sm:$0xf] %v22771_v2  ;;  %448 = vst [vmem:[#allocation3 + $0x30] sm:$0xf] %v22771_v2  ;;  %1198 = vmatprep.subr.bf16.mxu1 %v21767_v18  ;;  %v21781_v27 = vld [vmem:[%s26750_s2 + $0x60] ss:$8 sps:$4 sm:$0xff]  }
  0x27   : > { %449 = vst [vmem:[#allocation3 + $0x34] sm:$0xf] %v22771_v2  ;;  %450 = vst [vmem:[#allocation3 + $0x38] sm:$0xf] %v22771_v2  ;;  %v21782_v28 = vld [vmem:[%s26750_s2 + $0x160] ss:$8 sps:$4 sm:$0xff]  }
  0x28   : > { %451 = vst [vmem:[#allocation3 + $0x3c] sm:$0xf] %v22771_v2  ;;  %452 = vst [vmem:[#allocation3 + $0x40] sm:$0xf] %v22771_v2  ;;  %742 = vmatpush1.bf16.msra.mxu0 %v21769_v19  ;;  %v21783_v29 = vld [vmem:[%s26750_s2 + $0x74] ss:$8 sps:$4 sm:$0xff]  }
  0x29   : > { %453 = vst [vmem:[#allocation3 + $0x44] sm:$0xf] %v22771_v2  ;;  %454 = vst [vmem:[#allocation3 + $0x48] sm:$0xf] %v22771_v2  ;;  %1199 = vmatpush1.bf16.msra.mxu1 %v21770_v20  ;;  %743 = vmatprep.subr.bf16.mxu0 %v21771_v21  ;;  %v21785_v30 = vld [vmem:[%s26750_s2 + $0x174] ss:$8 sps:$4 sm:$0xff]  }
  0x2a   : > { %455 = vst [vmem:[#allocation3 + $0x4c] sm:$0xf] %v22771_v2  ;;  %456 = vst [vmem:[#allocation3 + $0x50] sm:$0xf] %v22771_v2  ;;  %1200 = vmatprep.subr.bf16.mxu1 %v21773_v22  ;;  %v21787_v31 = vld [vmem:[%s26750_s2 + $0x70] ss:$8 sps:$4 sm:$0xff]  }
  0x2b   : > { %457 = vst [vmem:[#allocation3 + $0x54] sm:$0xf] %v22771_v2  ;;  %458 = vst [vmem:[#allocation3 + $0x58] sm:$0xf] %v22771_v2  ;;  %v21788_v32 = vld [vmem:[%s26750_s2 + $0x170] ss:$8 sps:$4 sm:$0xff]  }
  0x2c   : > { %459 = vst [vmem:[#allocation3 + $0x5c] sm:$0xf] %v22771_v2  ;;  %460 = vst [vmem:[#allocation3 + $0x60] sm:$0xf] %v22771_v2  ;;  %744 = vmatpush1.bf16.msra.mxu0 %v21775_v23  ;;  %v21789_v33 = vld [vmem:[%s26750_s2 + $0x84] ss:$8 sps:$4 sm:$0xff]  }
  0x2d   : > { %461 = vst [vmem:[#allocation3 + $0x64] sm:$0xf] %v22771_v2  ;;  %462 = vst [vmem:[#allocation3 + $0x68] sm:$0xf] %v22771_v2  ;;  %1201 = vmatpush1.bf16.msra.mxu1 %v21776_v24  ;;  %745 = vmatprep.subr.bf16.mxu0 %v21777_v25  ;;  %v21791_v34 = vld [vmem:[%s26750_s2 + $0x184] ss:$8 sps:$4 sm:$0xff]  }
  0x2e   : > { %463 = vst [vmem:[#allocation3 + $0x6c] sm:$0xf] %v22771_v2  ;;  %464 = vst [vmem:[#allocation3 + $0x70] sm:$0xf] %v22771_v2  ;;  %1202 = vmatprep.subr.bf16.mxu1 %v21779_v26  ;;  %v21793_v35 = vld [vmem:[%s26750_s2 + $0x80] ss:$8 sps:$4 sm:$0xff]  }
  0x2f   : > { %465 = vst [vmem:[#allocation3 + $0x74] sm:$0xf] %v22771_v2  ;;  %466 = vst [vmem:[#allocation3 + $0x78] sm:$0xf] %v22771_v2  ;;  %v21794_v36 = vld [vmem:[%s26750_s2 + $0x180] ss:$8 sps:$4 sm:$0xff]  }
  0x30   : > { %467 = vst [vmem:[#allocation3 + $0x7c] sm:$0xf] %v22771_v2  ;;  %468 = vst [vmem:[#allocation3 + $0x80] sm:$0xf] %v22771_v2  ;;  %746 = vmatpush1.bf16.msra.mxu0 %v21781_v27  ;;  %v21795_v37 = vld [vmem:[%s26750_s2 + $0x94] ss:$8 sps:$4 sm:$0xff]  }
  0x31   : > { %469 = vst [vmem:[#allocation3 + $0x84] sm:$0xf] %v22771_v2  ;;  %470 = vst [vmem:[#allocation3 + $0x88] sm:$0xf] %v22771_v2  ;;  %1203 = vmatpush1.bf16.msra.mxu1 %v21782_v28  ;;  %747 = vmatprep.subr.bf16.mxu0 %v21783_v29  ;;  %v21797_v38 = vld [vmem:[%s26750_s2 + $0x194] ss:$8 sps:$4 sm:$0xff]  }
  0x32   : > { %471 = vst [vmem:[#allocation3 + $0x8c] sm:$0xf] %v22771_v2  ;;  %472 = vst [vmem:[#allocation3 + $0x90] sm:$0xf] %v22771_v2  ;;  %1204 = vmatprep.subr.bf16.mxu1 %v21785_v30  ;;  %v21799_v39 = vld [vmem:[%s26750_s2 + $0x90] ss:$8 sps:$4 sm:$0xff]  }
  0x33   : > { %473 = vst [vmem:[#allocation3 + $0x94] sm:$0xf] %v22771_v2  ;;  %474 = vst [vmem:[#allocation3 + $0x98] sm:$0xf] %v22771_v2  ;;  %v21800_v40 = vld [vmem:[%s26750_s2 + $0x190] ss:$8 sps:$4 sm:$0xff]  }
  0x34   : > { %475 = vst [vmem:[#allocation3 + $0x9c] sm:$0xf] %v22771_v2  ;;  %476 = vst [vmem:[#allocation3 + $0xa0] sm:$0xf] %v22771_v2  ;;  %748 = vmatpush1.bf16.msra.mxu0 %v21787_v31  ;;  %v21801_v41 = vld [vmem:[%s26750_s2 + $0xa4] ss:$8 sps:$4 sm:$0xff]  }
  0x35   : > { %477 = vst [vmem:[#allocation3 + $0xa4] sm:$0xf] %v22771_v2  ;;  %478 = vst [vmem:[#allocation3 + $0xa8] sm:$0xf] %v22771_v2  ;;  %1205 = vmatpush1.bf16.msra.mxu1 %v21788_v32  ;;  %749 = vmatprep.subr.bf16.mxu0 %v21789_v33  ;;  %v21803_v42 = vld [vmem:[%s26750_s2 + $0x1a4] ss:$8 sps:$4 sm:$0xff]  }
  0x36   : > { %479 = vst [vmem:[#allocation3 + $0xac] sm:$0xf] %v22771_v2  ;;  %480 = vst [vmem:[#allocation3 + $0xb0] sm:$0xf] %v22771_v2  ;;  %1206 = vmatprep.subr.bf16.mxu1 %v21791_v34  ;;  %s19679_s18 = sshll.u32 %s23075_s21, 6  ;;  %v21849_v5 = vld [vmem:[%s26752_s4] sm:$0xff]  }
  0x37   : > { %481 = vst [vmem:[#allocation3 + $0xb4] sm:$0xf] %v22771_v2  ;;  %482 = vst [vmem:[#allocation3 + $0xb8] sm:$0xf] %v22771_v2  ;;  %v21805_v43 = vld [vmem:[%s26750_s2 + $0xa0] ss:$8 sps:$4 sm:$0xff]   ;;  %s23102_s11 = scalar_lea.vmem %s26748_s0, %s19679_s18 }
  0x38   : > { %483 = vst [vmem:[#allocation3 + $0xbc] sm:$0xf] %v22771_v2  ;;  %484 = vst [vmem:[#allocation3 + $0xc0] sm:$0xf] %v22771_v2  ;;  %750 = vmatpush1.bf16.msra.mxu0 %v21793_v35  ;;  %v21806_v44 = vld [vmem:[%s26750_s2 + $0x1a0] ss:$8 sps:$4 sm:$0xff]  }
  0x39   : > { %485 = vst [vmem:[#allocation3 + $0xc4] sm:$0xf] %v22771_v2  ;;  %486 = vst [vmem:[#allocation3 + $0xc8] sm:$0xf] %v22771_v2  ;;  %1207 = vmatpush1.bf16.msra.mxu1 %v21794_v36  ;;  %751 = vmatprep.subr.bf16.mxu0 %v21795_v37  ;;  %v21807_v45 = vld [vmem:[%s26750_s2 + $0xb4] ss:$8 sps:$4 sm:$0xff]  }
  0x3a   : > { %487 = vst [vmem:[#allocation3 + $0xcc] sm:$0xf] %v22771_v2  ;;  %488 = vst [vmem:[#allocation3 + $0xd0] sm:$0xf] %v22771_v2  ;;  %1208 = vmatprep.subr.bf16.mxu1 %v21797_v38  ;;  %v21809_v46 = vld [vmem:[%s26750_s2 + $0x1b4] ss:$8 sps:$4 sm:$0xff]  }
  0x3b   : > { %489 = vst [vmem:[#allocation3 + $0xd4] sm:$0xf] %v22771_v2  ;;  %490 = vst [vmem:[#allocation3 + $0xd8] sm:$0xf] %v22771_v2  ;;  %v21811_v47 = vld [vmem:[%s26750_s2 + $0xb0] ss:$8 sps:$4 sm:$0xff]  }
  0x3c   : > { %752 = vmatpush1.bf16.msra.mxu0 %v21799_v39  ;;  %v21812_v48 = vld [vmem:[%s26750_s2 + $0x1b0] ss:$8 sps:$4 sm:$0xff]   ;;  %v21839_v49 = vld [vmem:[%s23102_s11 + $0x4] ss:$8 sps:$4 sm:$0xff]   ;;  %v21817_v52 = vld [vmem:[%s26750_s2 + $0xc0] ss:$8 sps:$4 sm:$0xff]  }
  0x3d   : > { %1209 = vmatpush1.bf16.msra.mxu1 %v21800_v40  ;;  %753 = vmatprep.subr.bf16.mxu0 %v21801_v41  ;;  %v21813_v50 = vld [vmem:[%s26750_s2 + $0xc4] ss:$8 sps:$4 sm:$0xff]   ;;  %v21818_v53 = vld [vmem:[%s26750_s2 + $0x1c0] ss:$8 sps:$4 sm:$0xff]   ;;  %v21819_v54 = vld [vmem:[%s26750_s2 + $0xd4] ss:$8 sps:$4 sm:$0xff]  }
  0x3e   : > { %1210 = vmatprep.subr.bf16.mxu1 %v21803_v42  ;;  %v21815_v51 = vld [vmem:[%s26750_s2 + $0x1c4] ss:$8 sps:$4 sm:$0xff]   ;;  %765 = vmatprep.mubr.bf16.mxu0 %v21839_v49  ;;  %v21821_v55 = vld [vmem:[%s26750_s2 + $0x1d4] ss:$8 sps:$4 sm:$0xff]   ;;  %v21823_v56 = vld [vmem:[%s26750_s2 + $0xd0] ss:$8 sps:$4 sm:$0xff]  }
  0x3f   : > { %1222 = vmatprep.mubr.bf16.mxu1 %v21839_v49  ;;  %v21824_v57 = vld [vmem:[%s26750_s2 + $0x1d0] ss:$8 sps:$4 sm:$0xff]   ;;  %v21825_v58 = vld [vmem:[%s26750_s2 + $0xe4] ss:$8 sps:$4 sm:$0xff]   ;;  %v21829_v60 = vld [vmem:[%s26750_s2 + $0xe0] ss:$8 sps:$4 sm:$0xff]  }
  0x40   : > { %754 = vmatpush1.bf16.msra.mxu0 %v21805_v43  ;;  %v21827_v59 = vld [vmem:[%s26750_s2 + $0x1e4] ss:$8 sps:$4 sm:$0xff]   ;;  %v21830_v61 = vld [vmem:[%s26750_s2 + $0x1e0] ss:$8 sps:$4 sm:$0xff]   ;;  %v21831_v62 = vld [vmem:[%s26750_s2 + $0xf4] ss:$8 sps:$4 sm:$0xff]  }
  0x41   : > { %1211 = vmatpush1.bf16.msra.mxu1 %v21806_v44  ;;  %755 = vmatprep.subr.bf16.mxu0 %v21807_v45  ;;  %v21833_v63 = vld [vmem:[%s26750_s2 + $0x1f4] ss:$8 sps:$4 sm:$0xff]   ;;  %v21835_v0 = vld [vmem:[%s26750_s2 + $0xf0] ss:$8 sps:$4 sm:$0xff]   ;;  %v21837_v3 = vld [vmem:[%s23102_s11] ss:$8 sps:$4 sm:$0xff]  }
  0x42   : > { %1212 = vmatprep.subr.bf16.mxu1 %v21809_v46  ;;  %v21836_v1 = vld [vmem:[%s26750_s2 + $0x1f0] ss:$8 sps:$4 sm:$0xff]   ;;  %v21840_v4 = vld [vmem:[%s23102_s11 + $0x14] ss:$8 sps:$4 sm:$0xff]   ;;  %v21852_v6 = vld [vmem:[%s26752_s4 + $0x100] sm:$0xff]   ;;  %v857_v46 = vlaneseq  ;;  %vm1481_vm0 = vcmask 1043456  }
  0x43   : > { %v21850_v7 = vld [vmem:[%s26752_s4 + $0x8] sm:$0xff]   ;;  %v21842_v9 = vld [vmem:[%s23102_s11 + $0x10] ss:$8 sps:$4 sm:$0xff]   ;;  %v21846_v16 = vld [vmem:[%s23102_s11 + $0x34] ss:$8 sps:$4 sm:$0xff]   ;;  %vm1484_vm2 = vcmask 1047556  }
  0x44   : > { %756 = vmatpush1.bf16.msra.mxu0 %v21811_v47  ;;  %v21854_v8 = vld [vmem:[%s26752_s4 + $0x108] sm:$0xff]   ;;  %v21851_v11 = vld [vmem:[%s26752_s4 + $0x10] sm:$0xff]   ;;  %v21853_v13 = vld [vmem:[%s26752_s4 + $0x18] sm:$0xff]   ;;  %v22772_v44 = vmov 1935823168   ;;  %v858_v49 = vshrl.u32 %v857_v46, 7 }
  0x45   : > { %1213 = vmatpush1.bf16.msra.mxu1 %v21812_v48  ;;  %757 = vmatprep.subr.bf16.mxu0 %v21813_v50  ;;  %v21843_v10 = vld [vmem:[%s23102_s11 + $0x24] ss:$8 sps:$4 sm:$0xff]   ;;  %v21856_v12 = vld [vmem:[%s26752_s4 + $0x110] sm:$0xff]   ;;  %v21858_v14 = vld [vmem:[%s26752_s4 + $0x118] sm:$0xff]   ;;  %v855_v45 = vunpack.c.l.s4 %v22772_v44  ;;  %vm1482_vm1 = vsmask.f32 7938 }
  0x46   : > { %1214 = vmatprep.subr.bf16.mxu1 %v21815_v51  ;;  %v21845_v15 = vld [vmem:[%s23102_s11 + $0x20] ss:$8 sps:$4 sm:$0xff]   ;;  %v21848_v21 = vld [vmem:[%s23102_s11 + $0x30] ss:$8 sps:$4 sm:$0xff]   ;;  %s19680_s11 = sshll.u32 %s23075_s21, 7  ;;  %vm1492_vm5 = vcmask 1040384   ;;  %vm23381_vm9 = vmand %vm1481_vm0, %vm1482_vm1 }
  0x47   : > { %v21855_v17 = vld [vmem:[%s26752_s4 + $0x20] sm:$0xff]   ;;  %v21857_v19 = vld [vmem:[%s26752_s4 + $0x28] sm:$0xff]   ;;  %v21859_v22 = vld [vmem:[%s26752_s4 + $0x30] sm:$0xff]   ;;  %s23309_s20 = scalar_lea.vmem %s26749_s1, %s19680_s11  ;;  %v856_v48 = vunpack.c.0.s8 %v855_v45  ;;  %vm1485_vm3 = vsmask.f32 7954  ;;  %vm1494_vm6 = vcmask 1044484  }
  0x48   : > { %758 = vmatpush1.bf16.msra.mxu0 %v21817_v52  ;;  %v21860_v18 = vld [vmem:[%s26752_s4 + $0x120] sm:$0xff]   ;;  %v21862_v20 = vld [vmem:[%s26752_s4 + $0x128] sm:$0xff]   ;;  %v21864_v23 = vld [vmem:[%s26752_s4 + $0x130] sm:$0xff]   ;;  %vm1458_vm4 = vsmask.f32 256  ;;  %vm4431_vm0 = vcmask 1046528  }
  0x49   : > { %1215 = vmatpush1.bf16.msra.mxu1 %v21818_v53  ;;  %759 = vmatprep.subr.bf16.mxu0 %v21819_v54  ;;  %v21861_v24 = vld [vmem:[%s26752_s4 + $0x38] sm:$0xff]   ;;  %v21863_v26 = vld [vmem:[%s26752_s4 + $0x40] sm:$0xff]   ;;  %v21865_v27 = vld [vmem:[%s26752_s4 + $0x48] sm:$0xff]   ;;  %vm1495_vm7 = vsmask.f32 4352  ;;  %s365_s26 = sand.u32 1, %s22761_s14  }
  0x4a   : > { %1216 = vmatprep.subr.bf16.mxu1 %v21821_v55  ;;  %v21866_v25 = vld [vmem:[%s26752_s4 + $0x138] sm:$0xff]   ;;  %v21867_v28 = vld [vmem:[%s26752_s4 + $0x50] sm:$0xff]   ;;  %v23245_v29 = vld [vmem:[#allocation2] sm:$0xff]  ;;  %vm1459_vm8 = vsmask.f32 4368  ;;  %s19713_s11 = sshll.u32 %s22852_s17, 12 }
  0x4b   : > { %v21868_v30 = vld [vmem:[%s26752_s4 + $0x140] sm:$0xff]   ;;  %v21870_v31 = vld [vmem:[%s26752_s4 + $0x148] sm:$0xff]   ;;  %v21872_v33 = vld [vmem:[%s26752_s4 + $0x150] sm:$0xff]   ;;  %v18343_v39 = vcombine.high %v23245_v29, %v23245_v29  ;;  %v18342_v40 = vcombine.low %v23245_v29, %v23245_v29  ;;  %vm3246_vm1 = vsmask.f32 7424  ;;  %s26700_s22 = scalar_lea.hbm %s26758_s10, %s19713_s11  ;;  %s26707_s25 = scalar_lea.sflag [#allocation6], %s365_s26 }
  0x4c   : > { %760 = vmatpush1.bf16.msra.mxu0 %v21823_v56  ;;  %v21871_v32 = vld [vmem:[%s26752_s4 + $0x60] sm:$0xff]   ;;  %v21873_v34 = vld [vmem:[%s26752_s4 + $0x68] sm:$0xff]   ;;  %v21874_v35 = vld [vmem:[%s26752_s4 + $0x158] sm:$0xff]   ;;  %s22773_s18 = smov [#allocation5]  }
  0x4d   : > { %1217 = vmatpush1.bf16.msra.mxu1 %v21824_v57  ;;  %761 = vmatprep.subr.bf16.mxu0 %v21825_v58  ;;  %v21875_v36 = vld [vmem:[%s26752_s4 + $0x70] sm:$0xff]   ;;  %v21876_v37 = vld [vmem:[%s26752_s4 + $0x160] sm:$0xff]   ;;  %v21877_v38 = vld [vmem:[%s26752_s4 + $0x78] sm:$0xff]   ;;  %v23322_v57 = vsub.s32 %v856_v48, %v858_v49  ;;  %s22711_s27 = sshll.u32 %s22773_s18, 4  ;;  %s22712_s27 = int_to_ptr.vmem [resolvable:$false] %s22711_s27 }
  0x4e   : > { %1218 = vmatprep.subr.bf16.mxu1 %v21827_v59  ;;  %v21878_v41 = vld [vmem:[%s26752_s4 + $0x168] sm:$0xff]   ;;  %v21879_v42 = vld [vmem:[%s26752_s4 + $0x170] sm:$0xff]   ;;  %v21880_v43 = vld [vmem:[%s26752_s4 + $0x178] sm:$0xff]   ;;  %s22713_s28 = scalar_lea.vmem %s22712_s27, 8192 }
  0x4f   : > { %v4152_v47 = vld [vmem:[#allocation2] sm:$0xee]  ;;  %v23315_v51 = vld [vmem:[%s23309_s20 + $0x14] ss:$8 sps:$4 sm:$0xff]   ;;  %v18300_v48 = vld [vmem:[%s23309_s20 + $0x10] sm:$0xf] }
  0x50   : > { %762 = vmatpush1.bf16.msra.mxu0 %v21829_v60  ;;  %v23312_v50 = vld [vmem:[%s23309_s20 + $0x4] ss:$8 sps:$4 sm:$0xff]   ;;  %v18536_v52 = vcombine.low %v4152_v47, %v23245_v29  ;;  %v18537_v53 = vcombine.high %v4152_v47, %v23245_v29  ;;  %v1546_v59 = vunpack.c.l.b16 %v23315_v51  ;;  %vm1486_vm10 = vmand %vm1484_vm2, %vm1485_vm3 }
  0x51   : > { %1219 = vmatpush1.bf16.msra.mxu1 %v21830_v61  ;;  %763 = vmatprep.subr.bf16.mxu0 %v21831_v62  ;;  %v23320_v54 = vld [vmem:[%s23309_s20 + $0x24] ss:$16 sps:$4 sm:$0xff]   ;;  %v1452_v58 = vunpack.c.l.b16 %v23312_v50  ;;  %v23327_v60 = vld [vmem:[%s23309_s20 + $0x2c] ss:$16 sps:$4 sm:$0xff]   ;;  %vm23402_vm11 = vmand %vm1492_vm5, %vm1458_vm4 }
  0x52   : > { %1220 = vmatprep.subr.bf16.mxu1 %v21833_v63  ;;  %v23330_v61 = vld [vmem:[%s23309_s20 + $0x44] ss:$16 sps:$4 sm:$0xff]   ;;  %vm23408_vm12 = vmand %vm1494_vm6, %vm1495_vm7 }
  0x53   : > { %vm23414_vm13 = vmor %vm1486_vm10, %vm23381_vm9 }
  0x54   : > { %764 = vmatpush1.bf16.msra.mxu0 %v21835_v0  ;;  %v1624_v0 = vunpack.c.l.b16 %v23320_v54  ;;  %vm23422_vm14 = vmor %vm1458_vm4, %vm1459_vm8 }
  0x55   : > { %1221 = vmatpush1.bf16.msra.mxu1 %v21836_v1  ;;  %4674 = vmatprep.subr.bf16.mxu0 %v22771_v2  ;;  %v23333_v1 = vrot.slane %v18536_v52, 1  ;;  %vm23434_vm15 = vmor %vm23408_vm12, %vm23402_vm11 }
  0x56   : > { %2598 = vmatprep.subr.bf16.mxu1 %v22771_v2 }
  0x57   : > { %766 = vmatmul.mubr.bf16.vlgmr.msra.gmra.mrb[0].mxu0 %v21837_v3 }
  0x58   : > { %1223 = vmatmul.mubr.bf16.vlgmr.msra.gmra.mrb[0].mxu1 %v21837_v3  ;;  %775 = vmatprep.mubr.bf16.mxu0 %v21840_v4  ;;  %v23335_v3 = vrot.slane %v18537_v53, 1  ;;  %v26814_v53 = vmov 0 }
  0x59   : > { %1232 = vmatprep.mubr.bf16.mxu1 %v21840_v4  ;;  %2599 = vmatpush1.bf16.msra.mxu1 %v21849_v5  ;;  %v26815_v53 = vsel %vm23381_vm9, 4294967295, %v26814_v53 }
  0x5a   : > { %4675 = vmatpush1.bf16.msra.mxu0 %v21852_v6  ;;  %2600 = vmatprep.subr.bf16.mxu1 %v22771_v2  ;;  %26816 = vst [vmem:[#allocation10_spill] sm:$0xff] %v26815_v53 }
  0x5b   : > { %4676 = vmatprep.subr.bf16.mxu0 %v22771_v2 }
  0x5d   : > { %2601 = vmatpush1.bf16.msra.mxu1 %v21850_v7 }
  0x5e   : > { %4677 = vmatpush1.bf16.msra.mxu0 %v21854_v8  ;;  %2602 = vmatprep.subr.bf16.mxu1 %v22771_v2 }
  0x5f   : > { %4678 = vmatprep.subr.bf16.mxu0 %v22771_v2  ;;  %776 = vmatmul.mubr.bf16.gmra.mrb[4].mxu0 %v21842_v9 }
  0x60   : > { %1233 = vmatmul.mubr.bf16.gmra.mrb[4].mxu1 %v21842_v9  ;;  %785 = vmatprep.mubr.bf16.mxu0 %v21843_v10 }
  0x61   : > { %1242 = vmatprep.mubr.bf16.mxu1 %v21843_v10  ;;  %2603 = vmatpush1.bf16.msra.mxu1 %v21851_v11  ;;  %v23340_v10 = vld [vmem:[%s26751_s3] ss:$0 sm:$0xff] }
  0x62   : > { %4679 = vmatpush1.bf16.msra.mxu0 %v21856_v12  ;;  %2604 = vmatprep.subr.bf16.mxu1 %v22771_v2 }
  0x63   : > { %4680 = vmatprep.subr.bf16.mxu0 %v22771_v2 }
  0x65   : > { %2605 = vmatpush1.bf16.msra.mxu1 %v21853_v13  ;;  %v1663_v13 = vunpack.c.l.b16 %v23327_v60 }
  0x66   : > { %4681 = vmatpush1.bf16.msra.mxu0 %v21858_v14  ;;  %2606 = vmatprep.subr.bf16.mxu1 %v22771_v2  ;;  %v1780_v14 = vunpack.c.l.b16 %v23330_v61 }
  0x67   : > { %4682 = vmatprep.subr.bf16.mxu0 %v22771_v2  ;;  %786 = vmatmul.mubr.bf16.gmra.mrb[8].mxu0 %v21845_v15 }
  0x68   : > { %1243 = vmatmul.mubr.bf16.gmra.mrb[8].mxu1 %v21845_v15  ;;  %795 = vmatprep.mubr.bf16.mxu0 %v21846_v16 }
  0x69   : > { %1252 = vmatprep.mubr.bf16.mxu1 %v21846_v16  ;;  %2607 = vmatpush1.bf16.msra.mxu1 %v21855_v17 }
  0x6a   : > { %4683 = vmatpush1.bf16.msra.mxu0 %v21860_v18  ;;  %2608 = vmatprep.subr.bf16.mxu1 %v22771_v2 }
  0x6b   : > { %4684 = vmatprep.subr.bf16.mxu0 %v22771_v2 }
  0x6d   : > { %2609 = vmatpush1.bf16.msra.mxu1 %v21857_v19 }
  0x6e   : > { %4685 = vmatpush1.bf16.msra.mxu0 %v21862_v20  ;;  %2610 = vmatprep.subr.bf16.mxu1 %v22771_v2 }
  0x6f   : > { %4686 = vmatprep.subr.bf16.mxu0 %v22771_v2  ;;  %796 = vmatmul.mubr.bf16.gmra.mrb[12].mxu0 %v21848_v21 }
  0x70   : > { %1253 = vmatmul.mubr.bf16.gmra.mrb[12].mxu1 %v21848_v21 }
  0x71   : > { %2611 = vmatpush1.bf16.msra.mxu1 %v21859_v22  ;;  %2630 = vmatprep.mubr.bf16.mxu1 %v18343_v39 }
  0x72   : > { %4687 = vmatpush1.bf16.msra.mxu0 %v21864_v23  ;;  %2612 = vmatprep.subr.bf16.mxu1 %v22771_v2  ;;  %v23349_v23 = vld [vmem:[%s23309_s20 + $0x4c] ss:$16 sps:$4 sm:$0xff]  }
  0x73   : > { %4688 = vmatprep.subr.bf16.mxu0 %v22771_v2 }
  0x75   : > { %2613 = vmatpush1.bf16.msra.mxu1 %v21861_v24 }
  0x76   : > { %4689 = vmatpush1.bf16.msra.mxu0 %v21866_v25  ;;  %2614 = vmatprep.subr.bf16.mxu1 %v22771_v2 }
  0x77   : > { %4690 = vmatprep.subr.bf16.mxu0 %v22771_v2 }
  0x79   : > { %2615 = vmatpush1.bf16.msra.mxu1 %v21863_v26 }
  0x7a   : > { %2616 = vmatprep.subr.bf16.mxu1 %v22771_v2  ;;  %4691 = vmatpush1.bf16.msra.mxu0 %v21868_v30  ;;  %v21869_v2 = vld [vmem:[%s26752_s4 + $0x58] sm:$0xff]   ;;  %v18297_v30 = vld [vmem:[%s23309_s20 + $0x8] sm:$0xf] }
  0x7b   : > { %4692 = vmatprep.subr.bf16.mxu0 %v23245_v29 }
  0x7d   : > { %2617 = vmatpush1.bf16.msra.mxu1 %v21865_v27 }
  0x7e   : > { %2618 = vmatprep.subr.bf16.mxu1 %v23245_v29  ;;  %4693 = vmatpush1.bf16.msra.mxu0 %v21870_v31 }
  0x7f   : > { %4694 = vmatprep.subr.bf16.mxu0 %v23245_v29 }
  0x81   : > { %2619 = vmatpush1.bf16.msra.mxu1 %v21867_v28  ;;  %v1447_v28 = vld [vmem:[%s23309_s20] sm:$0xf] }
  0x82   : > { %2620 = vmatprep.subr.bf16.mxu1 %v23245_v29  ;;  %4695 = vmatpush1.bf16.msra.mxu0 %v21872_v33 }
  0x83   : > { %4696 = vmatprep.subr.bf16.mxu0 %v23245_v29 }
  0x85   : > { %2621 = vmatpush1.bf16.msra.mxu1 %v21869_v2 }
  0x86   : > { %2622 = vmatprep.subr.bf16.mxu1 %v23245_v29  ;;  %4697 = vmatpush1.bf16.msra.mxu0 %v21874_v35 }
  0x87   : > { %4698 = vmatprep.subr.bf16.mxu0 %v23245_v29 }
  0x89   : > { %2623 = vmatpush1.bf16.msra.mxu1 %v21871_v32 }
  0x8a   : > { %2624 = vmatprep.subr.bf16.mxu1 %v23245_v29  ;;  %4699 = vmatpush1.bf16.msra.mxu0 %v21876_v37 }
  0x8b   : > { %4700 = vmatprep.subr.bf16.mxu0 %v23245_v29 }
  0x8d   : > { %2625 = vmatpush1.bf16.msra.mxu1 %v21873_v34 }
  0x8e   : > { %2626 = vmatprep.subr.bf16.mxu1 %v23245_v29  ;;  %4701 = vmatpush1.bf16.msra.mxu0 %v21878_v41 }
  0x8f   : > { %4702 = vmatprep.subr.bf16.mxu0 %v23245_v29 }
  0x91   : > { %2627 = vmatpush1.bf16.msra.mxu1 %v21875_v36 }
  0x92   : > { %2628 = vmatprep.subr.bf16.mxu1 %v23245_v29  ;;  %4703 = vmatpush1.bf16.msra.mxu0 %v21879_v42 }
  0x93   : > { %4704 = vmatprep.subr.bf16.mxu0 %v23245_v29 }
  0x95   : > { %2629 = vmatpush1.bf16.msra.mxu1 %v21877_v38  ;;  %v1819_v38 = vunpack.c.l.b16 %v23349_v23 }
  0x96   : > { %3783 = vmatprep.subr.bf16.mxu1 %v23245_v29  ;;  %4705 = vmatpush1.bf16.msra.mxu0 %v21880_v43 }
  0x97   : > { %5460 = vmatprep.subr.bf16.mxu0 %v23245_v29 }
  0x98   : > { %2631 = vmatmul.mubr.bf16.vlgmr.msra.gmra.mrb[16].mxu1 %v18342_v40 }
 0x12a   : > { %v767_v55 = vpop.f32.mrb[0].mxu0 }
 0x12b   : > { %v1224_v56 = vpop.f32.mrb[0].mxu1  ;;  %v769_v62 = vpop.f32.mrb[1].mxu0 }
 0x12c   : > { %v1226_v63 = vpop.f32.mrb[1].mxu1  ;;  %v822_v4 = vcombine.low %v767_v55, %v769_v62  ;;  %v823_v5 = vcombine.high %v767_v55, %v769_v62  ;;  %v771_v8 = vpop.f32.mrb[2].mxu0 }
 0x12d   : > { %v1279_v6 = vcombine.low %v1224_v56, %v1226_v63  ;;  %v1280_v7 = vcombine.high %v1224_v56, %v1226_v63  ;;  %v1228_v9 = vpop.f32.mrb[2].mxu1  ;;  %v773_v11 = vpop.f32.mrb[3].mxu0 }
 0x12e   : > { %v1230_v12 = vpop.f32.mrb[3].mxu1  ;;  %v860_v15 = vrot.slane %v822_v4, %v23322_v57  ;;  %v867_v16 = vrot.slane %v823_v5, %v23322_v57  ;;  %v824_v19 = vcombine.low %v771_v8, %v773_v11  ;;  %v825_v20 = vcombine.high %v771_v8, %v773_v11 }
 0x12f   : > { %v1317_v17 = vrot.slane %v1279_v6, %v23322_v57  ;;  %v1324_v18 = vrot.slane %v1280_v7, %v23322_v57  ;;  %v1281_v21 = vcombine.low %v1228_v9, %v1230_v12  ;;  %v1282_v22 = vcombine.high %v1228_v9, %v1230_v12 }
 0x130   : > { %v973_v24 = vadd.f32 %v23340_v10, %v860_v15  ;;  %v974_v25 = vadd.f32 %v23340_v10, %v867_v16  ;;  %v874_v2 = vrot.slane %v824_v19, %v23322_v57  ;;  %v881_v31 = vrot.slane %v825_v20, %v23322_v57 }
 0x131   : > { %v1423_v26 = vadd.f32 %v23340_v10, %v1317_v17  ;;  %v1424_v27 = vadd.f32 %v23340_v10, %v1324_v18  ;;  %v1331_v32 = vrot.slane %v1281_v21, %v23322_v57  ;;  %v1338_v33 = vrot.slane %v1282_v22, %v23322_v57  ;;  %v1498_v22 = vld [vmem:[#allocation2 + $0x28] sm:$0x11] }
 0x132   : > { %v989_v34 = vpack.c.bf16 %v974_v25, %v973_v24  ;;  %v23361_v36 = vpop.f32.mrb[4].mxu0  ;;  %v975_v39 = vadd.f32 %v23340_v10, %v874_v2  ;;  %v976_v40 = vadd.f32 %v23340_v10, %v881_v31  ;;  %v26817_v11 = vmov 0 }
 0x133   : > { %v1439_v35 = vpack.c.bf16 %v1424_v27, %v1423_v26  ;;  %v23363_v37 = vpop.f32.mrb[4].mxu1  ;;  %v1425_v41 = vadd.f32 %v23340_v10, %v1331_v32  ;;  %v1426_v42 = vadd.f32 %v23340_v10, %v1338_v33  ;;  %v23370_v43 = vpop.f32.mrb[5].mxu0  ;;  %v26818_v11 = vsel %vm23402_vm11, 4294967295, %v26817_v11 }
 0x134   : > { %v23372_v44 = vpop.f32.mrb[5].mxu1  ;;  %v1455_v45 = vunpack.c.h.b16 %v989_v34  ;;  %v18296_v46 = vcombine.low %v989_v34, %v1447_v28  ;;  %v23375_v49 = vpop.f32.mrb[6].mxu0  ;;  %v990_v55 = vpack.c.bf16 %v976_v40, %v975_v39  ;;  %v826_v62 = vcombine.low %v23361_v36, %v23370_v43  ;;  %26819 = vst [vmem:[#allocation11_spill] sm:$0xff] %v26818_v11 }
 0x135   : > { %v18299_v47 = vcombine.low %v1439_v35, %v18297_v30  ;;  %v23377_v52 = vpop.f32.mrb[6].mxu1  ;;  %v23385_v56 = vpack.c.bf16 %v1426_v42, %v1425_v41  ;;  %v827_v63 = vcombine.high %v23361_v36, %v23370_v43  ;;  %v23391_v4 = vpop.f32.mrb[7].mxu0  ;;  %v22699_v9 = vcombine.high %v1439_v35, %v23312_v50 }
 0x136   : > { %v23393_v5 = vpop.f32.mrb[7].mxu1  ;;  %v1457_v6 = vpack.c.b16 %v1452_v58, %v1455_v45  ;;  %v1462_v7 = vshrl.u32 %v18296_v46, 16  ;;  %v1465_v8 = vshll.u32 %v18296_v46, 16  ;;  %v1549_v16 = vunpack.c.h.b16 %v990_v55 }
 0x137   : > { %v1514_v12 = vshrl.u32 %v18299_v47, 16  ;;  %v1517_v15 = vshll.u32 %v18299_v47, 16  ;;  %v18302_v17 = vcombine.low %v990_v55, %v18300_v48  ;;  %v1522_v50 = vshrl.u32 %v22699_v9, 16 }
 0x138   : > { %v1464_v18 = vrot.slane %v1462_v7, 7  ;;  %v1470_v19 = vshrl.u32 %v1457_v6, 16  ;;  %v1473_v58 = vshll.u32 %v1457_v6, 16  ;;  %v1525_v25 = vshll.u32 %v22699_v9, 16  ;;  %v1537_v6 = vld [vmem:[#allocation2 + $0x40] sm:$0x11] }
 0x139   : > { %v1516_v24 = vrot.slane %v1514_v12, 7  ;;  %v1551_v26 = vpack.c.b16 %v1546_v59, %v1549_v16  ;;  %v1553_v27 = vshrl.u32 %v18302_v17, 16  ;;  %v26824_v28 = vmov 0 }
 0x13a   : > { %v26825_v28 = vsel %vm23422_vm14, 4294967295, %v26824_v28  ;;  %v1467_v30 = vor.u32 %v1465_v8, %v1464_v18  ;;  %v1468_v2 = vrot.slane %v1464_v18, 4  ;;  %v1472_v31 = vrot.slane %v1470_v19, 7  ;;  %v23426_v33 = vpop.f32.mrb[8].mxu0 }
 0x13b   : > { %26826 = vst [vmem:[#allocation12_spill] sm:$0xff] %v26825_v28  ;;  %v1524_v32 = vrot.slane %v1522_v50, 7  ;;  %v23428_v34 = vpop.f32.mrb[8].mxu1  ;;  %v1519_v35 = vor.u32 %v1517_v15, %v1516_v24  ;;  %v1520_v39 = vrot.slane %v1516_v24, 4  ;;  %v1555_v40 = vrot.slane %v1553_v27, 7  ;;  %v23438_v42 = vpop.f32.mrb[9].mxu0 }
 0x13c   : > { %v1556_v41 = vshll.u32 %v18302_v17, 16  ;;  %v23440_v45 = vpop.f32.mrb[9].mxu1  ;;  %v1475_v46 = vor.u32 %v1473_v58, %v1472_v31  ;;  %v1477_v47 = vrot.slane %v1472_v31, 4  ;;  %v1489_v48 = vsel %vm23414_vm13, %v1467_v30, %v23245_v29  ;;  %v23445_v7 = vpop.f32.mrb[10].mxu0  ;;  %v18303_v17 = vld [vmem:[%s23309_s20 + $0x18] sm:$0xf] }
 0x13d   : > { %v1527_v55 = vor.u32 %v1525_v25, %v1524_v32  ;;  %v23447_v8 = vpop.f32.mrb[10].mxu1  ;;  %1490 = vst [vmem:[#allocation2 + $0x18] sm:$0xff] %v1489_v48  ;;  %v1529_v9 = vrot.slane %v1524_v32, 4  ;;  %v23452_v12 = vsel %vm23414_vm13, %v1519_v35, %v23245_v29  ;;  %v1559_v16 = vrot.slane %v1555_v40, 4  ;;  %v23455_v18 = vpop.f32.mrb[11].mxu0  ;;  %v21895_v25 = vld [vmem:[%s26752_s4 + $0x80] sm:$0xff]  }
 0x13e   : > { %v1558_v15 = vor.u32 %v1556_v41, %v1555_v40  ;;  %v23457_v19 = vpop.f32.mrb[11].mxu1  ;;  %v23461_v58 = vsel %vm23422_vm14, %v1468_v2, %v1475_v46  ;;  %v1499_v20 = vsel %vm23434_vm15, %v1477_v47, %v1498_v22  ;;  %1535 = vst [vmem:[#allocation2 + $0x30] sm:$0xff] %v23452_v12  ;;  %v1561_v24 = vshrl.u32 %v1551_v26, 16  ;;  %3784 = vmatpush1.bf16.msra.mxu1 %v21895_v25  ;;  %v18306_v47 = vld [vmem:[%s23309_s20 + $0x20] sm:$0xf] }
 0x13f   : > { %v23467_v50 = vsel %vm23422_vm14, %v1520_v39, %v1527_v55  ;;  %1491 = vst [vmem:[#allocation2 + $0x20] sm:$0xff] %v23461_v58  ;;  %1500 = vst [vmem:[#allocation2 + $0x28] sm:$0x11] %v1499_v20  ;;  %v1538_v27 = vsel %vm23434_vm15, %v1529_v9, %v1537_v6  ;;  %v1564_v22 = vshll.u32 %v1551_v26, 16  ;;  %v18305_v31 = vcombine.low %v23385_v56, %v18303_v17  ;;  %v23494_v39 = vld [vmem:[#allocation2] sm:$0xff] }
 0x140   : > { %1536 = vst [vmem:[#allocation2 + $0x38] sm:$0xff] %v23467_v50  ;;  %v23480_v30 = vsel %vm23414_vm13, %v1558_v15, %v23245_v29  ;;  %1539 = vst [vmem:[#allocation2 + $0x40] sm:$0x11] %v1538_v27  ;;  %v1563_v2 = vrot.slane %v1561_v24, 7  ;;  %v888_v32 = vrot.slane %v826_v62, %v23322_v57  ;;  %v895_v26 = vrot.slane %v827_v63, %v23322_v57  ;;  %v1576_v29 = vld [vmem:[#allocation2 + $0x58] sm:$0x11] }
 0x141   : > { %1574 = vst [vmem:[#allocation2 + $0x48] sm:$0xff] %v23480_v30  ;;  %v22700_v35 = vcombine.high %v23385_v56, %v23315_v51  ;;  %v23497_v40 = vcombine.high %v23494_v39, %v1489_v48  ;;  %v23500_v41 = vcombine.low %v23494_v39, %v1489_v48  ;;  %v23504_v62 = vcombine.high %v23452_v12, %v23467_v50  ;;  %v21896_v15 = vld [vmem:[%s26752_s4 + $0x88] sm:$0xff]  }
 0x142   : > { %3785 = vmatprep.subr.bf16.mxu1 %v23494_v39  ;;  %v1566_v36 = vor.u32 %v1564_v22, %v1563_v2  ;;  %v1568_v43 = vrot.slane %v1563_v2, 4  ;;  %v1592_v63 = vshrl.u32 %v18305_v31, 16  ;;  %v1595_v46 = vshll.u32 %v18305_v31, 16  ;;  %v23508_v51 = vpop.f32.mrb[12].mxu0 }
 0x143   : > { %v1600_v56 = vshrl.u32 %v22700_v35, 16  ;;  %v1603_v55 = vshll.u32 %v22700_v35, 16  ;;  %v977_v6 = vadd.f32 %v23340_v10, %v888_v32  ;;  %v978_v48 = vadd.f32 %v23340_v10, %v895_v26  ;;  %2638 = vmatprep.mubr.bf16.mxu1 %v23497_v40  ;;  %v23513_v9 = vpop.f32.mrb[13].mxu0  ;;  %v23518_v17 = vpop.f32.mrb[12].mxu1  ;;  %3786 = vmatpush1.bf16.msra.mxu1 %v21896_v15  ;;  %v1615_v35 = vld [vmem:[#allocation2 + $0x70] sm:$0x11] }
 0x144   : > { %v23522_v20 = vsel %vm23422_vm14, %v1559_v16, %v1566_v36  ;;  %v1577_v24 = vsel %vm23434_vm15, %v1568_v43, %v1576_v29  ;;  %v1594_v25 = vrot.slane %v1592_v63, 7  ;;  %2639 = vmatmul.mubr.bf16.gmra.mrb[20].mxu1 %v23500_v41  ;;  %v4433_v27 = vrot.slane %v23500_v41, 1  ;;  %v23532_v16 = vpop.f32.mrb[13].mxu1  ;;  %3787 = vmatprep.subr.bf16.mxu1 %v23494_v39 }
 0x145   : > { %1575 = vst [vmem:[#allocation2 + $0x50] sm:$0xff] %v23522_v20  ;;  %1578 = vst [vmem:[#allocation2 + $0x58] sm:$0x11] %v1577_v24  ;;  %v1602_v22 = vrot.slane %v1600_v56, 7  ;;  %v991_v2 = vpack.c.bf16 %v978_v48, %v977_v6  ;;  %v4436_v31 = vrot.slane %v23497_v40, 1  ;;  %v828_v32 = vcombine.low %v23375_v49, %v23391_v4  ;;  %v21897_v40 = vld [vmem:[%s26752_s4 + $0x90] sm:$0xff]  }
 0x146   : > { %v1597_v26 = vor.u32 %v1595_v46, %v1594_v25  ;;  %v1598_v29 = vrot.slane %v1594_v25, 4  ;;  %v2187_v36 = vld [vmem:[#allocation2 + $0x28] sm:$0xff]  ;;  %v4434_v41 = vsel %vm4431_vm0, %v23333_v1, %v4433_v27  ;;  %v829_v43 = vcombine.high %v23375_v49, %v23391_v4  ;;  %v21881_v46 = vld [vmem:[%s26752_s4 + $0x180] sm:$0xff]  }
 0x147   : > { %v1605_v63 = vor.u32 %v1603_v55, %v1602_v22  ;;  %v1607_v56 = vrot.slane %v1602_v22, 4  ;;  %v1627_v6 = vunpack.c.h.b16 %v991_v2  ;;  %v18308_v48 = vcombine.low %v991_v2, %v18306_v47  ;;  %3788 = vmatpush1.bf16.msra.mxu1 %v21897_v40 }
 0x148   : > { %v23548_v1 = vsel %vm23414_vm13, %v1597_v26, %v23494_v39  ;;  %v18347_v49 = vcombine.high %v23461_v58, %v2187_v36  ;;  %v4437_v4 = vsel %vm4431_vm0, %v23335_v3, %v4436_v31  ;;  %v23554_v15 = vcombine.low %v23461_v58, %v2187_v36  ;;  %v21882_v36 = vld [vmem:[%s26752_s4 + $0x188] sm:$0xff]   ;;  %3789 = vmatprep.subr.bf16.mxu1 %v23494_v39 }
 0x149   : > { %v23558_v47 = vsel %vm23422_vm14, %v1598_v29, %v1605_v63  ;;  %1613 = vst [vmem:[#allocation2 + $0x60] sm:$0xff] %v23548_v1  ;;  %v1616_v55 = vsel %vm23434_vm15, %v1607_v56, %v1615_v35  ;;  %v1629_v24 = vpack.c.b16 %v1624_v0, %v1627_v6  ;;  %v1631_v25 = vshrl.u32 %v18308_v48, 16  ;;  %4706 = vmatprep.mubr.bf16.mxu0 %v4437_v4 }
 0x14a   : > { %1614 = vst [vmem:[#allocation2 + $0x68] sm:$0xff] %v23558_v47  ;;  %1617 = vst [vmem:[#allocation2 + $0x70] sm:$0x11] %v1616_v55  ;;  %v1634_v3 = vshll.u32 %v18308_v48, 16  ;;  %2646 = vmatprep.mubr.bf16.mxu1 %v18347_v49  ;;  %4707 = vmatmul.mubr.bf16.vlgmr.msra.gmra.mrb[16].mxu0 %v4434_v41  ;;  %v4440_v58 = vrot.slane %v18347_v49, 1  ;;  %v4438_v22 = vrot.slane %v23554_v15, 1  ;;  %v902_v2 = vrot.slane %v828_v32, %v23322_v57 }
 0x14b   : > { %v1633_v26 = vrot.slane %v1631_v25, 7  ;;  %v1639_v29 = vshrl.u32 %v1629_v24, 16  ;;  %v1642_v35 = vshll.u32 %v1629_v24, 16  ;;  %5461 = vmatpush1.bf16.msra.mxu0 %v21881_v46  ;;  %v909_v0 = vrot.slane %v829_v43, %v23322_v57  ;;  %v21899_v41 = vld [vmem:[%s26752_s4 + $0x98] sm:$0xff]   ;;  %v1654_v46 = vld [vmem:[#allocation2 + $0x88] sm:$0x11] }
 0x14c   : > { %v4441_v40 = vsel %vm4431_vm0, %v4436_v31, %v4440_v58  ;;  %2647 = vmatmul.mubr.bf16.gmra.mrb[24].mxu1 %v23554_v15  ;;  %v4439_v32 = vsel %vm4431_vm0, %v4433_v27, %v4438_v22  ;;  %5462 = vmatprep.subr.bf16.mxu0 %v23494_v39  ;;  %v979_v43 = vadd.f32 %v23340_v10, %v902_v2  ;;  %v4444_v63 = vrot.slane %v23504_v62, 1  ;;  %v18312_v49 = vld [vmem:[%s23309_s20 + $0x30] sm:$0xf]  ;;  %v23596_v25 = vpop.f32.mrb[14].mxu0 }
 0x14d   : > { %v1636_v56 = vor.u32 %v1634_v3, %v1633_v26  ;;  %v1637_v6 = vrot.slane %v1633_v26, 4  ;;  %v1641_v48 = vrot.slane %v1639_v29, 7  ;;  %4714 = vmatprep.mubr.bf16.mxu0 %v4441_v40  ;;  %2654 = vmatprep.mubr.bf16.mxu1 %v23504_v62  ;;  %v980_v31 = vadd.f32 %v23340_v10, %v909_v0 }
 0x14e   : > { %v1283_v4 = vcombine.low %v23363_v37, %v23372_v44  ;;  %v1284_v27 = vcombine.high %v23363_v37, %v23372_v44  ;;  %v4445_v55 = vsel %vm4431_vm0, %v4440_v58, %v4444_v63  ;;  %v1285_v24 = vcombine.low %v23377_v52, %v23393_v5  ;;  %3790 = vmatpush1.bf16.msra.mxu1 %v21899_v41  ;;  %v21883_v37 = vld [vmem:[%s26752_s4 + $0x190] sm:$0xff]   ;;  %v23607_v44 = vpop.f32.mrb[15].mxu0 }
 0x14f   : > { %v1644_v3 = vor.u32 %v1642_v35, %v1641_v48  ;;  %v1646_v2 = vrot.slane %v1641_v48, 4  ;;  %v23601_v26 = vsel %vm23414_vm13, %v1636_v56, %v23494_v39  ;;  %v992_v29 = vpack.c.bf16 %v980_v31, %v979_v43  ;;  %5463 = vmatpush1.bf16.msra.mxu0 %v21882_v36  ;;  %3791 = vmatprep.subr.bf16.mxu1 %v23494_v39  ;;  %v18309_v56 = vld [vmem:[%s23309_s20 + $0x28] sm:$0xf]  ;;  %v2190_v48 = vld [vmem:[#allocation2 + $0x40] sm:$0xff] }
 0x150   : > { %1652 = vst [vmem:[#allocation2 + $0x78] sm:$0xff] %v23601_v26  ;;  %v1345_v58 = vrot.slane %v1283_v4, %v23322_v57  ;;  %v1352_v35 = vrot.slane %v1284_v27, %v23322_v57  ;;  %v1286_v0 = vcombine.high %v23377_v52, %v23393_v5  ;;  %v1359_v41 = vrot.slane %v1285_v24, %v23322_v57  ;;  %v21900_v31 = vld [vmem:[%s26752_s4 + $0xa0] sm:$0xff]  }
 0x151   : > { %5464 = vmatprep.subr.bf16.mxu0 %v23494_v39  ;;  %v23618_v36 = vsel %vm23422_vm14, %v1637_v6, %v1644_v3  ;;  %v1655_v40 = vsel %vm23434_vm15, %v1646_v2, %v1654_v46  ;;  %v18314_v43 = vcombine.low %v992_v29, %v18312_v49  ;;  %v22701_v49 = vcombine.high %v992_v29, %v23320_v54 }
 0x152   : > { %1653 = vst [vmem:[#allocation2 + $0x80] sm:$0xff] %v23618_v36  ;;  %1656 = vst [vmem:[#allocation2 + $0x88] sm:$0x11] %v1655_v40  ;;  %4715 = vmatmul.mubr.bf16.gmra.mrb[20].mxu0 %v4439_v32  ;;  %v1427_v52 = vadd.f32 %v23340_v10, %v1345_v58  ;;  %v1428_v5 = vadd.f32 %v23340_v10, %v1352_v35  ;;  %v1366_v6 = vrot.slane %v1286_v0, %v23322_v57  ;;  %v21884_v32 = vld [vmem:[%s26752_s4 + $0x198] sm:$0xff]  }
 0x153   : > { %v1429_v46 = vadd.f32 %v23340_v10, %v1359_v41  ;;  %v1709_v4 = vshrl.u32 %v18314_v43, 16  ;;  %v1712_v27 = vshll.u32 %v18314_v43, 16  ;;  %4722 = vmatprep.mubr.bf16.mxu0 %v4445_v55  ;;  %v23634_v24 = vcombine.low %v23452_v12, %v23467_v50  ;;  %5465 = vmatpush1.bf16.msra.mxu0 %v21883_v37  ;;  %v18315_v58 = vld [vmem:[%s23309_s20 + $0x38] sm:$0xf]  ;;  %v21904_v37 = vld [vmem:[%s26752_s4 + $0xa8] sm:$0xff]  }
 0x154   : > { %v1441_v3 = vpack.c.bf16 %v1428_v5, %v1427_v52  ;;  %v1430_v2 = vadd.f32 %v23340_v10, %v1366_v6  ;;  %v23642_v35 = vcombine.high %v2190_v48, %v23480_v30  ;;  %v23645_v54 = vcombine.low %v2190_v48, %v23480_v30  ;;  %5466 = vmatprep.subr.bf16.mxu0 %v23494_v39  ;;  %v1732_v6 = vld [vmem:[#allocation2 + $0xb8] sm:$0x11] }
 0x155   : > { %v1711_v55 = vrot.slane %v1709_v4, 7  ;;  %v1717_v12 = vshrl.u32 %v22701_v49, 16  ;;  %v1720_v50 = vshll.u32 %v22701_v49, 16  ;;  %2655 = vmatmul.mubr.bf16.gmra.mrb[28].mxu1 %v23634_v24  ;;  %v4442_v29 = vrot.slane %v23634_v24, 1 }
 0x156   : > { %v1666_v0 = vunpack.c.h.b16 %v1441_v3  ;;  %v18311_v41 = vcombine.low %v1441_v3, %v18309_v56  ;;  %v1442_v40 = vpack.c.bf16 %v1430_v2, %v1429_v46  ;;  %2662 = vmatprep.mubr.bf16.mxu1 %v23642_v35  ;;  %v4448_v30 = vrot.slane %v23642_v35, 1  ;;  %3792 = vmatpush1.bf16.msra.mxu1 %v21900_v31  ;;  %v21885_v56 = vld [vmem:[%s26752_s4 + $0x1a0] sm:$0xff]  }
 0x157   : > { %v1714_v43 = vor.u32 %v1712_v27, %v1711_v55  ;;  %v1715_v48 = vrot.slane %v1711_v55, 4  ;;  %v1719_v52 = vrot.slane %v1717_v12, 7  ;;  %v4443_v5 = vsel %vm4431_vm0, %v4438_v22, %v4442_v29  ;;  %5467 = vmatpush1.bf16.msra.mxu0 %v21884_v32  ;;  %3793 = vmatprep.subr.bf16.mxu1 %v23494_v39  ;;  %v23672_v32 = vld [vmem:[#allocation2 + $0x58] sm:$0xff]  ;;  %v21905_v12 = vld [vmem:[%s26752_s4 + $0xb0] sm:$0xff]  }
 0x158   : > { %v1668_v31 = vpack.c.b16 %v1663_v13, %v1666_v0  ;;  %v1670_v46 = vshrl.u32 %v18311_v41, 16  ;;  %v1673_v49 = vshll.u32 %v18311_v41, 16  ;;  %5468 = vmatprep.subr.bf16.mxu0 %v23494_v39  ;;  %v18317_v22 = vcombine.low %v1442_v40, %v18315_v58 }
 0x159   : > { %v1722_v4 = vor.u32 %v1720_v50, %v1719_v52  ;;  %v1724_v27 = vrot.slane %v1719_v52, 4  ;;  %v23670_v15 = vsel %vm23414_vm13, %v1714_v43, %v23494_v39  ;;  %v22702_v13 = vcombine.high %v1442_v40, %v23327_v60  ;;  %v21886_v60 = vld [vmem:[%s26752_s4 + $0x1a8] sm:$0xff]   ;;  %v1693_v52 = vld [vmem:[#allocation2 + $0xa0] sm:$0x11] }
 0x15a   : > { %1730 = vst [vmem:[#allocation2 + $0xa8] sm:$0xff] %v23670_v15  ;;  %v1672_v3 = vrot.slane %v1670_v46, 7  ;;  %v1678_v2 = vshrl.u32 %v1668_v31, 16  ;;  %v1681_v55 = vshll.u32 %v1668_v31, 16  ;;  %4723 = vmatmul.mubr.bf16.gmra.mrb[24].mxu0 %v4443_v5  ;;  %3794 = vmatpush1.bf16.msra.mxu1 %v21904_v37  ;;  %v1748_v0 = vshrl.u32 %v18317_v22, 16 }
 0x15b   : > { %v23681_v50 = vsel %vm23422_vm14, %v1715_v48, %v1722_v4  ;;  %v1733_v58 = vsel %vm23434_vm15, %v1724_v27, %v1732_v6  ;;  %v1751_v41 = vshll.u32 %v18317_v22, 16  ;;  %5469 = vmatpush1.bf16.msra.mxu0 %v21885_v56  ;;  %3795 = vmatprep.subr.bf16.mxu1 %v23494_v39  ;;  %v1756_v48 = vshrl.u32 %v22702_v13, 16  ;;  %v1771_v22 = vld [vmem:[#allocation2 + $0xd0] sm:$0x11] }
 0x15c   : > { %1731 = vst [vmem:[#allocation2 + $0xb0] sm:$0xff] %v23681_v50  ;;  %1734 = vst [vmem:[#allocation2 + $0xb8] sm:$0x11] %v1733_v58  ;;  %v1675_v37 = vor.u32 %v1673_v49, %v1672_v3  ;;  %v1676_v40 = vrot.slane %v1672_v3, 4  ;;  %v1680_v43 = vrot.slane %v1678_v2, 7  ;;  %5470 = vmatprep.subr.bf16.mxu0 %v23494_v39  ;;  %v1750_v5 = vrot.slane %v1748_v0, 7 }
 0x15d   : > { %v1759_v6 = vshll.u32 %v22702_v13, 16  ;;  %v4449_v56 = vsel %vm4431_vm0, %v4444_v63, %v4448_v30  ;;  %2663 = vmatmul.mubr.bf16.gmra.mrb[32].mxu1 %v23645_v54  ;;  %v23699_v31 = vcombine.high %v23522_v20, %v23672_v32  ;;  %v1758_v27 = vrot.slane %v1756_v48, 7  ;;  %v2196_v0 = vld [vmem:[#allocation2 + $0x70] sm:$0xff]  ;;  %v2199_v48 = vld [vmem:[#allocation2 + $0x88] sm:$0xff] }
 0x15e   : > { %v1683_v46 = vor.u32 %v1681_v55, %v1680_v43  ;;  %v1685_v49 = vrot.slane %v1680_v43, 4  ;;  %v23704_v4 = vsel %vm23414_vm13, %v1675_v37, %v23494_v39  ;;  %4730 = vmatprep.mubr.bf16.mxu0 %v4449_v56  ;;  %3796 = vmatpush1.bf16.msra.mxu1 %v21905_v12  ;;  %v1753_v62 = vor.u32 %v1751_v41, %v1750_v5  ;;  %v21887_v41 = vld [vmem:[%s26752_s4 + $0x1b0] sm:$0xff]  }
 0x15f   : > { %1691 = vst [vmem:[#allocation2 + $0x90] sm:$0xff] %v23704_v4  ;;  %v1754_v63 = vrot.slane %v1750_v5, 4  ;;  %2670 = vmatprep.mubr.bf16.mxu1 %v23699_v31  ;;  %v4446_v3 = vrot.slane %v23645_v54, 1  ;;  %v4452_v2 = vrot.slane %v23699_v31, 1  ;;  %5471 = vmatpush1.bf16.msra.mxu0 %v21886_v60  ;;  %v1761_v12 = vor.u32 %v1759_v6, %v1758_v27  ;;  %v21908_v54 = vld [vmem:[%s26752_s4 + $0xb8] sm:$0xff]  }
 0x160   : > { %v23712_v55 = vsel %vm23422_vm14, %v1676_v40, %v1683_v46  ;;  %v1694_v13 = vsel %vm23434_vm15, %v1685_v49, %v1693_v52  ;;  %v1763_v58 = vrot.slane %v1758_v27, 4  ;;  %5472 = vmatprep.subr.bf16.mxu0 %v23494_v39  ;;  %3797 = vmatprep.subr.bf16.mxu1 %v23494_v39  ;;  %v23728_v60 = vsel %vm23414_vm13, %v1753_v62, %v23494_v39  ;;  %v21888_v31 = vld [vmem:[%s26752_s4 + $0x1b8] sm:$0xff]  }
 0x161   : > { %1692 = vst [vmem:[#allocation2 + $0x98] sm:$0xff] %v23712_v55  ;;  %1695 = vst [vmem:[#allocation2 + $0xa0] sm:$0x11] %v1694_v13  ;;  %v4447_v37 = vsel %vm4431_vm0, %v4442_v29, %v4446_v3  ;;  %v4453_v40 = vsel %vm4431_vm0, %v4448_v30, %v4452_v2  ;;  %v830_v43 = vcombine.low %v23426_v33, %v23438_v42  ;;  %v18318_v13 = vld [vmem:[%s23309_s20 + $0x40] sm:$0xf] }
 0x162   : > { %v23740_v52 = vsel %vm23422_vm14, %v1754_v63, %v1761_v12  ;;  %1769 = vst [vmem:[#allocation2 + $0xc0] sm:$0xff] %v23728_v60  ;;  %v1772_v5 = vsel %vm23434_vm15, %v1763_v58, %v1771_v22  ;;  %4731 = vmatmul.mubr.bf16.gmra.mrb[28].mxu0 %v4447_v37  ;;  %v831_v24 = vcombine.high %v23426_v33, %v23438_v42 }
 0x163   : > { %v18352_v35 = vcombine.low %v23522_v20, %v23672_v32  ;;  %1770 = vst [vmem:[#allocation2 + $0xc8] sm:$0xff] %v23740_v52  ;;  %1773 = vst [vmem:[#allocation2 + $0xd0] sm:$0x11] %v1772_v5  ;;  %4738 = vmatprep.mubr.bf16.mxu0 %v4453_v40  ;;  %v916_v29 = vrot.slane %v830_v43, %v23322_v57  ;;  %v18355_v30 = vcombine.high %v23548_v1, %v23558_v47  ;;  %v21889_v40 = vld [vmem:[%s26752_s4 + $0x1c0] sm:$0xff]  }
 0x164   : > { %v18354_v6 = vcombine.low %v23548_v1, %v23558_v47  ;;  %v23756_v56 = vcombine.high %v2196_v0, %v23601_v26  ;;  %v923_v33 = vrot.slane %v831_v24, %v23322_v57  ;;  %v23760_v20 = vcombine.low %v2196_v0, %v23601_v26  ;;  %5473 = vmatpush1.bf16.msra.mxu0 %v21887_v41  ;;  %v21909_v26 = vld [vmem:[%s26752_s4 + $0xc0] sm:$0xff]  }
 0x165   : > { %v4450_v42 = vrot.slane %v18352_v35, 1  ;;  %v23763_v32 = vcombine.high %v23618_v36, %v2199_v48  ;;  %3798 = vmatpush1.bf16.msra.mxu1 %v21908_v54  ;;  %v981_v1 = vadd.f32 %v23340_v10, %v916_v29  ;;  %v4456_v47 = vrot.slane %v18355_v30, 1  ;;  %5474 = vmatprep.subr.bf16.mxu0 %v23494_v39 }
 0x166   : > { %2671 = vmatmul.mubr.bf16.gmra.mrb[36].mxu1 %v18352_v35  ;;  %v4454_v46 = vrot.slane %v18354_v6, 1  ;;  %v4460_v49 = vrot.slane %v23756_v56, 1  ;;  %v982_v27 = vadd.f32 %v23340_v10, %v923_v33  ;;  %v4458_v63 = vrot.slane %v23760_v20, 1  ;;  %3799 = vmatprep.subr.bf16.mxu1 %v23494_v39  ;;  %v24761_v11 = vld [vmem:[#allocation2 + $0x90] sm:$0xff] }
 0x167   : > { %2678 = vmatprep.mubr.bf16.mxu1 %v18355_v30  ;;  %v4451_v62 = vsel %vm4431_vm0, %v4446_v3, %v4450_v42  ;;  %v4464_v22 = vrot.slane %v23763_v32, 1  ;;  %v4457_v12 = vsel %vm4431_vm0, %v4452_v2, %v4456_v47  ;;  %v23788_v41 = vcombine.low %v23618_v36, %v2199_v48  ;;  %26853 = vst [vmem:[#allocation37_spill] sm:$0xff] %v24761_v11 }
 0x168   : > { %v23782_v58 = vsel %vm4431_vm0, %v4450_v42, %v4454_v46  ;;  %v23785_v0 = vsel %vm4431_vm0, %v4456_v47, %v4460_v49  ;;  %v993_v54 = vpack.c.bf16 %v982_v27, %v981_v1  ;;  %v23793_v3 = vsel %vm4431_vm0, %v4454_v46, %v4458_v63  ;;  %5475 = vmatpush1.bf16.msra.mxu0 %v21888_v31  ;;  %v21912_v42 = vld [vmem:[%s26752_s4 + $0xc8] sm:$0xff]  }
 0x169   : > { %v23796_v37 = vsel %vm4431_vm0, %v4460_v49, %v4464_v22  ;;  %v23800_v2 = vcombine.high %v23704_v4, %v23712_v55  ;;  %v832_v36 = vcombine.low %v23445_v7, %v23455_v18  ;;  %v833_v43 = vcombine.high %v23445_v7, %v23455_v18  ;;  %5476 = vmatprep.subr.bf16.mxu0 %v23494_v39  ;;  %v21890_v47 = vld [vmem:[%s26752_s4 + $0x1c8] sm:$0xff]  }
 0x16a   : > { %v1287_v48 = vcombine.low %v23428_v34, %v23440_v45  ;;  %3800 = vmatpush1.bf16.msra.mxu1 %v21909_v26  ;;  %v1783_v5 = vunpack.c.h.b16 %v993_v54  ;;  %v18320_v24 = vcombine.low %v993_v54, %v18318_v13  ;;  %4739 = vmatmul.mubr.bf16.gmra.mrb[32].mxu0 %v4451_v62  ;;  %v4462_v35 = vrot.slane %v23788_v41, 1  ;;  %v18324_v26 = vld [vmem:[%s23309_s20 + $0x50] sm:$0xf] }
 0x16b   : > { %v1288_v29 = vcombine.high %v23428_v34, %v23440_v45  ;;  %3801 = vmatprep.subr.bf16.mxu1 %v23494_v39  ;;  %4746 = vmatprep.mubr.bf16.mxu0 %v4457_v12  ;;  %v930_v7 = vrot.slane %v832_v36, %v23322_v57  ;;  %v937_v18 = vrot.slane %v833_v43, %v23322_v57  ;;  %v4468_v33 = vrot.slane %v23800_v2, 1 }
 0x16c   : > { %v1373_v30 = vrot.slane %v1287_v48, %v23322_v57  ;;  %v1785_v31 = vpack.c.b16 %v1780_v14, %v1783_v5  ;;  %v1787_v34 = vshrl.u32 %v18320_v24, 16  ;;  %v1790_v45 = vshll.u32 %v18320_v24, 16  ;;  %5477 = vmatpush1.bf16.msra.mxu0 %v21889_v40 }
 0x16d   : > { %v1380_v1 = vrot.slane %v1288_v29, %v23322_v57  ;;  %v983_v46 = vadd.f32 %v23340_v10, %v930_v7  ;;  %v984_v49 = vadd.f32 %v23340_v10, %v937_v18  ;;  %v23836_v14 = vsel %vm4431_vm0, %v4464_v22, %v4468_v33  ;;  %5478 = vmatprep.subr.bf16.mxu0 %v23494_v39  ;;  %v18321_v29 = vld [vmem:[%s23309_s20 + $0x48] sm:$0xf]  ;;  %v21891_v7 = vld [vmem:[%s26752_s4 + $0x1d0] sm:$0xff]  }
 0x16e   : > { %2679 = vmatmul.mubr.bf16.gmra.mrb[40].mxu1 %v18354_v6  ;;  %v1431_v27 = vadd.f32 %v23340_v10, %v1373_v30  ;;  %v1789_v62 = vrot.slane %v1787_v34, 7  ;;  %v1795_v13 = vshrl.u32 %v1785_v31, 16  ;;  %v1798_v12 = vshll.u32 %v1785_v31, 16 }
 0x16f   : > { %2686 = vmatprep.mubr.bf16.mxu1 %v23756_v56  ;;  %v1432_v6 = vadd.f32 %v23340_v10, %v1380_v1  ;;  %v994_v54 = vpack.c.bf16 %v984_v49, %v983_v46  ;;  %v1289_v40 = vcombine.low %v23447_v8, %v23457_v19  ;;  %v1290_v36 = vcombine.high %v23447_v8, %v23457_v19  ;;  %v21914_v56 = vld [vmem:[%s26752_s4 + $0xd0] sm:$0xff]   ;;  %v1810_v8 = vld [vmem:[#allocation2 + $0xe8] sm:$0x11]  ;;  %v21917_v46 = vld [vmem:[%s26752_s4 + $0xd8] sm:$0xff]  }
 0x170   : > { %v23847_v22 = vcombine.low %v23704_v4, %v23712_v55  ;;  %3802 = vmatpush1.bf16.msra.mxu1 %v21912_v42  ;;  %v1792_v43 = vor.u32 %v1790_v45, %v1789_v62  ;;  %v1793_v48 = vrot.slane %v1789_v62, 4  ;;  %v1797_v5 = vrot.slane %v1795_v13, 7  ;;  %5479 = vmatpush1.bf16.msra.mxu0 %v21890_v47 }
 0x171   : > { %v1443_v24 = vpack.c.bf16 %v1432_v6, %v1431_v27  ;;  %3803 = vmatprep.subr.bf16.mxu1 %v23494_v39  ;;  %v18326_v19 = vcombine.low %v994_v54, %v18324_v26  ;;  %v1387_v4 = vrot.slane %v1289_v40, %v23322_v57  ;;  %v1394_v55 = vrot.slane %v1290_v36, %v23322_v57  ;;  %v21892_v26 = vld [vmem:[%s26752_s4 + $0x1d8] sm:$0xff]   ;;  %v2202_v6 = vld [vmem:[#allocation2 + $0xa0] sm:$0xff] }
 0x172   : > { %5480 = vmatprep.subr.bf16.mxu0 %v23494_v39  ;;  %v1800_v18 = vor.u32 %v1798_v12, %v1797_v5  ;;  %v1802_v30 = vrot.slane %v1797_v5, 4  ;;  %v23863_v42 = vsel %vm23414_vm13, %v1792_v43, %v23494_v39  ;;  %4747 = vmatmul.mubr.bf16.gmra.mrb[36].mxu0 %v23782_v58  ;;  %v22703_v34 = vcombine.high %v994_v54, %v23330_v61  ;;  %v23891_v40 = vld [vmem:[%s26751_s3] ss:$0 sm:$0xff]  ;;  %v1888_v5 = vld [vmem:[#allocation2 + $0x118] sm:$0x11] }
 0x173   : > { %v1822_v31 = vunpack.c.h.b16 %v1443_v24  ;;  %1808 = vst [vmem:[#allocation2 + $0xd8] sm:$0xff] %v23863_v42  ;;  %4754 = vmatprep.mubr.bf16.mxu0 %v23785_v0  ;;  %v1865_v45 = vshrl.u32 %v18326_v19, 16  ;;  %v1868_v1 = vshll.u32 %v18326_v19, 16  ;;  %v18323_v47 = vcombine.low %v1443_v24, %v18321_v29 }
 0x174   : > { %3804 = vmatpush1.bf16.msra.mxu1 %v21914_v56  ;;  %v23874_v49 = vsel %vm23422_vm14, %v1793_v48, %v1800_v18  ;;  %v1811_v58 = vsel %vm23434_vm15, %v1802_v30, %v1810_v8  ;;  %v1433_v61 = vadd.f32 %v23340_v10, %v1387_v4  ;;  %5481 = vmatpush1.bf16.msra.mxu0 %v21891_v7  ;;  %v1873_v62 = vshrl.u32 %v22703_v34, 16  ;;  %v18327_v7 = vld [vmem:[%s23309_s20 + $0x58] sm:$0xf]  ;;  %v21893_v4 = vld [vmem:[%s26752_s4 + $0x1e0] sm:$0xff]  }
 0x175   : > { %v1824_v0 = vpack.c.b16 %v1819_v38, %v1822_v31  ;;  %1809 = vst [vmem:[#allocation2 + $0xe0] sm:$0xff] %v23874_v49  ;;  %1812 = vst [vmem:[#allocation2 + $0xe8] sm:$0x11] %v1811_v58  ;;  %v1867_v27 = vrot.slane %v1865_v45, 7  ;;  %v1876_v13 = vshll.u32 %v22703_v34, 16  ;;  %v1826_v12 = vshrl.u32 %v18323_v47, 16  ;;  %5482 = vmatprep.subr.bf16.mxu0 %v23494_v39  ;;  %3805 = vmatprep.subr.bf16.mxu1 %v23494_v39 }
 0x176   : > { %2687 = vmatmul.mubr.bf16.gmra.mrb[44].mxu1 %v23760_v20  ;;  %v1829_v10 = vshll.u32 %v18323_v47, 16  ;;  %v1434_v36 = vadd.f32 %v23891_v40, %v1394_v55  ;;  %v1875_v48 = vrot.slane %v1873_v62, 7  ;;  %v23897_v8 = vcombine.high %v2202_v6, %v23670_v15  ;;  %v1849_v34 = vld [vmem:[#allocation2 + $0x100] sm:$0x11] }
 0x177   : > { %2694 = vmatprep.mubr.bf16.mxu1 %v23763_v32  ;;  %v1834_v38 = vshrl.u32 %v1824_v0, 16  ;;  %v1837_v54 = vshll.u32 %v1824_v0, 16  ;;  %v1870_v56 = vor.u32 %v1868_v1, %v1867_v27  ;;  %v1871_v43 = vrot.slane %v1867_v27, 4 }
 0x178   : > { %v1828_v24 = vrot.slane %v1826_v12, 7  ;;  %3806 = vmatpush1.bf16.msra.mxu1 %v21917_v46  ;;  %v1444_v32 = vpack.c.bf16 %v1434_v36, %v1433_v61  ;;  %v4466_v19 = vrot.slane %v23847_v22, 1  ;;  %5483 = vmatpush1.bf16.msra.mxu0 %v21892_v26  ;;  %v1878_v55 = vor.u32 %v1876_v13, %v1875_v48  ;;  %v21918_v46 = vld [vmem:[%s26752_s4 + $0xe0] sm:$0xff]   ;;  %v2205_v13 = vld [vmem:[#allocation2 + $0xb8] sm:$0xff]  ;;  %v21894_v12 = vld [vmem:[%s26752_s4 + $0x1e8] sm:$0xff]  }
 0x179   : > { %v1836_v29 = vrot.slane %v1834_v38, 7  ;;  %3807 = vmatprep.subr.bf16.mxu1 %v23494_v39  ;;  %v1880_v18 = vrot.slane %v1875_v48, 4  ;;  %v23907_v30 = vsel %vm23414_vm13, %v1870_v56, %v23494_v39  ;;  %5484 = vmatprep.subr.bf16.mxu0 %v23494_v39  ;;  %v23951_v36 = vcombine.low %v2202_v6, %v23670_v15 }
 0x17a   : > { %v1831_v31 = vor.u32 %v1829_v10, %v1828_v24  ;;  %4755 = vmatmul.mubr.bf16.gmra.mrb[40].mxu0 %v23793_v3  ;;  %1886 = vst [vmem:[#allocation2 + $0x108] sm:$0xff] %v23907_v30  ;;  %v1832_v45 = vrot.slane %v1828_v24, 4  ;;  %v23918_v58 = vsel %vm23422_vm14, %v1871_v43, %v1878_v55  ;;  %v18329_v61 = vcombine.low %v1444_v32, %v18327_v7  ;;  %v21922_v10 = vld [vmem:[%s26752_s4 + $0xe8] sm:$0xff]  }
 0x17b   : > { %v1839_v1 = vor.u32 %v1837_v54, %v1836_v29  ;;  %v1841_v47 = vrot.slane %v1836_v29, 4  ;;  %4762 = vmatprep.mubr.bf16.mxu0 %v23796_v37  ;;  %v1889_v0 = vsel %vm23434_vm15, %v1880_v18, %v1888_v5  ;;  %1887 = vst [vmem:[#allocation2 + $0x110] sm:$0xff] %v23918_v58  ;;  %v22704_v27 = vcombine.high %v1444_v32, %v23349_v23 }
 0x17c   : > { %v23925_v3 = vsel %vm23414_vm13, %v1831_v31, %v23494_v39  ;;  %1890 = vst [vmem:[#allocation2 + $0x118] sm:$0x11] %v1889_v0  ;;  %v23939_v62 = vsel %vm4431_vm0, %v4462_v35, %v4466_v19  ;;  %5485 = vmatpush1.bf16.msra.mxu0 %v21893_v4  ;;  %v1904_v23 = vshrl.u32 %v18329_v61, 16  ;;  %v1907_v38 = vshll.u32 %v18329_v61, 16  ;;  %3808 = vmatpush1.bf16.msra.mxu1 %v21918_v46  ;;  %v1927_v4 = vld [vmem:[#allocation2 + $0x130] sm:$0x11] }
 0x17d   : > { %v23930_v26 = vsel %vm23422_vm14, %v1832_v45, %v1839_v1  ;;  %1847 = vst [vmem:[#allocation2 + $0xf0] sm:$0xff] %v23925_v3  ;;  %v1850_v37 = vsel %vm23434_vm15, %v1841_v47, %v1849_v34  ;;  %v4472_v54 = vrot.slane %v23897_v8, 1  ;;  %5486 = vmatprep.subr.bf16.mxu0 %v23494_v39  ;;  %v1912_v56 = vshrl.u32 %v22704_v27, 16  ;;  %3809 = vmatprep.subr.bf16.mxu1 %v23494_v39  ;;  %v18330_v34 = vld [vmem:[%s23309_s20 + $0x60] sm:$0xf]  ;;  %v21901_v1 = vld [vmem:[%s26752_s4 + $0x1f8] sm:$0xff]  }
 0x17e   : > { %2695 = vmatmul.mubr.bf16.gmra.mrb[48].mxu1 %v23788_v41  ;;  %1848 = vst [vmem:[#allocation2 + $0xf8] sm:$0xff] %v23930_v26  ;;  %1851 = vst [vmem:[#allocation2 + $0x100] sm:$0x11] %v1850_v37  ;;  %v1915_v43 = vshll.u32 %v22704_v27, 16  ;;  %v834_v48 = vcombine.low %v23508_v51, %v23513_v9  ;;  %v1906_v5 = vrot.slane %v1904_v23, 7  ;;  %v4470_v15 = vrot.slane %v23951_v36, 1 }
 0x17f   : > { %2702 = vmatprep.mubr.bf16.mxu1 %v23800_v2  ;;  %v23962_v24 = vsel %vm4431_vm0, %v4468_v33, %v4472_v54  ;;  %v835_v6 = vcombine.high %v23508_v51, %v23513_v9  ;;  %v4463_v29 = vsel %vm4431_vm0, %v4458_v63, %v4462_v35  ;;  %v1914_v32 = vrot.slane %v1912_v56, 7  ;;  %v23978_v33 = vld [vmem:[%s23309_s20 + $0x64] ss:$8 sps:$4 sm:$0xff]   ;;  %v21898_v51 = vld [vmem:[%s26752_s4 + $0x1f0] sm:$0xff]  }
 0x180   : > { %v23974_v7 = vcombine.high %v23681_v50, %v2205_v13  ;;  %v944_v2 = vrot.slane %v834_v48, %v23322_v57  ;;  %5487 = vmatpush1.bf16.msra.mxu0 %v21894_v12  ;;  %v1909_v9 = vor.u32 %v1907_v38, %v1906_v5  ;;  %v1910_v41 = vrot.slane %v1906_v5, 4  ;;  %v2208_v35 = vld [vmem:[#allocation2 + $0xd0] sm:$0xff]  ;;  %3810 = vmatpush1.bf16.msra.mxu1 %v21922_v10  ;;  %v2211_v61 = vld [vmem:[#allocation2 + $0xe8] sm:$0xff] }
 0x181   : > { %v23986_v20 = vsel %vm4431_vm0, %v4466_v19, %v4470_v15  ;;  %v951_v63 = vrot.slane %v835_v6, %v23322_v57  ;;  %5488 = vmatprep.subr.bf16.mxu0 %v23494_v39  ;;  %v1917_v55 = vor.u32 %v1915_v43, %v1914_v32  ;;  %v1919_v18 = vrot.slane %v1914_v32, 4  ;;  %v21923_v19 = vld [vmem:[%s26752_s4 + $0xf0] sm:$0xff]   ;;  %3811 = vmatprep.subr.bf16.mxu1 %v23494_v39  ;;  %v24794_v28 = vld [vmem:[#allocation2 + $0x108] sm:$0xff] }
 0x182   : > { %4763 = vmatmul.mubr.bf16.gmra.mrb[44].mxu0 %v4463_v29  ;;  %v985_v31 = vadd.f32 %v23891_v40, %v944_v2  ;;  %v23993_v45 = vcombine.low %v23681_v50, %v2205_v13  ;;  %v24005_v47 = vsel %vm23414_vm13, %v1909_v9, %v23494_v39  ;;  %v1936_v50 = vunpack.c.l.b16 %v23978_v33  ;;  %v21926_v39 = vld [vmem:[%s26752_s4 + $0xf8] sm:$0xff]  }
 0x183   : > { %4770 = vmatprep.mubr.bf16.mxu0 %v23836_v14  ;;  %v986_v46 = vadd.f32 %v23891_v40, %v951_v63  ;;  %v24011_v0 = vcombine.high %v23728_v60, %v23740_v52  ;;  %v24016_v37 = vsel %vm23422_vm14, %v1910_v41, %v1917_v55  ;;  %1925 = vst [vmem:[#allocation2 + $0x120] sm:$0xff] %v24005_v47  ;;  %v4476_v12 = vrot.slane %v23974_v7, 1 }
 0x184   : > { %v1928_v14 = vsel %vm23434_vm15, %v1919_v18, %v1927_v4  ;;  %v24023_v27 = vcombine.low %v23728_v60, %v23740_v52  ;;  %v24026_v13 = vcombine.high %v2208_v35, %v23863_v42  ;;  %5489 = vmatpush1.bf16.msra.mxu0 %v21898_v51  ;;  %1926 = vst [vmem:[#allocation2 + $0x128] sm:$0xff] %v24016_v37  ;;  %v24038_v52 = vld [vmem:[#allocation2] sm:$0xff]  ;;  %v4474_v38 = vrot.slane %v23993_v45, 1 }
 0x185   : > { %1929 = vst [vmem:[#allocation2 + $0x130] sm:$0x11] %v1928_v14  ;;  %v995_v10 = vpack.c.bf16 %v986_v46, %v985_v31  ;;  %v4480_v23 = vrot.slane %v24011_v0, 1  ;;  %v24036_v60 = vcombine.low %v2208_v35, %v23863_v42  ;;  %5490 = vmatprep.subr.bf16.mxu0 %v24038_v52  ;;  %v24046_v43 = vcombine.high %v23874_v49, %v2211_v61  ;;  %v2214_v9 = vld [vmem:[#allocation2 + $0x100] sm:$0xff]  ;;  %v2217_v31 = vld [vmem:[#allocation2 + $0x118] sm:$0xff] }
 0x186   : > { %2703 = vmatmul.mubr.bf16.gmra.mrb[52].mxu1 %v23847_v22  ;;  %v4478_v56 = vrot.slane %v24023_v27, 1  ;;  %v4484_v22 = vrot.slane %v24026_v13, 1  ;;  %v24066_v2 = vcombine.low %v23874_v49, %v2211_v61  ;;  %v24070_v51 = vcombine.high %v23925_v3, %v23930_v26 }
 0x187   : > { %2710 = vmatprep.mubr.bf16.mxu1 %v23897_v8  ;;  %3812 = vmatpush1.bf16.msra.mxu1 %v21923_v19  ;;  %v1939_v48 = vunpack.c.h.b16 %v995_v10  ;;  %v18332_v5 = vcombine.low %v995_v10, %v18330_v34  ;;  %v24051_v42 = vsel %vm4431_vm0, %v4476_v12, %v4480_v23  ;;  %v4482_v6 = vrot.slane %v24036_v60, 1  ;;  %v1966_v10 = vld [vmem:[#allocation2 + $0x148] sm:$0x11] }
 0x188   : > { %3813 = vmatprep.subr.bf16.mxu1 %v24038_v52  ;;  %v24058_v29 = vsel %vm4431_vm0, %v4474_v38, %v4478_v56  ;;  %v24063_v32 = vsel %vm4431_vm0, %v4480_v23, %v4484_v22  ;;  %5491 = vmatpush1.bf16.msra.mxu0 %v21901_v1  ;;  %v4488_v49 = vrot.slane %v24046_v43, 1  ;;  %v4492_v55 = vrot.slane %v24070_v51, 1 }
 0x189   : > { %v1941_v41 = vpack.c.b16 %v1936_v50, %v1939_v48  ;;  %v1943_v4 = vshrl.u32 %v18332_v5, 16  ;;  %v1946_v63 = vshll.u32 %v18332_v5, 16  ;;  %v24075_v35 = vsel %vm4431_vm0, %v4478_v56, %v4482_v6  ;;  %6644 = vmatprep.subr.bf16.mxu0 %v24038_v52  ;;  %v24115_v5 = vpop.f32.mrb[14].mxu1 }
 0x18a   : > { %4771 = vmatmul.mubr.bf16.gmra.mrb[48].mxu0 %v23939_v62  ;;  %v24083_v18 = vcombine.low %v23925_v3, %v23930_v26  ;;  %v24087_v46 = vcombine.high %v2214_v9, %v23907_v30  ;;  %v4486_v62 = vrot.slane %v24066_v2, 1  ;;  %v24094_v50 = vsel %vm4431_vm0, %v4488_v49, %v4492_v55 }
 0x18b   : > { %3814 = vmatpush1.bf16.msra.mxu1 %v21926_v39  ;;  %4778 = vmatprep.mubr.bf16.mxu0 %v23962_v24  ;;  %v1945_v34 = vrot.slane %v1943_v4, 7  ;;  %v1951_v1 = vshrl.u32 %v1941_v41, 16  ;;  %v1954_v19 = vshll.u32 %v1941_v41, 16  ;;  %v24098_v26 = vcombine.low %v2214_v9, %v23907_v30 }
 0x18c   : > { %20578 = vmatprep.subr.bf16.mxu1 %v24038_v52  ;;  %v4490_v3 = vrot.slane %v24083_v18, 1  ;;  %v4496_v39 = vrot.slane %v24087_v46, 1  ;;  %v24109_v56 = vcombine.high %v23918_v58, %v2217_v31  ;;  %v24113_v48 = vcombine.low %v23918_v58, %v2217_v31 }
 0x18d   : > { %v1948_v24 = vor.u32 %v1946_v63, %v1945_v34  ;;  %v1949_v61 = vrot.slane %v1945_v34, 4  ;;  %v1953_v14 = vrot.slane %v1951_v1, 7  ;;  %v4494_v30 = vrot.slane %v24098_v26, 1 }
 0x18e   : > { %2711 = vmatmul.mubr.bf16.gmra.mrb[56].mxu1 %v23951_v36  ;;  %v24106_v23 = vsel %vm4431_vm0, %v4486_v62, %v4490_v3  ;;  %v24123_v63 = vsel %vm4431_vm0, %v4492_v55, %v4496_v39  ;;  %v4500_v58 = vrot.slane %v24109_v56, 1  ;;  %v1291_v31 = vcombine.low %v23518_v17, %v23532_v16 }
 0x18f   : > { %2718 = vmatprep.mubr.bf16.mxu1 %v23974_v7  ;;  %v1956_v9 = vor.u32 %v1954_v19, %v1953_v14  ;;  %v1958_v41 = vrot.slane %v1953_v14, 4  ;;  %v24120_v4 = vsel %vm23414_vm13, %v1948_v24, %v24038_v52  ;;  %v24127_v34 = vsel %vm4431_vm0, %v4490_v3, %v4494_v30  ;;  %v24159_v7 = vpop.f32.mrb[15].mxu1 }
 0x190   : > { %1964 = vst [vmem:[#allocation2 + $0x138] sm:$0xff] %v24120_v4  ;;  %v1292_v1 = vcombine.high %v23518_v17, %v23532_v16  ;;  %v4477_v55 = vsel %vm4431_vm0, %v4472_v54, %v4476_v12  ;;  %v24147_v24 = vcombine.high %v24005_v47, %v24016_v37  ;;  %v24154_v17 = vsel %vm4431_vm0, %v4496_v39, %v4500_v58 }
 0x191   : > { %v24141_v19 = vsel %vm23422_vm14, %v1949_v61, %v1956_v9  ;;  %v1967_v3 = vsel %vm23434_vm15, %v1958_v41, %v1966_v10  ;;  %v1401_v16 = vrot.slane %v1291_v31, %v23322_v57  ;;  %v4498_v54 = vrot.slane %v24113_v48, 1  ;;  %v24182_v31 = vld [vmem:[%s23309_s20 + $0x74] ss:$8 sps:$4 sm:$0xff]  }
 0x192   : > { %4779 = vmatmul.mubr.bf16.gmra.mrb[52].mxu0 %v23986_v20  ;;  %1965 = vst [vmem:[#allocation2 + $0x140] sm:$0xff] %v24141_v19  ;;  %1968 = vst [vmem:[#allocation2 + $0x148] sm:$0x11] %v1967_v3  ;;  %v1408_v8 = vrot.slane %v1292_v1, %v23322_v57  ;;  %v24163_v20 = vcombine.low %v24005_v47, %v24016_v37  ;;  %v836_v12 = vcombine.low %v23596_v25, %v23607_v44  ;;  %v18333_v47 = vld [vmem:[%s23309_s20 + $0x68] sm:$0xf] }
 0x193   : > { %4786 = vmatprep.mubr.bf16.mxu0 %v4477_v55  ;;  %v1435_v61 = vadd.f32 %v23891_v40, %v1401_v16  ;;  %v24172_v39 = vsel %vm4431_vm0, %v4494_v30, %v4498_v54  ;;  %v837_v10 = vcombine.high %v23596_v25, %v23607_v44  ;;  %v4475_v25 = vsel %vm4431_vm0, %v4470_v15, %v4474_v38  ;;  %v18336_v44 = vld [vmem:[%s23309_s20 + $0x70] sm:$0xf] }
 0x194   : > { %v1436_v14 = vadd.f32 %v23891_v40, %v1408_v8  ;;  %v958_v37 = vrot.slane %v836_v12, %v23322_v57  ;;  %v2014_v3 = vunpack.c.l.b16 %v24182_v31  ;;  %v26763_v21 = vrot.slane %v24147_v24, 1 }
 0x195   : > { %v965_v41 = vrot.slane %v837_v10, %v23322_v57 }
 0x196   : > { %2719 = vmatmul.mubr.bf16.gmra.mrb[60].mxu1 %v23993_v45  ;;  %v1445_v9 = vpack.c.bf16 %v1436_v14, %v1435_v61  ;;  %v987_v1 = vadd.f32 %v23891_v40, %v958_v37  ;;  %v4505_v59 = vsel %vm4431_vm0, %v4500_v58, %v26763_v21  ;;  %v24717_v21 = vld [vmem:[#allocation2 + $0x68] sm:$0xff] }
 0x197   : > { %2726 = vmatprep.mubr.bf16.mxu1 %v24011_v0  ;;  %v988_v30 = vadd.f32 %v23891_v40, %v965_v41  ;;  %v2005_v41 = vld [vmem:[#allocation2 + $0x160] sm:$0x11]  ;;  %26842 = vst [vmem:[#allocation26_spill] sm:$0xff] %v24717_v21 }
 0x198   : > { %v18335_v55 = vcombine.low %v1445_v9, %v18333_v47  ;;  %v22705_v0 = vcombine.high %v1445_v9, %v23978_v33 }
 0x199   : > { %v996_v12 = vpack.c.bf16 %v988_v30, %v987_v1 }
 0x19a   : > { %4787 = vmatmul.mubr.bf16.gmra.mrb[56].mxu0 %v4475_v25  ;;  %v1982_v16 = vshrl.u32 %v18335_v55, 16  ;;  %v1985_v8 = vshll.u32 %v18335_v55, 16  ;;  %v1990_v14 = vshrl.u32 %v22705_v0, 16  ;;  %v1993_v10 = vshll.u32 %v22705_v0, 16 }
 0x19b   : > { %4794 = vmatprep.mubr.bf16.mxu0 %v24051_v42  ;;  %v2017_v47 = vunpack.c.h.b16 %v996_v12  ;;  %v18338_v36 = vcombine.low %v996_v12, %v18336_v44  ;;  %v2044_v12 = vld [vmem:[#allocation2 + $0x178] sm:$0x11] }
 0x19c   : > { %v1984_v61 = vrot.slane %v1982_v16, 7  ;;  %v1992_v38 = vrot.slane %v1990_v14, 7 }
 0x19d   : > { %v2019_v37 = vpack.c.b16 %v2014_v3, %v2017_v47  ;;  %v2021_v33 = vshrl.u32 %v18338_v36, 16  ;;  %v2024_v9 = vshll.u32 %v18338_v36, 16  ;;  %v4489_v36 = vsel %vm4431_vm0, %v4484_v22, %v4488_v49 }
 0x19e   : > { %2727 = vmatmul.mubr.bf16.gmra.mrb[64].mxu1 %v24023_v27  ;;  %v1987_v15 = vor.u32 %v1985_v8, %v1984_v61  ;;  %v1988_v45 = vrot.slane %v1984_v61, 4  ;;  %v1995_v55 = vor.u32 %v1993_v10, %v1992_v38  ;;  %v1997_v1 = vrot.slane %v1992_v38, 4 }
 0x19f   : > { %2734 = vmatprep.mubr.bf16.mxu1 %v24026_v13  ;;  %v2029_v30 = vshrl.u32 %v2019_v37, 16  ;;  %v2023_v27 = vrot.slane %v2021_v33, 7  ;;  %v2032_v25 = vshll.u32 %v2019_v37, 16  ;;  %v4487_v13 = vsel %vm4431_vm0, %v4482_v6, %v4486_v62  ;;  %v24280_v33 = vld [vmem:[#allocation2 + $0x20] sm:$0xff] }
 0x1a0   : > { %v24200_v42 = vsel %vm23414_vm13, %v1987_v15, %v24038_v52  ;;  %v24206_v44 = vsel %vm23422_vm14, %v1988_v45, %v1995_v55  ;;  %v2006_v3 = vsel %vm23434_vm15, %v1997_v1, %v2005_v41  ;;  %v1293_v15 = vcombine.low %v24115_v5, %v24159_v7  ;;  %v24282_v55 = vld [vmem:[#allocation2 + $0x18] sm:$0xff] }
 0x1a1   : > { %2003 = vst [vmem:[#allocation2 + $0x150] sm:$0xff] %v24200_v42  ;;  %v2031_v0 = vrot.slane %v2029_v30, 7  ;;  %2004 = vst [vmem:[#allocation2 + $0x158] sm:$0xff] %v24206_v44  ;;  %v2026_v16 = vor.u32 %v2024_v9, %v2023_v27  ;;  %v2027_v8 = vrot.slane %v2023_v27, 4  ;;  %v18384_v61 = vcombine.low %v24200_v42, %v24206_v44  ;;  %v2223_v9 = vld [vmem:[#allocation2 + $0x148] sm:$0xff]  ;;  %v24295_v27 = vld [vmem:[#allocation2 + $0x30] sm:$0xff] }
 0x1a2   : > { %4795 = vmatmul.mubr.bf16.gmra.mrb[60].mxu0 %v24058_v29  ;;  %2007 = vst [vmem:[#allocation2 + $0x160] sm:$0x11] %v2006_v3  ;;  %v1294_v45 = vcombine.high %v24115_v5, %v24159_v7  ;;  %v1415_v38 = vrot.slane %v1293_v15, %v23322_v57  ;;  %v18635_v58 = vcombine.high %v24282_v55, %v24280_v33  ;;  %v24293_v30 = vld [vmem:[#allocation2 + $0x28] sm:$0xff] }
 0x1a3   : > { %4802 = vmatprep.mubr.bf16.mxu0 %v24063_v32  ;;  %v2034_v29 = vor.u32 %v2032_v25, %v2031_v0  ;;  %v2036_v14 = vrot.slane %v2031_v0, 4  ;;  %v24218_v10 = vsel %vm23414_vm13, %v2026_v16, %v24038_v52  ;;  %v18637_v25 = vcombine.high %v24293_v30, %v24295_v27  ;;  %v21913_v0 = vld [vmem:[%s26752_s4 + $0x208] sm:$0xff]  }
 0x1a4   : > { %2042 = vst [vmem:[#allocation2 + $0x168] sm:$0xff] %v24218_v10  ;;  %v1437_v22 = vadd.f32 %v23891_v40, %v1415_v38  ;;  %v18382_v3 = vcombine.low %v24141_v19, %v2223_v9  ;;  %v18439_v15 = vcombine.high %v24038_v52, %v24038_v52 }
 0x1a5   : > { %v24223_v32 = vsel %vm23422_vm14, %v2027_v8, %v2034_v29  ;;  %v2045_v47 = vsel %vm23434_vm15, %v2036_v14, %v2044_v12  ;;  %v18636_v8 = vcombine.low %v24293_v30, %v24295_v27  ;;  %v24316_v12 = vld [vmem:[#allocation2 + $0x38] sm:$0xff]  ;;  %v24318_v29 = vld [vmem:[#allocation2 + $0x40] sm:$0xff] }
 0x1a6   : > { %2735 = vmatmul.mubr.bf16.gmra.mrb[68].mxu1 %v24036_v60  ;;  %2043 = vst [vmem:[#allocation2 + $0x170] sm:$0xff] %v24223_v32  ;;  %2046 = vst [vmem:[#allocation2 + $0x178] sm:$0x11] %v2045_v47  ;;  %v18639_v14 = vcombine.high %v24316_v12, %v24318_v29 }
 0x1a7   : > { %2742 = vmatprep.mubr.bf16.mxu1 %v24046_v43 }
 0x1a9   : > { %v2226_v16 = vld [vmem:[#allocation2 + $0x160] sm:$0xff] }
 0x1aa   : > { %4803 = vmatmul.mubr.bf16.gmra.mrb[64].mxu0 %v24075_v35  ;;  %v1422_v35 = vrot.slane %v1294_v45, %v23322_v57  ;;  %v18387_v47 = vcombine.high %v2226_v16, %v24218_v10  ;;  %v24333_v45 = vld [vmem:[#allocation2 + $0x50] sm:$0xff] }
 0x1ab   : > { %4810 = vmatprep.mubr.bf16.mxu0 %v4489_v36  ;;  %v21927_v36 = vld [vmem:[%s26752_s4 + $0x218] sm:$0xff]  }
 0x1ac   : > { %v1438_v43 = vadd.f32 %v23891_v40, %v1422_v35  ;;  %v21934_v35 = vld [vmem:[%s26752_s4 + $0x220] sm:$0xff]  }
 0x1ad   : > { %v2229_v38 = vld [vmem:[#allocation2 + $0x178] sm:$0xff] }
 0x1ae   : > { %2743 = vmatmul.mubr.bf16.gmra.mrb[72].mxu1 %v24066_v2  ;;  %v1446_v49 = vpack.c.bf16 %v1438_v43, %v1437_v22  ;;  %v24340_v22 = vld [vmem:[#allocation2 + $0x48] sm:$0xff]  ;;  %v3262_v43 = vshll.u32 %v18439_v15, 16 }
 0x1af   : > { %2750 = vmatprep.mubr.bf16.mxu1 %v24070_v51  ;;  %v18339_v51 = vld [vmem:[%s23309_s20 + $0x78] sm:$0xf]  ;;  %s18186_s20 = sshll.u32 %s365_s26, 8 }
 0x1b0   : > { %v18341_v57 = vcombine.low %v1446_v49, %v18339_v51  ;;  %v22706_v2 = vcombine.high %v1446_v49, %v24182_v31  ;;  %v18389_v51 = vcombine.high %v24223_v32, %v2229_v38  ;;  %v21940_v49 = vld [vmem:[%s26752_s4 + $0x228] sm:$0xff]   ;;  %s26604_s30 = scalar_lea.vmem [#allocation5], %s18186_s20 }
 0x1b1   : > { %s18108_s12 = sshll.u32 %s26604_s30, 4  ;;  %s26702_s12 = int_to_ptr.vmem [resolvable:$true] %s18108_s12 }
 0x1b2   : > { %4811 = vmatmul.mubr.bf16.gmra.mrb[68].mxu0 %v4487_v13  ;;  %v2060_v5 = vshrl.u32 %v18341_v57, 16  ;;  %v2063_v60 = vshll.u32 %v18341_v57, 16  ;;  %v2068_v62 = vshrl.u32 %v22706_v2, 16  ;;  %v2071_v7 = vshll.u32 %v22706_v2, 16  ;;  %s22707_s17 = scalar_lea.vmem %s26702_s12, 4096  ;;  %p22714_p0 = scmp.lt.s32.totalorder %s26702_s12, %s22712_s27 }
 0x1b3   : > { %4818 = vmatprep.mubr.bf16.mxu0 %v24094_v50  ;;  %v18638_v13 = vcombine.low %v24316_v12, %v24318_v29  ;;  %v18438_v57 = vcombine.low %v24038_v52, %v24038_v52  ;;  %v3260_v2 = vshrl.u32 %v18439_v15, 16  ;;  %v21976_v15 = vld [vmem:[%s26752_s4 + $0x250] sm:$0xff]   ;;  %p22708_p11 = scmp.ne.s32.totalorder %s26702_s12, %s22707_s17  ;;  %p22715_p1 = scmp.lt.s32.totalorder %s22713_s28, %s22707_s17 }
 0x1b4   : > { %v2062_v6 = vrot.slane %v2060_v5, 7  ;;  %v2070_v37 = vrot.slane %v2068_v62, 7  ;;  %v3264_v5 = vrot.slane %v3262_v43, 1  ;;  %v21948_v62 = vld [vmem:[%s26752_s4 + $0x230] sm:$0xff]  }
 0x1b5   : > { %p22709_p12 = pnand %p22708_p11, %p22869_p5  ;;  %p22716_p2 = por %p22715_p1, %p22714_p0 }
 0x1b6   : > { %2751 = vmatmul.mubr.bf16.gmra.mrb[76].mxu1 %v24083_v18  ;;  %v2065_v40 = vor.u32 %v2063_v60, %v2062_v6  ;;  %v2066_v50 = vrot.slane %v2062_v6, 4  ;;  %v2083_v18 = vld [vmem:[#allocation2 + $0x190] sm:$0x11]  ;;  %v2075_v41 = vrot.slane %v2070_v37, 4  ;;  %v24355_v60 = vld [vmem:[#allocation2 + $0x58] sm:$0xff]  ;;  %v24357_v6 = vld [vmem:[#allocation2 + $0x60] sm:$0xff] }
 0x1b7   : > { %2758 = vmatprep.mubr.bf16.mxu1 %v24087_v46  ;;  %v2073_v46 = vor.u32 %v2071_v7, %v2070_v37  ;;  %v18640_v7 = vcombine.low %v24340_v22, %v24333_v45  ;;  %v3250_v37 = vshll.u32 %v18438_v57, 16  ;;  %p22710_p13 = pneg %p22709_p12 }
 0x1b8   : > { %v2080_v31 = vsel %vm23414_vm13, %v2065_v40, %v24038_v52  ;;  %v18440_v40 = vcombine.low %v24038_v52, %v24282_v55 }
 0x1b9   : > { %2081 = vst [vmem:[#allocation2 + $0x180] sm:$0xff] %v2080_v31  ;;  %v18443_v31 = vcombine.high %v24280_v33, %v24293_v30  ;;  %p22717_p3 = pnand %p22716_p2, %p22710_p13 }
 0x1ba   : > { %4819 = vmatmul.mubr.bf16.gmra.mrb[72].mxu0 %v24106_v23  ;;  %v2074_v23 = vsel %vm23422_vm14, %v2066_v50, %v2073_v46  ;;  %v3265_v50 = vor.u32 %v3264_v5, %v3260_v2  ;;  %v18388_v46 = vcombine.low %v24223_v32, %v2229_v38  ;;  %v18447_v2 = vcombine.high %v24318_v29, %v24340_v22  ;;  %v21982_v5 = vld [vmem:[%s26752_s4 + $0x258] sm:$0xff]  }
 0x1bb   : > { %4826 = vmatprep.mubr.bf16.mxu0 %v24123_v63  ;;  %v2084_v63 = vsel %vm23434_vm15, %v2075_v41, %v2083_v18  ;;  %2082 = vst [vmem:[#allocation2 + $0x188] sm:$0xff] %v2074_v23  ;;  %v18643_v18 = vcombine.high %v24355_v60, %v24357_v6  ;;  %v21954_v23 = vld [vmem:[%s26752_s4 + $0x238] sm:$0xff]  }
 0x1bc   : > { %2085 = vst [vmem:[#allocation2 + $0x190] sm:$0x11] %v2084_v63  ;;  %v3248_v63 = vshrl.u32 %v18438_v57, 16 }
 0x1be   : > { %2759 = vmatmul.mubr.bf16.gmra.mrb[80].mxu1 %v24098_v26  ;;  %v2220_v26 = vld [vmem:[#allocation2 + $0x130] sm:$0xff] }
 0x1bf   : > { %2766 = vmatprep.mubr.bf16.mxu1 %v24109_v56  ;;  %v18380_v1 = vcombine.low %v2220_v26, %v24120_v4 }
 0x1c2   : > { %4827 = vmatmul.mubr.bf16.gmra.mrb[76].mxu0 %v24127_v34  ;;  %v18381_v34 = vcombine.high %v2220_v26, %v24120_v4  ;;  %v18385_v4 = vcombine.high %v24200_v42, %v24206_v44  ;;  %v18641_v42 = vcombine.high %v24340_v22, %v24333_v45  ;;  %v18386_v44 = vcombine.low %v2226_v16, %v24218_v10  ;;  %v21968_v16 = vld [vmem:[%s26752_s4 + $0x248] sm:$0xff]  }
 0x1c3   : > { %4834 = vmatprep.mubr.bf16.mxu0 %v24154_v17  ;;  %v26762_v17 = vrot.slane %v24163_v20, 1  ;;  %v3252_v26 = vrot.slane %v3250_v37, 1  ;;  %v21990_v37 = vld [vmem:[%s26752_s4 + $0x260] sm:$0xff]  }
 0x1c5   : > { %v4503_v56 = vsel %vm4431_vm0, %v4498_v54, %v26762_v17  ;;  %v18634_v54 = vcombine.low %v24282_v55, %v24280_v33  ;;  %v24736_v17 = vld [vmem:[#allocation2 + $0x80] sm:$0xff] }
 0x1c6   : > { %2767 = vmatmul.mubr.bf16.gmra.mrb[84].mxu1 %v24113_v48  ;;  %v21906_v48 = vld [vmem:[%s26752_s4 + $0x200] sm:$0xff]   ;;  %26847 = vst [vmem:[#allocation31_spill] sm:$0xff] %v24736_v17  ;;  %v24894_v17 = vld [vmem:[#allocation2 + $0x168] sm:$0xff] }
 0x1c7   : > { %2774 = vmatprep.mubr.bf16.mxu1 %v24147_v24 }
 0x1ca   : > { %4835 = vmatmul.mubr.bf16.gmra.mrb[80].mxu0 %v24172_v39  ;;  %v18383_v39 = vcombine.high %v24141_v19, %v2223_v9  ;;  %v21920_v19 = vld [vmem:[%s26752_s4 + $0x210] sm:$0xff]  }
 0x1cb   : > { %4842 = vmatprep.mubr.bf16.mxu0 %v4505_v59  ;;  %v3255_v59 = vshll.u32 %v18440_v40, 16 }
 0x1ce   : > { %2775 = vmatmul.mubr.bf16.gmra.mrb[88].mxu1 %v24163_v20 }
 0x1cf   : > { %2782 = vmatprep.mubr.bf16.mxu1 %v18381_v34  ;;  %v3283_v34 = vshll.u32 %v18443_v31, 16 }
 0x1d2   : > { %4843 = vmatmul.mubr.bf16.gmra.mrb[84].mxu0 %v4503_v56  ;;  %v18642_v56 = vcombine.low %v24355_v60, %v24357_v6 }
 0x1d3   : > { %5492 = vmatprep.mubr.bf16.mxu0 %v18635_v58  ;;  %v24382_v58 = vld [vmem:[#allocation2 + $0x68] sm:$0xff] }
 0x1d6   : > { %2783 = vmatmul.mubr.bf16.gmra.mrb[92].mxu1 %v18380_v1  ;;  %v3253_v1 = vor.u32 %v3252_v26, %v3248_v63  ;;  %v24447_v26 = vcombine.high %v24333_v45, %v24355_v60 }
 0x1d7   : > { %2790 = vmatprep.mubr.bf16.mxu1 %v18383_v39  ;;  %v24384_v39 = vld [vmem:[#allocation2 + $0x70] sm:$0xff] }
 0x1d8   : > { %v18644_v38 = vcombine.low %v24382_v58, %v24384_v39 }
 0x1da   : > { %5493 = vmatmul.mubr.bf16.vlgmr.msra.gmra.mrb[16].mxu0 %v18634_v54  ;;  %v18442_v54 = vcombine.low %v24280_v33, %v24293_v30 }
 0x1db   : > { %6645 = vmatpush1.bf16.msra.mxu0 %v21906_v48  ;;  %5500 = vmatprep.mubr.bf16.mxu0 %v18637_v25  ;;  %v3257_v48 = vrot.slane %v3255_v59, 1  ;;  %v18645_v25 = vcombine.high %v24382_v58, %v24384_v39 }
 0x1dc   : > { %6646 = vmatprep.subr.bf16.mxu0 %v24038_v52  ;;  %v3275_v33 = vshll.u32 %v18442_v54, 16 }
 0x1de   : > { %2791 = vmatmul.mubr.bf16.gmra.mrb[96].mxu1 %v18382_v3 }
 0x1df   : > { %2798 = vmatprep.mubr.bf16.mxu1 %v18385_v4  ;;  %6647 = vmatpush1.bf16.msra.mxu0 %v21913_v0  ;;  %v3285_v4 = vrot.slane %v3283_v34, 1  ;;  %v18445_v0 = vcombine.high %v24295_v27, %v24316_v12  ;;  %v22614_v34 = vld [vmem:[%s26752_s4 + $0x118] sm:$0xff]  }
 0x1e0   : > { %6648 = vmatprep.subr.bf16.mxu0 %v24038_v52 }
 0x1e2   : > { %5501 = vmatmul.mubr.bf16.gmra.mrb[20].mxu0 %v18636_v8  ;;  %v3271_v8 = vshrl.u32 %v18440_v40, 16  ;;  %v22613_v40 = vld [vmem:[%s26752_s4 + $0x110] sm:$0xff]  }
 0x1e3   : > { %5508 = vmatprep.mubr.bf16.mxu0 %v18639_v14  ;;  %6649 = vmatpush1.bf16.msra.mxu0 %v21920_v19  ;;  %v3258_v19 = vsel %vm3246_vm1, %v3253_v1, %v3257_v48  ;;  %v22611_v14 = vld [vmem:[%s26752_s4 + $0x100] sm:$0xff]  }
 0x1e4   : > { %6650 = vmatprep.subr.bf16.mxu0 %v24038_v52  ;;  %v3273_v43 = vor.u32 %v3271_v8, %v3257_v48 }
 0x1e6   : > { %2799 = vmatmul.mubr.bf16.gmra.mrb[100].mxu1 %v18384_v61  ;;  %v18441_v61 = vcombine.high %v24038_v52, %v24282_v55  ;;  %v21962_v55 = vld [vmem:[%s26752_s4 + $0x240] sm:$0xff]  }
 0x1e7   : > { %2806 = vmatprep.mubr.bf16.mxu1 %v18387_v47  ;;  %6651 = vmatpush1.bf16.msra.mxu0 %v21927_v36  ;;  %v3295_v47 = vshrl.u32 %v18443_v31, 16  ;;  %v3299_v36 = vshll.u32 %v18445_v0, 16 }
 0x1e8   : > { %6652 = vmatprep.subr.bf16.mxu0 %v24038_v52  ;;  %v3267_v10 = vshll.u32 %v18441_v61, 16  ;;  %v3279_v9 = vshrl.u32 %v18441_v61, 16 }
 0x1e9   : > { %v3297_v61 = vor.u32 %v3295_v47, %v3285_v4  ;;  %v3301_v57 = vrot.slane %v3299_v36, 1  ;;  %v18451_v47 = vcombine.high %v24357_v6, %v24382_v58 }
 0x1ea   : > { %5509 = vmatmul.mubr.bf16.gmra.mrb[24].mxu0 %v18638_v13  ;;  %v3269_v41 = vrot.slane %v3267_v10, 1  ;;  %v24410_v13 = vld [vmem:[#allocation2 + $0x80] sm:$0xff] }
 0x1eb   : > { %5516 = vmatprep.mubr.bf16.mxu0 %v18641_v42  ;;  %6653 = vmatpush1.bf16.msra.mxu0 %v21934_v35  ;;  %v24408_v35 = vld [vmem:[#allocation2 + $0x78] sm:$0xff]  ;;  %v3277_v42 = vrot.slane %v3275_v33, 1  ;;  %v18448_v33 = vcombine.low %v24333_v45, %v24355_v60 }
 0x1ec   : > { %6654 = vmatprep.subr.bf16.mxu0 %v24038_v52  ;;  %v3270_v32 = vsel %vm3246_vm1, %v3265_v50, %v3269_v41  ;;  %v3281_v3 = vor.u32 %v3279_v9, %v3269_v41  ;;  %v3315_v50 = vshll.u32 %v18447_v2, 16  ;;  %v24440_v41 = vld [vmem:[#allocation2 + $0x90] sm:$0xff]  ;;  %v22007_v45 = vld [vmem:[%s26752_s4 + $0x278] sm:$0xff]  }
 0x1ed   : > { %v3278_v10 = vsel %vm3246_vm1, %v3273_v43, %v3277_v42 }
 0x1ee   : > { %2807 = vmatmul.mubr.bf16.gmra.mrb[104].mxu1 %v18386_v44  ;;  %v3286_v30 = vsel %vm3246_vm1, %v3281_v3, %v3285_v4  ;;  %v18647_v44 = vcombine.high %v24408_v35, %v24410_v13  ;;  %v3317_v9 = vrot.slane %v3315_v50, 1  ;;  %v22004_v3 = vld [vmem:[%s26752_s4 + $0x270] sm:$0xff]   ;;  %v22618_v50 = vld [vmem:[%s26752_s4 + $0x138] sm:$0xff]  }
 0x1ef   : > { %2814 = vmatprep.mubr.bf16.mxu1 %v18389_v51  ;;  %6655 = vmatpush1.bf16.msra.mxu0 %v21940_v49  ;;  %v18444_v51 = vcombine.low %v24295_v27, %v24316_v12  ;;  %v22612_v49 = vld [vmem:[%s26752_s4 + $0x108] sm:$0xff]   ;;  %v3302_v27 = vsel %vm3246_vm1, %v3297_v61, %v3301_v57  ;;  %v3311_v12 = vshrl.u32 %v18445_v0, 16  ;;  %v24471_v0 = vld [vmem:[#allocation2 + $0x98] sm:$0xff] }
 0x1f0   : > { %6656 = vmatprep.subr.bf16.mxu0 %v24038_v52 }
 0x1f1   : > { %v3313_v63 = vor.u32 %v3311_v12, %v3301_v57  ;;  %v3303_v1 = vshrl.u32 %v18444_v51, 16 }
 0x1f2   : > { %5517 = vmatmul.mubr.bf16.gmra.mrb[28].mxu0 %v18640_v7  ;;  %v3291_v7 = vshll.u32 %v18444_v51, 16  ;;  %v22617_v51 = vld [vmem:[%s26752_s4 + $0x130] sm:$0xff]  }
 0x1f3   : > { %5524 = vmatprep.mubr.bf16.mxu0 %v18643_v18  ;;  %6657 = vmatpush1.bf16.msra.mxu0 %v21948_v62  ;;  %v3287_v62 = vshrl.u32 %v18442_v54, 16  ;;  %v18646_v18 = vcombine.low %v24408_v35, %v24410_v13  ;;  %v22615_v54 = vld [vmem:[%s26752_s4 + $0x120] sm:$0xff]  }
 0x1f4   : > { %6658 = vmatprep.subr.bf16.mxu0 %v24038_v52  ;;  %v3293_v59 = vrot.slane %v3291_v7, 1 }
 0x1f5   : > { %v3289_v31 = vor.u32 %v3287_v62, %v3277_v42  ;;  %v3347_v42 = vshll.u32 %v18451_v47, 16 }
 0x1f6   : > { %2815 = vmatmul.mubr.bf16.gmra.mrb[108].mxu1 %v18388_v46  ;;  %v24438_v46 = vld [vmem:[#allocation2 + $0x88] sm:$0xff] }
 0x1f7   : > { %3815 = vmatprep.mubr.bf16.mxu1 %v3270_v32  ;;  %6659 = vmatpush1.bf16.msra.mxu0 %v21954_v23  ;;  %v18649_v23 = vcombine.high %v24438_v46, %v24440_v41  ;;  %v18446_v32 = vcombine.low %v24318_v29, %v24340_v22  ;;  %v3318_v29 = vsel %vm3246_vm1, %v3313_v63, %v3317_v9  ;;  %v3331_v22 = vshll.u32 %v24447_v26, 16  ;;  %v22619_v63 = vld [vmem:[%s26752_s4 + $0x140] sm:$0xff]  }
 0x1f8   : > { %6660 = vmatprep.subr.bf16.mxu0 %v24038_v52  ;;  %v18648_v4 = vcombine.low %v24438_v46, %v24440_v41  ;;  %v3349_v7 = vrot.slane %v3347_v42, 1 }
 0x1f9   : > { %v3307_v48 = vshll.u32 %v18446_v32, 16  ;;  %v3319_v61 = vshrl.u32 %v18446_v32, 16  ;;  %v24524_v32 = vld [vmem:[#allocation2 + $0xc0] sm:$0xff] }
 0x1fa   : > { %5525 = vmatmul.mubr.bf16.gmra.mrb[32].mxu0 %v18642_v56  ;;  %v3294_v56 = vsel %vm3246_vm1, %v3289_v31, %v3293_v59 }
 0x1fb   : > { %5532 = vmatprep.mubr.bf16.mxu0 %v18645_v25  ;;  %6661 = vmatpush1.bf16.msra.mxu0 %v21962_v55  ;;  %v21996_v55 = vld [vmem:[%s26752_s4 + $0x268] sm:$0xff]   ;;  %v3327_v25 = vshrl.u32 %v18447_v2, 16  ;;  %v3309_v36 = vrot.slane %v3307_v48, 1 }
 0x1fc   : > { %6662 = vmatprep.subr.bf16.mxu0 %v24038_v52  ;;  %v24501_v2 = vld [vmem:[#allocation2 + $0xa8] sm:$0xff] }
 0x1fd   : > { %v3329_v8 = vor.u32 %v3327_v25, %v3317_v9  ;;  %v22620_v48 = vld [vmem:[%s26752_s4 + $0x148] sm:$0xff]  }
 0x1fe   : > { %3816 = vmatmul.mubr.bf16.vlgmr.msra.gmra.mrb[16].mxu1 %v3258_v19  ;;  %v3305_v19 = vor.u32 %v3303_v1, %v3293_v59  ;;  %v24522_v59 = vld [vmem:[#allocation2 + $0xb8] sm:$0xff] }
 0x1ff   : > { %3823 = vmatprep.mubr.bf16.mxu1 %v3286_v30  ;;  %20594 = vmatpush1.bf16.msra.mxu1 %v22611_v14  ;;  %v3333_v14 = vrot.slane %v3331_v22, 1  ;;  %v18455_v22 = vcombine.high %v24410_v13, %v24438_v46 }
 0x200   : > { %6663 = vmatpush1.bf16.msra.mxu0 %v21968_v16  ;;  %20579 = vmatprep.subr.bf16.mxu1 %v24038_v52  ;;  %v24473_v16 = vld [vmem:[#allocation2 + $0xa0] sm:$0xff]  ;;  %v3310_v60 = vsel %vm3246_vm1, %v3305_v19, %v3309_v36  ;;  %v22621_v19 = vld [vmem:[%s26752_s4 + $0x150] sm:$0xff]  }
 0x201   : > { %6664 = vmatprep.subr.bf16.mxu0 %v24038_v52  ;;  %v18651_v30 = vcombine.high %v24471_v0, %v24473_v16  ;;  %v3334_v43 = vsel %vm3246_vm1, %v3329_v8, %v3333_v14  ;;  %v18650_v57 = vcombine.low %v24471_v0, %v24473_v16  ;;  %v24545_v8 = vld [vmem:[#allocation2 + $0xd0] sm:$0xff]  ;;  %v24561_v42 = vcombine.high %v24473_v16, %v24501_v2 }
 0x202   : > { %5533 = vmatmul.mubr.bf16.gmra.mrb[36].mxu0 %v18644_v38  ;;  %v3323_v38 = vshll.u32 %v18448_v33, 16 }
 0x203   : > { %20595 = vmatpush1.bf16.msra.mxu1 %v22612_v49  ;;  %5540 = vmatprep.mubr.bf16.mxu0 %v18647_v44  ;;  %v24492_v44 = vld [vmem:[#allocation2 + $0xb0] sm:$0xff]  ;;  %v3343_v49 = vshrl.u32 %v24447_v26, 16 }
 0x204   : > { %6665 = vmatpush1.bf16.msra.mxu0 %v21976_v15  ;;  %20580 = vmatprep.subr.bf16.mxu1 %v24038_v52  ;;  %v22616_v15 = vld [vmem:[%s26752_s4 + $0x128] sm:$0xff]   ;;  %v18653_v12 = vcombine.high %v24501_v2, %v24492_v44  ;;  %v18652_v26 = vcombine.low %v24501_v2, %v24492_v44 }
 0x205   : > { %6666 = vmatprep.subr.bf16.mxu0 %v24038_v52  ;;  %v3345_v62 = vor.u32 %v3343_v49, %v3333_v14 }
 0x206   : > { %3824 = vmatmul.mubr.bf16.gmra.mrb[20].mxu1 %v3278_v10  ;;  %v3325_v10 = vrot.slane %v3323_v38, 1  ;;  %v18457_v38 = vcombine.high %v24440_v41, %v24471_v0 }
 0x207   : > { %3831 = vmatprep.mubr.bf16.mxu1 %v3302_v27  ;;  %20596 = vmatpush1.bf16.msra.mxu1 %v22613_v40  ;;  %v18450_v27 = vcombine.low %v24357_v6, %v24382_v58  ;;  %v18453_v40 = vcombine.high %v24384_v39, %v24408_v35 }
 0x208   : > { %6667 = vmatpush1.bf16.msra.mxu0 %v21982_v5  ;;  %20581 = vmatprep.subr.bf16.mxu1 %v24038_v52  ;;  %v3321_v5 = vor.u32 %v3319_v61, %v3309_v36  ;;  %v3395_v49 = vshll.u32 %v18457_v38, 16 }
 0x209   : > { %6668 = vmatprep.subr.bf16.mxu0 %v24038_v52  ;;  %v3339_v58 = vshll.u32 %v18450_v27, 16  ;;  %v3363_v31 = vshll.u32 %v18453_v40, 16 }
 0x20a   : > { %5541 = vmatmul.mubr.bf16.gmra.mrb[40].mxu0 %v18646_v18  ;;  %v3326_v6 = vsel %vm3246_vm1, %v3321_v5, %v3325_v10  ;;  %v3359_v18 = vshrl.u32 %v18451_v47, 16  ;;  %v24568_v5 = vld [vmem:[#allocation2 + $0xd8] sm:$0xff] }
 0x20b   : > { %20597 = vmatpush1.bf16.msra.mxu1 %v22614_v34  ;;  %5548 = vmatprep.mubr.bf16.mxu0 %v18649_v23  ;;  %v3335_v23 = vshrl.u32 %v18448_v33, 16  ;;  %v3341_v9 = vrot.slane %v3339_v58, 1  ;;  %v18654_v33 = vcombine.low %v24522_v59, %v24524_v32  ;;  %v18465_v11 = vcombine.high %v24545_v8, %v24568_v5 }
 0x20c   : > { %6669 = vmatpush1.bf16.msra.mxu0 %v21990_v37  ;;  %20582 = vmatprep.subr.bf16.mxu1 %v24038_v52  ;;  %v3350_v37 = vsel %vm3246_vm1, %v3345_v62, %v3349_v7  ;;  %v3361_v1 = vor.u32 %v3359_v18, %v3349_v7  ;;  %v22624_v62 = vld [vmem:[%s26752_s4 + $0x160] sm:$0xff]  }
 0x20d   : > { %6670 = vmatprep.subr.bf16.mxu0 %v24038_v52  ;;  %v3337_v34 = vor.u32 %v3335_v23, %v3325_v10  ;;  %v24570_v10 = vld [vmem:[#allocation2 + $0xe0] sm:$0xff] }
 0x20e   : > { %3832 = vmatmul.mubr.bf16.gmra.mrb[24].mxu1 %v3294_v56  ;;  %v18655_v56 = vcombine.high %v24522_v59, %v24524_v32 }
 0x20f   : > { %3839 = vmatprep.mubr.bf16.mxu1 %v3318_v29  ;;  %20598 = vmatpush1.bf16.msra.mxu1 %v22615_v54  ;;  %v3365_v29 = vrot.slane %v3363_v31, 1  ;;  %v3342_v54 = vsel %vm3246_vm1, %v3337_v34, %v3341_v9  ;;  %v3407_v31 = vshrl.u32 %v18457_v38, 16  ;;  %v22625_v34 = vld [vmem:[%s26752_s4 + $0x168] sm:$0xff]  }
 0x210   : > { %6671 = vmatpush1.bf16.msra.mxu0 %v21996_v55  ;;  %20583 = vmatprep.subr.bf16.mxu1 %v24038_v52  ;;  %v18452_v55 = vcombine.low %v24384_v39, %v24408_v35  ;;  %v3351_v39 = vshrl.u32 %v18450_v27, 16  ;;  %v24574_v27 = vcombine.low %v24473_v16, %v24501_v2 }
 0x211   : > { %6672 = vmatprep.subr.bf16.mxu0 %v24038_v52  ;;  %v3366_v25 = vsel %vm3246_vm1, %v3361_v1, %v3365_v29  ;;  %v3423_v1 = vshrl.u32 %v24561_v42, 16 }
 0x212   : > { %5549 = vmatmul.mubr.bf16.gmra.mrb[44].mxu0 %v18648_v4  ;;  %v3355_v35 = vshll.u32 %v18452_v55, 16  ;;  %v3379_v4 = vshll.u32 %v18455_v22, 16  ;;  %v3353_v47 = vor.u32 %v3351_v39, %v3341_v9  ;;  %v3367_v61 = vshrl.u32 %v18452_v55, 16  ;;  %v24594_v9 = vld [vmem:[#allocation2 + $0xbc] ss:$8 sps:$4 sm:$0xff]  }
 0x213   : > { %20599 = vmatpush1.bf16.msra.mxu1 %v22616_v15  ;;  %5556 = vmatprep.mubr.bf16.mxu0 %v18651_v30  ;;  %v24543_v30 = vld [vmem:[#allocation2 + $0xc8] sm:$0xff]  ;;  %v18454_v15 = vcombine.low %v24410_v13, %v24438_v46  ;;  %v24563_v13 = vld [vmem:[#allocation2] sm:$0xff]  ;;  %v26761_v38 = vrot.slane %v24594_v9, 1 }
 0x214   : > { %6673 = vmatpush1.bf16.msra.mxu0 %v22004_v3  ;;  %20584 = vmatprep.subr.bf16.mxu1 %v24038_v52  ;;  %v3375_v3 = vshrl.u32 %v18453_v40, 16  ;;  %v18657_v14 = vcombine.high %v24543_v30, %v24545_v8  ;;  %v3357_v36 = vrot.slane %v3355_v35, 1  ;;  %v18656_v7 = vcombine.low %v24543_v30, %v24545_v8  ;;  %v24596_v55 = vld [vmem:[#allocation2 + $0xcc] ss:$8 sps:$4 sm:$0xff]  }
 0x215   : > { %6674 = vmatprep.subr.bf16.mxu0 %v24038_v52  ;;  %v18659_v40 = vcombine.high %v24568_v5, %v24570_v10  ;;  %v3383_v58 = vshrl.u32 %v18454_v15, 16  ;;  %v24607_v35 = vcombine.low %v24492_v44, %v24522_v59 }
 0x216   : > { %3840 = vmatmul.mubr.bf16.gmra.mrb[28].mxu1 %v3310_v60  ;;  %v3381_v60 = vrot.slane %v3379_v4, 1  ;;  %v3358_v46 = vsel %vm3246_vm1, %v3353_v47, %v3357_v36  ;;  %v3369_v16 = vor.u32 %v3367_v61, %v3357_v36  ;;  %v24610_v4 = vld [vmem:[#allocation2 + $0xe8] sm:$0xff]  ;;  %v24615_v36 = vld [vmem:[#allocation2 + $0xf8] sm:$0xff] }
 0x217   : > { %3847 = vmatprep.mubr.bf16.mxu1 %v3334_v43  ;;  %20600 = vmatpush1.bf16.msra.mxu1 %v22617_v51  ;;  %v18456_v43 = vcombine.low %v24440_v41, %v24471_v0  ;;  %v3371_v51 = vshll.u32 %v18454_v15, 16  ;;  %v3391_v41 = vshrl.u32 %v18455_v22, 16  ;;  %v22063_v22 = vld [vmem:[#allocation2 + $0xc8] ss:$8 sps:$4 sm:$0xff]   ;;  %v24617_v15 = vld [vmem:[#allocation2 + $0x100] sm:$0xff] }
 0x218   : > { %6675 = vmatpush1.bf16.msra.mxu0 %v22007_v45  ;;  %20585 = vmatprep.subr.bf16.mxu1 %v24038_v52  ;;  %v3377_v45 = vor.u32 %v3375_v3, %v3365_v29  ;;  %v24600_v29 = vld [vmem:[#allocation2 + $0xb8] ss:$8 sps:$4 sm:$0xff]   ;;  %v22070_v61 = vld [vmem:[#allocation2 + $0xe8] ss:$8 sps:$4 sm:$0xff]  }
 0x219   : > { %7534 = vmatprep.subr.bf16.mxu0 %v24038_v52  ;;  %v3373_v2 = vrot.slane %v3371_v51, 1  ;;  %v3399_v23 = vshrl.u32 %v18456_v43, 16  ;;  %v26760_v51 = vrot.slane %v24600_v29, 1  ;;  %v24740_v47 = vld [vmem:[#allocation2 + $0xa8] sm:$0xff] }
 0x21a   : > { %5557 = vmatmul.mubr.bf16.gmra.mrb[48].mxu0 %v18650_v57  ;;  %v3382_v0 = vsel %vm3246_vm1, %v3377_v45, %v3381_v60  ;;  %v3387_v57 = vshll.u32 %v18456_v43, 16  ;;  %v7336_v43 = vrot.slane %v24596_v55, 1  ;;  %v22083_v55 = vld [vmem:[#allocation2 + $0x12c] ss:$8 sps:$4 sm:$0xff]   ;;  %26849 = vst [vmem:[#allocation33_spill] sm:$0xff] %v24740_v47 }
 0x21b   : > { %20601 = vmatpush1.bf16.msra.mxu1 %v22618_v50  ;;  %5564 = vmatprep.mubr.bf16.mxu0 %v18653_v12  ;;  %v24578_v12 = vcombine.high %v24492_v44, %v24522_v59  ;;  %v3411_v50 = vshll.u32 %v24561_v42, 16  ;;  %v3385_v39 = vor.u32 %v3383_v58, %v3373_v2  ;;  %v22626_v59 = vld [vmem:[%s26752_s4 + $0x170] sm:$0xff]  }
 0x21c   : > { %20586 = vmatprep.subr.bf16.mxu1 %v24038_v52  ;;  %v3389_v18 = vrot.slane %v3387_v57, 1  ;;  %v22072_v57 = vld [vmem:[#allocation2 + $0xfc] ss:$8 sps:$4 sm:$0xff]   ;;  %v22078_v58 = vld [vmem:[#allocation2 + $0x108] ss:$8 sps:$4 sm:$0xff]  }
 0x21e   : > { %3848 = vmatmul.mubr.bf16.gmra.mrb[32].mxu1 %v3326_v6  ;;  %v3393_v6 = vor.u32 %v3391_v41, %v3381_v60  ;;  %v22067_v60 = vld [vmem:[#allocation2 + $0xd8] ss:$8 sps:$4 sm:$0xff]   ;;  %v7334_v41 = vrot.slane %v22063_v22, 1  ;;  %v22085_v22 = vld [vmem:[#allocation2 + $0x128] ss:$8 sps:$4 sm:$0xff]  }
 0x21f   : > { %3855 = vmatprep.mubr.bf16.mxu1 %v3350_v37  ;;  %20602 = vmatpush1.bf16.msra.mxu1 %v22619_v63  ;;  %v3397_v37 = vrot.slane %v3395_v49, 1  ;;  %v3403_v63 = vshll.u32 %v24574_v27, 16  ;;  %v24738_v49 = vld [vmem:[#allocation2 + $0xa0] sm:$0xff] }
 0x220   : > { %20587 = vmatprep.subr.bf16.mxu1 %v24038_v52  ;;  %26848 = vst [vmem:[#allocation32_spill] sm:$0xff] %v24738_v49 }
 0x221   : > { %v3398_v3 = vsel %vm3246_vm1, %v3393_v6, %v3397_v37  ;;  %v24619_v45 = vrot.slane %v3403_v63, 1  ;;  %v22075_v6 = vld [vmem:[#allocation2 + $0x10c] ss:$8 sps:$4 sm:$0xff]   ;;  %v26856_v63 = vshll.u32 %v24607_v35, 16 }
 0x222   : > { %5565 = vmatmul.mubr.bf16.gmra.mrb[52].mxu0 %v18652_v26  ;;  %v3427_v26 = vshll.u32 %v24578_v12, 16 }
 0x223   : > { %20603 = vmatpush1.bf16.msra.mxu1 %v22620_v48  ;;  %5572 = vmatprep.mubr.bf16.mxu0 %v18655_v56  ;;  %v3413_v56 = vrot.slane %v3411_v50, 1  ;;  %v3374_v48 = vsel %vm3246_vm1, %v3369_v16, %v3373_v2  ;;  %v3390_v50 = vsel %vm3246_vm1, %v3385_v39, %v3389_v18  ;;  %v18663_v2 = vcombine.high %v24615_v36, %v24617_v15 }
 0x224   : > { %20588 = vmatprep.subr.bf16.mxu1 %v24038_v52  ;;  %v24621_v44 = vrot.slane %v3427_v26, 1  ;;  %v22627_v26 = vld [vmem:[%s26752_s4 + $0x178] sm:$0xff]  }
 0x225   : > { %v3425_v42 = vor.u32 %v3423_v1, %v3413_v56 }
 0x226   : > { %3856 = vmatmul.mubr.bf16.gmra.mrb[36].mxu1 %v3342_v54  ;;  %v18658_v54 = vcombine.low %v24568_v5, %v24570_v10 }
 0x227   : > { %3863 = vmatprep.mubr.bf16.mxu1 %v3366_v25  ;;  %20604 = vmatpush1.bf16.msra.mxu1 %v22621_v19  ;;  %v22064_v25 = vld [vmem:[#allocation2 + $0xdc] ss:$8 sps:$4 sm:$0xff]   ;;  %v24612_v19 = vld [vmem:[#allocation2 + $0xf0] sm:$0xff]  ;;  %v24663_v1 = vsel %vm3246_vm1, %v3425_v42, %v24621_v44 }
 0x228   : > { %20589 = vmatprep.subr.bf16.mxu1 %v24038_v52  ;;  %v22622_v52 = vld [vmem:[%s26752_s4 + $0x158] sm:$0xff]  }
 0x22a   : > { %5573 = vmatmul.mubr.bf16.gmra.mrb[56].mxu0 %v18654_v33  ;;  %v3409_v33 = vor.u32 %v3407_v31, %v3397_v37  ;;  %v22079_v37 = vld [vmem:[#allocation2 + $0x11c] ss:$8 sps:$4 sm:$0xff]   ;;  %v24647_v31 = vsel %vm4431_vm0, %v26760_v51, %v7334_v41  ;;  %v24685_v51 = vld [vmem:[#allocation2 + $0x48] sm:$0xff] }
 0x22b   : > { %20605 = vmatpush1.bf16.msra.mxu1 %v22622_v52  ;;  %5580 = vmatprep.mubr.bf16.mxu0 %v18657_v14  ;;  %v3401_v14 = vor.u32 %v3399_v23, %v3389_v18  ;;  %v18661_v52 = vcombine.high %v24610_v4, %v24612_v19  ;;  %v24655_v18 = vcombine.high %v24524_v32, %v24543_v30 }
 0x22c   : > { %20590 = vmatprep.subr.bf16.mxu1 %v24563_v13  ;;  %v3414_v16 = vsel %vm3246_vm1, %v3409_v33, %v3413_v56  ;;  %v7338_v56 = vrot.slane %v22067_v60, 1  ;;  %v7352_v60 = vrot.slane %v22075_v6, 1  ;;  %26831 = vst [vmem:[#allocation15_spill] sm:$0xff] %v24685_v51  ;;  %v24698_v6 = vld [vmem:[#allocation2 + $0x50] sm:$0xff] }
 0x22d   : > { %v24651_v23 = vsel %vm3246_vm1, %v3401_v14, %v24619_v45  ;;  %v7348_v14 = vrot.slane %v22072_v57, 1  ;;  %26836 = vst [vmem:[#allocation20_spill] sm:$0xff] %v24698_v6  ;;  %v24904_v6 = vld [vmem:[#allocation2 + $0x18] ss:$8 sps:$4 sm:$0xff]  }
 0x22e   : > { %3864 = vmatmul.mubr.bf16.gmra.mrb[40].mxu1 %v3358_v46  ;;  %v22068_v46 = vld [vmem:[#allocation2 + $0xec] ss:$8 sps:$4 sm:$0xff]   ;;  %v24673_v33 = vsel %vm4431_vm0, %v7334_v41, %v7338_v56 }
 0x22f   : > { %3871 = vmatprep.mubr.bf16.mxu1 %v3382_v0  ;;  %20606 = vmatpush1.bf16.msra.mxu1 %v22624_v62  ;;  %v18660_v0 = vcombine.low %v24610_v4, %v24612_v19  ;;  %v22074_v62 = vld [vmem:[#allocation2 + $0xf8] ss:$8 sps:$4 sm:$0xff]   ;;  %v7344_v39 = vrot.slane %v22068_v46, 1  ;;  %v24681_v46 = vld [vmem:[#allocation2 + $0x30] sm:$0xff] }
 0x230   : > { %20591 = vmatprep.subr.bf16.mxu1 %v24563_v13  ;;  %26829 = vst [vmem:[#allocation13_spill] sm:$0xff] %v24681_v46 }
 0x231   : > { %v24688_v41 = vsel %vm4431_vm0, %v7344_v39, %v7348_v14 }
 0x232   : > { %5581 = vmatmul.mubr.bf16.gmra.mrb[60].mxu0 %v18656_v7  ;;  %v24638_v7 = vsel %vm4431_vm0, %v26761_v38, %v7336_v43  ;;  %26832 = vst [vmem:[#allocation16_spill] sm:$0xff] %v24688_v41  ;;  %v22246_v41 = vld [vmem:[#allocation2 + $0x90] ss:$8 sps:$4 sm:$0xff]  }
 0x233   : > { %20607 = vmatpush1.bf16.msra.mxu1 %v22625_v34  ;;  %5588 = vmatprep.mubr.bf16.mxu0 %v18659_v40  ;;  %v7340_v40 = vrot.slane %v22064_v25, 1  ;;  %v22081_v34 = vld [vmem:[#allocation2 + $0x118] ss:$8 sps:$4 sm:$0xff]   ;;  %v7342_v25 = vrot.slane %v22070_v61, 1 }
 0x234   : > { %20592 = vmatprep.subr.bf16.mxu1 %v24563_v13  ;;  %v24683_v61 = vld [vmem:[#allocation2 + $0x40] sm:$0xff] }
 0x235   : > { %v24679_v42 = vsel %vm4431_vm0, %v7338_v56, %v7342_v25  ;;  %26830 = vst [vmem:[#allocation14_spill] sm:$0xff] %v24683_v61  ;;  %v7360_v56 = vrot.slane %v22083_v55, 1 }
 0x236   : > { %3872 = vmatmul.mubr.bf16.gmra.mrb[44].mxu1 %v3374_v48  ;;  %v24665_v48 = vld [vmem:[#allocation2 + $0x13c] ss:$8 sps:$4 sm:$0xff]  }
 0x237   : > { %3879 = vmatprep.mubr.bf16.mxu1 %v3398_v3  ;;  %20608 = vmatpush1.bf16.msra.mxu1 %v22626_v59  ;;  %v24670_v3 = vld [vmem:[#allocation2 + $0x138] ss:$8 sps:$4 sm:$0xff]   ;;  %v7346_v59 = vrot.slane %v22074_v62, 1  ;;  %v24694_v62 = vsel %vm4431_vm0, %v7348_v14, %v7352_v60 }
 0x238   : > { %20593 = vmatprep.subr.bf16.mxu1 %v24563_v13  ;;  %26834 = vst [vmem:[#allocation18_spill] sm:$0xff] %v24694_v62  ;;  %v26766_v38 = vrot.slane %v24670_v3, 1 }
 0x239   : > { %v24691_v57 = vsel %vm4431_vm0, %v7342_v25, %v7346_v59  ;;  %v24708_v25 = vld [vmem:[#allocation2 + $0x60] sm:$0xff] }
 0x23a   : > { %5589 = vmatmul.mubr.bf16.gmra.mrb[64].mxu0 %v18658_v54  ;;  %v24668_v54 = vsel %vm4431_vm0, %v7336_v43, %v7340_v40  ;;  %v7356_v43 = vrot.slane %v22079_v37, 1  ;;  %26833 = vst [vmem:[#allocation17_spill] sm:$0xff] %v24691_v57  ;;  %26840 = vst [vmem:[#allocation24_spill] sm:$0xff] %v24708_v25  ;;  %v22243_v57 = vld [vmem:[#allocation2 + $0x94] ss:$8 sps:$4 sm:$0xff]  }
 0x23b   : > { %20609 = vmatpush1.bf16.msra.mxu1 %v22627_v26  ;;  %5596 = vmatprep.mubr.bf16.mxu0 %v18661_v52  ;;  %v24676_v52 = vsel %vm4431_vm0, %v7340_v40, %v7344_v39  ;;  %v7350_v26 = vrot.slane %v22078_v58, 1  ;;  %v7354_v40 = vrot.slane %v22081_v34, 1  ;;  %v7358_v39 = vrot.slane %v22085_v22, 1 }
 0x23c   : > { %v24706_v37 = vsel %vm4431_vm0, %v7352_v60, %v7356_v43  ;;  %v26767_v34 = vrot.slane %v24665_v48, 1  ;;  %v24721_v60 = vld [vmem:[#allocation2 + $0x78] sm:$0xff]  ;;  %v24724_v55 = vsel %vm4431_vm0, %v7356_v43, %v7360_v56 }
 0x23d   : > { %v24703_v58 = vsel %vm4431_vm0, %v7346_v59, %v7350_v26  ;;  %26839 = vst [vmem:[#allocation23_spill] sm:$0xff] %v24706_v37  ;;  %v24711_v14 = vsel %vm4431_vm0, %v7350_v26, %v7354_v40  ;;  %v24719_v59 = vld [vmem:[#allocation2 + $0x70] sm:$0xff]  ;;  %26844 = vst [vmem:[#allocation28_spill] sm:$0xff] %v24721_v60  ;;  %v24727_v22 = vsel %vm4431_vm0, %v7354_v40, %v7358_v39  ;;  %v24759_v26 = vld [vmem:[#allocation2 + $0x88] sm:$0xff] }
 0x23e   : > { %3880 = vmatmul.mubr.bf16.gmra.mrb[48].mxu1 %v3390_v50  ;;  %v24696_v50 = vld [vmem:[#allocation2 + $0x38] sm:$0xff]  ;;  %26838 = vst [vmem:[#allocation22_spill] sm:$0xff] %v24703_v58  ;;  %26841 = vst [vmem:[#allocation25_spill] sm:$0xff] %v24711_v14  ;;  %v24745_v43 = vsel %vm4431_vm0, %v7360_v56, %v26767_v34  ;;  %v24750_v40 = vsel %vm4431_vm0, %v7358_v39, %v26766_v38  ;;  %v3443_v38 = vshll.u32 %v24655_v18, 16  ;;  %v24790_v34 = vld [vmem:[#allocation2 + $0x110] sm:$0xff] }
 0x23f   : > { %3887 = vmatprep.mubr.bf16.mxu1 %v3414_v16  ;;  %26835 = vst [vmem:[#allocation19_spill] sm:$0xff] %v24696_v50  ;;  %v24700_v16 = vld [vmem:[#allocation2 + $0x58] sm:$0xff]  ;;  %26843 = vst [vmem:[#allocation27_spill] sm:$0xff] %v24719_v59  ;;  %v18662_v39 = vcombine.low %v24615_v36, %v24617_v15  ;;  %v22240_v14 = vld [vmem:[#allocation2 + $0x84] ss:$8 sps:$4 sm:$0xff]  }
 0x240   : > { %26837 = vst [vmem:[#allocation21_spill] sm:$0xff] %v24700_v16  ;;  %26845 = vst [vmem:[#allocation29_spill] sm:$0xff] %v24724_v55  ;;  %v24763_v56 = vld [vmem:[#allocation2 + $0x98] sm:$0xff]  ;;  %v3445_v49 = vrot.slane %v3443_v38, 1  ;;  %v24818_v38 = vld [vmem:[#allocation2 + $0x120] sm:$0xff] }
 0x241   : > { %26846 = vst [vmem:[#allocation30_spill] sm:$0xff] %v24727_v22  ;;  %26850 = vst [vmem:[#allocation34_spill] sm:$0xff] %v24745_v43  ;;  %v24948_v22 = vld [vmem:[#allocation2 + $0x188] sm:$0xff] }
 0x242   : > { %5597 = vmatmul.mubr.bf16.gmra.mrb[68].mxu0 %v18660_v0  ;;  %26851 = vst [vmem:[#allocation35_spill] sm:$0xff] %v24750_v40  ;;  %26852 = vst [vmem:[#allocation36_spill] sm:$0xff] %v24759_v26  ;;  %v18462_v0 = vcombine.low %v24524_v32, %v24543_v30  ;;  %v3455_v30 = vshrl.u32 %v24655_v18, 16  ;;  %v18467_v18 = vcombine.high %v24570_v10, %v24610_v4 }
 0x243   : > { %5604 = vmatprep.mubr.bf16.mxu0 %v18663_v2  ;;  %26854 = vst [vmem:[#allocation38_spill] sm:$0xff] %v24763_v56  ;;  %v3421_v56 = vrot.slane %v26856_v63, 1  ;;  %v26857_v2 = vshrl.u32 %v24578_v12, 16  ;;  %v18664_v12 = vcombine.low %v24794_v28, %v24790_v34 }
 0x244   : > { %v3435_v63 = vshll.u32 %v18462_v0, 16 }
 0x245   : > { %v3441_v47 = vor.u32 %v26857_v2, %v24621_v44  ;;  %v24816_v44 = vld [vmem:[#allocation2 + $0x118] sm:$0xff] }
 0x246   : > { %3888 = vmatmul.mubr.bf16.gmra.mrb[52].mxu1 %v24651_v23  ;;  %v26855_v23 = vshrl.u32 %v24574_v27, 16  ;;  %v3437_v2 = vrot.slane %v3435_v63, 1  ;;  %v3475_v63 = vshll.u32 %v18467_v18, 16 }
 0x247   : > { %3895 = vmatprep.mubr.bf16.mxu1 %v24663_v1  ;;  %v18665_v1 = vcombine.high %v24794_v28, %v24790_v34  ;;  %v3446_v32 = vsel %vm3246_vm1, %v3441_v47, %v3445_v49  ;;  %v3457_v47 = vor.u32 %v3455_v30, %v3445_v49  ;;  %v24832_v49 = vld [vmem:[#allocation2 + $0x130] sm:$0xff] }
 0x248   : > { %v3417_v53 = vor.u32 %v26855_v23, %v24619_v45  ;;  %v3431_v45 = vshrl.u32 %v24607_v35, 16  ;;  %v3459_v23 = vshll.u32 %v18465_v11, 16  ;;  %v18667_v35 = vcombine.high %v24816_v44, %v24818_v38 }
 0x24a   : > { %5605 = vmatmul.mubr.bf16.gmra.mrb[72].mxu0 %v18662_v39  ;;  %v3422_v27 = vsel %vm3246_vm1, %v3417_v53, %v3421_v56  ;;  %v3433_v39 = vor.u32 %v3431_v45, %v3421_v56  ;;  %v18464_v53 = vcombine.low %v24545_v8, %v24568_v5  ;;  %v3471_v45 = vshrl.u32 %v18465_v11, 16  ;;  %v24830_v5 = vld [vmem:[#allocation2 + $0x128] sm:$0xff] }
 0x24b   : > { %5612 = vmatprep.mubr.bf16.mxu0 %v18665_v1  ;;  %v3461_v1 = vrot.slane %v3459_v23, 1  ;;  %v18666_v8 = vcombine.low %v24816_v44, %v24818_v38  ;;  %v18469_v11 = vcombine.high %v24612_v19, %v24615_v36 }
 0x24c   : > { %v3451_v26 = vshll.u32 %v18464_v53, 16 }
 0x24d   : > { %v3462_v56 = vsel %vm3246_vm1, %v3457_v47, %v3461_v1 }
 0x24e   : > { %3896 = vmatmul.mubr.bf16.gmra.mrb[56].mxu1 %v3422_v27  ;;  %v3438_v27 = vsel %vm3246_vm1, %v3433_v39, %v3437_v2  ;;  %v3453_v23 = vrot.slane %v3451_v26, 1  ;;  %v3473_v39 = vor.u32 %v3471_v45, %v3461_v1  ;;  %v24844_v1 = vld [vmem:[#allocation2 + $0x138] sm:$0xff] }
 0x24f   : > { %3903 = vmatprep.mubr.bf16.mxu1 %v3446_v32  ;;  %v3447_v32 = vshrl.u32 %v18462_v0, 16  ;;  %v18669_v0 = vcombine.high %v24830_v5, %v24832_v49 }
 0x251   : > { %v3449_v30 = vor.u32 %v3447_v32, %v3437_v2  ;;  %v3487_v2 = vshrl.u32 %v18467_v18, 16  ;;  %v24846_v32 = vld [vmem:[#allocation2 + $0x140] sm:$0xff] }
 0x252   : > { %5613 = vmatmul.mubr.bf16.gmra.mrb[76].mxu0 %v18664_v12  ;;  %v18466_v12 = vcombine.low %v24570_v10, %v24610_v4  ;;  %v3491_v10 = vshll.u32 %v18469_v11, 16  ;;  %v18668_v4 = vcombine.low %v24830_v5, %v24832_v49 }
 0x253   : > { %5620 = vmatprep.mubr.bf16.mxu0 %v18667_v35  ;;  %v3477_v35 = vrot.slane %v3475_v63, 1  ;;  %v3454_v47 = vsel %vm3246_vm1, %v3449_v30, %v3453_v23  ;;  %v18468_v30 = vcombine.low %v24612_v19, %v24615_v36  ;;  %v18670_v19 = vcombine.low %v24844_v1, %v24846_v32  ;;  %v24860_v36 = vld [vmem:[#allocation2 + $0x150] sm:$0xff] }
 0x254   : > { %v3493_v18 = vrot.slane %v3491_v10, 1  ;;  %v22628_v10 = vld [vmem:[#allocation2 + $0x148] sm:$0xff] }
 0x255   : > { %v3478_v26 = vsel %vm3246_vm1, %v3473_v39, %v3477_v35 }
 0x256   : > { %3904 = vmatmul.mubr.bf16.gmra.mrb[60].mxu1 %v3438_v27  ;;  %v3463_v27 = vshrl.u32 %v18464_v53, 16  ;;  %v3489_v53 = vor.u32 %v3487_v2, %v3477_v35  ;;  %v18470_v35 = vcombine.low %v24617_v15, %v24794_v28 }
 0x257   : > { %3911 = vmatprep.mubr.bf16.mxu1 %v3462_v56  ;;  %v3467_v56 = vshll.u32 %v18466_v12, 16 }
 0x258   : > { %v3465_v45 = vor.u32 %v3463_v27, %v3453_v23  ;;  %v3494_v23 = vsel %vm3246_vm1, %v3489_v53, %v3493_v18  ;;  %v3503_v27 = vshrl.u32 %v18469_v11, 16  ;;  %v3495_v53 = vshrl.u32 %v18468_v30, 16 }
 0x259   : > { %v3469_v63 = vrot.slane %v3467_v56, 1  ;;  %v3483_v56 = vshll.u32 %v18468_v30, 16 }
 0x25a   : > { %5621 = vmatmul.mubr.bf16.gmra.mrb[80].mxu0 %v18666_v8  ;;  %v18671_v8 = vcombine.high %v24844_v1, %v24846_v32 }
 0x25b   : > { %5628 = vmatprep.mubr.bf16.mxu0 %v18669_v0  ;;  %v18471_v0 = vcombine.high %v24617_v15, %v24794_v28  ;;  %v3470_v39 = vsel %vm3246_vm1, %v3465_v45, %v3469_v63  ;;  %v18473_v45 = vcombine.high %v24790_v34, %v24816_v44  ;;  %v3485_v11 = vrot.slane %v3483_v56, 1  ;;  %v24870_v56 = vld [vmem:[#allocation2 + $0x158] sm:$0xff] }
 0x25c   : > { %v18472_v15 = vcombine.low %v24790_v34, %v24816_v44 }
 0x25e   : > { %3912 = vmatmul.mubr.bf16.gmra.mrb[64].mxu1 %v3454_v47  ;;  %v3479_v47 = vshrl.u32 %v18466_v12, 16  ;;  %v3505_v12 = vor.u32 %v3503_v27, %v3493_v18  ;;  %v3497_v18 = vor.u32 %v3495_v53, %v3485_v11  ;;  %v3515_v30 = vshll.u32 %v18472_v15, 16 }
 0x25f   : > { %3919 = vmatprep.mubr.bf16.mxu1 %v3478_v26  ;;  %v3507_v26 = vshll.u32 %v18471_v0, 16 }
 0x260   : > { %v3481_v2 = vor.u32 %v3479_v47, %v3469_v63  ;;  %v3519_v47 = vshrl.u32 %v18471_v0, 16  ;;  %v18474_v0 = vcombine.low %v24818_v38, %v24830_v5 }
 0x262   : > { %5629 = vmatmul.mubr.bf16.gmra.mrb[84].mxu0 %v18668_v4  ;;  %v18673_v4 = vcombine.high %v22628_v10, %v24860_v36  ;;  %v3486_v28 = vsel %vm3246_vm1, %v3481_v2, %v3485_v11  ;;  %v18475_v2 = vcombine.high %v24818_v38, %v24830_v5  ;;  %v22012_v11 = vld [vmem:[#allocation2 + $0x1c] ss:$8 sps:$4 sm:$0xff]   ;;  %v3531_v5 = vshll.u32 %v18474_v0, 16 }
 0x263   : > { %5636 = vmatprep.mubr.bf16.mxu0 %v18671_v8  ;;  %v3509_v8 = vrot.slane %v3507_v26, 1  ;;  %v3511_v26 = vshrl.u32 %v18470_v35, 16  ;;  %v6121_v51 = vshrl.u32 %v22012_v11, 16 }
 0x264   : > { %v3539_v38 = vshll.u32 %v18475_v2, 16  ;;  %v3533_v59 = vrot.slane %v3531_v5, 1 }
 0x265   : > { %v3510_v63 = vsel %vm3246_vm1, %v3505_v12, %v3509_v8  ;;  %v3521_v44 = vor.u32 %v3519_v47, %v3509_v8  ;;  %v3008_v12 = vld [vmem:[#allocation2 + $0x148] sm:$0xff]  ;;  %v3517_v47 = vrot.slane %v3515_v30, 1 }
 0x266   : > { %3920 = vmatmul.mubr.bf16.gmra.mrb[68].mxu1 %v3470_v39  ;;  %v3499_v39 = vshll.u32 %v18470_v35, 16  ;;  %v3535_v35 = vshrl.u32 %v18473_v45, 16  ;;  %v24907_v61 = vcombine.low %v24846_v32, %v3008_v12 }
 0x267   : > { %3927 = vmatprep.mubr.bf16.mxu1 %v3494_v23  ;;  %v3523_v23 = vshll.u32 %v18473_v45, 16  ;;  %v24891_v45 = vcombine.low %v24832_v49, %v24844_v1 }
 0x268   : > { %v3501_v27 = vrot.slane %v3499_v39, 1  ;;  %v24880_v39 = vcombine.high %v24832_v49, %v24844_v1  ;;  %v3541_v1 = vrot.slane %v3539_v38, 1 }
 0x269   : > { %v3547_v30 = vshll.u32 %v24891_v45, 16 }
 0x26a   : > { %5637 = vmatmul.mubr.bf16.gmra.mrb[88].mxu0 %v18670_v19  ;;  %v18672_v19 = vcombine.low %v22628_v10, %v24860_v36  ;;  %v3502_v10 = vsel %vm3246_vm1, %v3497_v18, %v3501_v27  ;;  %v3513_v53 = vor.u32 %v3511_v26, %v3501_v27  ;;  %v3555_v18 = vshll.u32 %v24880_v39, 16 }
 0x26b   : > { %5644 = vmatprep.mubr.bf16.mxu0 %v18673_v4  ;;  %v22629_v4 = vld [vmem:[#allocation2 + $0x160] sm:$0xff]  ;;  %v6123_v27 = vshll.u32 %v22012_v11, 16  ;;  %v3551_v26 = vshrl.u32 %v18475_v2, 16  ;;  %v3549_v50 = vrot.slane %v3547_v30, 1 }
 0x26c   : > { %v18675_v34 = vcombine.high %v24870_v56, %v22629_v4  ;;  %v3518_v2 = vsel %vm3246_vm1, %v3513_v53, %v3517_v47 }
 0x26d   : > { %v6125_v21 = vrot.slane %v6123_v27, 1  ;;  %v3553_v25 = vor.u32 %v3551_v26, %v3541_v1 }
 0x26e   : > { %3928 = vmatmul.mubr.bf16.gmra.mrb[72].mxu1 %v3486_v28  ;;  %v3525_v28 = vrot.slane %v3523_v23, 1  ;;  %v24886_v23 = vld [vmem:[#allocation2 + $0x170] sm:$0xff] }
 0x26f   : > { %3935 = vmatprep.mubr.bf16.mxu1 %v3510_v63  ;;  %v24883_v63 = vcombine.high %v24846_v32, %v3008_v12  ;;  %v18677_v60 = vcombine.high %v24894_v17, %v24886_v23  ;;  %v6126_v38 = vor.u32 %v6125_v21, %v6121_v51  ;;  %v3563_v32 = vshll.u32 %v24907_v61, 16  ;;  %v8690_v21 = vld [vmem:[#allocation2 + $0x38] sm:$0xff]  ;;  %v22227_v51 = vld [vmem:[#allocation2 + $0x44] ss:$8 sps:$4 sm:$0xff]  }
 0x270   : > { %v3526_v8 = vsel %vm3246_vm1, %v3521_v44, %v3525_v28  ;;  %v3567_v44 = vshrl.u32 %v24880_v39, 16  ;;  %v3537_v49 = vor.u32 %v3535_v35, %v3525_v28  ;;  %v6111_v12 = vshll.u32 %v24904_v6, 16 }
 0x271   : > { %v10156_v62 = vrot.slane %v22227_v51, 1 }
 0x272   : > { %5645 = vmatmul.mubr.bf16.gmra.mrb[92].mxu0 %v18672_v19  ;;  %v3527_v19 = vshrl.u32 %v18472_v15, 16  ;;  %v24899_v15 = vld [vmem:[#allocation2 + $0x2c] ss:$8 sps:$4 sm:$0xff]   ;;  %v3542_v53 = vsel %vm3246_vm1, %v3537_v49, %v3541_v1  ;;  %v3583_v49 = vshrl.u32 %v24883_v63, 16 }
 0x273   : > { %5652 = vmatprep.mubr.bf16.mxu0 %v18675_v34  ;;  %v3543_v34 = vshrl.u32 %v18474_v0, 16  ;;  %v3557_v0 = vrot.slane %v3555_v18, 1  ;;  %v6128_v35 = vshll.u32 %v24899_v15, 16  ;;  %v18676_v18 = vcombine.low %v24894_v17, %v24886_v23  ;;  %v22229_v1 = vld [vmem:[#allocation2 + $0x54] ss:$8 sps:$4 sm:$0xff]  }
 0x275   : > { %v3545_v16 = vor.u32 %v3543_v34, %v3533_v59  ;;  %v3569_v46 = vor.u32 %v3567_v44, %v3557_v0  ;;  %v3558_v11 = vsel %vm3246_vm1, %v3553_v25, %v3557_v0  ;;  %v24926_v34 = vrot.slane %v6128_v35, 1  ;;  %v22630_v25 = vld [vmem:[#allocation2 + $0x180] sm:$0xff]  ;;  %v24928_v44 = vld [vmem:[#allocation2 + $0x190] sm:$0xff] }
 0x276   : > { %3936 = vmatmul.mubr.bf16.gmra.mrb[76].mxu1 %v3502_v10  ;;  %v18674_v10 = vcombine.low %v24870_v56, %v22629_v4  ;;  %v3529_v4 = vor.u32 %v3527_v19, %v3517_v47  ;;  %v3559_v47 = vshrl.u32 %v24891_v45, 16  ;;  %v22225_v19 = vld [vmem:[#allocation2 + $0x40] ss:$8 sps:$4 sm:$0xff]   ;;  %v22232_v35 = vld [vmem:[#allocation2 + $0x64] ss:$8 sps:$4 sm:$0xff]   ;;  %v18681_v55 = vcombine.high %v24948_v22, %v24928_v44 }
 0x277   : > { %3943 = vmatprep.mubr.bf16.mxu1 %v3526_v8  ;;  %v3571_v8 = vshll.u32 %v24883_v63, 16  ;;  %v24921_v27 = vsel %vm3246_vm1, %v3545_v16, %v3549_v50  ;;  %v22236_v16 = vld [vmem:[#allocation2 + $0x74] ss:$8 sps:$4 sm:$0xff]   ;;  %v22238_v0 = vld [vmem:[#allocation2 + $0x70] ss:$8 sps:$4 sm:$0xff]  }
 0x278   : > { %v3534_v5 = vsel %vm3246_vm1, %v3529_v4, %v3533_v59  ;;  %v9873_v59 = vld [vmem:[#allocation2 + $0x30] sm:$0xee] }
 0x279   : > { %v3573_v28 = vrot.slane %v3571_v8, 1  ;;  %v24930_v8 = vor.u32 %v3559_v47, %v3549_v50  ;;  %v22231_v50 = vld [vmem:[#allocation2 + $0x50] ss:$8 sps:$4 sm:$0xff]   ;;  %v24946_v47 = vrot.slane %v6111_v12, 1  ;;  %v19120_v40 = vcombine.low %v9873_v59, %v8690_v21  ;;  %v22242_v12 = vld [vmem:[#allocation2 + $0x80] ss:$8 sps:$4 sm:$0xff]  }
 0x27a   : > { %5653 = vmatmul.mubr.bf16.gmra.mrb[96].mxu0 %v18674_v10  ;;  %v22631_v10 = vld [vmem:[#allocation2 + $0x178] sm:$0xff] }
 0x27b   : > { %5660 = vmatprep.mubr.bf16.mxu0 %v18677_v60  ;;  %v24912_v60 = vld [vmem:[#allocation2 + $0x28] ss:$8 sps:$4 sm:$0xff]   ;;  %v24924_v26 = vsel %vm3246_vm1, %v3569_v46, %v3573_v28  ;;  %v18679_v30 = vcombine.high %v22631_v10, %v22630_v25  ;;  %v24936_v46 = vsel %vm3246_vm1, %v6126_v38, %v24926_v34  ;;  %v19121_v38 = vcombine.high %v9873_v59, %v8690_v21 }
 0x27c   : > { %v18678_v43 = vcombine.low %v22631_v10, %v22630_v25  ;;  %v10152_v37 = vrot.slane %v19120_v40, 1  ;;  %v10160_v59 = vrot.slane %v22229_v1, 1  ;;  %v10158_v25 = vrot.slane %v22231_v50, 1  ;;  %v8705_v40 = vld [vmem:[#allocation2 + $0xb0] sm:$0xff] }
 0x27d   : > { %v10155_v58 = vrot.slane %v19121_v38, 1  ;;  %v10164_v10 = vrot.slane %v22232_v35, 1  ;;  %v10166_v50 = vrot.slane %v22238_v0, 1  ;;  %v9890_v35 = vld [vmem:[#allocation2 + $0xb8] sm:$0xff]  ;;  %v24981_v0 = vld [vmem:[#allocation2 + $0x14c] ss:$8 sps:$4 sm:$0xff]  }
 0x27e   : > { %3944 = vmatmul.mubr.bf16.gmra.mrb[80].mxu1 %v3518_v2  ;;  %v24940_v2 = vcombine.high %v24860_v36, %v24870_v56  ;;  %v24964_v51 = vsel %vm4431_vm0, %v10156_v62, %v10160_v59 }
 0x27f   : > { %3951 = vmatprep.mubr.bf16.mxu1 %v3542_v53  ;;  %v24944_v53 = vrot.slane %v3563_v32, 1  ;;  %v24954_v32 = vor.u32 %v3583_v49, %v3573_v28  ;;  %v24958_v4 = vsel %vm4431_vm0, %v10155_v58, %v10156_v62  ;;  %v22247_v49 = vld [vmem:[#allocation2 + $0xa4] ss:$8 sps:$4 sm:$0xff]   ;;  %26860 = vst [vmem:[#allocation41_spill] sm:$0xff] %v24964_v51  ;;  %v24970_v1 = vsel %vm4431_vm0, %v10160_v59, %v10164_v10  ;;  %v22249_v58 = vld [vmem:[#allocation2 + $0xa0] ss:$8 sps:$4 sm:$0xff]  }
 0x280   : > { %26858 = vst [vmem:[#allocation39_spill] sm:$0xff] %v24958_v4  ;;  %26862 = vst [vmem:[#allocation43_spill] sm:$0xff] %v24970_v1  ;;  %v5874_v62 = vld [vmem:[#allocation2 + $0x180] sm:$0xff]  ;;  %v10180_v59 = vrot.slane %v22247_v49, 1  ;;  %v24983_v1 = vld [vmem:[#allocation2 + $0x148] ss:$8 sps:$4 sm:$0xff]  }
 0x281   : > { %v25003_v49 = vld [vmem:[#allocation2 + $0x3c] ss:$8 sps:$4 sm:$0xff]  }
 0x282   : > { %5661 = vmatmul.mubr.bf16.gmra.mrb[100].mxu0 %v18676_v18  ;;  %v22235_v18 = vld [vmem:[#allocation2 + $0x60] ss:$8 sps:$4 sm:$0xff]   ;;  %v22030_v4 = vld [vmem:[#allocation2 + $0x5c] ss:$8 sps:$4 sm:$0xff]  }
 0x283   : > { %5668 = vmatprep.mubr.bf16.mxu0 %v18679_v30  ;;  %v10153_v30 = vrot.slane %v22225_v19, 1  ;;  %v10162_v28 = vrot.slane %v22235_v18, 1  ;;  %v10170_v18 = vrot.slane %v22242_v12, 1  ;;  %v24991_v12 = vld [vmem:[#allocation2 + $0x158] sm:$0xff] }
 0x285   : > { %v24961_v19 = vsel %vm4431_vm0, %v10152_v37, %v10153_v30  ;;  %v24973_v38 = vsel %vm4431_vm0, %v10158_v25, %v10162_v28  ;;  %v24979_v21 = vsel %vm4431_vm0, %v10162_v28, %v10166_v50  ;;  %v7054_v28 = vld [vmem:[#allocation2 + $0x160] sm:$0xff] }
 0x286   : > { %3952 = vmatmul.mubr.bf16.gmra.mrb[84].mxu1 %v3534_v5  ;;  %26859 = vst [vmem:[#allocation40_spill] sm:$0xff] %v24961_v19  ;;  %v10168_v5 = vrot.slane %v22236_v16, 1  ;;  %26863 = vst [vmem:[#allocation44_spill] sm:$0xff] %v24973_v38  ;;  %v10172_v16 = vrot.slane %v22240_v14, 1  ;;  %v10178_v14 = vrot.slane %v22249_v58, 1  ;;  %v18868_v58 = vcombine.low %v24991_v12, %v7054_v28 }
 0x287   : > { %3959 = vmatprep.mubr.bf16.mxu1 %v3558_v11  ;;  %v24967_v11 = vsel %vm4431_vm0, %v10153_v30, %v10158_v25  ;;  %26865 = vst [vmem:[#allocation46_spill] sm:$0xff] %v24979_v21  ;;  %v10176_v30 = vrot.slane %v22243_v57, 1  ;;  %v7057_v21 = vld [vmem:[#allocation2 + $0x178] sm:$0xff] }
 0x288   : > { %26861 = vst [vmem:[#allocation42_spill] sm:$0xff] %v24967_v11  ;;  %v24976_v37 = vsel %vm4431_vm0, %v10164_v10, %v10168_v5  ;;  %v10174_v11 = vrot.slane %v22246_v41, 1  ;;  %v24986_v25 = vsel %vm4431_vm0, %v10168_v5, %v10172_v16  ;;  %v24989_v10 = vsel %vm4431_vm0, %v10166_v50, %v10170_v18 }
 0x289   : > { %26864 = vst [vmem:[#allocation45_spill] sm:$0xff] %v24976_v37  ;;  %26866 = vst [vmem:[#allocation47_spill] sm:$0xff] %v24986_v25  ;;  %v24994_v41 = vsel %vm4431_vm0, %v10172_v16, %v10176_v30  ;;  %v19136_v5 = vcombine.low %v8705_v40, %v9890_v35  ;;  %v18869_v50 = vcombine.high %v24991_v12, %v7054_v28  ;;  %v25023_v28 = vld [vmem:[#allocation2 + $0x18c] ss:$8 sps:$4 sm:$0xff]  }
 0x28a   : > { %5669 = vmatmul.mubr.bf16.gmra.mrb[104].mxu0 %v18678_v43  ;;  %26867 = vst [vmem:[#allocation48_spill] sm:$0xff] %v24989_v10  ;;  %v19137_v43 = vcombine.high %v8705_v40, %v9890_v35  ;;  %26868 = vst [vmem:[#allocation49_spill] sm:$0xff] %v24994_v41  ;;  %v24997_v57 = vsel %vm4431_vm0, %v10170_v18, %v10174_v11  ;;  %v18873_v10 = vcombine.high %v7057_v21, %v5874_v62  ;;  %v25012_v18 = vld [vmem:[#allocation2 + $0x160] sm:$0xff]  ;;  %v22099_v40 = vld [vmem:[#allocation2 + $0x168] ss:$8 sps:$4 sm:$0xff]  }
 0x28b   : > { %5676 = vmatprep.mubr.bf16.mxu0 %v18681_v55  ;;  %26869 = vst [vmem:[#allocation50_spill] sm:$0xff] %v24997_v57  ;;  %v25000_v55 = vsel %vm4431_vm0, %v10176_v30, %v10180_v59  ;;  %v18872_v25 = vcombine.low %v7057_v21, %v5874_v62  ;;  %v25010_v16 = vcombine.low %v24860_v36, %v24870_v56  ;;  %v25014_v30 = vld [vmem:[#allocation2 + $0x16c] ss:$8 sps:$4 sm:$0xff]   ;;  %26874 = vst [vmem:[#allocation55_spill] sm:$0xff] %v25023_v28  ;;  %v25027_v62 = vld [vmem:[#allocation2 + $0x188] ss:$8 sps:$4 sm:$0xff]  }
 0x28c   : > { %26870 = vst [vmem:[#allocation51_spill] sm:$0xff] %v25000_v55  ;;  %v25019_v35 = vrot.slane %v19137_v43, 1  ;;  %v25021_v55 = vrot.slane %v19136_v5, 1  ;;  %v7366_v21 = vrot.slane %v24983_v1, 1  ;;  %v7372_v36 = vrot.slane %v18869_v50, 1  ;;  %26875 = vst [vmem:[#allocation56_spill] sm:$0xff] %v25027_v62 }
 0x28d   : > { %v7370_v56 = vrot.slane %v18868_v58, 1  ;;  %v7376_v57 = vrot.slane %v25014_v30, 1  ;;  %v7374_v41 = vrot.slane %v22099_v40, 1  ;;  %v7380_v37 = vrot.slane %v18873_v10, 1 }
 0x28e   : > { %3960 = vmatmul.mubr.bf16.gmra.mrb[88].mxu1 %v24921_v27  ;;  %v25017_v27 = vsel %vm4431_vm0, %v10174_v11, %v10178_v14  ;;  %26872 = vst [vmem:[#allocation53_spill] sm:$0xff] %v25019_v35  ;;  %26873 = vst [vmem:[#allocation54_spill] sm:$0xff] %v25021_v55  ;;  %v7378_v11 = vrot.slane %v18872_v25, 1  ;;  %v26876_v43 = vrot.slane %v24665_v48, 1  ;;  %v25042_v50 = vsel %vm4431_vm0, %v10180_v59, %v25019_v35 }
 0x28f   : > { %3967 = vmatprep.mubr.bf16.mxu1 %v24924_v26  ;;  %26871 = vst [vmem:[#allocation52_spill] sm:$0xff] %v25017_v27  ;;  %v7368_v26 = vrot.slane %v24981_v0, 1  ;;  %v26877_v27 = vrot.slane %v24670_v3, 1  ;;  %26878 = vst [vmem:[#allocation57_spill] sm:$0xff] %v25042_v50  ;;  %v25046_v58 = vsel %vm4431_vm0, %v10178_v14, %v25021_v55  ;;  %v26880_v25 = vcombine.low %v24948_v22, %v24928_v44 }
 0x290   : > { %26879 = vst [vmem:[#allocation58_spill] sm:$0xff] %v25046_v58  ;;  %v25052_v48 = vsel %vm4431_vm0, %v7372_v36, %v7376_v57  ;;  %v25055_v3 = vsel %vm4431_vm0, %v7370_v56, %v7374_v41  ;;  %v25058_v10 = vsel %vm4431_vm0, %v7376_v57, %v7380_v37  ;;  %v25061_v59 = vsel %vm4431_vm0, %v7374_v41, %v7378_v11 }
 0x291   : > { %v25033_v5 = vsel %vm4431_vm0, %v26876_v43, %v7368_v26  ;;  %v25038_v38 = vsel %vm4431_vm0, %v26877_v27, %v7366_v21  ;;  %v3566_v14 = vsel %vm3246_vm1, %v24930_v8, %v24944_v53  ;;  %v26881_v22 = vshll.u32 %v24940_v2, 16  ;;  %v25095_v8 = vld [vmem:[#allocation2 + $0x4c] ss:$8 sps:$4 sm:$0xff]  }
 0x292   : > { %5677 = vmatmul.mubr.bf16.gmra.mrb[108].mxu0 %v26880_v25  ;;  %v6144_v40 = vshll.u32 %v25003_v49, 16  ;;  %v25072_v27 = vcombine.high %v25012_v18, %v24894_v17  ;;  %v26882_v57 = vshrl.u32 %v24904_v6, 16  ;;  %v3575_v43 = vshrl.u32 %v24907_v61, 16 }
 0x293   : > { %6676 = vmatprep.mubr.bf16.mxu0 %v24936_v46  ;;  %v3589_v44 = vrot.slane %v26881_v22, 1  ;;  %v25078_v46 = vld [vmem:[#allocation2 + $0x38] ss:$8 sps:$4 sm:$0xff]   ;;  %v3599_v55 = vshrl.u32 %v24940_v2, 16  ;;  %v25086_v35 = vsel %vm4431_vm0, %v7368_v26, %v7372_v36  ;;  %v25089_v6 = vsel %vm4431_vm0, %v7366_v21, %v7370_v56 }
 0x294   : > { %v6114_v41 = vor.u32 %v24946_v47, %v26882_v57  ;;  %v26883_v47 = vshrl.u32 %v24899_v15, 16  ;;  %v3579_v25 = vshll.u32 %v25010_v16, 16  ;;  %v26885_v26 = vrot.slane %v25027_v62, 1 }
 0x295   : > { %v3590_v22 = vsel %vm3246_vm1, %v24954_v32, %v3589_v44  ;;  %v26884_v32 = vrot.slane %v25023_v28, 1  ;;  %v26886_v36 = vshll.u32 %v24912_v60, 16  ;;  %v3603_v56 = vshll.u32 %v25072_v27, 16 }
 0x296   : > { %3968 = vmatmul.mubr.bf16.gmra.mrb[92].mxu1 %v3566_v14  ;;  %v6142_v57 = vor.u32 %v26883_v47, %v24926_v34  ;;  %v25097_v14 = vld [vmem:[#allocation2 + $0x178] sm:$0xff]  ;;  %v25107_v21 = vsel %vm4431_vm0, %v7378_v11, %v26885_v26  ;;  %v22018_v34 = vld [vmem:[%s26752_s4 + $0x280] sm:$0xff]   ;;  %v3577_v47 = vor.u32 %v3575_v43, %v24944_v53  ;;  %v3601_v11 = vor.u32 %v3599_v55, %v3589_v44  ;;  %v22026_v55 = vld [vmem:[%s26752_s4 + $0x288] sm:$0xff]  }
 0x297   : > { %3975 = vmatprep.mubr.bf16.mxu1 %v3590_v22  ;;  %v25102_v58 = vsel %vm4431_vm0, %v7380_v37, %v26884_v32  ;;  %v6118_v15 = vrot.slane %v26886_v36, 1  ;;  %v6146_v22 = vrot.slane %v6144_v40, 1  ;;  %v6132_v37 = vshrl.u32 %v24912_v60, 16 }
 0x298   : > { %v6136_v32 = vshll.u32 %v25078_v46, 16  ;;  %v6156_v26 = vshrl.u32 %v25003_v49, 16  ;;  %v25122_v36 = vcombine.high %v24886_v23, %v25097_v14  ;;  %v3581_v19 = vrot.slane %v3579_v25, 1 }
 0x299   : > { %v6119_v50 = vsel %vm3246_vm1, %v6114_v41, %v6118_v15  ;;  %v6147_v51 = vsel %vm3246_vm1, %v6142_v57, %v6146_v22  ;;  %v6160_v40 = vshll.u32 %v25095_v8, 16  ;;  %v25128_v60 = vcombine.low %v25012_v18, %v24894_v17 }
 0x29a   : > { %6677 = vmatmul.mubr.bf16.vlgmr.msra.gmra.mrb[16].mxu0 %v6119_v50  ;;  %v3605_v53 = vrot.slane %v3603_v56, 1  ;;  %v3582_v49 = vsel %vm3246_vm1, %v3577_v47, %v3581_v19  ;;  %v6134_v44 = vor.u32 %v6132_v37, %v6118_v15  ;;  %v3591_v50 = vshrl.u32 %v25010_v16, 16  ;;  %v3015_v15 = vld [vmem:[#allocation2 + $0x180] sm:$0x11]  ;;  %v22035_v37 = vld [vmem:[%s26752_s4 + $0x290] sm:$0xff]  }
 0x29b   : > { %7535 = vmatpush1.bf16.msra.mxu0 %v22018_v34  ;;  %6684 = vmatprep.mubr.bf16.mxu0 %v6147_v51  ;;  %v3615_v17 = vshrl.u32 %v25072_v27, 16  ;;  %v3619_v43 = vshll.u32 %v25122_v36, 16  ;;  %v25139_v51 = vld [vmem:[#allocation2 + $0x48] ss:$8 sps:$4 sm:$0xff]   ;;  %v6138_v25 = vrot.slane %v6136_v32, 1  ;;  %v6158_v57 = vor.u32 %v6156_v26, %v6146_v22 }
 0x29c   : > { %7536 = vmatprep.subr.bf16.mxu0 %v24563_v13  ;;  %v3606_v41 = vsel %vm3246_vm1, %v3601_v11, %v3605_v53  ;;  %v6162_v34 = vrot.slane %v6160_v40, 1  ;;  %v3595_v56 = vshll.u32 %v25128_v60, 16  ;;  %v6148_v47 = vshrl.u32 %v25078_v46, 16 }
 0x29d   : > { %v6139_v11 = vsel %vm3246_vm1, %v6134_v44, %v6138_v25  ;;  %v3617_v22 = vor.u32 %v3615_v17, %v3605_v53  ;;  %v3621_v32 = vrot.slane %v3619_v43, 1  ;;  %v6152_v26 = vshll.u32 %v25139_v51, 16  ;;  %v25161_v17 = vld [vmem:[#allocation2] sm:$0xff] }
 0x29e   : > { %3976 = vmatmul.mubr.bf16.gmra.mrb[96].mxu1 %v3582_v49  ;;  %v3593_v49 = vor.u32 %v3591_v50, %v3581_v19  ;;  %v18487_v40 = vcombine.high %v3015_v15, %v3015_v15  ;;  %v6163_v46 = vsel %vm3246_vm1, %v6158_v57, %v6162_v34  ;;  %v6150_v62 = vor.u32 %v6148_v47, %v6138_v25  ;;  %v25166_v47 = vld [vmem:[#allocation2 + $0x6c] ss:$8 sps:$4 sm:$0xff]  }
 0x29f   : > { %3983 = vmatprep.mubr.bf16.mxu1 %v3606_v41  ;;  %7537 = vmatpush1.bf16.msra.mxu0 %v22026_v55  ;;  %v25149_v41 = vcombine.low %v24886_v23, %v25097_v14  ;;  %v3597_v55 = vrot.slane %v3595_v56, 1  ;;  %v6172_v19 = vshrl.u32 %v25095_v8, 16  ;;  %v22042_v23 = vld [vmem:[%s26752_s4 + $0x298] sm:$0xff]   ;;  %v6176_v53 = vshll.u32 %v22030_v4, 16 }
 0x2a0   : > { %7538 = vmatprep.subr.bf16.mxu0 %v24563_v13  ;;  %v3607_v44 = vshrl.u32 %v25128_v60, 16  ;;  %v3622_v43 = vsel %vm3246_vm1, %v3617_v22, %v3621_v32  ;;  %v6154_v8 = vrot.slane %v6152_v26, 1  ;;  %v3631_v25 = vshrl.u32 %v25122_v36, 16 }
 0x2a1   : > { %v3598_v13 = vsel %vm3246_vm1, %v3593_v49, %v3597_v55  ;;  %v3611_v50 = vshll.u32 %v25149_v41, 16  ;;  %v3635_v57 = vshll.u32 %v18487_v40, 16  ;;  %v6174_v56 = vor.u32 %v6172_v19, %v6162_v34 }
 0x2a2   : > { %6685 = vmatmul.mubr.bf16.gmra.mrb[20].mxu0 %v6139_v11  ;;  %v22047_v11 = vld [vmem:[%s26752_s4 + $0x2a0] sm:$0xff]   ;;  %v6178_v49 = vrot.slane %v6176_v53, 1  ;;  %v6155_v22 = vsel %vm3246_vm1, %v6150_v62, %v6154_v8  ;;  %v3633_v26 = vor.u32 %v3631_v25, %v3621_v32  ;;  %v6192_v19 = vshll.u32 %v25166_v47, 16 }
 0x2a3   : > { %6692 = vmatprep.mubr.bf16.mxu0 %v6163_v46  ;;  %7539 = vmatpush1.bf16.msra.mxu0 %v22035_v37  ;;  %v22034_v37 = vld [vmem:[#allocation2 + $0x58] ss:$8 sps:$4 sm:$0xff]   ;;  %v3609_v46 = vor.u32 %v3607_v44, %v3597_v55  ;;  %v3613_v28 = vrot.slane %v3611_v50, 1  ;;  %v3637_v40 = vrot.slane %v3635_v57, 1  ;;  %v6188_v53 = vshrl.u32 %v22030_v4, 16  ;;  %v22059_v4 = vld [vmem:[%s26752_s4 + $0x2b0] sm:$0xff]  }
 0x2a4   : > { %7540 = vmatprep.subr.bf16.mxu0 %v25161_v17  ;;  %v6179_v34 = vsel %vm3246_vm1, %v6174_v56, %v6178_v49  ;;  %v3623_v62 = vshrl.u32 %v25149_v41, 16  ;;  %v25181_v44 = vld [vmem:[#allocation2 + $0x68] ss:$8 sps:$4 sm:$0xff]   ;;  %v6194_v57 = vrot.slane %v6192_v19, 1  ;;  %v25185_v56 = vld [vmem:[#allocation2 + $0x7c] ss:$8 sps:$4 sm:$0xff]  }
 0x2a5   : > { %v3614_v55 = vsel %vm3246_vm1, %v3609_v46, %v3613_v28  ;;  %v3638_v50 = vsel %vm3246_vm1, %v3633_v26, %v3637_v40  ;;  %v6190_v25 = vor.u32 %v6188_v53, %v6178_v49  ;;  %v6180_v49 = vshrl.u32 %v22034_v37, 16  ;;  %v7942_v40 = vld [vmem:[#allocation2 + $0x168] sm:$0xff] }
 0x2a6   : > { %3984 = vmatmul.mubr.bf16.gmra.mrb[100].mxu1 %v3598_v13  ;;  %v18486_v13 = vcombine.low %v3015_v15, %v3015_v15  ;;  %v22053_v15 = vld [vmem:[%s26752_s4 + $0x2a8] sm:$0xff]   ;;  %v3625_v46 = vor.u32 %v3623_v62, %v3613_v28  ;;  %v6204_v19 = vshrl.u32 %v25166_v47, 16  ;;  %v26887_v62 = vrot.slane %v24147_v24, 1  ;;  %v22071_v24 = vld [vmem:[%s26752_s4 + $0x2c0] sm:$0xff]  }
 0x2a7   : > { %3991 = vmatprep.mubr.bf16.mxu1 %v3622_v43  ;;  %7541 = vmatpush1.bf16.msra.mxu0 %v22042_v23  ;;  %v6164_v23 = vshrl.u32 %v25139_v51, 16  ;;  %v6168_v43 = vshll.u32 %v22034_v37, 16 }
 0x2a8   : > { %7542 = vmatprep.subr.bf16.mxu0 %v25161_v17  ;;  %v3627_v32 = vshll.u32 %v18486_v13, 16 }
 0x2a9   : > { %v6166_v51 = vor.u32 %v6164_v23, %v6154_v8  ;;  %v4508_v8 = vrot.slane %v24880_v39, 1  ;;  %v6208_v23 = vshll.u32 %v25185_v56, 16 }
 0x2aa   : > { %6693 = vmatmul.mubr.bf16.gmra.mrb[24].mxu0 %v6155_v22  ;;  %v3629_v13 = vrot.slane %v3627_v32, 1  ;;  %v6184_v22 = vshll.u32 %v25181_v44, 16 }
 0x2ab   : > { %6700 = vmatprep.mubr.bf16.mxu0 %v6179_v34  ;;  %7543 = vmatpush1.bf16.msra.mxu0 %v22047_v11  ;;  %v6170_v11 = vrot.slane %v6168_v43, 1  ;;  %v6195_v34 = vsel %vm3246_vm1, %v6190_v25, %v6194_v57  ;;  %v22066_v43 = vld [vmem:[%s26752_s4 + $0x2b8] sm:$0xff]   ;;  %v4509_v32 = vsel %vm4431_vm0, %v26887_v62, %v4508_v8 }
 0x2ac   : > { %7544 = vmatprep.subr.bf16.mxu0 %v25161_v17  ;;  %v3630_v39 = vsel %vm3246_vm1, %v3625_v46, %v3629_v13  ;;  %v6186_v37 = vrot.slane %v6184_v22, 1  ;;  %v25213_v25 = vld [vmem:[#allocation2 + $0x178] sm:$0xff]  ;;  %v4506_v22 = vrot.slane %v24891_v45, 1 }
 0x2ad   : > { %v6171_v26 = vsel %vm3246_vm1, %v6166_v51, %v6170_v11  ;;  %v6182_v28 = vor.u32 %v6180_v49, %v6170_v11  ;;  %v25211_v51 = vld [vmem:[#allocation2 + $0x8c] ss:$8 sps:$4 sm:$0xff]   ;;  %v6206_v11 = vor.u32 %v6204_v19, %v6194_v57  ;;  %v4512_v57 = vrot.slane %v24883_v63, 1 }
 0x2ae   : > { %3992 = vmatmul.mubr.bf16.gmra.mrb[104].mxu1 %v3614_v55  ;;  %v7943_v55 = vld [vmem:[#allocation2 + $0x170] sm:$0xff] }
 0x2af   : > { %3999 = vmatprep.mubr.bf16.mxu1 %v3638_v50  ;;  %7545 = vmatpush1.bf16.msra.mxu0 %v22053_v15  ;;  %v25200_v15 = vld [vmem:[#allocation2 + $0x160] sm:$0xff]  ;;  %v25223_v49 = vcombine.low %v7943_v55, %v25213_v25 }
 0x2b0   : > { %7546 = vmatprep.subr.bf16.mxu0 %v25161_v17  ;;  %v19061_v53 = vcombine.high %v25200_v15, %v7942_v40  ;;  %v19060_v47 = vcombine.low %v25200_v15, %v7942_v40  ;;  %v25209_v50 = vld [vmem:[#allocation2 + $0x78] ss:$8 sps:$4 sm:$0xff]   ;;  %v6187_v40 = vsel %vm3246_vm1, %v6182_v28, %v6186_v37 }
 0x2b1   : > { %26889 = vst [vmem:[#allocation60_spill] sm:$0xff] %v25223_v49  ;;  %v6200_v19 = vshll.u32 %v25209_v50, 16 }
 0x2b2   : > { %6701 = vmatmul.mubr.bf16.gmra.mrb[28].mxu0 %v6171_v26  ;;  %v9276_v46 = vshll.u32 %v19061_v53, 16  ;;  %v9268_v13 = vshll.u32 %v19060_v47, 16  ;;  %v25220_v26 = vcombine.high %v7943_v55, %v25213_v25  ;;  %v9288_v28 = vshrl.u32 %v19061_v53, 16 }
 0x2b3   : > { %6708 = vmatprep.mubr.bf16.mxu0 %v6195_v34  ;;  %7547 = vmatpush1.bf16.msra.mxu0 %v22059_v4  ;;  %v6210_v4 = vrot.slane %v6208_v23, 1  ;;  %v6196_v34 = vshrl.u32 %v25181_v44, 16  ;;  %v6220_v23 = vshrl.u32 %v25185_v56, 16  ;;  %v9280_v62 = vshrl.u32 %v19060_v47, 16  ;;  %v22077_v44 = vld [vmem:[%s26752_s4 + $0x2c8] sm:$0xff]  }
 0x2b4   : > { %7548 = vmatprep.subr.bf16.mxu0 %v25161_v17  ;;  %26888 = vst [vmem:[#allocation59_spill] sm:$0xff] %v25220_v26  ;;  %v25229_v45 = vrot.slane %v9276_v46, 1  ;;  %v9292_v63 = vshll.u32 %v25220_v26, 16  ;;  %v26890_v56 = vrot.slane %v24163_v20, 1 }
 0x2b5   : > { %v6211_v55 = vsel %vm3246_vm1, %v6206_v11, %v6210_v4  ;;  %v6222_v20 = vor.u32 %v6220_v23, %v6210_v4 }
 0x2b6   : > { %4000 = vmatmul.mubr.bf16.gmra.mrb[108].mxu1 %v3630_v39  ;;  %v25234_v39 = vrot.slane %v9268_v13, 1  ;;  %v4507_v46 = vsel %vm4431_vm0, %v26890_v56, %v4506_v22  ;;  %v9290_v11 = vor.u32 %v9288_v28, %v25229_v45  ;;  %v25247_v53 = vrot.slane %v9292_v63, 1  ;;  %v22082_v28 = vld [vmem:[%s26752_s4 + $0x2d0] sm:$0xff]  }
 0x2b7   : > { %4850 = vmatprep.mubr.bf16.mxu1 %v4509_v32  ;;  %7549 = vmatpush1.bf16.msra.mxu0 %v22066_v43  ;;  %v6224_v43 = vshll.u32 %v25211_v51, 16  ;;  %v9284_v32 = vshll.u32 %v25223_v49, 16  ;;  %v4513_v13 = vsel %vm4431_vm0, %v4508_v8, %v4512_v57  ;;  %v6236_v63 = vshrl.u32 %v25211_v51, 16 }
 0x2b8   : > { %7550 = vmatprep.subr.bf16.mxu0 %v25161_v17  ;;  %v9282_v47 = vor.u32 %v9280_v62, %v25234_v39  ;;  %v25255_v56 = vsel %vm3246_vm1, %v9290_v11, %v25247_v53  ;;  %v4516_v62 = vrot.slane %v24940_v2, 1  ;;  %v22093_v2 = vld [vmem:[%s26752_s4 + $0x2e0] sm:$0xff]  }
 0x2b9   : > { %v25251_v26 = vrot.slane %v9284_v32, 1  ;;  %v6226_v49 = vrot.slane %v6224_v43, 1 }
 0x2ba   : > { %6709 = vmatmul.mubr.bf16.gmra.mrb[32].mxu0 %v6187_v40  ;;  %v6202_v40 = vrot.slane %v6200_v19, 1  ;;  %v6212_v19 = vshrl.u32 %v25209_v50, 16  ;;  %v4517_v50 = vsel %vm4431_vm0, %v4512_v57, %v4516_v62 }
 0x2bb   : > { %6716 = vmatprep.mubr.bf16.mxu0 %v6211_v55  ;;  %7551 = vmatpush1.bf16.msra.mxu0 %v22071_v24  ;;  %v6198_v24 = vor.u32 %v6196_v34, %v6186_v37  ;;  %v22046_v55 = vld [vmem:[#allocation2 + $0x88] ss:$8 sps:$4 sm:$0xff]   ;;  %v25262_v8 = vsel %vm3246_vm1, %v9282_v47, %v25251_v26  ;;  %v4510_v37 = vrot.slane %v24907_v61, 1  ;;  %v22048_v34 = vld [vmem:[#allocation2 + $0x9c] ss:$8 sps:$4 sm:$0xff]   ;;  %v6227_v43 = vsel %vm3246_vm1, %v6222_v20, %v6226_v49 }
 0x2bc   : > { %7552 = vmatprep.subr.bf16.mxu0 %v25161_v17  ;;  %v6216_v23 = vshll.u32 %v22046_v55, 16  ;;  %v22088_v61 = vld [vmem:[%s26752_s4 + $0x2d8] sm:$0xff]   ;;  %v6240_v32 = vshll.u32 %v22048_v34, 16  ;;  %v6238_v51 = vor.u32 %v6236_v63, %v6226_v49  ;;  %v4520_v20 = vrot.slane %v25072_v27, 1 }
 0x2bd   : > { %v6203_v4 = vsel %vm3246_vm1, %v6198_v24, %v6202_v40  ;;  %v22050_v47 = vld [vmem:[#allocation2 + $0x98] ss:$8 sps:$4 sm:$0xff]   ;;  %v22051_v24 = vld [vmem:[#allocation2 + $0xac] ss:$8 sps:$4 sm:$0xff]   ;;  %v4514_v49 = vrot.slane %v25010_v16, 1 }
 0x2be   : > { %4851 = vmatmul.mubr.bf16.vlgmr.msra.gmra.mrb[88].mxu1 %v4507_v46  ;;  %v6214_v46 = vor.u32 %v6212_v19, %v6202_v40  ;;  %v6218_v11 = vrot.slane %v6216_v23, 1  ;;  %v6252_v40 = vshrl.u32 %v22048_v34, 16  ;;  %v22098_v19 = vld [vmem:[%s26752_s4 + $0x2e8] sm:$0xff]   ;;  %v4521_v27 = vsel %vm4431_vm0, %v4516_v62, %v4520_v20 }
 0x2bf   : > { %4858 = vmatprep.mubr.bf16.mxu1 %v4513_v13  ;;  %7553 = vmatpush1.bf16.msra.mxu0 %v22077_v44  ;;  %v4511_v44 = vsel %vm4431_vm0, %v4506_v22, %v4510_v37  ;;  %v6242_v13 = vrot.slane %v6240_v32, 1  ;;  %v4515_v23 = vsel %vm4431_vm0, %v4510_v37, %v4514_v49  ;;  %v22054_v34 = vld [vmem:[#allocation2 + $0xa8] ss:$8 sps:$4 sm:$0xff]   ;;  %v4518_v37 = vrot.slane %v25128_v60, 1 }
 0x2c0   : > { %7554 = vmatprep.subr.bf16.mxu0 %v25161_v17  ;;  %v6219_v22 = vsel %vm3246_vm1, %v6214_v46, %v6218_v11  ;;  %v4524_v46 = vrot.slane %v25122_v36, 1  ;;  %v6248_v60 = vshll.u32 %v22054_v34, 16 }
 0x2c1   : > { %v6243_v57 = vsel %vm3246_vm1, %v6238_v51, %v6242_v13  ;;  %v6254_v63 = vor.u32 %v6252_v40, %v6242_v13  ;;  %v6268_v13 = vshrl.u32 %v22051_v24, 16  ;;  %v4519_v36 = vsel %vm4431_vm0, %v4514_v49, %v4518_v37 }
 0x2c2   : > { %6717 = vmatmul.mubr.bf16.gmra.mrb[36].mxu0 %v6203_v4  ;;  %v6232_v4 = vshll.u32 %v22050_v47, 16 }
 0x2c3   : > { %6724 = vmatprep.mubr.bf16.mxu0 %v6227_v43  ;;  %7555 = vmatpush1.bf16.msra.mxu0 %v22082_v28  ;;  %v6228_v28 = vshrl.u32 %v22046_v55, 16  ;;  %v6256_v43 = vshll.u32 %v22051_v24, 16 }
 0x2c4   : > { %7556 = vmatprep.subr.bf16.mxu0 %v25161_v17  ;;  %v6234_v16 = vrot.slane %v6232_v4, 1  ;;  %v22107_v4 = vld [vmem:[%s26752_s4 + $0x2f8] sm:$0xff]  }
 0x2c5   : > { %v6230_v55 = vor.u32 %v6228_v28, %v6218_v11  ;;  %v6258_v32 = vrot.slane %v6256_v43, 1  ;;  %v6244_v11 = vshrl.u32 %v22050_v47, 16  ;;  %v4525_v47 = vsel %vm4431_vm0, %v4520_v20, %v4524_v46 }
 0x2c6   : > { %4859 = vmatmul.mubr.bf16.gmra.mrb[92].mxu1 %v4511_v44 }
 0x2c7   : > { %4866 = vmatprep.mubr.bf16.mxu1 %v4517_v50  ;;  %7557 = vmatpush1.bf16.msra.mxu0 %v22088_v61  ;;  %v22102_v61 = vld [vmem:[%s26752_s4 + $0x2f0] sm:$0xff]   ;;  %v6235_v50 = vsel %vm3246_vm1, %v6230_v55, %v6234_v16  ;;  %v6259_v51 = vsel %vm3246_vm1, %v6254_v63, %v6258_v32  ;;  %v4522_v63 = vrot.slane %v25149_v41, 1 }
 0x2c8   : > { %7558 = vmatprep.subr.bf16.mxu0 %v25161_v17 }
 0x2c9   : > { %v4523_v41 = vsel %vm4431_vm0, %v4518_v37, %v4522_v63 }
 0x2ca   : > { %6725 = vmatmul.mubr.bf16.gmra.mrb[40].mxu0 %v6219_v22  ;;  %v22634_v22 = vld [vmem:[#allocation2 + $0xbc] ss:$8 sps:$4 sm:$0xff]  }
 0x2cb   : > { %6732 = vmatprep.mubr.bf16.mxu0 %v6243_v57  ;;  %7559 = vmatpush1.bf16.msra.mxu0 %v22093_v2  ;;  %v6272_v28 = vshll.u32 %v22634_v22, 16  ;;  %v4200_v57 = vld [vmem:[#allocation2 + $0x180] sm:$0x11] }
 0x2cc   : > { %7560 = vmatprep.subr.bf16.mxu0 %v25161_v17  ;;  %v18585_v24 = vcombine.high %v4200_v57, %v4200_v57 }
 0x2cd   : > { %v6274_v43 = vrot.slane %v6272_v28, 1 }
 0x2ce   : > { %4867 = vmatmul.mubr.bf16.gmra.mrb[96].mxu1 %v4515_v23  ;;  %v6270_v23 = vor.u32 %v6268_v13, %v6258_v32  ;;  %v6284_v32 = vshrl.u32 %v22634_v22, 16  ;;  %v22637_v22 = vld [vmem:[#allocation2 + $0xc8] ss:$8 sps:$4 sm:$0xff]  }
 0x2cf   : > { %4874 = vmatprep.mubr.bf16.mxu1 %v4521_v27  ;;  %7561 = vmatpush1.bf16.msra.mxu0 %v22098_v19  ;;  %v6246_v19 = vor.u32 %v6244_v11, %v6234_v16  ;;  %v6250_v27 = vrot.slane %v6248_v60, 1  ;;  %v22636_v11 = vld [vmem:[#allocation2 + $0xcc] ss:$8 sps:$4 sm:$0xff]   ;;  %v18584_v60 = vcombine.low %v4200_v57, %v4200_v57 }
 0x2d0   : > { %7562 = vmatprep.subr.bf16.mxu0 %v25161_v17  ;;  %v6275_v20 = vsel %vm3246_vm1, %v6270_v23, %v6274_v43  ;;  %v6288_v13 = vshll.u32 %v22636_v11, 16 }
 0x2d1   : > { %v25294_v44 = vpop.f32.mrb[16].mxu1  ;;  %v4526_v23 = vrot.slane %v18584_v60, 1 }
 0x2d2   : > { %v3819_v62 = vpop.f32.mrb[17].mxu1  ;;  %6733 = vmatmul.mubr.bf16.gmra.mrb[44].mxu0 %v6235_v50  ;;  %v4528_v50 = vrot.slane %v18585_v24, 1 }
 0x2d3   : > { %v25301_v2 = vpop.f32.mrb[18].mxu1  ;;  %6740 = vmatprep.mubr.bf16.mxu0 %v6259_v51  ;;  %7563 = vmatpush1.bf16.msra.mxu0 %v22102_v61  ;;  %v6251_v61 = vsel %vm3246_vm1, %v6246_v19, %v6250_v27  ;;  %v6260_v62 = vshrl.u32 %v22054_v34, 16  ;;  %v22635_v51 = vld [vmem:[#allocation2 + $0xb8] ss:$8 sps:$4 sm:$0xff]   ;;  %v6290_v19 = vrot.slane %v6288_v13, 1 }
 0x2d4   : > { %v3822_v40 = vpop.f32.mrb[19].mxu1  ;;  %7564 = vmatprep.subr.bf16.mxu0 %v25161_v17 }
 0x2d5   : > { %v6264_v40 = vshll.u32 %v22635_v51, 16 }
 0x2d6   : > { %4875 = vmatmul.mubr.bf16.gmra.mrb[100].mxu1 %v4519_v36  ;;  %v6262_v36 = vor.u32 %v6260_v62, %v6250_v27 }
 0x2d7   : > { %4882 = vmatprep.mubr.bf16.mxu1 %v4525_v47  ;;  %7565 = vmatpush1.bf16.msra.mxu0 %v22107_v4  ;;  %v4529_v4 = vsel %vm4431_vm0, %v4524_v46, %v4528_v50  ;;  %v6266_v34 = vrot.slane %v6264_v40, 1  ;;  %v6286_v47 = vor.u32 %v6284_v32, %v6274_v43  ;;  %v22638_v46 = vld [vmem:[#allocation2 + $0xdc] ss:$8 sps:$4 sm:$0xff]   ;;  %v4527_v43 = vsel %vm4431_vm0, %v4522_v63, %v4526_v23  ;;  %v9912_v32 = vld [vmem:[#allocation2 + $0x168] sm:$0xff] }
 0x2d8   : > { %8320 = vmatprep.subr.bf16.mxu0 %v25161_v17  ;;  %v6304_v27 = vshll.u32 %v22638_v46, 16  ;;  %v19159_v13 = vcombine.high %v25200_v15, %v9912_v32 }
 0x2d9   : > { %v3825_v55 = vpop.f32.mrb[20].mxu1  ;;  %v6291_v37 = vsel %vm3246_vm1, %v6286_v47, %v6290_v19 }
 0x2da   : > { %v3827_v49 = vpop.f32.mrb[21].mxu1  ;;  %6741 = vmatmul.mubr.bf16.gmra.mrb[48].mxu0 %v6251_v61  ;;  %v6276_v55 = vshrl.u32 %v22635_v51, 16  ;;  %v6280_v61 = vshll.u32 %v22637_v22, 16  ;;  %v9913_v51 = vld [vmem:[#allocation2 + $0x170] sm:$0xff]  ;;  %v25326_v47 = vrot.slane %v19159_v13, 1 }
 0x2db   : > { %v25313_v16 = vpop.f32.mrb[22].mxu1  ;;  %6748 = vmatprep.mubr.bf16.mxu0 %v6275_v20  ;;  %v6267_v49 = vsel %vm3246_vm1, %v6262_v36, %v6266_v34  ;;  %v19161_v60 = vcombine.high %v9913_v51, %v25213_v25  ;;  %v6306_v36 = vrot.slane %v6304_v27, 1 }
 0x2dc   : > { %v3830_v28 = vpop.f32.mrb[23].mxu1  ;;  %v6278_v62 = vor.u32 %v6276_v55, %v6266_v34  ;;  %v6282_v40 = vrot.slane %v6280_v61, 1 }
 0x2dd   : > { %v6300_v28 = vshrl.u32 %v22636_v11, 16  ;;  %v25332_v34 = vrot.slane %v19161_v60, 1 }
 0x2de   : > { %4883 = vmatmul.mubr.bf16.gmra.mrb[104].mxu1 %v4523_v41  ;;  %v19158_v41 = vcombine.low %v25200_v15, %v9912_v32  ;;  %v6283_v55 = vsel %vm3246_vm1, %v6278_v62, %v6282_v40  ;;  %v6292_v15 = vshrl.u32 %v22637_v22, 16 }
 0x2df   : > { %4890 = vmatprep.mubr.bf16.mxu1 %v4529_v4  ;;  %v19160_v4 = vcombine.low %v9913_v51, %v25213_v25  ;;  %v6302_v11 = vor.u32 %v6300_v28, %v6290_v19  ;;  %v22640_v28 = vld [vmem:[#allocation2 + $0xec] ss:$8 sps:$4 sm:$0xff]  }
 0x2e0   : > { %v6320_v27 = vshll.u32 %v22640_v28, 16 }
 0x2e1   : > { %v25317_v24 = vpop.f32.mrb[24].mxu1  ;;  %v25334_v23 = vrot.slane %v19160_v4, 1  ;;  %v6307_v25 = vsel %vm3246_vm1, %v6302_v11, %v6306_v36  ;;  %v22641_v11 = vld [vmem:[#allocation2 + $0xe8] ss:$8 sps:$4 sm:$0xff]  }
 0x2e2   : > { %26891 = vst [vmem:[#allocation61_spill] sm:$0xff] %v25317_v24  ;;  %v3835_v20 = vpop.f32.mrb[25].mxu1  ;;  %6749 = vmatmul.mubr.bf16.gmra.mrb[52].mxu0 %v6267_v49  ;;  %v25328_v49 = vrot.slane %v19158_v41, 1  ;;  %v6322_v51 = vrot.slane %v6320_v27, 1  ;;  %v22650_v24 = vld [vmem:[#allocation2 + $0x13c] ss:$8 sps:$4 sm:$0xff]  }
 0x2e3   : > { %v3836_v57 = vpop.f32.mrb[26].mxu1  ;;  %6756 = vmatprep.mubr.bf16.mxu0 %v6291_v37  ;;  %v22639_v20 = vld [vmem:[#allocation2 + $0xd8] ss:$8 sps:$4 sm:$0xff]  }
 0x2e4   : > { %v3838_v50 = vpop.f32.mrb[27].mxu1  ;;  %v6296_v37 = vshll.u32 %v22639_v20, 16  ;;  %v6316_v57 = vshrl.u32 %v22638_v46, 16  ;;  %v6294_v46 = vor.u32 %v6292_v15, %v6282_v40  ;;  %v6308_v4 = vshrl.u32 %v22639_v20, 16 }
 0x2e5   : > { %v25343_v50 = vsel %vm4431_vm0, %v25326_v47, %v25332_v34 }
 0x2e6   : > { %4891 = vmatmul.mubr.bf16.gmra.mrb[108].mxu1 %v4527_v43  ;;  %v25348_v43 = vsel %vm4431_vm0, %v25328_v49, %v25334_v23  ;;  %v6298_v62 = vrot.slane %v6296_v37, 1  ;;  %v6318_v32 = vor.u32 %v6316_v57, %v6306_v36 }
 0x2e8   : > { %v6299_v41 = vsel %vm3246_vm1, %v6294_v46, %v6298_v62  ;;  %v6310_v15 = vor.u32 %v6308_v4, %v6298_v62 }
 0x2e9   : > { %v25330_v63 = vpop.f32.mrb[28].mxu1 }
 0x2ea   : > { %26892 = vst [vmem:[#allocation62_spill] sm:$0xff] %v25330_v63  ;;  %v3843_v61 = vpop.f32.mrb[29].mxu1  ;;  %6757 = vmatmul.mubr.bf16.gmra.mrb[56].mxu0 %v6283_v55  ;;  %v6312_v55 = vshll.u32 %v22641_v11, 16  ;;  %v6332_v63 = vshrl.u32 %v22640_v28, 16 }
 0x2eb   : > { %v25338_v19 = vpop.f32.mrb[30].mxu1  ;;  %6764 = vmatprep.mubr.bf16.mxu0 %v6307_v25  ;;  %v6323_v61 = vsel %vm3246_vm1, %v6318_v32, %v6322_v51 }
 0x2ec   : > { %26893 = vst [vmem:[#allocation63_spill] sm:$0xff] %v25338_v19  ;;  %v3846_v22 = vpop.f32.mrb[31].mxu1  ;;  %v6314_v36 = vrot.slane %v6312_v55, 1  ;;  %v6334_v37 = vor.u32 %v6332_v63, %v6322_v51 }
 0x2ed   : > { %v22642_v22 = vld [vmem:[#allocation2 + $0xfc] ss:$8 sps:$4 sm:$0xff]  }
 0x2ee   : > { %v6336_v40 = vshll.u32 %v22642_v22, 16  ;;  %v6315_v20 = vsel %vm3246_vm1, %v6310_v15, %v6314_v36 }
 0x2f0   : > { %v6338_v27 = vrot.slane %v6336_v40, 1 }
 0x2f1   : > { %v3849_v13 = vpop.f32.mrb[32].mxu1 }
 0x2f2   : > { %v3851_v60 = vpop.f32.mrb[33].mxu1  ;;  %6765 = vmatmul.mubr.bf16.gmra.mrb[60].mxu0 %v6299_v41  ;;  %v6324_v13 = vshrl.u32 %v22641_v11, 16  ;;  %v6339_v32 = vsel %vm3246_vm1, %v6334_v37, %v6338_v27 }
 0x2f3   : > { %v25352_v19 = vpop.f32.mrb[34].mxu1  ;;  %6772 = vmatprep.mubr.bf16.mxu0 %v6323_v61  ;;  %v6348_v60 = vshrl.u32 %v22642_v22, 16  ;;  %v22643_v61 = vld [vmem:[#allocation2 + $0xf8] ss:$8 sps:$4 sm:$0xff]  }
 0x2f4   : > { %26894 = vst [vmem:[#allocation64_spill] sm:$0xff] %v25352_v19  ;;  %v3854_v25 = vpop.f32.mrb[35].mxu1  ;;  %v22644_v19 = vld [vmem:[#allocation2 + $0x10c] ss:$8 sps:$4 sm:$0xff]   ;;  %v6326_v4 = vor.u32 %v6324_v13, %v6314_v36  ;;  %v22646_v36 = vld [vmem:[#allocation2 + $0x108] ss:$8 sps:$4 sm:$0xff]  }
 0x2f5   : > { %v6328_v25 = vshll.u32 %v22643_v61, 16  ;;  %v6352_v62 = vshll.u32 %v22644_v19, 16  ;;  %v6350_v63 = vor.u32 %v6348_v60, %v6338_v27  ;;  %v6344_v27 = vshll.u32 %v22646_v36, 16 }
 0x2f7   : > { %v6330_v51 = vrot.slane %v6328_v25, 1  ;;  %v6354_v40 = vrot.slane %v6352_v62, 1  ;;  %v6346_v62 = vrot.slane %v6344_v27, 1 }
 0x2f9   : > { %v25354_v57 = vpop.f32.mrb[36].mxu1  ;;  %v6331_v15 = vsel %vm3246_vm1, %v6326_v4, %v6330_v51  ;;  %v6355_v37 = vsel %vm3246_vm1, %v6350_v63, %v6354_v40 }
 0x2fa   : > { %26895 = vst [vmem:[#allocation65_spill] sm:$0xff] %v25354_v57  ;;  %v3859_v46 = vpop.f32.mrb[37].mxu1  ;;  %6773 = vmatmul.mubr.bf16.gmra.mrb[64].mxu0 %v6315_v20  ;;  %v6340_v20 = vshrl.u32 %v22643_v61, 16 }
 0x2fb   : > { %v3860_v41 = vpop.f32.mrb[38].mxu1  ;;  %6780 = vmatprep.mubr.bf16.mxu0 %v6339_v32  ;;  %v6364_v46 = vshrl.u32 %v22644_v19, 16  ;;  %v22645_v32 = vld [vmem:[#allocation2 + $0x11c] ss:$8 sps:$4 sm:$0xff]  }
 0x2fc   : > { %v3862_v28 = vpop.f32.mrb[39].mxu1  ;;  %v6368_v41 = vshll.u32 %v22645_v32, 16  ;;  %v6342_v13 = vor.u32 %v6340_v20, %v6330_v51 }
 0x2fd   : > { %v6366_v60 = vor.u32 %v6364_v46, %v6354_v40 }
 0x2fe   : > { %v6370_v25 = vrot.slane %v6368_v41, 1  ;;  %v6347_v4 = vsel %vm3246_vm1, %v6342_v13, %v6346_v62 }
 0x300   : > { %v6371_v19 = vsel %vm3246_vm1, %v6366_v60, %v6370_v25 }
 0x301   : > { %v25358_v55 = vpop.f32.mrb[40].mxu1 }
 0x302   : > { %26896 = vst [vmem:[#allocation66_spill] sm:$0xff] %v25358_v55  ;;  %v3867_v11 = vpop.f32.mrb[41].mxu1  ;;  %6781 = vmatmul.mubr.bf16.gmra.mrb[68].mxu0 %v6331_v15  ;;  %v6356_v15 = vshrl.u32 %v22646_v36, 16 }
 0x303   : > { %v25362_v22 = vpop.f32.mrb[42].mxu1  ;;  %6788 = vmatprep.mubr.bf16.mxu0 %v6355_v37  ;;  %v22647_v11 = vld [vmem:[#allocation2 + $0x118] ss:$8 sps:$4 sm:$0xff]   ;;  %v6380_v37 = vshrl.u32 %v22645_v32, 16 }
 0x304   : > { %26897 = vst [vmem:[#allocation67_spill] sm:$0xff] %v25362_v22  ;;  %v3870_v28 = vpop.f32.mrb[43].mxu1  ;;  %v6360_v63 = vshll.u32 %v22647_v11, 16  ;;  %v6358_v40 = vor.u32 %v6356_v15, %v6346_v62  ;;  %v6372_v13 = vshrl.u32 %v22647_v11, 16 }
 0x305   : > { %v22648_v28 = vld [vmem:[#allocation2 + $0x12c] ss:$8 sps:$4 sm:$0xff]   ;;  %v6382_v46 = vor.u32 %v6380_v37, %v6370_v25 }
 0x306   : > { %v6384_v57 = vshll.u32 %v22648_v28, 16  ;;  %v6362_v20 = vrot.slane %v6360_v63, 1 }
 0x308   : > { %v6363_v36 = vsel %vm3246_vm1, %v6358_v40, %v6362_v20  ;;  %v6374_v15 = vor.u32 %v6372_v13, %v6362_v20 }
 0x309   : > { %v3873_v55 = vpop.f32.mrb[44].mxu1 }
 0x30a   : > { %v3875_v61 = vpop.f32.mrb[45].mxu1  ;;  %6789 = vmatmul.mubr.bf16.gmra.mrb[72].mxu0 %v6347_v4  ;;  %v6386_v55 = vrot.slane %v6384_v57, 1  ;;  %v22649_v4 = vld [vmem:[#allocation2 + $0x128] ss:$8 sps:$4 sm:$0xff]  }
 0x30b   : > { %v25366_v22 = vpop.f32.mrb[46].mxu1  ;;  %6796 = vmatprep.mubr.bf16.mxu0 %v6371_v19  ;;  %v6376_v61 = vshll.u32 %v22649_v4, 16  ;;  %v6400_v19 = vshll.u32 %v22650_v24, 16  ;;  %v6388_v40 = vshrl.u32 %v22649_v4, 16  ;;  %v18771_v4 = vcombine.high %v24991_v12, %v25012_v18 }
 0x30c   : > { %26898 = vst [vmem:[#allocation68_spill] sm:$0xff] %v25366_v22  ;;  %v3878_v51 = vpop.f32.mrb[47].mxu1  ;;  %v6387_v60 = vsel %vm3246_vm1, %v6382_v46, %v6386_v55  ;;  %v6396_v22 = vshrl.u32 %v22648_v28, 16 }
 0x30d   : > { %v6378_v25 = vrot.slane %v6376_v61, 1  ;;  %v6402_v63 = vrot.slane %v6400_v19, 1 }
 0x30e   : > { %v6398_v57 = vor.u32 %v6396_v22, %v6386_v55 }
 0x30f   : > { %v6379_v51 = vsel %vm3246_vm1, %v6374_v15, %v6378_v25  ;;  %v6390_v22 = vor.u32 %v6388_v40, %v6378_v25  ;;  %v6428_v25 = vshrl.u32 %v24981_v0, 16  ;;  %v6432_v40 = vshll.u32 %v18771_v4, 16 }
 0x310   : > { %v6403_v46 = vsel %vm3246_vm1, %v6398_v57, %v6402_v63  ;;  %v6408_v57 = vshll.u32 %v24983_v1, 16 }
 0x311   : > { %v25368_v41 = vpop.f32.mrb[48].mxu1 }
 0x312   : > { %v3883_v27 = vpop.f32.mrb[49].mxu1  ;;  %6797 = vmatmul.mubr.bf16.gmra.mrb[76].mxu0 %v6363_v36 }
 0x313   : > { %v3884_v32 = vpop.f32.mrb[50].mxu1  ;;  %6804 = vmatprep.mubr.bf16.mxu0 %v6387_v60  ;;  %v22651_v27 = vld [vmem:[#allocation2 + $0x138] ss:$8 sps:$4 sm:$0xff]   ;;  %v6416_v60 = vshll.u32 %v24981_v0, 16 }
 0x314   : > { %v3886_v62 = vpop.f32.mrb[51].mxu1  ;;  %v6392_v36 = vshll.u32 %v22651_v27, 16  ;;  %v6412_v32 = vshrl.u32 %v22650_v24, 16 }
 0x315   : > { %v6418_v61 = vrot.slane %v6416_v60, 1  ;;  %v18770_v60 = vcombine.low %v24991_v12, %v25012_v18  ;;  %v22653_v18 = vld [vmem:[#allocation2 + $0x180] sm:$0xff] }
 0x316   : > { %v6394_v55 = vrot.slane %v6392_v36, 1  ;;  %v6414_v13 = vor.u32 %v6412_v32, %v6402_v63 }
 0x317   : > { %v6430_v32 = vor.u32 %v6428_v25, %v6418_v61 }
 0x318   : > { %v6395_v62 = vsel %vm3246_vm1, %v6390_v22, %v6394_v55  ;;  %v6419_v24 = vsel %vm3246_vm1, %v6414_v13, %v6418_v61  ;;  %v22652_v13 = vld [vmem:[#allocation2 + $0x148] ss:$8 sps:$4 sm:$0xff]   ;;  %v6448_v61 = vshll.u32 %v25014_v30, 16 }
 0x319   : > { %v25372_v37 = vpop.f32.mrb[52].mxu1 }
 0x31a   : > { %26899 = vst [vmem:[#allocation69_spill] sm:$0xff] %v25372_v37  ;;  %v3891_v11 = vpop.f32.mrb[53].mxu1  ;;  %6805 = vmatmul.mubr.bf16.gmra.mrb[80].mxu0 %v6379_v51  ;;  %v6404_v51 = vshrl.u32 %v22651_v27, 16  ;;  %v6434_v27 = vrot.slane %v6432_v40, 1  ;;  %v6450_v40 = vrot.slane %v6448_v61, 1 }
 0x31b   : > { %v25376_v28 = vpop.f32.mrb[54].mxu1  ;;  %6812 = vmatprep.mubr.bf16.mxu0 %v6403_v46  ;;  %v6410_v46 = vrot.slane %v6408_v57, 1  ;;  %v22684_v37 = vld [vmem:[#allocation2 + $0x64] ss:$8 sps:$4 sm:$0xff]  }
 0x31c   : > { %26900 = vst [vmem:[#allocation70_spill] sm:$0xff] %v25376_v28  ;;  %v3894_v20 = vpop.f32.mrb[55].mxu1  ;;  %v6406_v36 = vor.u32 %v6404_v51, %v6394_v55  ;;  %v6435_v0 = vsel %vm3246_vm1, %v6430_v32, %v6434_v27  ;;  %v6424_v51 = vshll.u32 %v18770_v60, 16  ;;  %v6436_v32 = vshrl.u32 %v18770_v60, 16 }
 0x31e   : > { %v6411_v1 = vsel %vm3246_vm1, %v6406_v36, %v6410_v46  ;;  %v6426_v25 = vrot.slane %v6424_v51, 1 }
 0x321   : > { %v3897_v19 = vpop.f32.mrb[56].mxu1 }
 0x322   : > { %v3899_v15 = vpop.f32.mrb[57].mxu1  ;;  %6813 = vmatmul.mubr.bf16.gmra.mrb[84].mxu0 %v6395_v62  ;;  %v6420_v19 = vshrl.u32 %v22652_v13, 16  ;;  %v22654_v13 = vld [vmem:[#allocation2 + $0x16c] ss:$8 sps:$4 sm:$0xff]  }
 0x323   : > { %v25384_v11 = vpop.f32.mrb[58].mxu1  ;;  %6820 = vmatprep.mubr.bf16.mxu0 %v6419_v24  ;;  %v6444_v15 = vshrl.u32 %v18771_v4, 16  ;;  %v18775_v24 = vcombine.high %v25097_v14, %v22653_v18  ;;  %v6460_v30 = vshrl.u32 %v22654_v13, 16 }
 0x324   : > { %26901 = vst [vmem:[#allocation71_spill] sm:$0xff] %v25384_v11  ;;  %v3902_v63 = vpop.f32.mrb[59].mxu1  ;;  %v6422_v57 = vor.u32 %v6420_v19, %v6410_v46  ;;  %v22655_v19 = vld [vmem:[#allocation2 + $0x168] ss:$8 sps:$4 sm:$0xff]  }
 0x325   : > { %v6446_v12 = vor.u32 %v6444_v15, %v6434_v27  ;;  %v6464_v46 = vshll.u32 %v18775_v24, 16  ;;  %v18774_v15 = vcombine.low %v25097_v14, %v22653_v18  ;;  %v5877_v14 = vld [vmem:[#allocation2 + $0x198] sm:$0x11] }
 0x326   : > { %v6427_v36 = vsel %vm3246_vm1, %v6422_v57, %v6426_v25 }
 0x327   : > { %v6451_v4 = vsel %vm3246_vm1, %v6446_v12, %v6450_v40  ;;  %v6466_v51 = vrot.slane %v6464_v46, 1  ;;  %v6452_v12 = vshrl.u32 %v22655_v19, 16  ;;  %v18779_v46 = vcombine.high %v5877_v14, %v5877_v14 }
 0x329   : > { %v25389_v20 = vpop.f32.mrb[60].mxu1 }
 0x32a   : > { %26902 = vst [vmem:[#allocation72_spill] sm:$0xff] %v25389_v20  ;;  %v3907_v22 = vpop.f32.mrb[61].mxu1  ;;  %6821 = vmatmul.mubr.bf16.gmra.mrb[88].mxu0 %v6411_v1 }
 0x32b   : > { %v3908_v62 = vpop.f32.mrb[62].mxu1  ;;  %6828 = vmatprep.mubr.bf16.mxu0 %v6435_v0  ;;  %v6440_v0 = vshll.u32 %v22655_v19, 16 }
 0x32c   : > { %v3910_v55 = vpop.f32.mrb[63].mxu1  ;;  %v6438_v62 = vor.u32 %v6436_v32, %v6426_v25 }
 0x32d   : > { %v6462_v55 = vor.u32 %v6460_v30, %v6450_v40  ;;  %v6442_v61 = vrot.slane %v6440_v0, 1 }
 0x32f   : > { %v6443_v60 = vsel %vm3246_vm1, %v6438_v62, %v6442_v61  ;;  %v6467_v13 = vsel %vm3246_vm1, %v6462_v55, %v6466_v51  ;;  %v6454_v18 = vor.u32 %v6452_v12, %v6442_v61  ;;  %v22657_v55 = vld [vmem:[#allocation2 + $0x188] ss:$8 sps:$4 sm:$0xff]  }
 0x331   : > { %v25395_v63 = vpop.f32.mrb[64].mxu1 }
 0x332   : > { %26903 = vst [vmem:[#allocation73_spill] sm:$0xff] %v25395_v63  ;;  %v3915_v1 = vpop.f32.mrb[65].mxu1  ;;  %6829 = vmatmul.mubr.bf16.gmra.mrb[92].mxu0 %v6427_v36 }
 0x333   : > { %v25399_v22 = vpop.f32.mrb[66].mxu1  ;;  %6836 = vmatprep.mubr.bf16.mxu0 %v6451_v4  ;;  %v6456_v1 = vshll.u32 %v18774_v15, 16  ;;  %v6476_v4 = vshrl.u32 %v18775_v24, 16 }
 0x334   : > { %26904 = vst [vmem:[#allocation74_spill] sm:$0xff] %v25399_v22  ;;  %v3918_v27 = vpop.f32.mrb[67].mxu1 }
 0x335   : > { %v22656_v27 = vld [vmem:[#allocation2 + $0x18c] ss:$8 sps:$4 sm:$0xff]   ;;  %v6458_v40 = vrot.slane %v6456_v1, 1  ;;  %v6478_v32 = vor.u32 %v6476_v4, %v6466_v51 }
 0x336   : > { %v6480_v63 = vshll.u32 %v22656_v27, 16 }
 0x337   : > { %v6459_v19 = vsel %vm3246_vm1, %v6454_v18, %v6458_v40 }
 0x338   : > { %v6482_v30 = vrot.slane %v6480_v63, 1  ;;  %v18778_v63 = vcombine.low %v5877_v14, %v5877_v14 }
 0x339   : > { %v3921_v57 = vpop.f32.mrb[68].mxu1 }
 0x33a   : > { %v3923_v36 = vpop.f32.mrb[69].mxu1  ;;  %6837 = vmatmul.mubr.bf16.gmra.mrb[96].mxu0 %v6443_v60  ;;  %v6468_v57 = vshrl.u32 %v18774_v15, 16  ;;  %v6472_v60 = vshll.u32 %v22657_v55, 16  ;;  %v6483_v24 = vsel %vm3246_vm1, %v6478_v32, %v6482_v30 }
 0x33b   : > { %v25404_v22 = vpop.f32.mrb[70].mxu1  ;;  %6844 = vmatprep.mubr.bf16.mxu0 %v6467_v13  ;;  %v6492_v13 = vshrl.u32 %v22656_v27, 16 }
 0x33c   : > { %26905 = vst [vmem:[#allocation75_spill] sm:$0xff] %v25404_v22  ;;  %v3926_v25 = vpop.f32.mrb[71].mxu1  ;;  %v6470_v12 = vor.u32 %v6468_v57, %v6458_v40  ;;  %v6474_v51 = vrot.slane %v6472_v60, 1 }
 0x33d   : > { %v6496_v25 = vshll.u32 %v18779_v46, 16  ;;  %v6494_v1 = vor.u32 %v6492_v13, %v6482_v30  ;;  %v22111_v46 = vld [vmem:[#allocation2 + $0x1c] ss:$8 sps:$4 sm:$0xfe]  }
 0x33e   : > { %v6475_v15 = vsel %vm3246_vm1, %v6470_v12, %v6474_v51  ;;  %v7295_v60 = vrot.slane %v22111_v46, 1  ;;  %v22114_v46 = vld [vmem:[%s26752_s4 + $0x300] sm:$0xff]  }
 0x33f   : > { %v6498_v4 = vrot.slane %v6496_v25, 1 }
 0x341   : > { %v25406_v0 = vpop.f32.mrb[72].mxu1  ;;  %v6499_v32 = vsel %vm3246_vm1, %v6494_v1, %v6498_v4  ;;  %v22659_v4 = vld [vmem:[#allocation2 + $0x40] sm:$0xff] }
 0x342   : > { %26906 = vst [vmem:[#allocation76_spill] sm:$0xff] %v25406_v0  ;;  %v3931_v62 = vpop.f32.mrb[73].mxu1  ;;  %6845 = vmatmul.mubr.bf16.gmra.mrb[100].mxu0 %v6459_v19  ;;  %v7015_v0 = vld [vmem:[#allocation2 + $0x28] sm:$0xff]  ;;  %v6488_v19 = vshll.u32 %v18778_v63, 16 }
 0x343   : > { %v3932_v36 = vpop.f32.mrb[74].mxu1  ;;  %6852 = vmatprep.mubr.bf16.mxu0 %v6483_v24  ;;  %v6484_v62 = vshrl.u32 %v22657_v55, 16  ;;  %v22658_v24 = vld [vmem:[#allocation2 + $0x30] sm:$0xff]  ;;  %v22109_v55 = vld [vmem:[#allocation2 + $0x18] ss:$8 sps:$4 sm:$0xfe]  }
 0x344   : > { %v3934_v61 = vpop.f32.mrb[75].mxu1  ;;  %v18831_v40 = vcombine.high %v7015_v0, %v22658_v24  ;;  %v6490_v57 = vrot.slane %v6488_v19, 1  ;;  %v18830_v12 = vcombine.low %v7015_v0, %v22658_v24 }
 0x345   : > { %v6486_v30 = vor.u32 %v6484_v62, %v6474_v51  ;;  %v7292_v51 = vrot.slane %v22109_v55, 1  ;;  %v22118_v55 = vld [vmem:[%s26752_s4 + $0x308] sm:$0xff]  }
 0x346   : > { %v7296_v36 = vrot.slane %v18831_v40, 1  ;;  %v7293_v62 = vrot.slane %v18830_v12, 1 }
 0x347   : > { %v6491_v25 = vsel %vm3246_vm1, %v6486_v30, %v6490_v57 }
 0x348   : > { %v7297_v63 = vsel %vm4431_vm0, %v7295_v60, %v7296_v36  ;;  %v7294_v0 = vsel %vm4431_vm0, %v7292_v51, %v7293_v62  ;;  %v22661_v60 = vld [vmem:[#allocation2 + $0x48] sm:$0xff]  ;;  %v22664_v51 = vld [vmem:[#allocation2 + $0x60] sm:$0xff] }
 0x349   : > { %v25410_v22 = vpop.f32.mrb[76].mxu1 }
 0x34a   : > { %26907 = vst [vmem:[#allocation77_spill] sm:$0xff] %v25410_v22  ;;  %v3939_v18 = vpop.f32.mrb[77].mxu1  ;;  %6853 = vmatmul.mubr.bf16.gmra.mrb[104].mxu0 %v6475_v15  ;;  %v22660_v15 = vld [vmem:[#allocation2 + $0x38] sm:$0xff] }
 0x34b   : > { %v25414_v27 = vpop.f32.mrb[78].mxu1  ;;  %6860 = vmatprep.mubr.bf16.mxu0 %v6499_v32  ;;  %v18833_v18 = vcombine.high %v22660_v15, %v22659_v4 }
 0x34c   : > { %26908 = vst [vmem:[#allocation78_spill] sm:$0xff] %v25414_v27  ;;  %v3942_v14 = vpop.f32.mrb[79].mxu1 }
 0x34d   : > { %v7300_v19 = vrot.slane %v18833_v18, 1  ;;  %v18832_v14 = vcombine.low %v22660_v15, %v22659_v4 }
 0x34f   : > { %v7301_v30 = vsel %vm4431_vm0, %v7296_v36, %v7300_v19  ;;  %v7298_v12 = vrot.slane %v18832_v14, 1  ;;  %v22122_v36 = vld [vmem:[%s26752_s4 + $0x310] sm:$0xff]  }
 0x351   : > { %v3945_v13 = vpop.f32.mrb[80].mxu1  ;;  %v7299_v4 = vsel %vm4431_vm0, %v7293_v62, %v7298_v12  ;;  %v22130_v62 = vld [vmem:[%s26752_s4 + $0x320] sm:$0xff]  }
 0x352   : > { %v3947_v61 = vpop.f32.mrb[81].mxu1  ;;  %6861 = vmatmul.mubr.bf16.gmra.mrb[108].mxu0 %v6491_v25  ;;  %v22662_v13 = vld [vmem:[#allocation2 + $0x50] sm:$0xff] }
 0x353   : > { %v25418_v1 = vpop.f32.mrb[82].mxu1  ;;  %7566 = vmatprep.mubr.bf16.mxu0 %v7297_v63  ;;  %v18835_v25 = vcombine.high %v22661_v60, %v22662_v13  ;;  %v18834_v15 = vcombine.low %v22661_v60, %v22662_v13  ;;  %v22666_v13 = vld [vmem:[#allocation2 + $0x68] sm:$0xff] }
 0x354   : > { %26909 = vst [vmem:[#allocation79_spill] sm:$0xff] %v25418_v1  ;;  %v3950_v32 = vpop.f32.mrb[83].mxu1 }
 0x355   : > { %v7304_v63 = vrot.slane %v18835_v25, 1  ;;  %v22663_v32 = vld [vmem:[#allocation2 + $0x58] sm:$0xff]  ;;  %v22667_v25 = vld [vmem:[#allocation2 + $0x70] sm:$0xff] }
 0x357   : > { %v7305_v18 = vsel %vm4431_vm0, %v7300_v19, %v7304_v63 }
 0x359   : > { %v25423_v40 = vpop.f32.mrb[84].mxu1 }
 0x35a   : > { %26910 = vst [vmem:[#allocation80_spill] sm:$0xff] %v25423_v40  ;;  %v3955_v24 = vpop.f32.mrb[85].mxu1  ;;  %7567 = vmatmul.mubr.bf16.vlgmr.msra.gmra.mrb[16].mxu0 %v7294_v0  ;;  %v22126_v0 = vld [vmem:[%s26752_s4 + $0x318] sm:$0xff]  }
 0x35b   : > { %v3956_v57 = vpop.f32.mrb[86].mxu1  ;;  %8321 = vmatpush1.bf16.msra.mxu0 %v22114_v46  ;;  %7574 = vmatprep.mubr.bf16.mxu0 %v7301_v30  ;;  %v18837_v46 = vcombine.high %v22663_v32, %v22664_v51  ;;  %v7302_v24 = vrot.slane %v18834_v15, 1  ;;  %v25444_v30 = vld [vmem:[#allocation2] sm:$0xff] }
 0x35c   : > { %v3958_v61 = vpop.f32.mrb[87].mxu1  ;;  %8322 = vmatprep.subr.bf16.mxu0 %v25161_v17  ;;  %v18836_v57 = vcombine.low %v22663_v32, %v22664_v51  ;;  %v22669_v32 = vld [vmem:[#allocation2 + $0x80] sm:$0xff] }
 0x35d   : > { %v7308_v14 = vrot.slane %v18837_v46, 1  ;;  %v7303_v19 = vsel %vm4431_vm0, %v7298_v12, %v7302_v24  ;;  %v22134_v61 = vld [vmem:[%s26752_s4 + $0x328] sm:$0xff]   ;;  %v22136_v12 = vld [vmem:[%s26752_s4 + $0x330] sm:$0xff]   ;;  %v22137_v46 = vld [vmem:[%s26752_s4 + $0x338] sm:$0xff]  }
 0x35f   : > { %8323 = vmatpush1.bf16.msra.mxu0 %v22118_v55  ;;  %v7309_v60 = vsel %vm4431_vm0, %v7304_v63, %v7308_v14  ;;  %v7306_v55 = vrot.slane %v18836_v57, 1 }
 0x360   : > { %8324 = vmatprep.subr.bf16.mxu0 %v25161_v17 }
 0x361   : > { %v7307_v63 = vsel %vm4431_vm0, %v7302_v24, %v7306_v55  ;;  %v22138_v24 = vld [vmem:[%s26752_s4 + $0x340] sm:$0xff]  }
 0x362   : > { %7575 = vmatmul.mubr.bf16.gmra.mrb[20].mxu0 %v7299_v4  ;;  %v18838_v4 = vcombine.low %v22666_v13, %v22667_v25 }
 0x363   : > { %7582 = vmatprep.mubr.bf16.mxu0 %v7305_v18  ;;  %8325 = vmatpush1.bf16.msra.mxu0 %v22122_v36  ;;  %v22668_v18 = vld [vmem:[#allocation2 + $0x78] sm:$0xff] }
 0x364   : > { %8326 = vmatprep.subr.bf16.mxu0 %v25161_v17  ;;  %v18839_v17 = vcombine.high %v22666_v13, %v22667_v25  ;;  %v18841_v51 = vcombine.high %v22668_v18, %v22669_v32  ;;  %v22671_v13 = vld [vmem:[#allocation2 + $0x90] sm:$0xff] }
 0x366   : > { %v7312_v36 = vrot.slane %v18839_v17, 1  ;;  %v22139_v17 = vld [vmem:[%s26752_s4 + $0x348] sm:$0xff]  }
 0x367   : > { %8327 = vmatpush1.bf16.msra.mxu0 %v22126_v0  ;;  %v7310_v0 = vrot.slane %v18838_v4, 1 }
 0x368   : > { %8328 = vmatprep.subr.bf16.mxu0 %v25444_v30  ;;  %v7313_v15 = vsel %vm4431_vm0, %v7308_v14, %v7312_v36 }
 0x369   : > { %v7311_v14 = vsel %vm4431_vm0, %v7306_v55, %v7310_v0  ;;  %v22140_v55 = vld [vmem:[%s26752_s4 + $0x350] sm:$0xff]  }
 0x36a   : > { %7583 = vmatmul.mubr.bf16.gmra.mrb[24].mxu0 %v7303_v19  ;;  %v18840_v19 = vcombine.low %v22668_v18, %v22669_v32  ;;  %v22672_v18 = vld [vmem:[#allocation2 + $0xa0] sm:$0xff]  ;;  %v22673_v32 = vld [vmem:[#allocation2 + $0x98] sm:$0xff] }
 0x36b   : > { %7590 = vmatprep.mubr.bf16.mxu0 %v7309_v60  ;;  %8329 = vmatpush1.bf16.msra.mxu0 %v22130_v62  ;;  %v7316_v62 = vrot.slane %v18841_v51, 1  ;;  %v22670_v60 = vld [vmem:[#allocation2 + $0x88] sm:$0xff]  ;;  %v18845_v51 = vcombine.high %v22673_v32, %v22672_v18 }
 0x36c   : > { %8330 = vmatprep.subr.bf16.mxu0 %v25444_v30  ;;  %v18843_v25 = vcombine.high %v22670_v60, %v22671_v13 }
 0x36d   : > { %v7317_v57 = vsel %vm4431_vm0, %v7312_v36, %v7316_v62 }
 0x36f   : > { %8331 = vmatpush1.bf16.msra.mxu0 %v22134_v61  ;;  %v7314_v61 = vrot.slane %v18840_v19, 1 }
 0x370   : > { %8332 = vmatprep.subr.bf16.mxu0 %v25444_v30 }
 0x371   : > { %v7315_v36 = vsel %vm4431_vm0, %v7310_v0, %v7314_v61  ;;  %v22142_v0 = vld [vmem:[%s26752_s4 + $0x360] sm:$0xff]  }
 0x372   : > { %7591 = vmatmul.mubr.bf16.gmra.mrb[28].mxu0 %v7307_v63  ;;  %v18842_v63 = vcombine.low %v22670_v60, %v22671_v13  ;;  %v18844_v13 = vcombine.low %v22673_v32, %v22672_v18 }
 0x373   : > { %7598 = vmatprep.mubr.bf16.mxu0 %v7313_v15  ;;  %8333 = vmatpush1.bf16.msra.mxu0 %v22136_v12  ;;  %v7320_v12 = vrot.slane %v18843_v25, 1  ;;  %v22141_v15 = vld [vmem:[%s26752_s4 + $0x358] sm:$0xff]   ;;  %v22145_v25 = vld [vmem:[%s26752_s4 + $0x368] sm:$0xff]  }
 0x374   : > { %8334 = vmatprep.subr.bf16.mxu0 %v25444_v30 }
 0x375   : > { %v7321_v4 = vsel %vm4431_vm0, %v7316_v62, %v7320_v12  ;;  %v7324_v62 = vrot.slane %v18845_v51, 1  ;;  %v22150_v51 = vld [vmem:[%s26752_s4 + $0x378] sm:$0xff]  }
 0x377   : > { %8335 = vmatpush1.bf16.msra.mxu0 %v22137_v46  ;;  %v7318_v46 = vrot.slane %v18842_v63, 1  ;;  %v7325_v19 = vsel %vm4431_vm0, %v7320_v12, %v7324_v62 }
 0x378   : > { %8336 = vmatprep.subr.bf16.mxu0 %v25444_v30 }
 0x37a   : > { %7599 = vmatmul.mubr.bf16.gmra.mrb[32].mxu0 %v7311_v14  ;;  %v7319_v14 = vsel %vm4431_vm0, %v7314_v61, %v7318_v46  ;;  %v22148_v61 = vld [vmem:[%s26752_s4 + $0x370] sm:$0xff]  }
 0x37b   : > { %7606 = vmatprep.mubr.bf16.mxu0 %v7317_v57  ;;  %8337 = vmatpush1.bf16.msra.mxu0 %v22138_v24  ;;  %v25483_v24 = vld [vmem:[#allocation2 + $0xb0] sm:$0xff]  ;;  %v22674_v57 = vld [vmem:[#allocation2 + $0xa8] sm:$0xff] }
 0x37c   : > { %8338 = vmatprep.subr.bf16.mxu0 %v25444_v30  ;;  %v18847_v60 = vcombine.high %v22674_v57, %v25483_v24 }
 0x37f   : > { %8339 = vmatpush1.bf16.msra.mxu0 %v22139_v17  ;;  %v7328_v17 = vrot.slane %v18847_v60, 1 }
 0x380   : > { %8340 = vmatprep.subr.bf16.mxu0 %v25444_v30 }
 0x382   : > { %7607 = vmatmul.mubr.bf16.gmra.mrb[36].mxu0 %v7315_v36 }
 0x383   : > { %7614 = vmatprep.mubr.bf16.mxu0 %v7321_v4  ;;  %8341 = vmatpush1.bf16.msra.mxu0 %v22140_v55  ;;  %v7322_v55 = vrot.slane %v18844_v13, 1  ;;  %v18846_v4 = vcombine.low %v22674_v57, %v25483_v24 }
 0x384   : > { %8342 = vmatprep.subr.bf16.mxu0 %v25444_v30 }
 0x385   : > { %v7323_v36 = vsel %vm4431_vm0, %v7318_v46, %v7322_v55 }
 0x387   : > { %8343 = vmatpush1.bf16.msra.mxu0 %v22141_v15  ;;  %v7329_v15 = vsel %vm4431_vm0, %v7324_v62, %v7328_v17  ;;  %v26913_v62 = vrot.slane %v24594_v9, 1 }
 0x388   : > { %8344 = vmatprep.subr.bf16.mxu0 %v25444_v30 }
 0x389   : > { %v7333_v57 = vsel %vm4431_vm0, %v7328_v17, %v26913_v62 }
 0x38a   : > { %7615 = vmatmul.mubr.bf16.gmra.mrb[40].mxu0 %v7319_v14 }
 0x38b   : > { %7622 = vmatprep.mubr.bf16.mxu0 %v7325_v19  ;;  %8345 = vmatpush1.bf16.msra.mxu0 %v22142_v0  ;;  %v7326_v0 = vrot.slane %v18846_v4, 1 }
 0x38c   : > { %8346 = vmatprep.subr.bf16.mxu0 %v25444_v30 }
 0x38d   : > { %v7327_v14 = vsel %vm4431_vm0, %v7322_v55, %v7326_v0 }
 0x38f   : > { %8347 = vmatpush1.bf16.msra.mxu0 %v22145_v25 }
 0x390   : > { %8348 = vmatprep.subr.bf16.mxu0 %v25444_v30 }
 0x391   : > { %v25499_v12 = vpop.f32.mrb[88].mxu1 }
 0x392   : > { %26911 = vst [vmem:[#allocation81_spill] sm:$0xff] %v25499_v12  ;;  %v4854_v63 = vpop.f32.mrb[89].mxu1  ;;  %7623 = vmatmul.mubr.bf16.gmra.mrb[44].mxu0 %v7323_v36  ;;  %v25762_v12 = vcombine.low %v25444_v30, %v25444_v30 }
 0x393   : > { %v25505_v18 = vpop.f32.mrb[90].mxu1  ;;  %7630 = vmatprep.mubr.bf16.mxu0 %v7329_v15  ;;  %8349 = vmatpush1.bf16.msra.mxu0 %v22148_v61  ;;  %v26916_v61 = vrot.slane %v24600_v29, 1 }
 0x394   : > { %26912 = vst [vmem:[#allocation82_spill] sm:$0xff] %v25505_v18  ;;  %v4857_v32 = vpop.f32.mrb[91].mxu1  ;;  %8350 = vmatprep.subr.bf16.mxu0 %v25444_v30 }
 0x395   : > { %v7331_v36 = vsel %vm4431_vm0, %v7326_v0, %v26916_v61  ;;  %v26926_v61 = vld [vmem:[#allocation25_spill] sm:$0xff] }
 0x397   : > { %8351 = vmatpush1.bf16.msra.mxu0 %v22150_v51 }
 0x398   : > { %9504 = vmatprep.subr.bf16.mxu0 %v25444_v30 }
 0x399   : > { %v4860_v46 = vpop.f32.mrb[92].mxu1 }
 0x39a   : > { %v4862_v19 = vpop.f32.mrb[93].mxu1  ;;  %7631 = vmatmul.mubr.bf16.gmra.mrb[48].mxu0 %v7327_v14 }
 0x39b   : > { %v25516_v60 = vpop.f32.mrb[94].mxu1  ;;  %7638 = vmatprep.mubr.bf16.mxu0 %v7333_v57  ;;  %v26921_v19 = vld [vmem:[#allocation16_spill] sm:$0xff]  ;;  %v26923_v57 = vld [vmem:[#allocation18_spill] sm:$0xff] }
 0x39c   : > { %26914 = vst [vmem:[#allocation83_spill] sm:$0xff] %v25516_v60  ;;  %v4865_v13 = vpop.f32.mrb[95].mxu1 }
 0x39d   : > { %v26924_v13 = vld [vmem:[#allocation22_spill] sm:$0xff] }
 0x3a1   : > { %v25518_v25 = vpop.f32.mrb[96].mxu1 }
 0x3a2   : > { %26915 = vst [vmem:[#allocation84_spill] sm:$0xff] %v25518_v25  ;;  %v4870_v63 = vpop.f32.mrb[97].mxu1  ;;  %7639 = vmatmul.mubr.bf16.gmra.mrb[52].mxu0 %v7331_v36  ;;  %v26928_v36 = vld [vmem:[#allocation30_spill] sm:$0xff] }
 0x3a3   : > { %v4871_v4 = vpop.f32.mrb[98].mxu1  ;;  %7646 = vmatprep.mubr.bf16.mxu0 %v24638_v7  ;;  %v26929_v63 = vld [vmem:[#allocation34_spill] sm:$0xff] }
 0x3a4   : > { %v4873_v55 = vpop.f32.mrb[99].mxu1  ;;  %v7061_v4 = vld [vmem:[#allocation2 + $0x198] sm:$0x11] }
 0x3a5   : > { %v18877_v55 = vcombine.high %v7061_v4, %v7061_v4 }
 0x3a9   : > { %v25524_v15 = vpop.f32.mrb[100].mxu1 }
 0x3aa   : > { %26917 = vst [vmem:[#allocation85_spill] sm:$0xff] %v25524_v15  ;;  %v4878_v9 = vpop.f32.mrb[101].mxu1  ;;  %7647 = vmatmul.mubr.bf16.gmra.mrb[56].mxu0 %v24647_v31  ;;  %v22680_v15 = vld [vmem:[#allocation2 + $0x44] ss:$8 sps:$4 sm:$0xff]  }
 0x3ab   : > { %v25527_v17 = vpop.f32.mrb[102].mxu1  ;;  %7654 = vmatprep.mubr.bf16.mxu0 %v24668_v54  ;;  %v26922_v54 = vld [vmem:[#allocation17_spill] sm:$0xff]  ;;  %v7388_v9 = vrot.slane %v18877_v55, 1  ;;  %v8988_v25 = vshll.u32 %v22680_v15, 16  ;;  %v9000_v22 = vshrl.u32 %v22680_v15, 16 }
 0x3ac   : > { %26918 = vst [vmem:[#allocation86_spill] sm:$0xff] %v25527_v17  ;;  %v4881_v32 = vpop.f32.mrb[103].mxu1  ;;  %v22174_v55 = vld [vmem:[%s26752_s4 + $0x3a8] sm:$0xff]  }
 0x3ad   : > { %v26933_v32 = vld [vmem:[#allocation56_spill] sm:$0xff] }
 0x3b1   : > { %v4884_v51 = vpop.f32.mrb[104].mxu1 }
 0x3b2   : > { %v4886_v29 = vpop.f32.mrb[105].mxu1  ;;  %7655 = vmatmul.mubr.bf16.gmra.mrb[60].mxu0 %v24673_v33  ;;  %v26925_v33 = vld [vmem:[#allocation23_spill] sm:$0xff]  ;;  %v26935_v51 = vld [vmem:[#allocation13_spill] sm:$0xff] }
 0x3b3   : > { %v25531_v0 = vpop.f32.mrb[106].mxu1  ;;  %7662 = vmatprep.mubr.bf16.mxu0 %v24676_v52  ;;  %v26927_v52 = vld [vmem:[#allocation29_spill] sm:$0xff] }
 0x3b4   : > { %26919 = vst [vmem:[#allocation87_spill] sm:$0xff] %v25531_v0  ;;  %v4889_v7 = vpop.f32.mrb[107].mxu1  ;;  %v25744_v0 = vld [vmem:[#allocation2 + $0x180] ss:$8 sps:$4 sm:$0xff]  }
 0x3b5   : > { %v26939_v7 = vld [vmem:[#allocation14_spill] sm:$0xff] }
 0x3b9   : > { %v25534_v46 = vpop.f32.mrb[108].mxu1 }
 0x3ba   : > { %26920 = vst [vmem:[#allocation88_spill] sm:$0xff] %v25534_v46  ;;  %v4894_v14 = vpop.f32.mrb[109].mxu1  ;;  %7663 = vmatmul.mubr.bf16.gmra.mrb[64].mxu0 %v24679_v42  ;;  %v26930_v42 = vld [vmem:[#allocation35_spill] sm:$0xff] }
 0x3bb   : > { %v4895_v31 = vpop.f32.mrb[110].mxu1  ;;  %7670 = vmatprep.mubr.bf16.mxu0 %v26921_v19  ;;  %v26940_v14 = vld [vmem:[#allocation15_spill] sm:$0xff]  ;;  %v22158_v19 = vld [vmem:[%s26752_s4 + $0x388] sm:$0xff]  }
 0x3bc   : > { %v4897_v62 = vpop.f32.mrb[111].mxu1  ;;  %v26941_v31 = vcombine.high %v26939_v7, %v26940_v14  ;;  %v8689_v46 = vld [vmem:[#allocation2 + $0x30] sm:$0xff] }
 0x3bd   : > { %v22162_v62 = vld [vmem:[%s26752_s4 + $0x390] sm:$0xff]  }
 0x3c2   : > { %7671 = vmatmul.mubr.bf16.gmra.mrb[68].mxu0 %v26922_v54  ;;  %v26942_v54 = vcombine.low %v26939_v7, %v26940_v14  ;;  %v26959_v7 = vld [vmem:[#allocation37_spill] sm:$0xff]  ;;  %v26960_v14 = vld [vmem:[#allocation38_spill] sm:$0xff] }
 0x3c3   : > { %7678 = vmatprep.mubr.bf16.mxu0 %v26923_v57  ;;  %v26943_v57 = vld [vmem:[#allocation20_spill] sm:$0xff] }
 0x3ca   : > { %7679 = vmatmul.mubr.bf16.gmra.mrb[72].mxu0 %v26924_v13  ;;  %v26944_v13 = vld [vmem:[#allocation21_spill] sm:$0xff] }
 0x3cb   : > { %7686 = vmatprep.mubr.bf16.mxu0 %v26925_v33  ;;  %v26945_v33 = vcombine.high %v26943_v57, %v26944_v13 }
 0x3d2   : > { %7687 = vmatmul.mubr.bf16.gmra.mrb[76].mxu0 %v26926_v61  ;;  %v22166_v61 = vld [vmem:[%s26752_s4 + $0x398] sm:$0xff]  }
 0x3d3   : > { %7694 = vmatprep.mubr.bf16.mxu0 %v26927_v52  ;;  %v22170_v52 = vld [vmem:[%s26752_s4 + $0x3a0] sm:$0xff]  }
 0x3da   : > { %7695 = vmatmul.mubr.bf16.gmra.mrb[80].mxu0 %v26928_v36  ;;  %v26946_v36 = vcombine.low %v26943_v57, %v26944_v13  ;;  %v26963_v57 = vld [vmem:[#allocation32_spill] sm:$0xff]  ;;  %v26964_v13 = vld [vmem:[#allocation33_spill] sm:$0xff] }
 0x3db   : > { %7702 = vmatprep.mubr.bf16.mxu0 %v26929_v63  ;;  %v26947_v63 = vld [vmem:[#allocation24_spill] sm:$0xff] }
 0x3e2   : > { %7703 = vmatmul.mubr.bf16.gmra.mrb[84].mxu0 %v26930_v42  ;;  %v26948_v42 = vld [vmem:[#allocation26_spill] sm:$0xff] }
 0x3e3   : > { %7710 = vmatprep.mubr.bf16.mxu0 %v25033_v5  ;;  %v18876_v5 = vcombine.low %v7061_v4, %v7061_v4  ;;  %v26949_v4 = vcombine.high %v26947_v63, %v26948_v42 }
 0x3ea   : > { %7711 = vmatmul.mubr.bf16.gmra.mrb[88].mxu0 %v25038_v38  ;;  %v26931_v38 = vld [vmem:[#allocation55_spill] sm:$0xff] }
 0x3eb   : > { %7718 = vmatprep.mubr.bf16.mxu0 %v25086_v35  ;;  %v26932_v35 = vrot.slane %v26931_v38, 1  ;;  %v26951_v38 = vld [vmem:[#allocation27_spill] sm:$0xff] }
 0x3f2   : > { %7719 = vmatmul.mubr.bf16.gmra.mrb[92].mxu0 %v25089_v6  ;;  %v7389_v6 = vsel %vm4431_vm0, %v26932_v35, %v7388_v9  ;;  %v22179_v9 = vld [vmem:[%s26752_s4 + $0x3b0] sm:$0xff]   ;;  %v26952_v35 = vld [vmem:[#allocation28_spill] sm:$0xff] }
 0x3f3   : > { %7726 = vmatprep.mubr.bf16.mxu0 %v25052_v48  ;;  %v7386_v48 = vrot.slane %v18876_v5, 1  ;;  %v26950_v5 = vcombine.low %v26947_v63, %v26948_v42  ;;  %v26966_v42 = vcombine.low %v26963_v57, %v26964_v13 }
 0x3fa   : > { %7727 = vmatmul.mubr.bf16.gmra.mrb[96].mxu0 %v25055_v3  ;;  %v26934_v3 = vrot.slane %v26933_v32, 1  ;;  %v22190_v32 = vld [vmem:[%s26752_s4 + $0x3c0] sm:$0xff]  }
 0x3fb   : > { %7734 = vmatprep.mubr.bf16.mxu0 %v25058_v10 }
 0x3fc   : > { %v7387_v10 = vsel %vm4431_vm0, %v26934_v3, %v7386_v48  ;;  %v22185_v48 = vld [vmem:[%s26752_s4 + $0x3b8] sm:$0xff]   ;;  %v26954_v3 = vcombine.low %v26951_v38, %v26952_v35 }
 0x402   : > { %7735 = vmatmul.mubr.bf16.gmra.mrb[100].mxu0 %v25061_v59  ;;  %v26936_v59 = vld [vmem:[#allocation19_spill] sm:$0xff] }
 0x403   : > { %7742 = vmatprep.mubr.bf16.mxu0 %v25102_v58  ;;  %v26937_v29 = vcombine.high %v26935_v51, %v26936_v59  ;;  %v22154_v58 = vld [vmem:[%s26752_s4 + $0x380] sm:$0xff]  }
 0x40a   : > { %7743 = vmatmul.mubr.bf16.gmra.mrb[104].mxu0 %v25107_v21  ;;  %v26938_v21 = vcombine.low %v26935_v51, %v26936_v59  ;;  %v26956_v51 = vld [vmem:[#allocation36_spill] sm:$0xff] }
 0x40b   : > { %7750 = vmatprep.mubr.bf16.mxu0 %v7389_v6  ;;  %v26953_v6 = vcombine.high %v26951_v38, %v26952_v35  ;;  %v25686_v38 = vld [vmem:[#allocation2 + $0xd4] ss:$8 sps:$4 sm:$0xff]   ;;  %v25690_v35 = vld [vmem:[#allocation2 + $0xd0] ss:$8 sps:$4 sm:$0xff]  }
 0x412   : > { %7751 = vmatmul.mubr.bf16.gmra.mrb[108].mxu0 %v7387_v10  ;;  %v26955_v10 = vld [vmem:[#allocation31_spill] sm:$0xff] }
 0x413   : > { %8352 = vmatprep.mubr.bf16.mxu0 %v26937_v29  ;;  %v26957_v59 = vcombine.high %v26955_v10, %v26956_v51  ;;  %v22196_v29 = vld [vmem:[%s26752_s4 + $0x3c8] sm:$0xff]  }
 0x41a   : > { %8353 = vmatmul.mubr.bf16.vlgmr.msra.gmra.mrb[16].mxu0 %v26938_v21  ;;  %v26958_v21 = vcombine.low %v26955_v10, %v26956_v51  ;;  %v25708_v10 = vld [vmem:[#allocation2 + $0x100] ss:$8 sps:$4 sm:$0xff]   ;;  %v25710_v51 = vld [vmem:[#allocation2 + $0x114] ss:$8 sps:$4 sm:$0xff]  }
 0x41b   : > { %9505 = vmatpush1.bf16.msra.mxu0 %v22154_v58  ;;  %8360 = vmatprep.mubr.bf16.mxu0 %v26941_v31  ;;  %v22201_v58 = vld [vmem:[%s26752_s4 + $0x3d0] sm:$0xff]   ;;  %v26961_v31 = vcombine.high %v26959_v7, %v26960_v14 }
 0x41c   : > { %9506 = vmatprep.subr.bf16.mxu0 %v25444_v30 }
 0x41f   : > { %9507 = vmatpush1.bf16.msra.mxu0 %v22158_v19  ;;  %v22207_v19 = vld [vmem:[%s26752_s4 + $0x3d8] sm:$0xff]  }
 0x420   : > { %9508 = vmatprep.subr.bf16.mxu0 %v25444_v30 }
 0x422   : > { %8361 = vmatmul.mubr.bf16.gmra.mrb[20].mxu0 %v26942_v54  ;;  %v26962_v54 = vcombine.low %v26959_v7, %v26960_v14  ;;  %v25726_v7 = vld [vmem:[#allocation2 + $0x130] ss:$8 sps:$4 sm:$0xff]   ;;  %v25728_v14 = vld [vmem:[#allocation2 + $0x144] ss:$8 sps:$4 sm:$0xff]  }
 0x423   : > { %8368 = vmatprep.mubr.bf16.mxu0 %v26945_v33  ;;  %9509 = vmatpush1.bf16.msra.mxu0 %v22162_v62  ;;  %v22212_v62 = vld [vmem:[%s26752_s4 + $0x3e0] sm:$0xff]   ;;  %v26965_v33 = vcombine.high %v26963_v57, %v26964_v13  ;;  %v22676_v57 = vld [vmem:[#allocation2 + $0x168] sm:$0xff] }
 0x424   : > { %9510 = vmatprep.subr.bf16.mxu0 %v25444_v30 }
 0x427   : > { %9511 = vmatpush1.bf16.msra.mxu0 %v22166_v61  ;;  %v22216_v61 = vld [vmem:[%s26752_s4 + $0x3e8] sm:$0xff]  }
 0x428   : > { %9512 = vmatprep.subr.bf16.mxu0 %v25444_v30 }
 0x42a   : > { %8369 = vmatmul.mubr.bf16.gmra.mrb[24].mxu0 %v26946_v36  ;;  %v25666_v36 = vld [vmem:[#allocation2 + $0xb8] sm:$0xff] }
 0x42b   : > { %8376 = vmatprep.mubr.bf16.mxu0 %v26949_v4  ;;  %9513 = vmatpush1.bf16.msra.mxu0 %v22170_v52  ;;  %v22221_v52 = vld [vmem:[%s26752_s4 + $0x3f0] sm:$0xff]   ;;  %v18943_v63 = vcombine.high %v25483_v24, %v25666_v36  ;;  %v22222_v4 = vld [vmem:[%s26752_s4 + $0x3f8] sm:$0xff]  }
 0x42c   : > { %9514 = vmatprep.subr.bf16.mxu0 %v25444_v30 }
 0x42f   : > { %9515 = vmatpush1.bf16.msra.mxu0 %v22174_v55  ;;  %v18942_v55 = vcombine.low %v25483_v24, %v25666_v36  ;;  %v25696_v24 = vld [vmem:[#allocation2 + $0xe0] ss:$8 sps:$4 sm:$0xff]  }
 0x430   : > { %9516 = vmatprep.subr.bf16.mxu0 %v25444_v30 }
 0x432   : > { %8377 = vmatmul.mubr.bf16.gmra.mrb[28].mxu0 %v26950_v5  ;;  %v25684_v5 = vld [vmem:[#allocation2 + $0xc0] ss:$8 sps:$4 sm:$0xff]  }
 0x433   : > { %8384 = vmatprep.mubr.bf16.mxu0 %v26953_v6  ;;  %9517 = vmatpush1.bf16.msra.mxu0 %v22179_v9  ;;  %v25681_v9 = vld [vmem:[#allocation2 + $0xc4] ss:$8 sps:$4 sm:$0xff]  }
 0x434   : > { %9518 = vmatprep.subr.bf16.mxu0 %v25444_v30  ;;  %v25692_v6 = vld [vmem:[#allocation2 + $0xe4] ss:$8 sps:$4 sm:$0xff]  }
 0x437   : > { %9519 = vmatpush1.bf16.msra.mxu0 %v22185_v48  ;;  %v25698_v48 = vld [vmem:[#allocation2 + $0xf4] ss:$8 sps:$4 sm:$0xff]  }
 0x438   : > { %9520 = vmatprep.subr.bf16.mxu0 %v25444_v30 }
 0x43a   : > { %8385 = vmatmul.mubr.bf16.gmra.mrb[32].mxu0 %v26954_v3  ;;  %v25704_v3 = vld [vmem:[#allocation2 + $0x104] ss:$8 sps:$4 sm:$0xff]  }
 0x43b   : > { %8392 = vmatprep.mubr.bf16.mxu0 %v26957_v59  ;;  %9521 = vmatpush1.bf16.msra.mxu0 %v22190_v32  ;;  %v25702_v32 = vld [vmem:[#allocation2 + $0xf0] ss:$8 sps:$4 sm:$0xff]  }
 0x43c   : > { %9522 = vmatprep.subr.bf16.mxu0 %v25444_v30  ;;  %v25714_v59 = vld [vmem:[#allocation2 + $0x110] ss:$8 sps:$4 sm:$0xff]  }
 0x43f   : > { %9523 = vmatpush1.bf16.msra.mxu0 %v22196_v29  ;;  %v25716_v29 = vld [vmem:[#allocation2 + $0x124] ss:$8 sps:$4 sm:$0xff]  }
 0x440   : > { %9524 = vmatprep.subr.bf16.mxu0 %v25444_v30 }
 0x442   : > { %8393 = vmatmul.mubr.bf16.gmra.mrb[36].mxu0 %v26958_v21  ;;  %v25722_v21 = vld [vmem:[#allocation2 + $0x134] ss:$8 sps:$4 sm:$0xff]  }
 0x443   : > { %8400 = vmatprep.mubr.bf16.mxu0 %v26961_v31  ;;  %9525 = vmatpush1.bf16.msra.mxu0 %v22201_v58  ;;  %v25720_v58 = vld [vmem:[#allocation2 + $0x120] ss:$8 sps:$4 sm:$0xff]  }
 0x444   : > { %9526 = vmatprep.subr.bf16.mxu0 %v25444_v30  ;;  %v25732_v31 = vld [vmem:[#allocation2 + $0x140] ss:$8 sps:$4 sm:$0xff]  }
 0x447   : > { %9527 = vmatpush1.bf16.msra.mxu0 %v22207_v19  ;;  %v25734_v19 = vld [vmem:[#allocation2 + $0x154] ss:$8 sps:$4 sm:$0xff]  }
 0x448   : > { %9528 = vmatprep.subr.bf16.mxu0 %v25444_v30 }
 0x44a   : > { %8401 = vmatmul.mubr.bf16.gmra.mrb[40].mxu0 %v26962_v54  ;;  %v22675_v54 = vld [vmem:[#allocation2 + $0x160] sm:$0xff] }
 0x44b   : > { %8408 = vmatprep.mubr.bf16.mxu0 %v26965_v33  ;;  %9529 = vmatpush1.bf16.msra.mxu0 %v22212_v62  ;;  %v25738_v62 = vld [vmem:[#allocation2 + $0x150] ss:$8 sps:$4 sm:$0xff]   ;;  %v18965_v13 = vcombine.high %v22675_v54, %v22676_v57  ;;  %v18964_v33 = vcombine.low %v22675_v54, %v22676_v57 }
 0x44c   : > { %9530 = vmatprep.subr.bf16.mxu0 %v25444_v30  ;;  %v22679_v54 = vld [vmem:[#allocation2 + $0x38] sm:$0xff] }
 0x44d   : > { %v19023_v57 = vcombine.high %v8689_v46, %v22679_v54 }
 0x44f   : > { %9531 = vmatpush1.bf16.msra.mxu0 %v22216_v61  ;;  %v22677_v61 = vld [vmem:[#allocation2 + $0x178] sm:$0xff] }
 0x450   : > { %9532 = vmatprep.subr.bf16.mxu0 %v25444_v30 }
 0x452   : > { %8409 = vmatmul.mubr.bf16.gmra.mrb[44].mxu0 %v26966_v42 }
 0x453   : > { %8416 = vmatprep.mubr.bf16.mxu0 %v18943_v63  ;;  %9533 = vmatpush1.bf16.msra.mxu0 %v22221_v52  ;;  %v22678_v52 = vld [vmem:[#allocation2 + $0x170] sm:$0xff] }
 0x454   : > { %9534 = vmatprep.subr.bf16.mxu0 %v25444_v30  ;;  %v18967_v63 = vcombine.high %v22678_v52, %v22677_v61  ;;  %v18966_v42 = vcombine.low %v22678_v52, %v22677_v61  ;;  %v25756_v61 = vcombine.high %v25444_v30, %v25444_v30  ;;  %v19022_v52 = vcombine.low %v8689_v46, %v22679_v54  ;;  %v22681_v54 = vld [vmem:[#allocation2 + $0x54] ss:$8 sps:$4 sm:$0xff]  }
 0x456   : > { %v8971_v60 = vshll.u32 %v19022_v52, 16  ;;  %v8969_v40 = vshrl.u32 %v19022_v52, 16  ;;  %v22683_v52 = vld [vmem:[#allocation2 + $0x50] ss:$8 sps:$4 sm:$0xff]  }
 0x457   : > { %9535 = vmatpush1.bf16.msra.mxu0 %v22222_v4  ;;  %v25741_v4 = vld [vmem:[#allocation2 + $0x184] ss:$8 sps:$4 sm:$0xff]   ;;  %v8996_v28 = vshll.u32 %v22683_v52, 16 }
 0x458   : > { %10394 = vmatprep.subr.bf16.mxu0 %v25444_v30  ;;  %v8973_v1 = vrot.slane %v8971_v60, 1 }
 0x45a   : > { %8417 = vmatmul.mubr.bf16.gmra.mrb[48].mxu0 %v18942_v55  ;;  %v7947_v55 = vld [vmem:[#allocation2 + $0x190] sm:$0xff]  ;;  %v8974_v20 = vor.u32 %v8973_v1, %v8969_v40  ;;  %v8998_v40 = vrot.slane %v8996_v28, 1  ;;  %v9008_v28 = vshrl.u32 %v22683_v52, 16 }
 0x45b   : > { %8424 = vmatprep.mubr.bf16.mxu0 %v25681_v9  ;;  %v25747_v17 = vcombine.high %v7947_v55, %v25444_v30 }
 0x462   : > { %8425 = vmatmul.mubr.bf16.gmra.mrb[52].mxu0 %v25684_v5 }
 0x463   : > { %8432 = vmatprep.mubr.bf16.mxu0 %v25686_v38 }
 0x46a   : > { %8433 = vmatmul.mubr.bf16.gmra.mrb[56].mxu0 %v25690_v35 }
 0x46b   : > { %8440 = vmatprep.mubr.bf16.mxu0 %v25692_v6 }
 0x472   : > { %8441 = vmatmul.mubr.bf16.gmra.mrb[60].mxu0 %v25696_v24 }
 0x473   : > { %8448 = vmatprep.mubr.bf16.mxu0 %v25698_v48 }
 0x47a   : > { %8449 = vmatmul.mubr.bf16.gmra.mrb[64].mxu0 %v25702_v32 }
 0x47b   : > { %8456 = vmatprep.mubr.bf16.mxu0 %v25704_v3 }
 0x482   : > { %8457 = vmatmul.mubr.bf16.gmra.mrb[68].mxu0 %v25708_v10 }
 0x483   : > { %8464 = vmatprep.mubr.bf16.mxu0 %v25710_v51 }
 0x48a   : > { %8465 = vmatmul.mubr.bf16.gmra.mrb[72].mxu0 %v25714_v59 }
 0x48b   : > { %8472 = vmatprep.mubr.bf16.mxu0 %v25716_v29 }
 0x492   : > { %8473 = vmatmul.mubr.bf16.gmra.mrb[76].mxu0 %v25720_v58 }
 0x493   : > { %8480 = vmatprep.mubr.bf16.mxu0 %v25722_v21 }
 0x49a   : > { %8481 = vmatmul.mubr.bf16.gmra.mrb[80].mxu0 %v25726_v7 }
 0x49b   : > { %8488 = vmatprep.mubr.bf16.mxu0 %v25728_v14 }
 0x4a2   : > { %8489 = vmatmul.mubr.bf16.gmra.mrb[84].mxu0 %v25732_v31 }
 0x4a3   : > { %8496 = vmatprep.mubr.bf16.mxu0 %v25734_v19 }
 0x4aa   : > { %8497 = vmatmul.mubr.bf16.gmra.mrb[88].mxu0 %v25738_v62 }
 0x4ab   : > { %8504 = vmatprep.mubr.bf16.mxu0 %v18965_v13  ;;  %v8983_v13 = vshll.u32 %v19023_v57, 16 }
 0x4b2   : > { %8505 = vmatmul.mubr.bf16.gmra.mrb[92].mxu0 %v18964_v33  ;;  %v25752_v33 = vcombine.low %v7947_v55, %v25444_v30  ;;  %v8990_v55 = vrot.slane %v8988_v25, 1  ;;  %v22228_v25 = vld [vmem:[%s26752_s4 + $0x400] sm:$0xff]  }
 0x4b3   : > { %8512 = vmatprep.mubr.bf16.mxu0 %v18967_v63  ;;  %v8981_v63 = vshrl.u32 %v19023_v57, 16  ;;  %v9004_v57 = vshll.u32 %v22681_v54, 16 }
 0x4b4   : > { %v9002_v11 = vor.u32 %v9000_v22, %v8990_v55  ;;  %v22234_v22 = vld [vmem:[%s26752_s4 + $0x408] sm:$0xff]  }
 0x4ba   : > { %8513 = vmatmul.mubr.bf16.gmra.mrb[96].mxu0 %v18966_v42  ;;  %v8985_v42 = vrot.slane %v8983_v13, 1  ;;  %v22682_v13 = vld [vmem:[#allocation2 + $0x40] ss:$8 sps:$4 sm:$0xff]  }
 0x4bb   : > { %8520 = vmatprep.mubr.bf16.mxu0 %v25741_v4  ;;  %v8976_v27 = vshll.u32 %v22682_v13, 16  ;;  %v8992_v15 = vshrl.u32 %v22682_v13, 16  ;;  %v22685_v13 = vld [vmem:[#allocation2 + $0x60] ss:$8 sps:$4 sm:$0xff]  }
 0x4bc   : > { %v8986_v18 = vor.u32 %v8985_v42, %v8981_v63  ;;  %v9006_v63 = vrot.slane %v9004_v57, 1 }
 0x4bd   : > { %v8978_v42 = vrot.slane %v8976_v27, 1  ;;  %v9016_v27 = vshrl.u32 %v22681_v54, 16 }
 0x4be   : > { %v8991_v46 = vsel %vm3246_vm1, %v8986_v18, %v8990_v55  ;;  %v9007_v18 = vsel %vm3246_vm1, %v9002_v11, %v9006_v63  ;;  %v22239_v11 = vld [vmem:[%s26752_s4 + $0x410] sm:$0xff]  }
 0x4bf   : > { %v8979_v60 = vsel %vm3246_vm1, %v8974_v20, %v8978_v42  ;;  %v8994_v1 = vor.u32 %v8992_v15, %v8978_v42  ;;  %v9018_v20 = vor.u32 %v9016_v27, %v9006_v63  ;;  %v22245_v63 = vld [vmem:[%s26752_s4 + $0x418] sm:$0xff]  }
 0x4c1   : > { %v8999_v57 = vsel %vm3246_vm1, %v8994_v1, %v8998_v40  ;;  %v9024_v1 = vshrl.u32 %v22685_v13, 16 }
 0x4c2   : > { %8521 = vmatmul.mubr.bf16.gmra.mrb[100].mxu0 %v25744_v0 }
 0x4c3   : > { %8528 = vmatprep.mubr.bf16.mxu0 %v25747_v17 }
 0x4ca   : > { %8529 = vmatmul.mubr.bf16.gmra.mrb[104].mxu0 %v25752_v33 }
 0x4cb   : > { %8536 = vmatprep.mubr.bf16.mxu0 %v25756_v61 }
 0x4d2   : > { %8537 = vmatmul.mubr.bf16.gmra.mrb[108].mxu0 %v25762_v12 }
 0x4d3   : > { %9536 = vmatprep.mubr.bf16.mxu0 %v8991_v46  ;;  %v9020_v46 = vshll.u32 %v22684_v37, 16 }
 0x4d5   : > { %v9022_v55 = vrot.slane %v9020_v46, 1  ;;  %v9010_v46 = vor.u32 %v9008_v28, %v8998_v40  ;;  %v22688_v40 = vld [vmem:[#allocation2 + $0x84] ss:$8 sps:$4 sm:$0xff]  }
 0x4d7   : > { %v9023_v54 = vsel %vm3246_vm1, %v9018_v20, %v9022_v55  ;;  %v22687_v20 = vld [vmem:[#allocation2 + $0x70] ss:$8 sps:$4 sm:$0xff]  }
 0x4da   : > { %9537 = vmatmul.mubr.bf16.vlgmr.msra.gmra.mrb[16].mxu0 %v8979_v60  ;;  %v9032_v60 = vshrl.u32 %v22684_v37, 16  ;;  %v22250_v37 = vld [vmem:[%s26752_s4 + $0x420] sm:$0xff]  }
 0x4db   : > { %10395 = vmatpush1.bf16.msra.mxu0 %v22228_v25  ;;  %9544 = vmatprep.mubr.bf16.mxu0 %v9007_v18  ;;  %v9012_v25 = vshll.u32 %v22685_v13, 16  ;;  %v22686_v18 = vld [vmem:[#allocation2 + $0x74] ss:$8 sps:$4 sm:$0xff]  }
 0x4dc   : > { %10396 = vmatprep.subr.bf16.mxu0 %v25444_v30  ;;  %v9036_v42 = vshll.u32 %v22686_v18, 16 }
 0x4dd   : > { %v9014_v15 = vrot.slane %v9012_v25, 1  ;;  %v9052_v25 = vshll.u32 %v22688_v40, 16 }
 0x4de   : > { %v9038_v27 = vrot.slane %v9036_v42, 1 }
 0x4df   : > { %10397 = vmatpush1.bf16.msra.mxu0 %v22234_v22  ;;  %v9034_v22 = vor.u32 %v9032_v60, %v9022_v55  ;;  %v9015_v52 = vsel %vm3246_vm1, %v9010_v46, %v9014_v15  ;;  %v22253_v55 = vld [vmem:[%s26752_s4 + $0x428] sm:$0xff]   ;;  %v9026_v60 = vor.u32 %v9024_v1, %v9014_v15  ;;  %v9054_v13 = vrot.slane %v9052_v25, 1  ;;  %v22255_v15 = vld [vmem:[%s26752_s4 + $0x438] sm:$0xff]  }
 0x4e0   : > { %10398 = vmatprep.subr.bf16.mxu0 %v25444_v30  ;;  %v9040_v46 = vshrl.u32 %v22687_v20, 16 }
 0x4e2   : > { %9545 = vmatmul.mubr.bf16.gmra.mrb[20].mxu0 %v8999_v57  ;;  %v9039_v57 = vsel %vm3246_vm1, %v9034_v22, %v9038_v27  ;;  %v22689_v22 = vld [vmem:[#allocation2 + $0x80] ss:$8 sps:$4 sm:$0xff]  }
 0x4e3   : > { %9552 = vmatprep.mubr.bf16.mxu0 %v9023_v54  ;;  %10399 = vmatpush1.bf16.msra.mxu0 %v22239_v11  ;;  %v9028_v11 = vshll.u32 %v22687_v20, 16  ;;  %v9048_v54 = vshrl.u32 %v22686_v18, 16  ;;  %v22256_v20 = vld [vmem:[%s26752_s4 + $0x440] sm:$0xff]  }
 0x4e4   : > { %10400 = vmatprep.subr.bf16.mxu0 %v25444_v30 }
 0x4e5   : > { %v9030_v42 = vrot.slane %v9028_v11, 1  ;;  %v9050_v28 = vor.u32 %v9048_v54, %v9038_v27  ;;  %v22690_v27 = vld [vmem:[#allocation2 + $0x94] ss:$8 sps:$4 sm:$0xff]  }
 0x4e6   : > { %v9068_v1 = vshll.u32 %v22690_v27, 16 }
 0x4e7   : > { %10401 = vmatpush1.bf16.msra.mxu0 %v22245_v63  ;;  %v22254_v63 = vld [vmem:[%s26752_s4 + $0x430] sm:$0xff]   ;;  %v9031_v18 = vsel %vm3246_vm1, %v9026_v60, %v9030_v42  ;;  %v9042_v11 = vor.u32 %v9040_v46, %v9030_v42  ;;  %v9056_v60 = vshrl.u32 %v22689_v22, 16  ;;  %v22692_v46 = vld [vmem:[#allocation2 + $0xa4] ss:$8 sps:$4 sm:$0xff]  }
 0x4e8   : > { %10402 = vmatprep.subr.bf16.mxu0 %v25444_v30 }
 0x4ea   : > { %9553 = vmatmul.mubr.bf16.gmra.mrb[24].mxu0 %v9015_v52  ;;  %v9055_v52 = vsel %vm3246_vm1, %v9050_v28, %v9054_v13 }
 0x4eb   : > { %9560 = vmatprep.mubr.bf16.mxu0 %v9039_v57  ;;  %10403 = vmatpush1.bf16.msra.mxu0 %v22250_v37  ;;  %v9044_v37 = vshll.u32 %v22689_v22, 16  ;;  %v9064_v57 = vshrl.u32 %v22688_v40, 16 }
 0x4ec   : > { %10404 = vmatprep.subr.bf16.mxu0 %v25444_v30 }
 0x4ed   : > { %v9046_v54 = vrot.slane %v9044_v37, 1  ;;  %v9066_v25 = vor.u32 %v9064_v57, %v9054_v13  ;;  %v22257_v13 = vld [vmem:[%s26752_s4 + $0x448] sm:$0xff]   ;;  %v9084_v37 = vshll.u32 %v22692_v46, 16 }
 0x4ef   : > { %10405 = vmatpush1.bf16.msra.mxu0 %v22253_v55  ;;  %v9070_v55 = vrot.slane %v9068_v1, 1  ;;  %v9047_v40 = vsel %vm3246_vm1, %v9042_v11, %v9046_v54  ;;  %v9086_v11 = vrot.slane %v9084_v37, 1 }
 0x4f0   : > { %10406 = vmatprep.subr.bf16.mxu0 %v25444_v30 }
 0x4f1   : > { %v9071_v28 = vsel %vm3246_vm1, %v9066_v25, %v9070_v55 }
 0x4f2   : > { %9561 = vmatmul.mubr.bf16.gmra.mrb[28].mxu0 %v9031_v18  ;;  %v22691_v18 = vld [vmem:[#allocation2 + $0x90] ss:$8 sps:$4 sm:$0xff]  }
 0x4f3   : > { %9568 = vmatprep.mubr.bf16.mxu0 %v9055_v52  ;;  %10407 = vmatpush1.bf16.msra.mxu0 %v22254_v63  ;;  %v9080_v63 = vshrl.u32 %v22690_v27, 16  ;;  %v9060_v42 = vshll.u32 %v22691_v18, 16  ;;  %v9058_v52 = vor.u32 %v9056_v60, %v9046_v54  ;;  %v22258_v27 = vld [vmem:[%s26752_s4 + $0x450] sm:$0xff]   ;;  %v9096_v54 = vshrl.u32 %v22692_v46, 16  ;;  %v22694_v60 = vld [vmem:[#allocation2 + $0xa0] ss:$8 sps:$4 sm:$0xff]  }
 0x4f4   : > { %10408 = vmatprep.subr.bf16.mxu0 %v25444_v30  ;;  %v22262_v46 = vld [vmem:[%s26752_s4 + $0x460] sm:$0xff]  }
 0x4f5   : > { %v9082_v57 = vor.u32 %v9080_v63, %v9070_v55  ;;  %v9062_v1 = vrot.slane %v9060_v42, 1  ;;  %v22259_v63 = vld [vmem:[%s26752_s4 + $0x458] sm:$0xff]   ;;  %v9098_v37 = vor.u32 %v9096_v54, %v9086_v11 }
 0x4f7   : > { %10409 = vmatpush1.bf16.msra.mxu0 %v22255_v15  ;;  %v22693_v15 = vld [vmem:[#allocation2 + $0xb0] sm:$0xff]  ;;  %v9063_v25 = vsel %vm3246_vm1, %v9058_v52, %v9062_v1 }
 0x4f8   : > { %10410 = vmatprep.subr.bf16.mxu0 %v25444_v30  ;;  %v19039_v22 = vcombine.high %v22693_v15, %v25666_v36 }
 0x4fa   : > { %9569 = vmatmul.mubr.bf16.gmra.mrb[32].mxu0 %v9047_v40  ;;  %v9087_v40 = vsel %vm3246_vm1, %v9082_v57, %v9086_v11  ;;  %v9100_v55 = vshll.u32 %v19039_v22, 16 }
 0x4fb   : > { %9576 = vmatprep.mubr.bf16.mxu0 %v9071_v28  ;;  %10411 = vmatpush1.bf16.msra.mxu0 %v22256_v20  ;;  %v9072_v20 = vshrl.u32 %v22691_v18, 16  ;;  %v9076_v28 = vshll.u32 %v22694_v60, 16 }
 0x4fc   : > { %10412 = vmatprep.subr.bf16.mxu0 %v25444_v30  ;;  %v9102_v18 = vrot.slane %v9100_v55, 1 }
 0x4fd   : > { %v9074_v42 = vor.u32 %v9072_v20, %v9062_v1  ;;  %v9078_v52 = vrot.slane %v9076_v28, 1  ;;  %v9112_v1 = vshrl.u32 %v19039_v22, 16 }
 0x4ff   : > { %10413 = vmatpush1.bf16.msra.mxu0 %v22257_v13  ;;  %v19038_v13 = vcombine.low %v22693_v15, %v25666_v36  ;;  %v9079_v57 = vsel %vm3246_vm1, %v9074_v42, %v9078_v52  ;;  %v9116_v36 = vshll.u32 %v25681_v9, 16  ;;  %v22265_v15 = vld [vmem:[%s26752_s4 + $0x468] sm:$0xff]   ;;  %v9114_v54 = vor.u32 %v9112_v1, %v9102_v18 }
 0x500   : > { %10414 = vmatprep.subr.bf16.mxu0 %v25444_v30 }
 0x501   : > { %v9118_v55 = vrot.slane %v9116_v36, 1  ;;  %v9104_v28 = vshrl.u32 %v19038_v13, 16  ;;  %v9144_v36 = vshrl.u32 %v25686_v38, 16 }
 0x502   : > { %9577 = vmatmul.mubr.bf16.gmra.mrb[36].mxu0 %v9063_v25  ;;  %v9092_v25 = vshll.u32 %v19038_v13, 16 }
 0x503   : > { %9584 = vmatprep.mubr.bf16.mxu0 %v9087_v40  ;;  %10415 = vmatpush1.bf16.msra.mxu0 %v22258_v27  ;;  %v9088_v27 = vshrl.u32 %v22694_v60, 16  ;;  %v9103_v40 = vsel %vm3246_vm1, %v9098_v37, %v9102_v18  ;;  %v22266_v60 = vld [vmem:[%s26752_s4 + $0x470] sm:$0xff]   ;;  %v9119_v42 = vsel %vm3246_vm1, %v9114_v54, %v9118_v55  ;;  %v9128_v37 = vshrl.u32 %v25681_v9, 16 }
 0x504   : > { %10416 = vmatprep.subr.bf16.mxu0 %v25444_v30  ;;  %v9094_v20 = vrot.slane %v9092_v25, 1  ;;  %v9132_v18 = vshll.u32 %v25686_v38, 16  ;;  %v9124_v9 = vshll.u32 %v25690_v35, 16  ;;  %v9164_v38 = vshll.u32 %v25698_v48, 16 }
 0x505   : > { %v9090_v11 = vor.u32 %v9088_v27, %v9078_v52  ;;  %v22267_v52 = vld [vmem:[%s26752_s4 + $0x478] sm:$0xff]   ;;  %v9130_v13 = vor.u32 %v9128_v37, %v9118_v55 }
 0x506   : > { %v9134_v27 = vrot.slane %v9132_v18, 1  ;;  %v9166_v18 = vrot.slane %v9164_v38, 1 }
 0x507   : > { %10417 = vmatpush1.bf16.msra.mxu0 %v22259_v63  ;;  %v9095_v22 = vsel %vm3246_vm1, %v9090_v11, %v9094_v20  ;;  %v9108_v63 = vshll.u32 %v25684_v5, 16  ;;  %v9126_v11 = vrot.slane %v9124_v9, 1 }
 0x508   : > { %10418 = vmatprep.subr.bf16.mxu0 %v25444_v30  ;;  %v9135_v1 = vsel %vm3246_vm1, %v9130_v13, %v9134_v27  ;;  %v9156_v13 = vshll.u32 %v25702_v32, 16 }
 0x50a   : > { %9585 = vmatmul.mubr.bf16.gmra.mrb[40].mxu0 %v9079_v57  ;;  %v9110_v57 = vrot.slane %v9108_v63, 1 }
 0x50b   : > { %9592 = vmatprep.mubr.bf16.mxu0 %v9103_v40  ;;  %10419 = vmatpush1.bf16.msra.mxu0 %v22262_v46  ;;  %v9106_v46 = vor.u32 %v9104_v28, %v9094_v20  ;;  %v9120_v40 = vshrl.u32 %v25684_v5, 16  ;;  %v9146_v20 = vor.u32 %v9144_v36, %v9134_v27  ;;  %v9140_v5 = vshll.u32 %v25696_v24, 16 }
 0x50c   : > { %10420 = vmatprep.subr.bf16.mxu0 %v25444_v30  ;;  %v9160_v28 = vshrl.u32 %v25692_v6, 16  ;;  %v9168_v36 = vshrl.u32 %v25702_v32, 16  ;;  %v9188_v32 = vshll.u32 %v25714_v59, 16 }
 0x50d   : > { %v9111_v25 = vsel %vm3246_vm1, %v9106_v46, %v9110_v57  ;;  %v9152_v46 = vshrl.u32 %v25696_v24, 16 }
 0x50f   : > { %10421 = vmatpush1.bf16.msra.mxu0 %v22265_v15  ;;  %v9148_v15 = vshll.u32 %v25692_v6, 16  ;;  %v9180_v6 = vshll.u32 %v25704_v3, 16 }
 0x510   : > { %10422 = vmatprep.subr.bf16.mxu0 %v25444_v30 }
 0x511   : > { %v9150_v54 = vrot.slane %v9148_v15, 1  ;;  %v9182_v9 = vrot.slane %v9180_v6, 1  ;;  %v9192_v15 = vshrl.u32 %v25704_v3, 16  ;;  %v9208_v3 = vshrl.u32 %v25710_v51, 16 }
 0x512   : > { %9593 = vmatmul.mubr.bf16.gmra.mrb[44].mxu0 %v9095_v22 }
 0x513   : > { %9600 = vmatprep.mubr.bf16.mxu0 %v9119_v42  ;;  %10423 = vmatpush1.bf16.msra.mxu0 %v22266_v60  ;;  %v9136_v60 = vshrl.u32 %v25690_v35, 16  ;;  %v9151_v22 = vsel %vm3246_vm1, %v9146_v20, %v9150_v54  ;;  %v9142_v42 = vrot.slane %v9140_v5, 1  ;;  %v9162_v37 = vor.u32 %v9160_v28, %v9150_v54 }
 0x514   : > { %10424 = vmatprep.subr.bf16.mxu0 %v25444_v30  ;;  %v9122_v30 = vor.u32 %v9120_v40, %v9110_v57  ;;  %v9176_v57 = vshrl.u32 %v25698_v48, 16  ;;  %v9158_v40 = vrot.slane %v9156_v13, 1  ;;  %v9196_v48 = vshll.u32 %v25710_v51, 16 }
 0x515   : > { %v9138_v63 = vor.u32 %v9136_v60, %v9126_v11  ;;  %v9167_v35 = vsel %vm3246_vm1, %v9162_v37, %v9166_v18  ;;  %v9154_v27 = vor.u32 %v9152_v46, %v9142_v42  ;;  %v9194_v20 = vor.u32 %v9192_v15, %v9182_v9 }
 0x516   : > { %v9127_v55 = vsel %vm3246_vm1, %v9122_v30, %v9126_v11  ;;  %v9172_v30 = vshll.u32 %v25708_v10, 16  ;;  %v9170_v11 = vor.u32 %v9168_v36, %v9158_v40  ;;  %v9198_v54 = vrot.slane %v9196_v48, 1 }
 0x517   : > { %10425 = vmatpush1.bf16.msra.mxu0 %v22267_v52  ;;  %v9143_v52 = vsel %vm3246_vm1, %v9138_v63, %v9142_v42  ;;  %v9184_v5 = vshrl.u32 %v25708_v10, 16  ;;  %v9212_v28 = vshll.u32 %v25716_v29, 16  ;;  %v9190_v63 = vrot.slane %v9188_v32, 1 }
 0x518   : > { %v9210_v42 = vor.u32 %v9208_v3, %v9198_v54  ;;  %v9204_v10 = vshll.u32 %v25720_v58, 16  ;;  %v9228_v51 = vshll.u32 %v25722_v21, 16  ;;  %v9248_v3 = vshrl.u32 %v25732_v31, 16 }
 0x519   : > { %v9214_v37 = vrot.slane %v9212_v28, 1  ;;  %v9272_v28 = vshrl.u32 %v25734_v19, 16 }
 0x51a   : > { %9601 = vmatmul.mubr.bf16.gmra.mrb[48].mxu0 %v9111_v25  ;;  %v9178_v25 = vor.u32 %v9176_v57, %v9166_v18  ;;  %v9206_v13 = vrot.slane %v9204_v10, 1 }
 0x51b   : > { %9608 = vmatprep.mubr.bf16.mxu0 %v9135_v1  ;;  %v9159_v1 = vsel %vm3246_vm1, %v9154_v27, %v9158_v40  ;;  %v9215_v46 = vsel %vm3246_vm1, %v9210_v42, %v9214_v37  ;;  %v9230_v27 = vrot.slane %v9228_v51, 1  ;;  %v9216_v40 = vshrl.u32 %v25720_v58, 16 }
 0x51c   : > { %v9183_v24 = vsel %vm3246_vm1, %v9178_v25, %v9182_v9  ;;  %v9236_v58 = vshll.u32 %v25732_v31, 16 }
 0x51d   : > { %v9218_v36 = vor.u32 %v9216_v40, %v9206_v13 }
 0x522   : > { %9609 = vmatmul.mubr.bf16.gmra.mrb[52].mxu0 %v9127_v55  ;;  %v9174_v55 = vrot.slane %v9172_v30, 1 }
 0x523   : > { %9616 = vmatprep.mubr.bf16.mxu0 %v9151_v22  ;;  %v9199_v22 = vsel %vm3246_vm1, %v9194_v20, %v9198_v54  ;;  %v9256_v54 = vshrl.u32 %v25728_v14, 16 }
 0x524   : > { %v9175_v60 = vsel %vm3246_vm1, %v9170_v11, %v9174_v55  ;;  %v9186_v38 = vor.u32 %v9184_v5, %v9174_v55  ;;  %v9232_v11 = vshrl.u32 %v25726_v7, 16 }
 0x526   : > { %v9191_v18 = vsel %vm3246_vm1, %v9186_v38, %v9190_v63  ;;  %v9252_v38 = vshll.u32 %v25738_v62, 16 }
 0x528   : > { %v9254_v42 = vrot.slane %v9252_v38, 1 }
 0x52a   : > { %9617 = vmatmul.mubr.bf16.gmra.mrb[56].mxu0 %v9143_v52  ;;  %v9200_v52 = vshrl.u32 %v25714_v59, 16  ;;  %v9220_v59 = vshll.u32 %v25726_v7, 16 }
 0x52b   : > { %9624 = vmatprep.mubr.bf16.mxu0 %v9167_v35  ;;  %v9224_v35 = vshrl.u32 %v25716_v29, 16  ;;  %v9244_v29 = vshll.u32 %v25728_v14, 16 }
 0x52c   : > { %v9202_v57 = vor.u32 %v9200_v52, %v9190_v63 }
 0x52d   : > { %v9226_v6 = vor.u32 %v9224_v35, %v9214_v37  ;;  %v9246_v48 = vrot.slane %v9244_v29, 1  ;;  %v9308_v35 = vshll.u32 %v25741_v4, 16  ;;  %v8737_v29 = vld [vmem:[#allocation2 + $0x1b0] sm:$0x11] }
 0x52e   : > { %v9207_v25 = vsel %vm3246_vm1, %v9202_v57, %v9206_v13 }
 0x52f   : > { %v9231_v9 = vsel %vm3246_vm1, %v9226_v6, %v9230_v27  ;;  %v9258_v5 = vor.u32 %v9256_v54, %v9246_v48  ;;  %v9310_v57 = vrot.slane %v9308_v35, 1  ;;  %v9300_v6 = vshll.u32 %v25744_v0, 16  ;;  %v26980_v35 = vld [vmem:[#allocation50_spill] sm:$0xff] }
 0x530   : > { %v9332_v54 = vshll.u32 %v25762_v12, 16 }
 0x531   : > { %v9302_v40 = vrot.slane %v9300_v6, 1 }
 0x532   : > { %9625 = vmatmul.mubr.bf16.gmra.mrb[60].mxu0 %v9159_v1  ;;  %v9240_v1 = vshrl.u32 %v25722_v21, 16  ;;  %v9260_v21 = vshll.u32 %v25734_v19, 16  ;;  %v26967_v19 = vld [vmem:[#allocation59_spill] sm:$0xff] }
 0x533   : > { %9632 = vmatprep.mubr.bf16.mxu0 %v9183_v24  ;;  %v9222_v24 = vrot.slane %v9220_v59, 1 }
 0x534   : > { %v9242_v15 = vor.u32 %v9240_v1, %v9230_v27  ;;  %v9262_v32 = vrot.slane %v9260_v21, 1  ;;  %v9324_v27 = vshll.u32 %v25747_v17, 16  ;;  %v9316_v1 = vshll.u32 %v25752_v33, 16 }
 0x535   : > { %v9223_v30 = vsel %vm3246_vm1, %v9218_v36, %v9222_v24  ;;  %v9234_v55 = vor.u32 %v9232_v11, %v9222_v24  ;;  %v9340_v36 = vshll.u32 %v25756_v61, 16  ;;  %v19071_v24 = vcombine.high %v8737_v29, %v8737_v29 }
 0x536   : > { %v9247_v20 = vsel %vm3246_vm1, %v9242_v15, %v9246_v48  ;;  %v9263_v7 = vsel %vm3246_vm1, %v9258_v5, %v9262_v32  ;;  %v9274_v63 = vor.u32 %v9272_v28, %v9262_v32  ;;  %v9326_v59 = vrot.slane %v9324_v27, 1  ;;  %v26985_v27 = vld [vmem:[#allocation53_spill] sm:$0xff] }
 0x537   : > { %v9318_v15 = vrot.slane %v9316_v1, 1  ;;  %v9352_v11 = vshrl.u32 %v25756_v61, 16  ;;  %v19070_v21 = vcombine.low %v8737_v29, %v8737_v29  ;;  %v9334_v32 = vrot.slane %v9332_v54, 1  ;;  %v22279_v29 = vld [vmem:[#allocation2 + $0xd0] ss:$8 sps:$4 sm:$0xff]  }
 0x538   : > { %v9279_v52 = vsel %vm3246_vm1, %v9274_v63, %v25229_v45  ;;  %v26970_v63 = vld [vmem:[#allocation40_spill] sm:$0xff]  ;;  %v22286_v54 = vld [vmem:[#allocation2 + $0x104] ss:$8 sps:$4 sm:$0xff]  }
 0x53a   : > { %9633 = vmatmul.mubr.bf16.gmra.mrb[64].mxu0 %v9175_v60  ;;  %v9238_v60 = vrot.slane %v9236_v58, 1  ;;  %v9356_v58 = vshll.u32 %v19071_v24, 16 }
 0x53b   : > { %9640 = vmatprep.mubr.bf16.mxu0 %v9199_v22 }
 0x53c   : > { %v9239_v22 = vsel %vm3246_vm1, %v9234_v55, %v9238_v60  ;;  %v9250_v14 = vor.u32 %v9248_v3, %v9238_v60  ;;  %v9358_v60 = vrot.slane %v9356_v58, 1  ;;  %v9348_v3 = vshll.u32 %v19070_v21, 16 }
 0x53d   : > { %v10204_v21 = vrot.slane %v22286_v54, 1  ;;  %v22695_v54 = vld [vmem:[#allocation2] sm:$0xff] }
 0x53e   : > { %v9255_v37 = vsel %vm3246_vm1, %v9250_v14, %v9254_v42  ;;  %v9350_v28 = vrot.slane %v9348_v3, 1  ;;  %v26969_v14 = vld [vmem:[#allocation39_spill] sm:$0xff] }
 0x542   : > { %9641 = vmatmul.mubr.bf16.gmra.mrb[68].mxu0 %v9191_v18  ;;  %v9264_v18 = vshrl.u32 %v25738_v62, 16  ;;  %v26968_v62 = vld [vmem:[#allocation60_spill] sm:$0xff] }
 0x543   : > { %9648 = vmatprep.mubr.bf16.mxu0 %v9215_v46  ;;  %v9304_v46 = vshrl.u32 %v26967_v19, 16  ;;  %v9296_v13 = vshrl.u32 %v26968_v62, 16  ;;  %v26978_v19 = vld [vmem:[#allocation48_spill] sm:$0xff]  ;;  %v22274_v62 = vld [vmem:[#allocation2 + $0xc4] ss:$8 sps:$4 sm:$0xff]  }
 0x544   : > { %v9266_v31 = vor.u32 %v9264_v18, %v9254_v42  ;;  %v26971_v42 = vld [vmem:[#allocation41_spill] sm:$0xff]  ;;  %v26974_v18 = vld [vmem:[#allocation44_spill] sm:$0xff]  ;;  %v10188_v6 = vrot.slane %v22274_v62, 1 }
 0x545   : > { %v9306_v51 = vor.u32 %v9304_v46, %v25247_v53  ;;  %v26979_v46 = vld [vmem:[#allocation49_spill] sm:$0xff] }
 0x546   : > { %v9271_v10 = vsel %vm3246_vm1, %v9266_v31, %v25234_v39  ;;  %v9320_v39 = vshrl.u32 %v25741_v4, 16  ;;  %v9336_v4 = vshrl.u32 %v25747_v17, 16  ;;  %v26976_v31 = vld [vmem:[#allocation46_spill] sm:$0xff] }
 0x547   : > { %v9311_v45 = vsel %vm3246_vm1, %v9306_v51, %v9310_v57  ;;  %v26981_v51 = vld [vmem:[#allocation51_spill] sm:$0xff] }
 0x548   : > { %v9338_v48 = vor.u32 %v9336_v4, %v9326_v59  ;;  %v22280_v4 = vld [vmem:[#allocation2 + $0xe4] ss:$8 sps:$4 sm:$0xff]  }
 0x549   : > { %v10196_v24 = vrot.slane %v22280_v4, 1  ;;  %v22321_v4 = vld [vmem:[#allocation3] sm:$0xff]  }
 0x54a   : > { %9649 = vmatmul.mubr.bf16.gmra.mrb[72].mxu0 %v9207_v25  ;;  %v9298_v25 = vor.u32 %v9296_v13, %v25251_v26  ;;  %v26983_v13 = vld [vmem:[#allocation57_spill] sm:$0xff]  ;;  %20018 = vmatprep.mubr.bf16.mxu1 %v22321_v4 }
 0x54b   : > { %9656 = vmatprep.mubr.bf16.mxu0 %v9231_v9  ;;  %v9312_v9 = vshrl.u32 %v25744_v0, 16 }
 0x54c   : > { %v9303_v53 = vsel %vm3246_vm1, %v9298_v25, %v9302_v40  ;;  %v10189_v25 = vsel %vm4431_vm0, %v26985_v27, %v10188_v6  ;;  %v22319_v27 = vld [vmem:[%s26755_s7 + $0x30] sm:$0xff]  }
 0x54d   : > { %v9314_v26 = vor.u32 %v9312_v9, %v9302_v40  ;;  %v22277_v40 = vld [vmem:[#allocation2 + $0xd4] ss:$8 sps:$4 sm:$0xff]   ;;  %v26986_v9 = vld [vmem:[#allocation54_spill] sm:$0xff] }
 0x54f   : > { %v9319_v0 = vsel %vm3246_vm1, %v9314_v26, %v9318_v15 }
 0x552   : > { %9657 = vmatmul.mubr.bf16.gmra.mrb[76].mxu0 %v9223_v30  ;;  %v9342_v30 = vrot.slane %v9340_v36, 1  ;;  %v10190_v36 = vrot.slane %v22279_v29, 1 }
 0x553   : > { %9664 = vmatprep.mubr.bf16.mxu0 %v9247_v20  ;;  %v9328_v20 = vshrl.u32 %v25752_v33, 16 }
 0x554   : > { %v9343_v17 = vsel %vm3246_vm1, %v9338_v48, %v9342_v30  ;;  %v9354_v55 = vor.u32 %v9352_v11, %v9342_v30  ;;  %v22283_v30 = vld [vmem:[#allocation2 + $0xf4] ss:$8 sps:$4 sm:$0xff]  }
 0x555   : > { %v9330_v5 = vor.u32 %v9328_v20, %v9318_v15  ;;  %v22282_v15 = vld [vmem:[#allocation2 + $0xe0] ss:$8 sps:$4 sm:$0xff]   ;;  %v10200_v58 = vrot.slane %v22283_v30, 1  ;;  %v22308_v30 = vld [vmem:[#allocation2 + $0x184] ss:$8 sps:$4 sm:$0xff]  }
 0x556   : > { %v9359_v61 = vsel %vm3246_vm1, %v9354_v55, %v9358_v60  ;;  %v10194_v11 = vrot.slane %v22282_v15, 1 }
 0x557   : > { %v10201_v20 = vsel %vm4431_vm0, %v10196_v24, %v10200_v58 }
 0x55a   : > { %9665 = vmatmul.mubr.bf16.gmra.mrb[80].mxu0 %v9239_v22  ;;  %v9344_v22 = vshrl.u32 %v25762_v12, 16  ;;  %v26973_v12 = vld [vmem:[#allocation43_spill] sm:$0xff] }
 0x55b   : > { %9672 = vmatprep.mubr.bf16.mxu0 %v9263_v7  ;;  %v9335_v7 = vsel %vm3246_vm1, %v9330_v5, %v9334_v32  ;;  %v22288_v5 = vld [vmem:[#allocation2 + $0x100] ss:$8 sps:$4 sm:$0xff]  }
 0x55c   : > { %v9346_v33 = vor.u32 %v9344_v22, %v9334_v32  ;;  %v10205_v32 = vsel %vm4431_vm0, %v10200_v58, %v10204_v21  ;;  %v22289_v22 = vld [vmem:[#allocation2 + $0x114] ss:$8 sps:$4 sm:$0xff]   ;;  %v10202_v3 = vrot.slane %v22288_v5, 1 }
 0x55d   : > { %v9917_v58 = vld [vmem:[#allocation2 + $0x190] sm:$0xff] }
 0x55e   : > { %v9351_v38 = vsel %vm3246_vm1, %v9346_v33, %v9350_v28  ;;  %v22291_v33 = vld [vmem:[#allocation2 + $0x110] ss:$8 sps:$4 sm:$0xff]  }
 0x562   : > { %9673 = vmatmul.mubr.bf16.gmra.mrb[84].mxu0 %v9255_v37  ;;  %v26972_v37 = vld [vmem:[#allocation42_spill] sm:$0xff] }
 0x563   : > { %9680 = vmatprep.mubr.bf16.mxu0 %v9279_v52  ;;  %v26975_v52 = vld [vmem:[#allocation45_spill] sm:$0xff] }
 0x56a   : > { %9681 = vmatmul.mubr.bf16.gmra.mrb[88].mxu0 %v9271_v10  ;;  %v26977_v10 = vld [vmem:[#allocation47_spill] sm:$0xff] }
 0x56b   : > { %9688 = vmatprep.mubr.bf16.mxu0 %v25255_v56  ;;  %v9322_v56 = vor.u32 %v9320_v39, %v9310_v57  ;;  %v26982_v57 = vld [vmem:[#allocation52_spill] sm:$0xff]  ;;  %v26984_v39 = vld [vmem:[#allocation58_spill] sm:$0xff] }
 0x572   : > { %9689 = vmatmul.mubr.bf16.gmra.mrb[92].mxu0 %v25262_v8  ;;  %v9327_v8 = vsel %vm3246_vm1, %v9322_v56, %v9326_v59  ;;  %v22313_v56 = vld [vmem:[%s26755_s7] sm:$0xff]  }
 0x573   : > { %9696 = vmatprep.mubr.bf16.mxu0 %v9311_v45  ;;  %v22276_v45 = vld [vmem:[#allocation2 + $0xc0] ss:$8 sps:$4 sm:$0xff]   ;;  %20002 = vmatprep.subr.bf16.mxu1 %v22313_v56 }
 0x574   : > { %v10186_v59 = vrot.slane %v22276_v45, 1  ;;  %20003 = vmatpush3.bf16.msra.mxu1 %v22313_v56 }
 0x576   : > { %v10187_v1 = vsel %vm4431_vm0, %v26986_v9, %v10186_v59  ;;  %v10191_v26 = vsel %vm4431_vm0, %v10186_v59, %v10190_v36  ;;  %v22301_v59 = vld [vmem:[#allocation2 + $0x154] ss:$8 sps:$4 sm:$0xff]  }
 0x577   : > { %v10224_v9 = vrot.slane %v22301_v59, 1 }
 0x579   : > { %v10229_v15 = vsel %vm4431_vm0, %v10224_v9, %v25326_v47 }
 0x57a   : > { %9697 = vmatmul.mubr.bf16.gmra.mrb[96].mxu0 %v9303_v53  ;;  %v10192_v53 = vrot.slane %v22277_v40, 1  ;;  %v22300_v40 = vld [vmem:[#allocation2 + $0x140] ss:$8 sps:$4 sm:$0xff]  }
 0x57b   : > { %9704 = vmatprep.mubr.bf16.mxu0 %v9327_v8 }
 0x57c   : > { %v10193_v8 = vsel %vm4431_vm0, %v10188_v6, %v10192_v53  ;;  %v10197_v48 = vsel %vm4431_vm0, %v10192_v53, %v10196_v24  ;;  %v10218_v53 = vrot.slane %v22300_v40, 1 }
 0x582   : > { %9705 = vmatmul.mubr.bf16.gmra.mrb[100].mxu0 %v9319_v0  ;;  %v10195_v0 = vsel %vm4431_vm0, %v10190_v36, %v10194_v11 }
 0x583   : > { %9712 = vmatprep.mubr.bf16.mxu0 %v9343_v17  ;;  %v22285_v17 = vld [vmem:[#allocation2 + $0xf0] ss:$8 sps:$4 sm:$0xff]  }
 0x584   : > { %v10198_v55 = vrot.slane %v22285_v17, 1  ;;  %v19165_v17 = vcombine.high %v9917_v58, %v22695_v54 }
 0x586   : > { %v10199_v60 = vsel %vm4431_vm0, %v10194_v11, %v10198_v55  ;;  %v10236_v11 = vrot.slane %v22308_v30, 1 }
 0x58a   : > { %9713 = vmatmul.mubr.bf16.gmra.mrb[104].mxu0 %v9335_v7  ;;  %v10203_v7 = vsel %vm4431_vm0, %v10198_v55, %v10202_v3  ;;  %v19164_v55 = vcombine.low %v9917_v58, %v22695_v54 }
 0x58b   : > { %9720 = vmatprep.mubr.bf16.mxu0 %v9359_v61  ;;  %v10208_v61 = vrot.slane %v22289_v22, 1 }
 0x58c   : > { %v10238_v5 = vrot.slane %v19164_v55, 1 }
 0x58d   : > { %v10209_v28 = vsel %vm4431_vm0, %v10204_v21, %v10208_v61  ;;  %v10240_v21 = vrot.slane %v19165_v17, 1 }
 0x592   : > { %9721 = vmatmul.mubr.bf16.gmra.mrb[108].mxu0 %v9351_v38  ;;  %v22292_v38 = vld [vmem:[#allocation2 + $0x124] ss:$8 sps:$4 sm:$0xff]  }
 0x593   : > { %10426 = vmatprep.mubr.bf16.mxu0 %v26969_v14  ;;  %v10206_v14 = vrot.slane %v22291_v33, 1 }
 0x59a   : > { %10427 = vmatmul.mubr.bf16.vlgmr.msra.gmra.mrb[16].mxu0 %v26970_v63  ;;  %v10212_v63 = vrot.slane %v22292_v38, 1 }
 0x59b   : > { %10434 = vmatprep.mubr.bf16.mxu0 %v26971_v42  ;;  %v22314_v42 = vld [vmem:[%s26755_s7 + $0x8] sm:$0xff]  }
 0x59c   : > { %20004 = vmatprep.subr.bf16.mxu1 %v22314_v42 }
 0x59d   : > { %20005 = vmatpush3.bf16.msra.mxu1 %v22314_v42  ;;  %v26017_v42 = vld [vmem:[%s26755_s7 + $0x40] sm:$0xff]  }
 0x5a2   : > { %10435 = vmatmul.mubr.bf16.gmra.mrb[20].mxu0 %v26972_v37  ;;  %v10207_v37 = vsel %vm4431_vm0, %v10202_v3, %v10206_v14  ;;  %v19166_v3 = vcombine.low %v22695_v54, %v22695_v54 }
 0x5a3   : > { %10442 = vmatprep.mubr.bf16.mxu0 %v26973_v12  ;;  %v22294_v12 = vld [vmem:[#allocation2 + $0x120] ss:$8 sps:$4 sm:$0xff]  }
 0x5a4   : > { %v10242_v33 = vrot.slane %v19166_v3, 1 }
 0x5a6   : > { %v10243_v38 = vsel %vm4431_vm0, %v10238_v5, %v10242_v33 }
 0x5aa   : > { %10443 = vmatmul.mubr.bf16.gmra.mrb[24].mxu0 %v26974_v18  ;;  %v22315_v18 = vld [vmem:[%s26755_s7 + $0x10] sm:$0xff]  }
 0x5ab   : > { %10450 = vmatprep.mubr.bf16.mxu0 %v26975_v52  ;;  %v10213_v52 = vsel %vm4431_vm0, %v10208_v61, %v10212_v63  ;;  %20006 = vmatprep.subr.bf16.mxu1 %v22315_v18 }
 0x5ac   : > { %20007 = vmatpush3.bf16.msra.mxu1 %v22315_v18 }
 0x5b2   : > { %10451 = vmatmul.mubr.bf16.gmra.mrb[28].mxu0 %v26976_v31  ;;  %v22295_v31 = vld [vmem:[#allocation2 + $0x134] ss:$8 sps:$4 sm:$0xff]  }
 0x5b3   : > { %10458 = vmatprep.mubr.bf16.mxu0 %v26977_v10  ;;  %v22316_v10 = vld [vmem:[%s26755_s7 + $0x18] sm:$0xff]  }
 0x5b4   : > { %20008 = vmatprep.subr.bf16.mxu1 %v22316_v10 }
 0x5b5   : > { %20009 = vmatpush3.bf16.msra.mxu1 %v22316_v10 }
 0x5ba   : > { %10459 = vmatmul.mubr.bf16.gmra.mrb[32].mxu0 %v26978_v19  ;;  %v10210_v19 = vrot.slane %v22294_v12, 1  ;;  %v26023_v12 = vld [vmem:[%s26753_s5] ss:$0 sm:$0xff] }
 0x5bb   : > { %10466 = vmatprep.mubr.bf16.mxu0 %v26979_v46  ;;  %v10216_v46 = vrot.slane %v22295_v31, 1  ;;  %v26029_v31 = vld [vmem:[%s26754_s6] ss:$0 sm:$0xff] }
 0x5bd   : > { %v10217_v62 = vsel %vm4431_vm0, %v10212_v63, %v10216_v46 }
 0x5c2   : > { %10467 = vmatmul.mubr.bf16.gmra.mrb[36].mxu0 %v26980_v35  ;;  %v10211_v35 = vsel %vm4431_vm0, %v10206_v14, %v10210_v19 }
 0x5c3   : > { %10474 = vmatprep.mubr.bf16.mxu0 %v26981_v51  ;;  %v22297_v51 = vld [vmem:[#allocation2 + $0x130] ss:$8 sps:$4 sm:$0xff]  }
 0x5c4   : > { %v10214_v6 = vrot.slane %v22297_v51, 1 }
 0x5c6   : > { %v10219_v29 = vsel %vm4431_vm0, %v10214_v6, %v10218_v53 }
 0x5ca   : > { %10475 = vmatmul.mubr.bf16.gmra.mrb[40].mxu0 %v26982_v57  ;;  %v22317_v57 = vld [vmem:[%s26755_s7 + $0x20] sm:$0xff]  }
 0x5cb   : > { %10482 = vmatprep.mubr.bf16.mxu0 %v26983_v13  ;;  %v22298_v13 = vld [vmem:[#allocation2 + $0x144] ss:$8 sps:$4 sm:$0xff]   ;;  %20010 = vmatprep.subr.bf16.mxu1 %v22317_v57 }
 0x5cc   : > { %v10220_v45 = vrot.slane %v22298_v13, 1  ;;  %20011 = vmatpush3.bf16.msra.mxu1 %v22317_v57 }
 0x5ce   : > { %v10221_v56 = vsel %vm4431_vm0, %v10216_v46, %v10220_v45  ;;  %v10225_v36 = vsel %vm4431_vm0, %v10220_v45, %v10224_v9 }
 0x5d2   : > { %10483 = vmatmul.mubr.bf16.gmra.mrb[44].mxu0 %v26984_v39  ;;  %v22318_v39 = vld [vmem:[%s26755_s7 + $0x28] sm:$0xff]  }
 0x5d3   : > { %10490 = vmatprep.mubr.bf16.mxu0 %v10189_v25  ;;  %v10215_v25 = vsel %vm4431_vm0, %v10210_v19, %v10214_v6  ;;  %20012 = vmatprep.subr.bf16.mxu1 %v22318_v39 }
 0x5d4   : > { %20013 = vmatpush3.bf16.msra.mxu1 %v22318_v39 }
 0x5d5   : > { %20014 = vmatprep.subr.bf16.mxu1 %v22319_v27 }
 0x5d8   : > { %20015 = vmatpush3.bf16.msra.mxu1 %v22319_v27 }
 0x5da   : > { %10491 = vmatmul.mubr.bf16.gmra.mrb[48].mxu0 %v10187_v1  ;;  %v22320_v1 = vld [vmem:[%s26755_s7 + $0x38] sm:$0xff]  }
 0x5db   : > { %10498 = vmatprep.mubr.bf16.mxu0 %v10193_v8  ;;  %v22303_v8 = vld [vmem:[#allocation2 + $0x150] ss:$8 sps:$4 sm:$0xff]   ;;  %20016 = vmatprep.subr.bf16.mxu1 %v22320_v1 }
 0x5dc   : > { %20017 = vmatpush3.bf16.msra.mxu1 %v22320_v1  ;;  %v10222_v24 = vrot.slane %v22303_v8, 1 }
 0x5dd   : > { %20066 = vmatprep.subr.bf16.mxu1 %v26017_v42 }
 0x5e2   : > { %10499 = vmatmul.mubr.bf16.gmra.mrb[52].mxu0 %v10191_v26  ;;  %v10223_v26 = vsel %vm4431_vm0, %v10218_v53, %v10222_v24 }
 0x5e3   : > { %10506 = vmatprep.mubr.bf16.mxu0 %v10197_v48  ;;  %v10227_v48 = vsel %vm4431_vm0, %v10222_v24, %v25328_v49 }
 0x5ea   : > { %10507 = vmatmul.mubr.bf16.gmra.mrb[56].mxu0 %v10195_v0  ;;  %v22310_v0 = vld [vmem:[#allocation2 + $0x180] ss:$8 sps:$4 sm:$0xff]  }
 0x5eb   : > { %10514 = vmatprep.mubr.bf16.mxu0 %v10201_v20  ;;  %v10237_v20 = vsel %vm4431_vm0, %v25332_v34, %v10236_v11  ;;  %v10234_v47 = vrot.slane %v22310_v0, 1 }
 0x5ed   : > { %v10235_v49 = vsel %vm4431_vm0, %v25334_v23, %v10234_v47  ;;  %v10239_v34 = vsel %vm4431_vm0, %v10234_v47, %v10238_v5 }
 0x5f2   : > { %10515 = vmatmul.mubr.bf16.gmra.mrb[60].mxu0 %v10199_v60  ;;  %v19167_v60 = vcombine.high %v22695_v54, %v22695_v54  ;;  %v26988_v54 = vld [vmem:[#allocation61_spill] sm:$0xff] }
 0x5f3   : > { %10522 = vmatprep.mubr.bf16.mxu0 %v10205_v32  ;;  %v9921_v32 = vld [vmem:[#allocation2 + $0x1b0] sm:$0x11] }
 0x5f4   : > { %v19169_v22 = vcombine.high %v9921_v32, %v9921_v32  ;;  %v19168_v23 = vcombine.low %v9921_v32, %v9921_v32 }
 0x5f6   : > { %v10246_v14 = vrot.slane %v19168_v23, 1 }
 0x5f8   : > { %v10247_v63 = vsel %vm4431_vm0, %v10242_v33, %v10246_v14 }
 0x5fa   : > { %10523 = vmatmul.mubr.bf16.gmra.mrb[64].mxu0 %v10203_v7  ;;  %v10248_v7 = vrot.slane %v19169_v22, 1 }
 0x5fb   : > { %10530 = vmatprep.mubr.bf16.mxu0 %v10209_v28 }
 0x602   : > { %10531 = vmatmul.mubr.bf16.gmra.mrb[68].mxu0 %v10207_v37 }
 0x603   : > { %10538 = vmatprep.mubr.bf16.mxu0 %v10213_v52 }
 0x60a   : > { %10539 = vmatmul.mubr.bf16.gmra.mrb[72].mxu0 %v10211_v35 }
 0x60b   : > { %10546 = vmatprep.mubr.bf16.mxu0 %v10217_v62 }
 0x612   : > { %10547 = vmatmul.mubr.bf16.gmra.mrb[76].mxu0 %v10215_v25 }
 0x613   : > { %10554 = vmatprep.mubr.bf16.mxu0 %v10221_v56 }
 0x61a   : > { %10555 = vmatmul.mubr.bf16.gmra.mrb[80].mxu0 %v10219_v29  ;;  %v10970_v29 = vld [vmem:[#allocation3 + $0xc] sm:$0xf] }
 0x61b   : > { %10562 = vmatprep.mubr.bf16.mxu0 %v10225_v36 }
 0x622   : > { %10563 = vmatmul.mubr.bf16.gmra.mrb[84].mxu0 %v10223_v26 }
 0x623   : > { %10570 = vmatprep.mubr.bf16.mxu0 %v10229_v15  ;;  %v10974_v15 = vld [vmem:[#allocation3 + $0x14] sm:$0x1] }
 0x62a   : > { %10571 = vmatmul.mubr.bf16.gmra.mrb[88].mxu0 %v10227_v48 }
 0x62b   : > { %10578 = vmatprep.mubr.bf16.mxu0 %v25343_v50  ;;  %v10241_v50 = vsel %vm4431_vm0, %v10236_v11, %v10240_v21 }
 0x632   : > { %10579 = vmatmul.mubr.bf16.gmra.mrb[92].mxu0 %v25348_v43  ;;  %v10244_v43 = vrot.slane %v19167_v60, 1 }
 0x633   : > { %10586 = vmatprep.mubr.bf16.mxu0 %v10237_v20 }
 0x634   : > { %v10245_v61 = vsel %vm4431_vm0, %v10240_v21, %v10244_v43  ;;  %v10249_v28 = vsel %vm4431_vm0, %v10244_v43, %v10248_v7  ;;  %v22698_v21 = vld [vmem:[%s26755_s7 + $0x80] sm:$0xff]  }
 0x63a   : > { %10587 = vmatmul.mubr.bf16.gmra.mrb[96].mxu0 %v10235_v49 }
 0x63b   : > { %10594 = vmatprep.mubr.bf16.mxu0 %v10241_v50 }
 0x642   : > { %10595 = vmatmul.mubr.bf16.gmra.mrb[100].mxu0 %v10239_v34 }
 0x643   : > { %10602 = vmatprep.mubr.bf16.mxu0 %v10245_v61  ;;  %v11003_v61 = vld [vmem:[#allocation3 + $0x18] sm:$0xf] }
 0x64a   : > { %10603 = vmatmul.mubr.bf16.gmra.mrb[104].mxu0 %v10243_v38 }
 0x64b   : > { %10610 = vmatprep.mubr.bf16.mxu0 %v10249_v28  ;;  %v26991_v28 = vld [vmem:[#allocation62_spill] sm:$0xff] }
 0x652   : > { %10611 = vmatmul.mubr.bf16.gmra.mrb[108].mxu0 %v10247_v63 }
 0x66d   : > { %v10428_v37 = vpop.f32.mrb[16].mxu0 }
 0x66e   : > { %v20610_v18 = vadd.f32 %v10428_v37, %v25294_v44  ;;  %v10430_v52 = vpop.f32.mrb[17].mxu0  ;;  %v22335_v37 = vld [vmem:[%s26755_s7 + $0x48] sm:$0xff]  }
 0x66f   : > { %v10431_v10 = vpop.f32.mrb[18].mxu0 }
 0x670   : > { %v10770_v19 = vmul.f32 %v20610_v18, %v26023_v12  ;;  %v20611_v46 = vadd.f32 %v10431_v10, %v25301_v2  ;;  %v10433_v35 = vpop.f32.mrb[19].mxu0 }
 0x672   : > { %v10825_v51 = vadd.f32 %v26029_v31, %v10770_v19  ;;  %v10771_v57 = vmul.f32 %v20611_v46, %v26023_v12  ;;  %v26992_v46 = vld [vmem:[#allocation63_spill] sm:$0xff] }
 0x674   : > { %v10873_v62 = vmax.f32 %v10825_v51, 0.0  ;;  %v10826_v13 = vadd.f32 %v26029_v31, %v10771_v57 }
 0x675   : > { %v10436_v44 = vpop.f32.mrb[20].mxu0 }
 0x676   : > { %v19681_v6 = vpack.c.bf16 %v10873_v62, %v10873_v62  ;;  %v10874_v45 = vmax.f32 %v10826_v13, 0.0  ;;  %v10438_v39 = vpop.f32.mrb[21].mxu0  ;;  %v22338_v13 = vld [vmem:[%s26755_s7 + $0x50] sm:$0xff]  }
 0x677   : > { %v10439_v27 = vpop.f32.mrb[22].mxu0 }
 0x678   : > { %v10951_v25 = vshrl.u32 %v19681_v6, 16  ;;  %v19682_v40 = vpack.c.bf16 %v10874_v45, %v10874_v45  ;;  %v20612_v56 = vadd.f32 %v10439_v27, %v25313_v16  ;;  %v10441_v59 = vpop.f32.mrb[23].mxu0  ;;  %v10954_v2 = vshll.u32 %v19681_v6, 16 }
 0x67a   : > { %v10953_v53 = vrot.slane %v10951_v25, 7  ;;  %v10959_v9 = vshrl.u32 %v19682_v40, 16  ;;  %v10773_v1 = vmul.f32 %v20612_v56, %v26023_v12  ;;  %v10962_v36 = vshll.u32 %v19682_v40, 16  ;;  %v11007_v25 = vld [vmem:[#allocation3 + $0x20] sm:$0x1] }
 0x67c   : > { %v10956_v8 = vor.u32 %v10954_v2, %v10953_v53  ;;  %v10961_v4 = vrot.slane %v10959_v9, 7  ;;  %v10828_v24 = vadd.f32 %v26029_v31, %v10773_v1  ;;  %v10957_v26 = vrot.slane %v10953_v53, 4 }
 0x67d   : > { %v10444_v48 = vpop.f32.mrb[24].mxu0 }
 0x67e   : > { %v10971_v11 = vsel %vm23381_vm9, %v10956_v8, %v10970_v29  ;;  %v10964_v58 = vor.u32 %v10962_v36, %v10961_v4  ;;  %v10966_v16 = vrot.slane %v10961_v4, 4  ;;  %v10876_v0 = vmax.f32 %v10828_v24, 0.0  ;;  %v10446_v20 = vpop.f32.mrb[25].mxu0  ;;  %v22340_v36 = vld [vmem:[%s26755_s7 + $0x58] sm:$0xff]  }
 0x67f   : > { %10972 = vst [vmem:[#allocation3 + $0xc] sm:$0xf] %v10971_v11  ;;  %v20613_v17 = vadd.f32 %v10444_v48, %v26988_v54  ;;  %v10447_v47 = vpop.f32.mrb[26].mxu0 }
 0x680   : > { %v10965_v49 = vsel %vm23422_vm14, %v10957_v26, %v10964_v58  ;;  %v10975_v50 = vsel %vm23402_vm11, %v10966_v16, %v10974_v15  ;;  %v19683_v60 = vpack.c.bf16 %v10876_v0, %v10876_v0  ;;  %v10449_v5 = vpop.f32.mrb[27].mxu0  ;;  %v26993_v15 = vld [vmem:[#allocation64_spill] sm:$0xff]  ;;  %v11035_v58 = vld [vmem:[#allocation3 + $0x24] sm:$0xf] }
 0x681   : > { %10973 = vst [vmem:[#allocation3 + $0x10] sm:$0xf] %v10965_v49  ;;  %10976 = vst [vmem:[#allocation3 + $0x14] sm:$0x1] %v10975_v50  ;;  %v10774_v32 = vmul.f32 %v20613_v17, %v26023_v12  ;;  %v11039_v5 = vld [vmem:[#allocation3 + $0x2c] sm:$0x1] }
 0x682   : > { %v10984_v43 = vshrl.u32 %v19683_v60, 16  ;;  %v10987_v3 = vshll.u32 %v19683_v60, 16 }
 0x683   : > { %v10829_v22 = vadd.f32 %v26029_v31, %v10774_v32 }
 0x684   : > { %v10986_v34 = vrot.slane %v10984_v43, 7 }
 0x685   : > { %v10877_v7 = vmax.f32 %v10829_v22, 0.0  ;;  %v10452_v33 = vpop.f32.mrb[28].mxu0 }
 0x686   : > { %v10989_v23 = vor.u32 %v10987_v3, %v10986_v34  ;;  %v20614_v38 = vadd.f32 %v10452_v33, %v26991_v28  ;;  %v10454_v14 = vpop.f32.mrb[29].mxu0  ;;  %v22322_v63 = vld [vmem:[#allocation3 + $0x8] sm:$0xff]   ;;  %v10990_v27 = vrot.slane %v10986_v34, 4 }
 0x687   : > { %v19684_v18 = vpack.c.bf16 %v10877_v7, %v10877_v7  ;;  %v10455_v52 = vpop.f32.mrb[30].mxu0  ;;  %20019 = vmatmul.mubr.bf16.vlgmr.msra.gmra.mrb[112].mxu1 %v22322_v63  ;;  %v26994_v7 = vld [vmem:[#allocation65_spill] sm:$0xff] }
 0x688   : > { %v11004_v10 = vsel %vm23381_vm9, %v10989_v23, %v11003_v61  ;;  %v10776_v19 = vmul.f32 %v20614_v38, %v26023_v12  ;;  %v20615_v35 = vadd.f32 %v10455_v52, %v26992_v46  ;;  %v10457_v51 = vpop.f32.mrb[31].mxu0  ;;  %v22323_v57 = vld [vmem:[#allocation3 + $0x10] sm:$0xff]   ;;  %20067 = vmatpush3.bf16.msra.mxu1 %v26017_v42  ;;  %v22343_v52 = vld [vmem:[%s26755_s7 + $0x60] sm:$0xff]  }
 0x689   : > { %11005 = vst [vmem:[#allocation3 + $0x18] sm:$0xf] %v11004_v10  ;;  %v10992_v62 = vshrl.u32 %v19684_v18, 16  ;;  %20022 = vmatprep.mubr.bf16.mxu1 %v22323_v57  ;;  %20068 = vmatprep.subr.bf16.mxu1 %v22335_v37  ;;  %v10995_v39 = vshll.u32 %v19684_v18, 16 }
 0x68a   : > { %v10831_v44 = vadd.f32 %v26029_v31, %v10776_v19  ;;  %v10777_v6 = vmul.f32 %v20615_v35, %v26023_v12  ;;  %v11068_v19 = vld [vmem:[#allocation3 + $0x30] sm:$0xf] }
 0x68b   : > { %v10994_v45 = vrot.slane %v10992_v62, 7 }
 0x68c   : > { %v10879_v40 = vmax.f32 %v10831_v44, 0.0  ;;  %v10832_v56 = vadd.f32 %v26029_v31, %v10777_v6  ;;  %20069 = vmatpush3.bf16.msra.mxu1 %v22335_v37  ;;  %v26995_v44 = vld [vmem:[#allocation66_spill] sm:$0xff] }
 0x68d   : > { %v10997_v59 = vor.u32 %v10995_v39, %v10994_v45  ;;  %v10999_v53 = vrot.slane %v10994_v45, 4  ;;  %v10460_v42 = vpop.f32.mrb[32].mxu0  ;;  %20070 = vmatprep.subr.bf16.mxu1 %v22338_v13 }
 0x68e   : > { %v19685_v2 = vpack.c.bf16 %v10879_v40, %v10879_v40  ;;  %v10880_v9 = vmax.f32 %v10832_v56, 0.0  ;;  %v10462_v1 = vpop.f32.mrb[33].mxu0 }
 0x68f   : > { %v10998_v29 = vsel %vm23422_vm14, %v10990_v27, %v10997_v59  ;;  %v11008_v8 = vsel %vm23402_vm11, %v10999_v53, %v11007_v25  ;;  %v10463_v4 = vpop.f32.mrb[34].mxu0  ;;  %v26996_v59 = vld [vmem:[#allocation67_spill] sm:$0xff] }
 0x690   : > { %11006 = vst [vmem:[#allocation3 + $0x1c] sm:$0xf] %v10998_v29  ;;  %11009 = vst [vmem:[#allocation3 + $0x20] sm:$0x1] %v11008_v8  ;;  %v11016_v24 = vshrl.u32 %v19685_v2, 16  ;;  %v19686_v26 = vpack.c.bf16 %v10880_v9, %v10880_v9  ;;  %v20616_v48 = vadd.f32 %v10463_v4, %v26993_v15  ;;  %v10465_v11 = vpop.f32.mrb[35].mxu0  ;;  %20071 = vmatpush3.bf16.msra.mxu1 %v22338_v13 }
 0x691   : > { %v11019_v0 = vshll.u32 %v19685_v2, 16  ;;  %20072 = vmatprep.subr.bf16.mxu1 %v22340_v36 }
 0x692   : > { %v11018_v16 = vrot.slane %v11016_v24, 7  ;;  %v11024_v20 = vshrl.u32 %v19686_v26, 16  ;;  %v10779_v54 = vmul.f32 %v20616_v48, %v26023_v12  ;;  %v11027_v49 = vshll.u32 %v19686_v26, 16  ;;  %v11072_v24 = vld [vmem:[#allocation3 + $0x38] sm:$0x1] }
 0x694   : > { %v11021_v17 = vor.u32 %v11019_v0, %v11018_v16  ;;  %v11026_v47 = vrot.slane %v11024_v20, 7  ;;  %v10834_v50 = vadd.f32 %v26029_v31, %v10779_v54  ;;  %v11022_v60 = vrot.slane %v11018_v16, 4  ;;  %20073 = vmatpush3.bf16.msra.mxu1 %v22340_v36 }
 0x695   : > { %v10468_v32 = vpop.f32.mrb[36].mxu0  ;;  %20074 = vmatprep.subr.bf16.mxu1 %v22343_v52 }
 0x696   : > { %v11036_v43 = vsel %vm23381_vm9, %v11021_v17, %v11035_v58  ;;  %v11029_v22 = vor.u32 %v11027_v49, %v11026_v47  ;;  %v11031_v34 = vrot.slane %v11026_v47, 4  ;;  %v10882_v3 = vmax.f32 %v10834_v50, 0.0  ;;  %v10470_v61 = vpop.f32.mrb[37].mxu0  ;;  %v22345_v49 = vld [vmem:[%s26755_s7 + $0x68] sm:$0xff]  }
 0x697   : > { %11037 = vst [vmem:[#allocation3 + $0x24] sm:$0xf] %v11036_v43  ;;  %v20617_v33 = vadd.f32 %v10468_v32, %v26994_v7  ;;  %v10471_v23 = vpop.f32.mrb[38].mxu0  ;;  %v22324_v28 = vld [vmem:[#allocation3 + $0x18] sm:$0xff]  }
 0x698   : > { %v11030_v38 = vsel %vm23422_vm14, %v11022_v60, %v11029_v22  ;;  %v11040_v14 = vsel %vm23402_vm11, %v11031_v34, %v11039_v5  ;;  %v19687_v63 = vpack.c.bf16 %v10882_v3, %v10882_v3  ;;  %v10473_v37 = vpop.f32.mrb[39].mxu0  ;;  %20023 = vmatmul.mubr.bf16.gmra.mrb[116].mxu1 %v22324_v28  ;;  %v26997_v5 = vld [vmem:[#allocation68_spill] sm:$0xff]  ;;  %v11100_v22 = vld [vmem:[#allocation3 + $0x3c] sm:$0xf] }
 0x699   : > { %11038 = vst [vmem:[#allocation3 + $0x28] sm:$0xf] %v11030_v38  ;;  %11041 = vst [vmem:[#allocation3 + $0x2c] sm:$0x1] %v11040_v14  ;;  %v10780_v18 = vmul.f32 %v20617_v33, %v26023_v12  ;;  %20075 = vmatpush3.bf16.msra.mxu1 %v22343_v52  ;;  %v11104_v33 = vld [vmem:[#allocation3 + $0x44] sm:$0x1] }
 0x69a   : > { %v11049_v10 = vshrl.u32 %v19687_v63, 16  ;;  %v11052_v51 = vshll.u32 %v19687_v63, 16  ;;  %20076 = vmatprep.subr.bf16.mxu1 %v22345_v49 }
 0x69b   : > { %v10835_v46 = vadd.f32 %v26029_v31, %v10780_v18 }
 0x69c   : > { %v11051_v35 = vrot.slane %v11049_v10, 7 }
 0x69d   : > { %v10883_v57 = vmax.f32 %v10835_v46, 0.0  ;;  %v10476_v62 = vpop.f32.mrb[40].mxu0  ;;  %20077 = vmatpush3.bf16.msra.mxu1 %v22345_v49  ;;  %v11137_v49 = vld [vmem:[#allocation3 + $0x50] sm:$0x1] }
 0x69e   : > { %v11054_v13 = vor.u32 %v11052_v51, %v11051_v35  ;;  %v20618_v6 = vadd.f32 %v10476_v62, %v26995_v44  ;;  %v10478_v45 = vpop.f32.mrb[41].mxu0  ;;  %v22325_v39 = vld [vmem:[#allocation3 + $0x20] sm:$0xff]   ;;  %v11055_v36 = vrot.slane %v11051_v35, 4 }
 0x69f   : > { %v19688_v27 = vpack.c.bf16 %v10883_v57, %v10883_v57  ;;  %v10479_v25 = vpop.f32.mrb[42].mxu0  ;;  %20026 = vmatprep.mubr.bf16.mxu1 %v22325_v39  ;;  %v22348_v39 = vld [vmem:[%s26755_s7 + $0x70] sm:$0xff]  }
 0x6a0   : > { %v11069_v40 = vsel %vm23381_vm9, %v11054_v13, %v11068_v19  ;;  %v10782_v56 = vmul.f32 %v20618_v6, %v26023_v12  ;;  %v20619_v53 = vadd.f32 %v10479_v25, %v26996_v59  ;;  %v10481_v42 = vpop.f32.mrb[43].mxu0  ;;  %v22326_v2 = vld [vmem:[#allocation3 + $0x28] sm:$0xff]   ;;  %20078 = vmatprep.subr.bf16.mxu1 %v22348_v39 }
 0x6a1   : > { %11070 = vst [vmem:[#allocation3 + $0x30] sm:$0xf] %v11069_v40  ;;  %v11057_v9 = vshrl.u32 %v19688_v27, 16  ;;  %20027 = vmatmul.mubr.bf16.gmra.mrb[120].mxu1 %v22326_v2  ;;  %v11060_v4 = vshll.u32 %v19688_v27, 16  ;;  %v11133_v27 = vld [vmem:[#allocation3 + $0x48] sm:$0xf] }
 0x6a2   : > { %v10837_v1 = vadd.f32 %v26029_v31, %v10782_v56  ;;  %v10783_v29 = vmul.f32 %v20619_v53, %v26023_v12  ;;  %20079 = vmatpush3.bf16.msra.mxu1 %v22348_v39  ;;  %v26998_v2 = vld [vmem:[#allocation69_spill] sm:$0xff] }
 0x6a3   : > { %v11059_v8 = vrot.slane %v11057_v9, 7 }
 0x6a4   : > { %v10885_v26 = vmax.f32 %v10837_v1, 0.0  ;;  %v10838_v15 = vadd.f32 %v26029_v31, %v10783_v29 }
 0x6a5   : > { %v11062_v48 = vor.u32 %v11060_v4, %v11059_v8  ;;  %v11064_v11 = vrot.slane %v11059_v8, 4  ;;  %v10484_v58 = vpop.f32.mrb[44].mxu0 }
 0x6a6   : > { %v19689_v16 = vpack.c.bf16 %v10885_v26, %v10885_v26  ;;  %v10886_v0 = vmax.f32 %v10838_v15, 0.0  ;;  %v10486_v20 = vpop.f32.mrb[45].mxu0  ;;  %v26999_v26 = vld [vmem:[#allocation70_spill] sm:$0xff] }
 0x6a7   : > { %v11063_v54 = vsel %vm23422_vm14, %v11055_v36, %v11062_v48  ;;  %v11073_v17 = vsel %vm23402_vm11, %v11064_v11, %v11072_v24  ;;  %v10487_v47 = vpop.f32.mrb[46].mxu0 }
 0x6a8   : > { %11071 = vst [vmem:[#allocation3 + $0x34] sm:$0xf] %v11063_v54  ;;  %11074 = vst [vmem:[#allocation3 + $0x38] sm:$0x1] %v11073_v17  ;;  %v11081_v50 = vshrl.u32 %v19689_v16, 16  ;;  %v19690_v60 = vpack.c.bf16 %v10886_v0, %v10886_v0  ;;  %v20620_v32 = vadd.f32 %v10487_v47, %v26997_v5  ;;  %v10489_v43 = vpop.f32.mrb[47].mxu0 }
 0x6a9   : > { %v11084_v3 = vshll.u32 %v19689_v16, 16  ;;  %v22350_v16 = vld [vmem:[%s26755_s7 + $0x78] sm:$0xff]   ;;  %v22355_v54 = vld [vmem:[%s26755_s7 + $0x80] sm:$0xff]  }
 0x6aa   : > { %v11083_v34 = vrot.slane %v11081_v50, 7  ;;  %v11089_v61 = vshrl.u32 %v19690_v60, 16  ;;  %v10785_v7 = vmul.f32 %v20620_v32, %v26023_v12  ;;  %v11092_v38 = vshll.u32 %v19690_v60, 16  ;;  %20080 = vmatprep.subr.bf16.mxu1 %v22350_v16 }
 0x6ab   : > { %20081 = vmatpush3.bf16.msra.mxu1 %v22350_v16 }
 0x6ac   : > { %v11086_v23 = vor.u32 %v11084_v3, %v11083_v34  ;;  %v11091_v28 = vrot.slane %v11089_v61, 7  ;;  %v10840_v14 = vadd.f32 %v26029_v31, %v10785_v7  ;;  %v11087_v63 = vrot.slane %v11083_v34, 4  ;;  %20130 = vmatprep.subr.bf16.mxu1 %v22355_v54 }
 0x6ad   : > { %v10492_v37 = vpop.f32.mrb[48].mxu0 }
 0x6ae   : > { %v11101_v18 = vsel %vm23381_vm9, %v11086_v23, %v11100_v22  ;;  %v11094_v52 = vor.u32 %v11092_v38, %v11091_v28  ;;  %v11096_v10 = vrot.slane %v11091_v28, 4  ;;  %v10888_v19 = vmax.f32 %v10840_v14, 0.0  ;;  %v10494_v46 = vpop.f32.mrb[49].mxu0  ;;  %v27000_v14 = vld [vmem:[#allocation71_spill] sm:$0xff] }
 0x6af   : > { %11102 = vst [vmem:[#allocation3 + $0x3c] sm:$0xf] %v11101_v18  ;;  %v20621_v35 = vadd.f32 %v10492_v37, %v25368_v41  ;;  %v10495_v51 = vpop.f32.mrb[50].mxu0  ;;  %v22327_v57 = vld [vmem:[#allocation3 + $0x30] sm:$0xff]  }
 0x6b0   : > { %v11095_v62 = vsel %vm23422_vm14, %v11087_v63, %v11094_v52  ;;  %v11105_v13 = vsel %vm23402_vm11, %v11096_v10, %v11104_v33  ;;  %v19691_v44 = vpack.c.bf16 %v10888_v19, %v10888_v19  ;;  %v10497_v6 = vpop.f32.mrb[51].mxu0  ;;  %20030 = vmatprep.mubr.bf16.mxu1 %v22327_v57  ;;  %v11165_v46 = vld [vmem:[#allocation3 + $0x54] sm:$0xf] }
 0x6b1   : > { %11103 = vst [vmem:[#allocation3 + $0x40] sm:$0xf] %v11095_v62  ;;  %11106 = vst [vmem:[#allocation3 + $0x44] sm:$0x1] %v11105_v13  ;;  %v10786_v45 = vmul.f32 %v20621_v35, %v26023_v12 }
 0x6b2   : > { %v11114_v41 = vshrl.u32 %v19691_v44, 16  ;;  %v11117_v56 = vshll.u32 %v19691_v44, 16  ;;  %v11169_v44 = vld [vmem:[#allocation3 + $0x5c] sm:$0x1] }
 0x6b3   : > { %v10841_v25 = vadd.f32 %v26029_v31, %v10786_v45 }
 0x6b4   : > { %v11116_v40 = vrot.slane %v11114_v41, 7 }
 0x6b5   : > { %v10889_v59 = vmax.f32 %v10841_v25, 0.0  ;;  %v10500_v53 = vpop.f32.mrb[52].mxu0 }
 0x6b6   : > { %v11119_v42 = vor.u32 %v11117_v56, %v11116_v40  ;;  %v20622_v9 = vadd.f32 %v10500_v53, %v26998_v2  ;;  %v10502_v1 = vpop.f32.mrb[53].mxu0  ;;  %v22328_v29 = vld [vmem:[#allocation3 + $0x38] sm:$0xff]   ;;  %v11120_v5 = vrot.slane %v11116_v40, 4 }
 0x6b7   : > { %v19692_v8 = vpack.c.bf16 %v10889_v59, %v10889_v59  ;;  %v10503_v4 = vpop.f32.mrb[54].mxu0  ;;  %20031 = vmatmul.mubr.bf16.gmra.mrb[124].mxu1 %v22328_v29  ;;  %v27001_v40 = vld [vmem:[#allocation72_spill] sm:$0xff] }
 0x6b8   : > { %v11134_v36 = vsel %vm23381_vm9, %v11119_v42, %v11133_v27  ;;  %v10788_v24 = vmul.f32 %v20622_v9, %v26023_v12  ;;  %v20623_v15 = vadd.f32 %v10503_v4, %v26999_v26  ;;  %v10505_v48 = vpop.f32.mrb[55].mxu0  ;;  %v22329_v11 = vld [vmem:[#allocation3 + $0x40] sm:$0xff]  }
 0x6b9   : > { %11135 = vst [vmem:[#allocation3 + $0x48] sm:$0xf] %v11134_v36  ;;  %v11122_v58 = vshrl.u32 %v19692_v8, 16  ;;  %20034 = vmatprep.mubr.bf16.mxu1 %v22329_v11  ;;  %v11125_v47 = vshll.u32 %v19692_v8, 16  ;;  %v11198_v26 = vld [vmem:[#allocation3 + $0x60] sm:$0xf] }
 0x6ba   : > { %v10843_v0 = vadd.f32 %v26029_v31, %v10788_v24  ;;  %v10789_v20 = vmul.f32 %v20623_v15, %v26023_v12 }
 0x6bb   : > { %v11124_v17 = vrot.slane %v11122_v58, 7  ;;  %v27002_v58 = vld [vmem:[#allocation73_spill] sm:$0xff] }
 0x6bc   : > { %v10891_v50 = vmax.f32 %v10843_v0, 0.0  ;;  %v10844_v60 = vadd.f32 %v26029_v31, %v10789_v20 }
 0x6bd   : > { %v11127_v32 = vor.u32 %v11125_v47, %v11124_v17  ;;  %v11129_v43 = vrot.slane %v11124_v17, 4  ;;  %v10508_v22 = vpop.f32.mrb[56].mxu0 }
 0x6be   : > { %v19693_v34 = vpack.c.bf16 %v10891_v50, %v10891_v50  ;;  %v10892_v3 = vmax.f32 %v10844_v60, 0.0  ;;  %v10510_v61 = vpop.f32.mrb[57].mxu0  ;;  %v27003_v50 = vld [vmem:[#allocation74_spill] sm:$0xff] }
 0x6bf   : > { %v11128_v7 = vsel %vm23422_vm14, %v11120_v5, %v11127_v32  ;;  %v11138_v33 = vsel %vm23402_vm11, %v11129_v43, %v11137_v49  ;;  %v10511_v23 = vpop.f32.mrb[58].mxu0  ;;  %v11202_v22 = vld [vmem:[#allocation3 + $0x68] sm:$0x1] }
 0x6c0   : > { %11136 = vst [vmem:[#allocation3 + $0x4c] sm:$0xf] %v11128_v7  ;;  %11139 = vst [vmem:[#allocation3 + $0x50] sm:$0x1] %v11138_v33  ;;  %v11146_v28 = vshrl.u32 %v19693_v34, 16  ;;  %v19694_v38 = vpack.c.bf16 %v10892_v3, %v10892_v3  ;;  %v20624_v63 = vadd.f32 %v10511_v23, %v27000_v14  ;;  %v10513_v37 = vpop.f32.mrb[59].mxu0 }
 0x6c1   : > { %v11149_v52 = vshll.u32 %v19693_v34, 16 }
 0x6c2   : > { %v11148_v18 = vrot.slane %v11146_v28, 7  ;;  %v11154_v10 = vshrl.u32 %v19694_v38, 16  ;;  %v10791_v19 = vmul.f32 %v20624_v63, %v26023_v12  ;;  %v11157_v57 = vshll.u32 %v19694_v38, 16 }
 0x6c4   : > { %v11151_v35 = vor.u32 %v11149_v52, %v11148_v18  ;;  %v11156_v51 = vrot.slane %v11154_v10, 7  ;;  %v10846_v62 = vadd.f32 %v26029_v31, %v10791_v19  ;;  %v11152_v13 = vrot.slane %v11148_v18, 4 }
 0x6c5   : > { %v10516_v6 = vpop.f32.mrb[60].mxu0 }
 0x6c6   : > { %v11166_v45 = vsel %vm23381_vm9, %v11151_v35, %v11165_v46  ;;  %v11159_v39 = vor.u32 %v11157_v57, %v11156_v51  ;;  %v11161_v41 = vrot.slane %v11156_v51, 4  ;;  %v10894_v27 = vmax.f32 %v10846_v62, 0.0  ;;  %v10518_v25 = vpop.f32.mrb[61].mxu0  ;;  %v27004_v57 = vld [vmem:[#allocation75_spill] sm:$0xff] }
 0x6c7   : > { %11167 = vst [vmem:[#allocation3 + $0x54] sm:$0xf] %v11166_v45  ;;  %v20625_v56 = vadd.f32 %v10516_v6, %v27001_v40  ;;  %v10519_v59 = vpop.f32.mrb[62].mxu0  ;;  %v22330_v53 = vld [vmem:[#allocation3 + $0x48] sm:$0xff]  }
 0x6c8   : > { %v11160_v42 = vsel %vm23422_vm14, %v11152_v13, %v11159_v39  ;;  %v11170_v2 = vsel %vm23402_vm11, %v11161_v41, %v11169_v44  ;;  %v19695_v9 = vpack.c.bf16 %v10894_v27, %v10894_v27  ;;  %v10521_v1 = vpop.f32.mrb[63].mxu0  ;;  %20035 = vmatmul.mubr.bf16.gmra.mrb[128].mxu1 %v22330_v53  ;;  %v11230_v41 = vld [vmem:[#allocation3 + $0x6c] sm:$0xf]  ;;  %v11234_v53 = vld [vmem:[#allocation3 + $0x74] sm:$0x1] }
 0x6c9   : > { %11168 = vst [vmem:[#allocation3 + $0x58] sm:$0xf] %v11160_v42  ;;  %11171 = vst [vmem:[#allocation3 + $0x5c] sm:$0x1] %v11170_v2  ;;  %v10792_v29 = vmul.f32 %v20625_v56, %v26023_v12 }
 0x6ca   : > { %v11179_v8 = vshrl.u32 %v19695_v9, 16  ;;  %v11182_v24 = vshll.u32 %v19695_v9, 16 }
 0x6cb   : > { %v10847_v4 = vadd.f32 %v26029_v31, %v10792_v29 }
 0x6cc   : > { %v11181_v36 = vrot.slane %v11179_v8, 7 }
 0x6cd   : > { %v10895_v15 = vmax.f32 %v10847_v4, 0.0  ;;  %v10524_v48 = vpop.f32.mrb[64].mxu0  ;;  %v27005_v4 = vld [vmem:[#allocation76_spill] sm:$0xff] }
 0x6ce   : > { %v11184_v11 = vor.u32 %v11182_v24, %v11181_v36  ;;  %v20626_v16 = vadd.f32 %v10524_v48, %v27002_v58  ;;  %v10526_v0 = vpop.f32.mrb[65].mxu0  ;;  %v22331_v20 = vld [vmem:[#allocation3 + $0x50] sm:$0xff]   ;;  %v11185_v28 = vrot.slane %v11181_v36, 4 }
 0x6cf   : > { %v19696_v54 = vpack.c.bf16 %v10895_v15, %v10895_v15  ;;  %v10527_v17 = vpop.f32.mrb[66].mxu0  ;;  %20038 = vmatprep.mubr.bf16.mxu1 %v22331_v20  ;;  %v26171_v0 = vld [vmem:[%s26754_s6] ss:$0 sm:$0xff] }
 0x6d0   : > { %v11199_v47 = vsel %vm23381_vm9, %v11184_v11, %v11198_v26  ;;  %v10794_v49 = vmul.f32 %v20626_v16, %v26023_v12  ;;  %v20627_v60 = vadd.f32 %v10527_v17, %v27003_v50  ;;  %v10529_v5 = vpop.f32.mrb[67].mxu0  ;;  %v22332_v32 = vld [vmem:[#allocation3 + $0x58] sm:$0xff]  }
 0x6d1   : > { %11200 = vst [vmem:[#allocation3 + $0x60] sm:$0xf] %v11199_v47  ;;  %v11187_v43 = vshrl.u32 %v19696_v54, 16  ;;  %20039 = vmatmul.mubr.bf16.gmra.mrb[132].mxu1 %v22332_v32  ;;  %v11190_v7 = vshll.u32 %v19696_v54, 16  ;;  %v11263_v47 = vld [vmem:[#allocation3 + $0x78] sm:$0xf] }
 0x6d2   : > { %v10849_v34 = vadd.f32 %v26029_v31, %v10794_v49  ;;  %v10795_v3 = vmul.f32 %v20627_v60, %v26023_v12  ;;  %v27006_v5 = vld [vmem:[#allocation77_spill] sm:$0xff] }
 0x6d3   : > { %v11189_v61 = vrot.slane %v11187_v43, 7 }
 0x6d4   : > { %v10897_v33 = vmax.f32 %v10849_v34, 0.0  ;;  %v10850_v23 = vadd.f32 %v26029_v31, %v10795_v3 }
 0x6d5   : > { %v11192_v38 = vor.u32 %v11190_v7, %v11189_v61  ;;  %v11194_v14 = vrot.slane %v11189_v61, 4  ;;  %v10532_v63 = vpop.f32.mrb[68].mxu0  ;;  %v26180_v61 = vld [vmem:[%s26753_s5] ss:$0 sm:$0xff] }
 0x6d6   : > { %v19697_v37 = vpack.c.bf16 %v10897_v33, %v10897_v33  ;;  %v10898_v18 = vmax.f32 %v10850_v23, 0.0  ;;  %v10534_v52 = vpop.f32.mrb[69].mxu0  ;;  %v27007_v33 = vld [vmem:[#allocation78_spill] sm:$0xff] }
 0x6d7   : > { %v11193_v10 = vsel %vm23422_vm14, %v11185_v28, %v11192_v38  ;;  %v11203_v19 = vsel %vm23402_vm11, %v11194_v14, %v11202_v22  ;;  %v10535_v46 = vpop.f32.mrb[70].mxu0 }
 0x6d8   : > { %11201 = vst [vmem:[#allocation3 + $0x64] sm:$0xf] %v11193_v10  ;;  %11204 = vst [vmem:[#allocation3 + $0x68] sm:$0x1] %v11203_v19  ;;  %v11211_v35 = vshrl.u32 %v19697_v37, 16  ;;  %v19698_v51 = vpack.c.bf16 %v10898_v18, %v10898_v18  ;;  %v20628_v62 = vadd.f32 %v10535_v46, %v27004_v57  ;;  %v10537_v13 = vpop.f32.mrb[71].mxu0 }
 0x6d9   : > { %v11214_v6 = vshll.u32 %v19697_v37, 16  ;;  %v11267_v10 = vld [vmem:[#allocation3 + $0x80] sm:$0x1] }
 0x6da   : > { %v11213_v44 = vrot.slane %v11211_v35, 7  ;;  %v11219_v45 = vshrl.u32 %v19698_v51, 16  ;;  %v10797_v39 = vmul.f32 %v20628_v62, %v26023_v12  ;;  %v11222_v40 = vshll.u32 %v19698_v51, 16 }
 0x6dc   : > { %v11216_v27 = vor.u32 %v11214_v6, %v11213_v44  ;;  %v11221_v25 = vrot.slane %v11219_v45, 7  ;;  %v10852_v56 = vadd.f32 %v26029_v31, %v10797_v39  ;;  %v11217_v59 = vrot.slane %v11213_v44, 4 }
 0x6dd   : > { %v10540_v42 = vpop.f32.mrb[72].mxu0 }
 0x6de   : > { %v11231_v2 = vsel %vm23381_vm9, %v11216_v27, %v11230_v41  ;;  %v11224_v9 = vor.u32 %v11222_v40, %v11221_v25  ;;  %v11226_v1 = vrot.slane %v11221_v25, 4  ;;  %v10900_v29 = vmax.f32 %v10852_v56, 0.0  ;;  %v10542_v8 = vpop.f32.mrb[73].mxu0  ;;  %v27008_v40 = vld [vmem:[#allocation79_spill] sm:$0xff] }
 0x6df   : > { %11232 = vst [vmem:[#allocation3 + $0x6c] sm:$0xf] %v11231_v2  ;;  %v20629_v36 = vadd.f32 %v10540_v42, %v27005_v4  ;;  %v10543_v24 = vpop.f32.mrb[74].mxu0  ;;  %v22334_v26 = vld [vmem:[#allocation3 + $0x60] sm:$0xff]  }
 0x6e0   : > { %v11225_v15 = vsel %vm23422_vm14, %v11217_v59, %v11224_v9  ;;  %v11235_v31 = vsel %vm23402_vm11, %v11226_v1, %v11234_v53  ;;  %v19699_v48 = vpack.c.bf16 %v10900_v29, %v10900_v29  ;;  %v10545_v11 = vpop.f32.mrb[75].mxu0  ;;  %20042 = vmatprep.mubr.bf16.mxu1 %v22334_v26  ;;  %v11295_v53 = vld [vmem:[#allocation3 + $0x84] sm:$0xf]  ;;  %v11299_v29 = vld [vmem:[#allocation3 + $0x8c] sm:$0x1] }
 0x6e1   : > { %11233 = vst [vmem:[#allocation3 + $0x70] sm:$0xf] %v11225_v15  ;;  %11236 = vst [vmem:[#allocation3 + $0x74] sm:$0x1] %v11235_v31  ;;  %v10798_v58 = vmul.f32 %v20629_v36, %v26023_v12 }
 0x6e2   : > { %v11244_v16 = vshrl.u32 %v19699_v48, 16  ;;  %v11247_v17 = vshll.u32 %v19699_v48, 16 }
 0x6e3   : > { %v10853_v20 = vadd.f32 %v26171_v0, %v10798_v58 }
 0x6e4   : > { %v11246_v54 = vrot.slane %v11244_v16, 7 }
 0x6e5   : > { %v10901_v49 = vmax.f32 %v10853_v20, 0.0  ;;  %v10548_v50 = vpop.f32.mrb[76].mxu0  ;;  %v27009_v20 = vld [vmem:[#allocation80_spill] sm:$0xff] }
 0x6e6   : > { %v11249_v60 = vor.u32 %v11247_v17, %v11246_v54  ;;  %v20630_v32 = vadd.f32 %v10548_v50, %v27006_v5  ;;  %v10550_v43 = vpop.f32.mrb[77].mxu0  ;;  %v22336_v22 = vld [vmem:[#allocation3 + $0x68] sm:$0xff]   ;;  %v11250_v19 = vrot.slane %v11246_v54, 4 }
 0x6e7   : > { %v19700_v12 = vpack.c.bf16 %v10901_v49, %v10901_v49  ;;  %v10551_v34 = vpop.f32.mrb[78].mxu0  ;;  %20043 = vmatmul.mubr.bf16.gmra.mrb[136].mxu1 %v22336_v22  ;;  %v11328_v22 = vld [vmem:[#allocation3 + $0x90] sm:$0xf] }
 0x6e8   : > { %v11264_v3 = vsel %vm23381_vm9, %v11249_v60, %v11263_v47  ;;  %v10800_v7 = vmul.f32 %v26180_v61, %v20630_v32  ;;  %v20631_v23 = vadd.f32 %v10551_v34, %v27007_v33  ;;  %v10553_v28 = vpop.f32.mrb[79].mxu0  ;;  %v22337_v38 = vld [vmem:[#allocation3 + $0x70] sm:$0xff]  }
 0x6e9   : > { %11265 = vst [vmem:[#allocation3 + $0x78] sm:$0xf] %v11264_v3  ;;  %v11252_v14 = vshrl.u32 %v19700_v12, 16  ;;  %20046 = vmatprep.mubr.bf16.mxu1 %v22337_v38  ;;  %v11255_v52 = vshll.u32 %v19700_v12, 16  ;;  %v27010_v28 = vld [vmem:[#allocation81_spill] sm:$0xff] }
 0x6ea   : > { %v10855_v63 = vadd.f32 %v26171_v0, %v10800_v7  ;;  %v10801_v37 = vmul.f32 %v26180_v61, %v20631_v23 }
 0x6eb   : > { %v11254_v18 = vrot.slane %v11252_v14, 7 }
 0x6ec   : > { %v10903_v46 = vmax.f32 %v10855_v63, 0.0  ;;  %v10856_v35 = vadd.f32 %v26171_v0, %v10801_v37 }
 0x6ed   : > { %v11257_v51 = vor.u32 %v11255_v52, %v11254_v18  ;;  %v11259_v57 = vrot.slane %v11254_v18, 4  ;;  %v10556_v62 = vpop.f32.mrb[80].mxu0 }
 0x6ee   : > { %v19701_v13 = vpack.c.bf16 %v10903_v46, %v10903_v46  ;;  %v10904_v44 = vmax.f32 %v10856_v35, 0.0  ;;  %v10558_v6 = vpop.f32.mrb[81].mxu0 }
 0x6ef   : > { %v11258_v45 = vsel %vm23422_vm14, %v11250_v19, %v11257_v51  ;;  %v11268_v39 = vsel %vm23402_vm11, %v11259_v57, %v11267_v10  ;;  %v10559_v41 = vpop.f32.mrb[82].mxu0  ;;  %v27011_v19 = vld [vmem:[#allocation82_spill] sm:$0xff] }
 0x6f0   : > { %11266 = vst [vmem:[#allocation3 + $0x7c] sm:$0xf] %v11258_v45  ;;  %11269 = vst [vmem:[#allocation3 + $0x80] sm:$0x1] %v11268_v39  ;;  %v11276_v27 = vshrl.u32 %v19701_v13, 16  ;;  %v19702_v25 = vpack.c.bf16 %v10904_v44, %v10904_v44  ;;  %v20632_v56 = vadd.f32 %v10559_v41, %v27008_v40  ;;  %v10561_v59 = vpop.f32.mrb[83].mxu0 }
 0x6f1   : > { %v11279_v2 = vshll.u32 %v19701_v13, 16  ;;  %v11332_v45 = vld [vmem:[#allocation3 + $0x98] sm:$0x1] }
 0x6f2   : > { %v11278_v42 = vrot.slane %v11276_v27, 7  ;;  %v11284_v9 = vshrl.u32 %v19702_v25, 16  ;;  %v10803_v1 = vmul.f32 %v26180_v61, %v20632_v56  ;;  %v11287_v36 = vshll.u32 %v19702_v25, 16 }
 0x6f4   : > { %v11281_v8 = vor.u32 %v11279_v2, %v11278_v42  ;;  %v11286_v4 = vrot.slane %v11284_v9, 7  ;;  %v10858_v24 = vadd.f32 %v26171_v0, %v10803_v1  ;;  %v11282_v26 = vrot.slane %v11278_v42, 4 }
 0x6f5   : > { %v10564_v15 = vpop.f32.mrb[84].mxu0 }
 0x6f6   : > { %v11296_v31 = vsel %vm23381_vm9, %v11281_v8, %v11295_v53  ;;  %v11289_v48 = vor.u32 %v11287_v36, %v11286_v4  ;;  %v11291_v11 = vrot.slane %v11286_v4, 4  ;;  %v10906_v58 = vmax.f32 %v10858_v24, 0.0  ;;  %v10566_v16 = vpop.f32.mrb[85].mxu0  ;;  %v27012_v4 = vld [vmem:[#allocation83_spill] sm:$0xff] }
 0x6f7   : > { %11297 = vst [vmem:[#allocation3 + $0x84] sm:$0xf] %v11296_v31  ;;  %v20633_v54 = vadd.f32 %v10564_v15, %v27009_v20  ;;  %v10567_v17 = vpop.f32.mrb[86].mxu0  ;;  %v22339_v47 = vld [vmem:[#allocation3 + $0x78] sm:$0xff]  }
 0x6f8   : > { %v11290_v49 = vsel %vm23422_vm14, %v11282_v26, %v11289_v48  ;;  %v11300_v50 = vsel %vm23402_vm11, %v11291_v11, %v11299_v29  ;;  %v19703_v60 = vpack.c.bf16 %v10906_v58, %v10906_v58  ;;  %v10569_v5 = vpop.f32.mrb[87].mxu0  ;;  %20047 = vmatmul.mubr.bf16.gmra.mrb[140].mxu1 %v22339_v47  ;;  %v11360_v26 = vld [vmem:[#allocation3 + $0x9c] sm:$0xf]  ;;  %v11364_v58 = vld [vmem:[#allocation3 + $0xa4] sm:$0x1] }
 0x6f9   : > { %11298 = vst [vmem:[#allocation3 + $0x88] sm:$0xf] %v11290_v49  ;;  %11301 = vst [vmem:[#allocation3 + $0x8c] sm:$0x1] %v11300_v50  ;;  %v10804_v32 = vmul.f32 %v26180_v61, %v20633_v54 }
 0x6fa   : > { %v11309_v43 = vshrl.u32 %v19703_v60, 16  ;;  %v11312_v3 = vshll.u32 %v19703_v60, 16 }
 0x6fb   : > { %v10859_v12 = vadd.f32 %v26171_v0, %v10804_v32 }
 0x6fc   : > { %v11311_v34 = vrot.slane %v11309_v43, 7 }
 0x6fd   : > { %v10907_v7 = vmax.f32 %v10859_v12, 0.0  ;;  %v10572_v33 = vpop.f32.mrb[88].mxu0 }
 0x6fe   : > { %v11314_v23 = vor.u32 %v11312_v3, %v11311_v34  ;;  %v20634_v38 = vadd.f32 %v10572_v33, %v27010_v28  ;;  %v10574_v14 = vpop.f32.mrb[89].mxu0  ;;  %v22341_v63 = vld [vmem:[#allocation3 + $0x80] sm:$0xff]   ;;  %v11315_v39 = vrot.slane %v11311_v34, 4 }
 0x6ff   : > { %v19704_v37 = vpack.c.bf16 %v10907_v7, %v10907_v7  ;;  %v10575_v18 = vpop.f32.mrb[90].mxu0  ;;  %20050 = vmatprep.mubr.bf16.mxu1 %v22341_v63 }
 0x700   : > { %v11329_v52 = vsel %vm23381_vm9, %v11314_v23, %v11328_v22  ;;  %v10806_v10 = vmul.f32 %v26180_v61, %v20634_v38  ;;  %v20635_v46 = vadd.f32 %v10575_v18, %v27011_v19  ;;  %v10577_v35 = vpop.f32.mrb[91].mxu0  ;;  %v22342_v51 = vld [vmem:[#allocation3 + $0x88] sm:$0xff]   ;;  %v27013_v22 = vld [vmem:[#allocation84_spill] sm:$0xff] }
 0x701   : > { %11330 = vst [vmem:[#allocation3 + $0x90] sm:$0xf] %v11329_v52  ;;  %v11317_v57 = vshrl.u32 %v19704_v37, 16  ;;  %20051 = vmatmul.mubr.bf16.gmra.mrb[144].mxu1 %v22342_v51  ;;  %v11320_v6 = vshll.u32 %v19704_v37, 16  ;;  %v11393_v52 = vld [vmem:[#allocation3 + $0xa8] sm:$0xf] }
 0x702   : > { %v10861_v62 = vadd.f32 %v26171_v0, %v10806_v10  ;;  %v10807_v13 = vmul.f32 %v26180_v61, %v20635_v46  ;;  %v27014_v35 = vld [vmem:[#allocation85_spill] sm:$0xff] }
 0x703   : > { %v11319_v44 = vrot.slane %v11317_v57, 7 }
 0x704   : > { %v10909_v41 = vmax.f32 %v10861_v62, 0.0  ;;  %v10862_v27 = vadd.f32 %v26171_v0, %v10807_v13 }
 0x705   : > { %v11322_v25 = vor.u32 %v11320_v6, %v11319_v44  ;;  %v11324_v40 = vrot.slane %v11319_v44, 4  ;;  %v10580_v56 = vpop.f32.mrb[92].mxu0 }
 0x706   : > { %v19705_v59 = vpack.c.bf16 %v10909_v41, %v10909_v41  ;;  %v10910_v53 = vmax.f32 %v10862_v27, 0.0  ;;  %v10582_v42 = vpop.f32.mrb[93].mxu0 }
 0x707   : > { %v11323_v2 = vsel %vm23422_vm14, %v11315_v39, %v11322_v25  ;;  %v11333_v9 = vsel %vm23402_vm11, %v11324_v40, %v11332_v45  ;;  %v10583_v1 = vpop.f32.mrb[94].mxu0  ;;  %v27015_v39 = vld [vmem:[#allocation86_spill] sm:$0xff] }
 0x708   : > { %11331 = vst [vmem:[#allocation3 + $0x94] sm:$0xf] %v11323_v2  ;;  %11334 = vst [vmem:[#allocation3 + $0x98] sm:$0x1] %v11333_v9  ;;  %v11341_v29 = vshrl.u32 %v19705_v59, 16  ;;  %v19706_v8 = vpack.c.bf16 %v10910_v53, %v10910_v53  ;;  %v20636_v36 = vadd.f32 %v10583_v1, %v27012_v4  ;;  %v10585_v24 = vpop.f32.mrb[95].mxu0 }
 0x709   : > { %v11344_v31 = vshll.u32 %v19705_v59, 16  ;;  %v11397_v2 = vld [vmem:[#allocation3 + $0xb0] sm:$0x1] }
 0x70a   : > { %v11343_v15 = vrot.slane %v11341_v29, 7  ;;  %v11349_v48 = vshrl.u32 %v19706_v8, 16  ;;  %v10809_v11 = vmul.f32 %v26180_v61, %v20636_v36  ;;  %v11352_v54 = vshll.u32 %v19706_v8, 16 }
 0x70c   : > { %v11346_v16 = vor.u32 %v11344_v31, %v11343_v15  ;;  %v11351_v20 = vrot.slane %v11349_v48, 7  ;;  %v10864_v17 = vadd.f32 %v26171_v0, %v10809_v11  ;;  %v11347_v47 = vrot.slane %v11343_v15, 4 }
 0x70d   : > { %v10588_v49 = vpop.f32.mrb[96].mxu0 }
 0x70e   : > { %v11361_v50 = vsel %vm23381_vm9, %v11346_v16, %v11360_v26  ;;  %v11354_v60 = vor.u32 %v11352_v54, %v11351_v20  ;;  %v11356_v5 = vrot.slane %v11351_v20, 4  ;;  %v10912_v32 = vmax.f32 %v10864_v17, 0.0  ;;  %v10590_v43 = vpop.f32.mrb[97].mxu0  ;;  %v27016_v20 = vld [vmem:[#allocation87_spill] sm:$0xff] }
 0x70f   : > { %11362 = vst [vmem:[#allocation3 + $0x9c] sm:$0xf] %v11361_v50  ;;  %v20637_v12 = vadd.f32 %v10588_v49, %v27013_v22  ;;  %v10591_v34 = vpop.f32.mrb[98].mxu0  ;;  %v22344_v3 = vld [vmem:[#allocation3 + $0x90] sm:$0xff]   ;;  %v11429_v43 = vld [vmem:[#allocation3 + $0xbc] sm:$0x1] }
 0x710   : > { %v11355_v7 = vsel %vm23422_vm14, %v11347_v47, %v11354_v60  ;;  %v11365_v33 = vsel %vm23402_vm11, %v11356_v5, %v11364_v58  ;;  %v19707_v23 = vpack.c.bf16 %v10912_v32, %v10912_v32  ;;  %v10593_v28 = vpop.f32.mrb[99].mxu0  ;;  %20054 = vmatprep.mubr.bf16.mxu1 %v22344_v3  ;;  %v22353_v47 = vld [vmem:[#allocation3] sm:$0xff]   ;;  %v11425_v32 = vld [vmem:[#allocation3 + $0xb4] sm:$0xf] }
 0x711   : > { %11363 = vst [vmem:[#allocation3 + $0xa0] sm:$0xf] %v11355_v7  ;;  %11366 = vst [vmem:[#allocation3 + $0xa4] sm:$0x1] %v11365_v33  ;;  %v10810_v38 = vmul.f32 %v26180_v61, %v20637_v12 }
 0x712   : > { %v11374_v14 = vshrl.u32 %v19707_v23, 16  ;;  %v11377_v18 = vshll.u32 %v19707_v23, 16  ;;  %v12378_v23 = vshll.u32 %v22353_v47, 16 }
 0x713   : > { %v10865_v63 = vadd.f32 %v26171_v0, %v10810_v38 }
 0x714   : > { %v11376_v37 = vrot.slane %v11374_v14, 7 }
 0x715   : > { %v10913_v10 = vmax.f32 %v10865_v63, 0.0  ;;  %v10596_v19 = vpop.f32.mrb[100].mxu0 }
 0x716   : > { %v11379_v46 = vor.u32 %v11377_v18, %v11376_v37  ;;  %v20638_v51 = vadd.f32 %v10596_v19, %v27014_v35  ;;  %v10598_v57 = vpop.f32.mrb[101].mxu0  ;;  %v22346_v62 = vld [vmem:[#allocation3 + $0x98] sm:$0xff]   ;;  %v11380_v9 = vrot.slane %v11376_v37, 4  ;;  %v22354_v18 = vld [vmem:[#allocation3 + $0x8] sm:$0xff]  }
 0x717   : > { %v19708_v13 = vpack.c.bf16 %v10913_v10, %v10913_v10  ;;  %v10599_v44 = vpop.f32.mrb[102].mxu0  ;;  %20055 = vmatmul.mubr.bf16.gmra.mrb[148].mxu1 %v22346_v62 }
 0x718   : > { %v11394_v6 = vsel %vm23381_vm9, %v11379_v46, %v11393_v52  ;;  %v10812_v45 = vmul.f32 %v26180_v61, %v20638_v51  ;;  %v20639_v41 = vadd.f32 %v10599_v44, %v27015_v39  ;;  %v10601_v27 = vpop.f32.mrb[103].mxu0  ;;  %v22347_v25 = vld [vmem:[#allocation3 + $0xa0] sm:$0xff]   ;;  %v27017_v52 = vld [vmem:[#allocation88_spill] sm:$0xff]  ;;  %v12383_v39 = vshll.u32 %v22354_v18, 16 }
 0x719   : > { %11395 = vst [vmem:[#allocation3 + $0xa8] sm:$0xf] %v11394_v6  ;;  %v11382_v40 = vshrl.u32 %v19708_v13, 16  ;;  %20058 = vmatprep.mubr.bf16.mxu1 %v22347_v25  ;;  %v11385_v42 = vshll.u32 %v19708_v13, 16  ;;  %v12376_v6 = vshrl.u32 %v22353_v47, 16 }
 0x71a   : > { %v10867_v56 = vadd.f32 %v26171_v0, %v10812_v45  ;;  %v10813_v59 = vmul.f32 %v26180_v61, %v20639_v41  ;;  %v12380_v45 = vrot.slane %v12378_v23, 1  ;;  %v11458_v41 = vld [vmem:[#allocation3 + $0xc0] sm:$0xf]  ;;  %v22363_v23 = vld [vmem:[%s26755_s7 + $0x90] sm:$0xff]  }
 0x71b   : > { %v11384_v53 = vrot.slane %v11382_v40, 7 }
 0x71c   : > { %v10915_v1 = vmax.f32 %v10867_v56, 0.0  ;;  %v10868_v29 = vadd.f32 %v26171_v0, %v10813_v59  ;;  %v22356_v56 = vld [vmem:[#allocation3 + $0x10] sm:$0xff]  }
 0x71d   : > { %v11387_v8 = vor.u32 %v11385_v42, %v11384_v53  ;;  %v11389_v4 = vrot.slane %v11384_v53, 4  ;;  %v10604_v36 = vpop.f32.mrb[104].mxu0  ;;  %v22357_v53 = vld [vmem:[#allocation3 + $0x18] sm:$0xff]  }
 0x71e   : > { %v19709_v24 = vpack.c.bf16 %v10915_v1, %v10915_v1  ;;  %v10916_v26 = vmax.f32 %v10868_v29, 0.0  ;;  %v10606_v15 = vpop.f32.mrb[105].mxu0  ;;  %v12385_v1 = vrot.slane %v12383_v39, 1  ;;  %v12403_v55 = vshrl.u32 %v22357_v53, 16 }
 0x71f   : > { %v11388_v31 = vsel %vm23422_vm14, %v11380_v9, %v11387_v8  ;;  %v11398_v48 = vsel %vm23402_vm11, %v11389_v4, %v11397_v2  ;;  %v10607_v11 = vpop.f32.mrb[106].mxu0  ;;  %v12381_v9 = vor.u32 %v12380_v45, %v12376_v6  ;;  %v12391_v4 = vshll.u32 %v22356_v56, 16 }
 0x720   : > { %11396 = vst [vmem:[#allocation3 + $0xac] sm:$0xf] %v11388_v31  ;;  %11399 = vst [vmem:[#allocation3 + $0xb0] sm:$0x1] %v11398_v48  ;;  %v11406_v58 = vshrl.u32 %v19709_v24, 16  ;;  %v19710_v16 = vpack.c.bf16 %v10916_v26, %v10916_v26  ;;  %v20640_v54 = vadd.f32 %v10607_v11, %v27016_v20  ;;  %v10609_v17 = vpop.f32.mrb[107].mxu0 }
 0x721   : > { %v11409_v50 = vshll.u32 %v19709_v24, 16  ;;  %v12399_v24 = vshll.u32 %v22357_v53, 16  ;;  %v22358_v26 = vld [vmem:[#allocation3 + $0x20] sm:$0xff]   ;;  %v11462_v48 = vld [vmem:[#allocation3 + $0xc8] sm:$0x1]  ;;  %v12387_v11 = vshrl.u32 %v22354_v18, 16 }
 0x722   : > { %v11408_v49 = vrot.slane %v11406_v58, 7  ;;  %v11414_v60 = vshrl.u32 %v19710_v16, 16  ;;  %v10815_v5 = vmul.f32 %v26180_v61, %v20640_v54  ;;  %v11417_v34 = vshll.u32 %v19710_v16, 16  ;;  %v22359_v20 = vld [vmem:[#allocation3 + $0x28] sm:$0xff]   ;;  %v22368_v18 = vld [vmem:[%s26755_s7 + $0x98] sm:$0xff]  }
 0x723   : > { %v12395_v58 = vshrl.u32 %v22356_v56, 16  ;;  %v12393_v16 = vrot.slane %v12391_v4, 1  ;;  %v12389_v47 = vor.u32 %v12387_v11, %v12385_v1  ;;  %v22366_v56 = vld [vmem:[#allocation3 + $0x50] sm:$0xff]  }
 0x724   : > { %v11411_v22 = vor.u32 %v11409_v50, %v11408_v49  ;;  %v11416_v12 = vrot.slane %v11414_v60, 7  ;;  %v10870_v3 = vadd.f32 %v26171_v0, %v10815_v5  ;;  %v11412_v7 = vrot.slane %v11408_v49, 4  ;;  %v22384_v4 = vld [vmem:[%s26755_s7 + $0xb8] sm:$0xff]  }
 0x725   : > { %v10612_v33 = vpop.f32.mrb[108].mxu0  ;;  %v12401_v49 = vrot.slane %v12399_v24, 1  ;;  %v12407_v50 = vshll.u32 %v22358_v26, 16 }
 0x726   : > { %v11426_v28 = vsel %vm23381_vm9, %v11411_v22, %v11425_v32  ;;  %v11419_v38 = vor.u32 %v11417_v34, %v11416_v12  ;;  %v11421_v14 = vrot.slane %v11416_v12, 4  ;;  %v10918_v63 = vmax.f32 %v10870_v3, 0.0  ;;  %v10614_v37 = vpop.f32.mrb[109].mxu0  ;;  %v22360_v22 = vld [vmem:[%s26755_s7 + $0x88] sm:$0xff]  }
 0x727   : > { %11427 = vst [vmem:[#allocation3 + $0xb4] sm:$0xf] %v11426_v28  ;;  %v20641_v10 = vadd.f32 %v10612_v33, %v27017_v52  ;;  %v10615_v19 = vpop.f32.mrb[110].mxu0  ;;  %v22349_v46 = vld [vmem:[#allocation3 + $0xa8] sm:$0xff]   ;;  %v12397_v32 = vor.u32 %v12395_v58, %v12393_v16  ;;  %v12394_v12 = vsel %vm3246_vm1, %v12389_v47, %v12393_v16  ;;  %v12409_v3 = vrot.slane %v12407_v50, 1 }
 0x728   : > { %v11420_v35 = vsel %vm23422_vm14, %v11412_v7, %v11419_v38  ;;  %v11430_v51 = vsel %vm23402_vm11, %v11421_v14, %v11429_v43  ;;  %v19711_v57 = vpack.c.bf16 %v10918_v63, %v10918_v63  ;;  %v10617_v62 = vpop.f32.mrb[111].mxu0  ;;  %20059 = vmatmul.mubr.bf16.gmra.mrb[152].mxu1 %v22349_v46  ;;  %v12415_v43 = vshll.u32 %v22359_v20, 16  ;;  %v22361_v7 = vld [vmem:[#allocation3 + $0x30] sm:$0xff]   ;;  %v22362_v38 = vld [vmem:[#allocation3 + $0x38] sm:$0xff]   ;;  %v22370_v58 = vld [vmem:[#allocation3 + $0x68] sm:$0xff]  }
 0x729   : > { %11428 = vst [vmem:[#allocation3 + $0xb8] sm:$0xf] %v11420_v35  ;;  %11431 = vst [vmem:[#allocation3 + $0xbc] sm:$0x1] %v11430_v51  ;;  %v10816_v13 = vmul.f32 %v26180_v61, %v20641_v10  ;;  %v12402_v34 = vsel %vm3246_vm1, %v12397_v32, %v12401_v49  ;;  %v12411_v33 = vshrl.u32 %v22358_v26, 16  ;;  %v12405_v63 = vor.u32 %v12403_v55, %v12401_v49  ;;  %v22364_v51 = vld [vmem:[#allocation3 + $0x40] sm:$0xff]  }
 0x72a   : > { %v11439_v44 = vshrl.u32 %v19711_v57, 16  ;;  %v11442_v40 = vshll.u32 %v19711_v57, 16  ;;  %v12417_v28 = vrot.slane %v12415_v43, 1  ;;  %v12423_v37 = vshll.u32 %v22361_v7, 16  ;;  %v22371_v62 = vld [vmem:[%s26755_s7 + $0xa0] sm:$0xff]   ;;  %v22372_v32 = vld [vmem:[#allocation3 + $0x70] sm:$0xff]  }
 0x72b   : > { %v10871_v27 = vadd.f32 %v26171_v0, %v10816_v13  ;;  %v12386_v0 = vsel %vm3246_vm1, %v12381_v9, %v12385_v1  ;;  %v12413_v14 = vor.u32 %v12411_v33, %v12409_v3  ;;  %v12410_v52 = vsel %vm3246_vm1, %v12405_v63, %v12409_v3  ;;  %v22374_v33 = vld [vmem:[#allocation3 + $0x80] sm:$0xff]  }
 0x72c   : > { %v11441_v25 = vrot.slane %v11439_v44, 7  ;;  %v12431_v10 = vshll.u32 %v22362_v38, 16  ;;  %v12419_v46 = vshrl.u32 %v22359_v20, 16  ;;  %v12427_v35 = vshrl.u32 %v22361_v7, 16  ;;  %v22365_v44 = vld [vmem:[#allocation3 + $0x48] sm:$0xff]  }
 0x72d   : > { %v10919_v59 = vmax.f32 %v10871_v27, 0.0  ;;  %v12418_v19 = vsel %vm3246_vm1, %v12413_v14, %v12417_v28  ;;  %v12425_v57 = vrot.slane %v12423_v37, 1  ;;  %v12439_v39 = vshll.u32 %v22364_v51, 16 }
 0x72e   : > { %v11444_v42 = vor.u32 %v11442_v40, %v11441_v25  ;;  %v22351_v2 = vld [vmem:[#allocation3 + $0xb0] sm:$0xff]   ;;  %v11445_v30 = vrot.slane %v11441_v25, 4  ;;  %v12433_v13 = vrot.slane %v12431_v10, 1  ;;  %v12421_v6 = vor.u32 %v12419_v46, %v12417_v28 }
 0x72f   : > { %v19712_v29 = vpack.c.bf16 %v10919_v59, %v10919_v59  ;;  %20062 = vmatprep.mubr.bf16.mxu1 %v22351_v2  ;;  %v12429_v45 = vor.u32 %v12427_v35, %v12425_v57  ;;  %v12447_v40 = vshll.u32 %v22365_v44, 16  ;;  %v12435_v59 = vshrl.u32 %v22362_v38, 16 }
 0x730   : > { %v11459_v61 = vsel %vm23381_vm9, %v11444_v42, %v11458_v41  ;;  %v22352_v8 = vld [vmem:[#allocation3 + $0xb8] sm:$0xff]   ;;  %v22376_v41 = vld [vmem:[%s26755_s7 + $0xa8] sm:$0xff]   ;;  %v12426_v27 = vsel %vm3246_vm1, %v12421_v6, %v12425_v57  ;;  %v12441_v53 = vrot.slane %v12439_v39, 1  ;;  %v22379_v42 = vld [vmem:[%s26755_s7 + $0xb0] sm:$0xff]   ;;  %v12443_v9 = vshrl.u32 %v22364_v51, 16 }
 0x731   : > { %11460 = vst [vmem:[#allocation3 + $0xc0] sm:$0xf] %v11459_v61  ;;  %v11447_v36 = vshrl.u32 %v19712_v29, 16  ;;  %20063 = vmatmul.mubr.bf16.gmra.mrb[156].mxu1 %v22352_v8  ;;  %v11450_v31 = vshll.u32 %v19712_v29, 16  ;;  %v12434_v25 = vsel %vm3246_vm1, %v12429_v45, %v12433_v13  ;;  %v12437_v2 = vor.u32 %v12435_v59, %v12433_v13  ;;  %v22367_v61 = vld [vmem:[#allocation3 + $0x58] sm:$0xff]   ;;  %v22377_v57 = vld [vmem:[#allocation3 + $0x90] sm:$0xff]  }
 0x732   : > { %20082 = vmatprep.mubr.bf16.mxu1 %v12386_v0  ;;  %v12449_v1 = vrot.slane %v12447_v40, 1  ;;  %v12455_v29 = vshll.u32 %v22366_v56, 16  ;;  %v12445_v8 = vor.u32 %v12443_v9, %v12441_v53  ;;  %v12463_v26 = vshll.u32 %v22367_v61, 16  ;;  %v22378_v13 = vld [vmem:[#allocation3 + $0x98] sm:$0xff]  }
 0x733   : > { %v11449_v15 = vrot.slane %v11447_v36, 7  ;;  %v12442_v36 = vsel %vm3246_vm1, %v12437_v2, %v12441_v53  ;;  %v12451_v11 = vshrl.u32 %v22365_v44, 16  ;;  %v12479_v47 = vshll.u32 %v22370_v58, 16  ;;  %v22380_v53 = vld [vmem:[#allocation3 + $0xa0] sm:$0xff]   ;;  %v22381_v2 = vld [vmem:[#allocation3 + $0xa8] sm:$0xff]  }
 0x734   : > { %v12450_v0 = vsel %vm3246_vm1, %v12445_v8, %v12449_v1  ;;  %v12457_v24 = vrot.slane %v12455_v29, 1  ;;  %v12465_v20 = vrot.slane %v12463_v26, 1  ;;  %v12467_v50 = vshrl.u32 %v22367_v61, 16 }
 0x735   : > { %v11452_v54 = vor.u32 %v11450_v31, %v11449_v15  ;;  %v11454_v17 = vrot.slane %v11449_v15, 4  ;;  %v22369_v15 = vld [vmem:[#allocation3 + $0x60] sm:$0xff]   ;;  %v12459_v31 = vshrl.u32 %v22366_v56, 16  ;;  %v12481_v43 = vrot.slane %v12479_v47, 1 }
 0x736   : > { %v12487_v3 = vshll.u32 %v22372_v32, 16  ;;  %v12491_v14 = vshrl.u32 %v22372_v32, 16  ;;  %v12503_v37 = vshll.u32 %v22374_v33, 16  ;;  %v12507_v51 = vshrl.u32 %v22374_v33, 16 }
 0x737   : > { %v11453_v60 = vsel %vm23422_vm14, %v11445_v30, %v11452_v54  ;;  %v11463_v5 = vsel %vm23402_vm11, %v11454_v17, %v11462_v48  ;;  %v26293_v48 = vld [vmem:[%s26755_s7 + $0xc0] sm:$0xff]   ;;  %v12461_v16 = vor.u32 %v12459_v31, %v12457_v24  ;;  %v12453_v30 = vor.u32 %v12451_v11, %v12449_v1 }
 0x738   : > { %11461 = vst [vmem:[#allocation3 + $0xc4] sm:$0xf] %v11453_v60  ;;  %11464 = vst [vmem:[#allocation3 + $0xc8] sm:$0x1] %v11463_v5  ;;  %v12471_v54 = vshll.u32 %v22369_v15, 16  ;;  %v12475_v60 = vshrl.u32 %v22369_v15, 16 }
 0x739   : > { %20083 = vmatmul.mubr.bf16.vlgmr.msra.gmra.mrb[112].mxu1 %v12394_v12  ;;  %v12458_v17 = vsel %vm3246_vm1, %v12453_v30, %v12457_v24  ;;  %v12466_v49 = vsel %vm3246_vm1, %v12461_v16, %v12465_v20  ;;  %v12469_v12 = vor.u32 %v12467_v50, %v12465_v20  ;;  %v12489_v28 = vrot.slane %v12487_v3, 1  ;;  %v22385_v50 = vld [vmem:[#allocation3 + $0xc0] ss:$0 sps:$4 sm:$0x11]   ;;  %v22387_v3 = vld [vmem:[#allocation3 + $0x8] sm:$0xff]  }
 0x73a   : > { %20131 = vmatpush3.bf16.msra.mxu1 %v22698_v21  ;;  %20086 = vmatprep.mubr.bf16.mxu1 %v12402_v34  ;;  %v12473_v5 = vrot.slane %v12471_v54, 1  ;;  %v12505_v46 = vrot.slane %v12503_v37, 1  ;;  %v12519_v39 = vshll.u32 %v22377_v57, 16  ;;  %v12523_v56 = vshrl.u32 %v22377_v57, 16 }
 0x73b   : > { %20132 = vmatprep.subr.bf16.mxu1 %v22360_v22  ;;  %v12535_v29 = vshll.u32 %v22380_v53, 16  ;;  %v12539_v15 = vshrl.u32 %v22380_v53, 16  ;;  %v12547_v47 = vshrl.u32 %v22381_v2, 16  ;;  %v13202_v33 = vrot.slane %v22387_v3, 1  ;;  %v22398_v53 = vld [vmem:[#allocation3 + $0x48] sm:$0xff]  }
 0x73c   : > { %v12477_v34 = vor.u32 %v12475_v60, %v12473_v5  ;;  %v12474_v21 = vsel %vm3246_vm1, %v12469_v12, %v12473_v5  ;;  %v12509_v44 = vor.u32 %v12507_v51, %v12505_v46  ;;  %v12521_v59 = vrot.slane %v12519_v39, 1  ;;  %v22396_v51 = vld [vmem:[%s26755_s7 + $0xd0] sm:$0xff]   ;;  %v22404_v39 = vld [vmem:[%s26755_s7 + $0xe0] sm:$0xff]  }
 0x73d   : > { %v12537_v24 = vrot.slane %v12535_v29, 1 }
 0x73e   : > { %20133 = vmatpush3.bf16.msra.mxu1 %v22360_v22  ;;  %v22373_v22 = vld [vmem:[#allocation3 + $0x78] sm:$0xff]   ;;  %v12482_v55 = vsel %vm3246_vm1, %v12477_v34, %v12481_v43  ;;  %v12525_v1 = vor.u32 %v12523_v56, %v12521_v59  ;;  %v22386_v34 = vld [vmem:[#allocation3] sm:$0xfe]  }
 0x73f   : > { %20134 = vmatprep.subr.bf16.mxu1 %v22363_v23  ;;  %v12495_v7 = vshll.u32 %v22373_v22, 16  ;;  %v12541_v16 = vor.u32 %v12539_v15, %v12537_v24  ;;  %v22397_v56 = vld [vmem:[#allocation3 + $0x40] sm:$0xff]  }
 0x740   : > { %v22402_v15 = vld [vmem:[#allocation3 + $0x60] sm:$0xff]  }
 0x741   : > { %20087 = vmatmul.mubr.bf16.gmra.mrb[116].mxu1 %v12410_v52  ;;  %v12497_v63 = vrot.slane %v12495_v7, 1  ;;  %v12493_v52 = vor.u32 %v12491_v14, %v12489_v28  ;;  %v13201_v7 = vrot.slane %v22386_v34, 1  ;;  %v22410_v34 = vld [vmem:[#allocation3 + $0x90] sm:$0xff]  }
 0x742   : > { %20090 = vmatprep.mubr.bf16.mxu1 %v12418_v19  ;;  %20135 = vmatpush3.bf16.msra.mxu1 %v22363_v23  ;;  %v12483_v23 = vshrl.u32 %v22370_v58, 16  ;;  %v22383_v58 = vld [vmem:[#allocation3 + $0xb8] sm:$0xff]  }
 0x743   : > { %20136 = vmatprep.subr.bf16.mxu1 %v22368_v18  ;;  %v12498_v19 = vsel %vm3246_vm1, %v12493_v52, %v12497_v63  ;;  %v13203_v14 = vsel %vm4431_vm0, %v13201_v7, %v13202_v33  ;;  %v22393_v52 = vld [vmem:[%s26755_s7 + $0xc8] sm:$0xff]  }
 0x744   : > { %v12485_v38 = vor.u32 %v12483_v23, %v12481_v43 }
 0x746   : > { %20137 = vmatpush3.bf16.msra.mxu1 %v22368_v18  ;;  %v22375_v18 = vld [vmem:[#allocation3 + $0x88] sm:$0xff]   ;;  %v12490_v10 = vsel %vm3246_vm1, %v12485_v38, %v12489_v28  ;;  %v22389_v38 = vld [vmem:[#allocation3 + $0x10] sm:$0xff]  }
 0x747   : > { %20138 = vmatprep.subr.bf16.mxu1 %v22371_v62  ;;  %v12511_v35 = vshll.u32 %v22375_v18, 16  ;;  %v12515_v40 = vshrl.u32 %v22375_v18, 16  ;;  %v13204_v37 = vrot.slane %v22389_v38, 1  ;;  %v22414_v38 = vld [vmem:[#allocation3 + $0xa8] sm:$0xff]  }
 0x749   : > { %20091 = vmatmul.mubr.bf16.gmra.mrb[120].mxu1 %v12426_v27  ;;  %v12513_v6 = vrot.slane %v12511_v35, 1  ;;  %v12527_v27 = vshll.u32 %v22378_v13, 16  ;;  %v22392_v35 = vld [vmem:[#allocation3 + $0x28] sm:$0xff]  }
 0x74a   : > { %20094 = vmatprep.mubr.bf16.mxu1 %v12434_v25  ;;  %20139 = vmatpush3.bf16.msra.mxu1 %v22371_v62  ;;  %v12499_v62 = vshrl.u32 %v22373_v22, 16  ;;  %v12567_v22 = vshll.u32 %v22385_v50, 16 }
 0x74b   : > { %20140 = vmatprep.subr.bf16.mxu1 %v22376_v41  ;;  %v12514_v25 = vsel %vm3246_vm1, %v12509_v44, %v12513_v6  ;;  %v12517_v9 = vor.u32 %v12515_v40, %v12513_v6  ;;  %v22394_v6 = vld [vmem:[#allocation3 + $0x30] sm:$0xff]  }
 0x74c   : > { %v12501_v45 = vor.u32 %v12499_v62, %v12497_v63  ;;  %v22390_v63 = vld [vmem:[#allocation3 + $0x18] sm:$0xff]   ;;  %v13210_v62 = vrot.slane %v22392_v35, 1 }
 0x74d   : > { %v12522_v61 = vsel %vm3246_vm1, %v12517_v9, %v12521_v59  ;;  %v13206_v18 = vrot.slane %v22390_v63, 1  ;;  %v13218_v9 = vrot.slane %v22398_v53, 1  ;;  %v13242_v63 = vrot.slane %v22414_v38, 1  ;;  %v22427_v53 = vld [vmem:[#allocation3 + $0x3c] sm:$0xff]   ;;  %v22457_v38 = vld [vmem:[#allocation3 + $0x34] sm:$0xff]  }
 0x74e   : > { %20141 = vmatpush3.bf16.msra.mxu1 %v22376_v41  ;;  %v12506_v41 = vsel %vm3246_vm1, %v12501_v45, %v12505_v46  ;;  %v22395_v45 = vld [vmem:[#allocation3 + $0x38] sm:$0xff]  }
 0x74f   : > { %20142 = vmatprep.subr.bf16.mxu1 %v22379_v42  ;;  %v13207_v46 = vsel %vm4431_vm0, %v13204_v37, %v13206_v18 }
 0x751   : > { %20095 = vmatmul.mubr.bf16.gmra.mrb[124].mxu1 %v12442_v36  ;;  %v12543_v36 = vshll.u32 %v22381_v2, 16  ;;  %v13216_v2 = vrot.slane %v22397_v56, 1  ;;  %v22426_v56 = vld [vmem:[#allocation3 + $0x34] sm:$0xff]  }
 0x752   : > { %20098 = vmatprep.mubr.bf16.mxu1 %v12450_v0  ;;  %20143 = vmatpush3.bf16.msra.mxu1 %v22379_v42  ;;  %v12529_v42 = vrot.slane %v12527_v27, 1  ;;  %v22382_v0 = vld [vmem:[#allocation3 + $0xb0] sm:$0xff]   ;;  %v13214_v27 = vrot.slane %v22395_v45, 1  ;;  %v22422_v45 = vld [vmem:[#allocation3 + $0x1c] sm:$0xff]  }
 0x753   : > { %20144 = vmatprep.subr.bf16.mxu1 %v22384_v4  ;;  %v12545_v31 = vrot.slane %v12543_v36, 1  ;;  %v12551_v11 = vshll.u32 %v22382_v0, 16  ;;  %v26345_v36 = vld [vmem:[%s26755_s7 + $0x100] sm:$0xff]  }
 0x754   : > { %v12530_v8 = vsel %vm3246_vm1, %v12525_v1, %v12529_v42  ;;  %v22417_v1 = vld [vmem:[%s26755_s7 + $0xf8] sm:$0xff]   ;;  %v13217_v29 = vsel %vm4431_vm0, %v13214_v27, %v13216_v2 }
 0x755   : > { %v12546_v30 = vsel %vm3246_vm1, %v12541_v16, %v12545_v31  ;;  %v12553_v54 = vrot.slane %v12551_v11, 1  ;;  %v12549_v32 = vor.u32 %v12547_v47, %v12545_v31  ;;  %v22403_v11 = vld [vmem:[#allocation3 + $0x68] sm:$0xff]  }
 0x756   : > { %20145 = vmatpush3.bf16.msra.mxu1 %v22384_v4  ;;  %v12531_v4 = vshrl.u32 %v22378_v13, 16  ;;  %v22401_v13 = vld [vmem:[%s26755_s7 + $0xd8] sm:$0xff]   ;;  %v13226_v16 = vrot.slane %v22403_v11, 1  ;;  %v22443_v11 = vld [vmem:[#allocation3 + $0x9c] sm:$0xff]  }
 0x757   : > { %20194 = vmatprep.subr.bf16.mxu1 %v26293_v48  ;;  %v12554_v43 = vsel %vm3246_vm1, %v12549_v32, %v12553_v54  ;;  %v22408_v32 = vld [vmem:[#allocation3 + $0x88] sm:$0xff]  }
 0x758   : > { %v12533_v26 = vor.u32 %v12531_v4, %v12529_v42  ;;  %v22412_v42 = vld [vmem:[%s26755_s7 + $0xf0] sm:$0xff]   ;;  %v22400_v4 = vld [vmem:[#allocation3 + $0x58] sm:$0xff]  }
 0x759   : > { %20099 = vmatmul.mubr.bf16.gmra.mrb[128].mxu1 %v12458_v17  ;;  %v12559_v17 = vshll.u32 %v22383_v58, 16 }
 0x75a   : > { %20102 = vmatprep.mubr.bf16.mxu1 %v12466_v49  ;;  %v12538_v20 = vsel %vm3246_vm1, %v12533_v26, %v12537_v24  ;;  %v12555_v49 = vshrl.u32 %v22382_v0, 16  ;;  %v13222_v24 = vrot.slane %v22400_v4, 1  ;;  %v22434_v4 = vld [vmem:[#allocation3 + $0x64] sm:$0xff]  }
 0x75b   : > { %v12561_v5 = vrot.slane %v12559_v17, 1  ;;  %v22406_v17 = vld [vmem:[#allocation3 + $0x78] sm:$0xff]  }
 0x75c   : > { %v12557_v60 = vor.u32 %v12555_v49, %v12553_v54  ;;  %v13230_v49 = vrot.slane %v22406_v17, 1 }
 0x75e   : > { %v12562_v12 = vsel %vm3246_vm1, %v12557_v60, %v12561_v5  ;;  %v22407_v60 = vld [vmem:[#allocation3 + $0x80] sm:$0xff]  }
 0x761   : > { %20103 = vmatmul.mubr.bf16.gmra.mrb[132].mxu1 %v12474_v21  ;;  %v12563_v21 = vshrl.u32 %v22383_v58, 16  ;;  %v13224_v58 = vrot.slane %v22402_v15, 1  ;;  %v22440_v15 = vld [vmem:[#allocation3 + $0x8c] sm:$0xff]  }
 0x762   : > { %20106 = vmatprep.mubr.bf16.mxu1 %v12482_v55  ;;  %v12569_v55 = vrot.slane %v12567_v22, 1  ;;  %v13234_v22 = vrot.slane %v22408_v32, 1 }
 0x763   : > { %v12565_v23 = vor.u32 %v12563_v21, %v12561_v5  ;;  %v13227_v54 = vsel %vm4431_vm0, %v13224_v58, %v13226_v16  ;;  %v22411_v21 = vld [vmem:[#allocation3 + $0x98] sm:$0xff]  }
 0x764   : > { %v13238_v7 = vrot.slane %v22411_v21, 1 }
 0x765   : > { %v12570_v28 = vsel %vm3246_vm1, %v12565_v23, %v12569_v55  ;;  %v13236_v55 = vrot.slane %v22410_v34, 1  ;;  %v22413_v23 = vld [vmem:[#allocation3 + $0xa0] sm:$0xff]  }
 0x769   : > { %20107 = vmatmul.mubr.bf16.gmra.mrb[136].mxu1 %v12490_v10  ;;  %v13205_v10 = vsel %vm4431_vm0, %v13202_v33, %v13204_v37  ;;  %v13237_v33 = vsel %vm4431_vm0, %v13234_v22, %v13236_v55 }
 0x76a   : > { %20110 = vmatprep.mubr.bf16.mxu1 %v12498_v19  ;;  %v22391_v19 = vld [vmem:[#allocation3 + $0x20] sm:$0xff]  }
 0x76b   : > { %v13208_v57 = vrot.slane %v22391_v19, 1 }
 0x76d   : > { %v13209_v44 = vsel %vm4431_vm0, %v13206_v18, %v13208_v57  ;;  %v22415_v18 = vld [vmem:[#allocation3 + $0xb0] sm:$0xff]  }
 0x76e   : > { %v13244_v19 = vrot.slane %v22415_v18, 1  ;;  %v22458_v18 = vld [vmem:[%s26755_s7 + $0x148] sm:$0xff]  }
 0x770   : > { %v13245_v35 = vsel %vm4431_vm0, %v13242_v63, %v13244_v19 }
 0x771   : > { %20111 = vmatmul.mubr.bf16.gmra.mrb[140].mxu1 %v12506_v41  ;;  %v13212_v41 = vrot.slane %v22394_v6, 1  ;;  %v22421_v6 = vld [vmem:[#allocation3 + $0x14] sm:$0xff]  }
 0x772   : > { %20114 = vmatprep.mubr.bf16.mxu1 %v12514_v25  ;;  %v22409_v25 = vld [vmem:[%s26755_s7 + $0xe8] sm:$0xff]  }
 0x773   : > { %v13213_v40 = vsel %vm4431_vm0, %v13210_v62, %v13212_v41  ;;  %v13215_v59 = vsel %vm4431_vm0, %v13212_v41, %v13214_v27  ;;  %v22423_v41 = vld [vmem:[#allocation3 + $0x24] sm:$0xff]   ;;  %v22433_v27 = vld [vmem:[%s26755_s7 + $0x118] sm:$0xff]  }
 0x779   : > { %20115 = vmatmul.mubr.bf16.gmra.mrb[144].mxu1 %v12522_v61  ;;  %v22399_v61 = vld [vmem:[#allocation3 + $0x50] sm:$0xff]  }
 0x77a   : > { %20118 = vmatprep.mubr.bf16.mxu1 %v12530_v8  ;;  %v13219_v8 = vsel %vm4431_vm0, %v13216_v2, %v13218_v9  ;;  %v13220_v0 = vrot.slane %v22399_v61, 1  ;;  %v22429_v2 = vld [vmem:[#allocation3 + $0x44] sm:$0xff]   ;;  %v22431_v61 = vld [vmem:[#allocation3 + $0x54] sm:$0xff]  }
 0x77c   : > { %v13221_v26 = vsel %vm4431_vm0, %v13218_v9, %v13220_v0  ;;  %v13223_v31 = vsel %vm4431_vm0, %v13220_v0, %v13222_v24  ;;  %v22449_v9 = vld [vmem:[%s26755_s7 + $0x138] sm:$0xff]  }
 0x77d   : > { %v22437_v0 = vld [vmem:[#allocation3 + $0x74] sm:$0xff]  }
 0x781   : > { %20119 = vmatmul.mubr.bf16.gmra.mrb[148].mxu1 %v12538_v20  ;;  %v13225_v20 = vsel %vm4431_vm0, %v13222_v24, %v13224_v58  ;;  %v22438_v24 = vld [vmem:[#allocation3 + $0x7c] sm:$0xff]   ;;  %v22445_v58 = vld [vmem:[#allocation3 + $0xa4] sm:$0xff]  }
 0x782   : > { %20122 = vmatprep.mubr.bf16.mxu1 %v12546_v30  ;;  %v22405_v30 = vld [vmem:[#allocation3 + $0x70] sm:$0xff]  }
 0x783   : > { %v13228_v47 = vrot.slane %v22405_v30, 1  ;;  %v22452_v30 = vld [vmem:[#allocation3 + $0x14] sm:$0xff]  }
 0x785   : > { %v13229_v50 = vsel %vm4431_vm0, %v13226_v16, %v13228_v47  ;;  %v13231_v5 = vsel %vm4431_vm0, %v13228_v47, %v13230_v49  ;;  %v22446_v16 = vld [vmem:[#allocation3 + $0xac] sm:$0xff]   ;;  %v22448_v47 = vld [vmem:[#allocation3 + $0xbc] sm:$0xff]  }
 0x789   : > { %20123 = vmatmul.mubr.bf16.gmra.mrb[152].mxu1 %v12554_v43  ;;  %v13232_v43 = vrot.slane %v22407_v60, 1  ;;  %v22454_v60 = vld [vmem:[#allocation3 + $0x1c] sm:$0xff]  }
 0x78a   : > { %20126 = vmatprep.mubr.bf16.mxu1 %v12562_v12  ;;  %v14522_v34 = vshll.u32 %v22454_v60, 16 }
 0x78b   : > { %v13233_v12 = vsel %vm4431_vm0, %v13230_v49, %v13232_v43  ;;  %v13235_v3 = vsel %vm4431_vm0, %v13232_v43, %v13234_v22  ;;  %v14514_v49 = vshll.u32 %v22452_v30, 16  ;;  %v22455_v43 = vld [vmem:[#allocation3 + $0x24] sm:$0xff]  }
 0x78c   : > { %v22450_v22 = vld [vmem:[#allocation3 + $0xc4] sm:$0xff]   ;;  %v14530_v21 = vshll.u32 %v22455_v43, 16 }
 0x78d   : > { %v14516_v32 = vrot.slane %v14514_v49, 1 }
 0x791   : > { %20127 = vmatmul.mubr.bf16.gmra.mrb[156].mxu1 %v12570_v28  ;;  %v13239_v28 = vsel %vm4431_vm0, %v13236_v55, %v13238_v7  ;;  %v14524_v55 = vrot.slane %v14522_v34, 1  ;;  %v22468_v34 = vld [vmem:[#allocation3 + $0x74] sm:$0xff]  }
 0x792   : > { %20146 = vmatprep.mubr.bf16.mxu1 %v13203_v14  ;;  %v13240_v14 = vrot.slane %v22413_v23, 1  ;;  %v14526_v23 = vshrl.u32 %v22454_v60, 16 }
 0x794   : > { %v13241_v37 = vsel %vm4431_vm0, %v13238_v7, %v13240_v14  ;;  %v22456_v7 = vld [vmem:[#allocation3 + $0x2c] sm:$0xff]  }
 0x799   : > { %20147 = vmatmul.mubr.bf16.vlgmr.msra.gmra.mrb[112].mxu1 %v13205_v10  ;;  %v22416_v10 = vld [vmem:[#allocation3 + $0xb8] sm:$0xff]  }
 0x79a   : > { %20195 = vmatpush3.bf16.msra.mxu1 %v26293_v48  ;;  %20150 = vmatprep.mubr.bf16.mxu1 %v13207_v46  ;;  %v13211_v48 = vsel %vm4431_vm0, %v13208_v57, %v13210_v62  ;;  %v13246_v46 = vrot.slane %v22416_v10, 1 }
 0x79b   : > { %20196 = vmatprep.subr.bf16.mxu1 %v22393_v52 }
 0x79c   : > { %v13247_v57 = vsel %vm4431_vm0, %v13244_v19, %v13246_v46  ;;  %v14546_v19 = vshll.u32 %v22457_v38, 16 }
 0x79e   : > { %20197 = vmatpush3.bf16.msra.mxu1 %v22393_v52  ;;  %v13243_v52 = vsel %vm4431_vm0, %v13240_v14, %v13242_v63  ;;  %v14528_v63 = vor.u32 %v14526_v23, %v14524_v55  ;;  %v14610_v23 = vshll.u32 %v22468_v34, 16 }
 0x79f   : > { %20198 = vmatprep.subr.bf16.mxu1 %v22396_v51 }
 0x7a1   : > { %20151 = vmatmul.mubr.bf16.gmra.mrb[116].mxu1 %v13209_v44  ;;  %v22419_v44 = vld [vmem:[#allocation3 + $0xc] sm:$0xff]  }
 0x7a2   : > { %20154 = vmatprep.mubr.bf16.mxu1 %v13211_v48  ;;  %20199 = vmatpush3.bf16.msra.mxu1 %v22396_v51  ;;  %v22418_v51 = vld [vmem:[#allocation3 + $0xc0] ss:$0 sps:$4 sm:$0x11]  }
 0x7a3   : > { %20200 = vmatprep.subr.bf16.mxu1 %v22401_v13  ;;  %v13248_v62 = vrot.slane %v22418_v51, 1  ;;  %v22425_v48 = vld [vmem:[%s26755_s7 + $0x108] sm:$0xff]   ;;  %v22461_v51 = vld [vmem:[%s26755_s7 + $0x150] sm:$0xff]  }
 0x7a6   : > { %20201 = vmatpush3.bf16.msra.mxu1 %v22401_v13  ;;  %v13249_v13 = vsel %vm4431_vm0, %v13246_v46, %v13248_v62  ;;  %v14542_v62 = vshrl.u32 %v22456_v7, 16 }
 0x7a7   : > { %20202 = vmatprep.subr.bf16.mxu1 %v22404_v39 }
 0x7a9   : > { %20155 = vmatmul.mubr.bf16.gmra.mrb[120].mxu1 %v13213_v40  ;;  %v22436_v40 = vld [vmem:[%s26755_s7 + $0x120] sm:$0xff]  }
 0x7aa   : > { %20158 = vmatprep.mubr.bf16.mxu1 %v13215_v59  ;;  %20203 = vmatpush3.bf16.msra.mxu1 %v22404_v39  ;;  %v22428_v39 = vld [vmem:[%s26755_s7 + $0x110] sm:$0xff]   ;;  %v22441_v59 = vld [vmem:[%s26755_s7 + $0x128] sm:$0xff]  }
 0x7ab   : > { %20204 = vmatprep.subr.bf16.mxu1 %v22409_v25 }
 0x7ae   : > { %20205 = vmatpush3.bf16.msra.mxu1 %v22409_v25  ;;  %v22424_v25 = vld [vmem:[#allocation3 + $0x2c] sm:$0xff]  }
 0x7af   : > { %20206 = vmatprep.subr.bf16.mxu1 %v22412_v42 }
 0x7b1   : > { %20159 = vmatmul.mubr.bf16.gmra.mrb[124].mxu1 %v13217_v29  ;;  %v22453_v29 = vld [vmem:[%s26755_s7 + $0x140] sm:$0xff]  }
 0x7b2   : > { %20162 = vmatprep.mubr.bf16.mxu1 %v13219_v8  ;;  %20207 = vmatpush3.bf16.msra.mxu1 %v22412_v42  ;;  %v22444_v42 = vld [vmem:[%s26755_s7 + $0x130] sm:$0xff]   ;;  %v22432_v8 = vld [vmem:[#allocation3 + $0x5c] sm:$0xff]  }
 0x7b3   : > { %20208 = vmatprep.subr.bf16.mxu1 %v22417_v1 }
 0x7b6   : > { %20209 = vmatpush3.bf16.msra.mxu1 %v22417_v1  ;;  %v22430_v1 = vld [vmem:[#allocation3 + $0x4c] sm:$0xff]  }
 0x7b7   : > { %20258 = vmatprep.subr.bf16.mxu1 %v26345_v36 }
 0x7b9   : > { %20163 = vmatmul.mubr.bf16.gmra.mrb[128].mxu1 %v13221_v26  ;;  %v22439_v26 = vld [vmem:[#allocation3 + $0x84] sm:$0xff]  }
 0x7ba   : > { %20166 = vmatprep.mubr.bf16.mxu1 %v13223_v31  ;;  %v22442_v31 = vld [vmem:[#allocation3 + $0x94] sm:$0xff]  }
 0x7c1   : > { %20167 = vmatmul.mubr.bf16.gmra.mrb[132].mxu1 %v13225_v20  ;;  %v22451_v20 = vld [vmem:[#allocation3 + $0xc] sm:$0xff]  }
 0x7c2   : > { %20170 = vmatprep.mubr.bf16.mxu1 %v13227_v54  ;;  %v22447_v54 = vld [vmem:[#allocation3 + $0xb4] sm:$0xff]   ;;  %v14509_v17 = vshll.u32 %v22451_v20, 16 }
 0x7c9   : > { %20171 = vmatmul.mubr.bf16.gmra.mrb[136].mxu1 %v13229_v50  ;;  %v14511_v50 = vrot.slane %v14509_v17, 1  ;;  %v22482_v17 = vld [vmem:[%s26755_s7 + $0x178] sm:$0xff]  }
 0x7ca   : > { %20174 = vmatprep.mubr.bf16.mxu1 %v13231_v5  ;;  %v14507_v5 = vshrl.u32 %v22451_v20, 16 }
 0x7d1   : > { %20175 = vmatmul.mubr.bf16.gmra.mrb[140].mxu1 %v13233_v12  ;;  %v14512_v12 = vor.u32 %v14511_v50, %v14507_v5  ;;  %v22467_v5 = vld [vmem:[#allocation3 + $0x6c] sm:$0xff]  }
 0x7d2   : > { %20178 = vmatprep.mubr.bf16.mxu1 %v13235_v3 }
 0x7d3   : > { %v14517_v3 = vsel %vm3246_vm1, %v14512_v12, %v14516_v32 }
 0x7d9   : > { %20179 = vmatmul.mubr.bf16.gmra.mrb[144].mxu1 %v13237_v33  ;;  %v14518_v33 = vshrl.u32 %v22452_v30, 16 }
 0x7da   : > { %20182 = vmatprep.mubr.bf16.mxu1 %v13239_v28  ;;  %v14532_v28 = vrot.slane %v14530_v21, 1 }
 0x7db   : > { %v14520_v14 = vor.u32 %v14518_v33, %v14516_v32  ;;  %v26421_v32 = vld [vmem:[%s26755_s7 + $0x180] sm:$0xff]  }
 0x7dc   : > { %v14533_v10 = vsel %vm3246_vm1, %v14528_v63, %v14532_v28  ;;  %v14606_v63 = vshrl.u32 %v22467_v5, 16 }
 0x7e1   : > { %20183 = vmatmul.mubr.bf16.gmra.mrb[148].mxu1 %v13241_v37  ;;  %v14538_v37 = vshll.u32 %v22456_v7, 16 }
 0x7e2   : > { %20186 = vmatprep.mubr.bf16.mxu1 %v13243_v52  ;;  %v14525_v52 = vsel %vm3246_vm1, %v14520_v14, %v14524_v55  ;;  %v14602_v55 = vshll.u32 %v22467_v5, 16 }
 0x7e3   : > { %v14540_v46 = vrot.slane %v14538_v37, 1  ;;  %v14612_v37 = vrot.slane %v14610_v23, 1  ;;  %v22483_v23 = vld [vmem:[#allocation3 + $0xcc] ss:$0 sps:$4 sm:$0x11]  }
 0x7e9   : > { %20187 = vmatmul.mubr.bf16.gmra.mrb[152].mxu1 %v13245_v35  ;;  %v22459_v35 = vld [vmem:[#allocation3 + $0x3c] sm:$0xff]  }
 0x7ea   : > { %20190 = vmatprep.mubr.bf16.mxu1 %v13247_v57  ;;  %v14534_v57 = vshrl.u32 %v22455_v43, 16 }
 0x7f1   : > { %20191 = vmatmul.mubr.bf16.gmra.mrb[156].mxu1 %v13249_v13  ;;  %v14548_v13 = vrot.slane %v14546_v19, 1 }
 0x7f2   : > { %20210 = vmatprep.mubr.bf16.mxu1 %v22419_v44  ;;  %v22460_v44 = vld [vmem:[#allocation3 + $0x44] sm:$0xff]  }
 0x7f9   : > { %20211 = vmatmul.mubr.bf16.vlgmr.msra.gmra.mrb[112].mxu1 %v22421_v6  ;;  %v14536_v6 = vor.u32 %v14534_v57, %v14532_v28  ;;  %v14604_v28 = vrot.slane %v14602_v55, 1 }
 0x7fa   : > { %20259 = vmatpush3.bf16.msra.mxu1 %v26345_v36  ;;  %20214 = vmatprep.mubr.bf16.mxu1 %v22422_v45  ;;  %v22435_v36 = vld [vmem:[#allocation3 + $0x6c] sm:$0xff]   ;;  %v14554_v45 = vshll.u32 %v22459_v35, 16 }
 0x7fb   : > { %20260 = vmatprep.subr.bf16.mxu1 %v22425_v48 }
 0x7fe   : > { %20261 = vmatpush3.bf16.msra.mxu1 %v22425_v48  ;;  %v14544_v48 = vor.u32 %v14542_v62, %v14540_v46  ;;  %v22472_v62 = vld [vmem:[#allocation3 + $0x8c] sm:$0xff]  }
 0x7ff   : > { %20262 = vmatprep.subr.bf16.mxu1 %v22428_v39 }
 0x801   : > { %20215 = vmatmul.mubr.bf16.gmra.mrb[116].mxu1 %v22423_v41  ;;  %v14541_v41 = vsel %vm3246_vm1, %v14536_v6, %v14540_v46 }
 0x802   : > { %20218 = vmatprep.mubr.bf16.mxu1 %v22424_v25  ;;  %20263 = vmatpush3.bf16.msra.mxu1 %v22428_v39  ;;  %v22466_v39 = vld [vmem:[%s26755_s7 + $0x158] sm:$0xff]   ;;  %v14562_v25 = vshll.u32 %v22460_v44, 16 }
 0x803   : > { %20264 = vmatprep.subr.bf16.mxu1 %v22433_v27 }
 0x806   : > { %20265 = vmatpush3.bf16.msra.mxu1 %v22433_v27  ;;  %v14549_v27 = vsel %vm3246_vm1, %v14544_v48, %v14548_v13  ;;  %v22473_v48 = vld [vmem:[#allocation3 + $0x94] sm:$0xff]  }
 0x807   : > { %20266 = vmatprep.subr.bf16.mxu1 %v22436_v40 }
 0x809   : > { %20219 = vmatmul.mubr.bf16.gmra.mrb[120].mxu1 %v22426_v56  ;;  %v22462_v56 = vld [vmem:[#allocation3 + $0x4c] sm:$0xff]  }
 0x80a   : > { %20222 = vmatprep.mubr.bf16.mxu1 %v22427_v53  ;;  %20267 = vmatpush3.bf16.msra.mxu1 %v22436_v40  ;;  %v14556_v40 = vrot.slane %v14554_v45, 1  ;;  %v14550_v53 = vshrl.u32 %v22457_v38, 16  ;;  %v22470_v38 = vld [vmem:[#allocation3 + $0x7c] sm:$0xff]  }
 0x80b   : > { %20268 = vmatprep.subr.bf16.mxu1 %v22441_v59  ;;  %v14618_v19 = vshll.u32 %v22470_v38, 16 }
 0x80d   : > { %v14620_v57 = vrot.slane %v14618_v19, 1 }
 0x80e   : > { %20269 = vmatpush3.bf16.msra.mxu1 %v22441_v59  ;;  %v22469_v59 = vld [vmem:[%s26755_s7 + $0x160] sm:$0xff]  }
 0x80f   : > { %20270 = vmatprep.subr.bf16.mxu1 %v22444_v42 }
 0x811   : > { %20223 = vmatmul.mubr.bf16.gmra.mrb[124].mxu1 %v22429_v2  ;;  %v14564_v2 = vrot.slane %v14562_v25, 1 }
 0x812   : > { %20226 = vmatprep.mubr.bf16.mxu1 %v22430_v1  ;;  %20271 = vmatpush3.bf16.msra.mxu1 %v22444_v42  ;;  %v14558_v42 = vshrl.u32 %v22459_v35, 16  ;;  %v14552_v1 = vor.u32 %v14550_v53, %v14548_v13  ;;  %v14614_v13 = vshrl.u32 %v22468_v34, 16 }
 0x813   : > { %20272 = vmatprep.subr.bf16.mxu1 %v22449_v9 }
 0x814   : > { %v14616_v45 = vor.u32 %v14614_v13, %v14612_v37 }
 0x816   : > { %20273 = vmatpush3.bf16.msra.mxu1 %v22449_v9  ;;  %v22463_v9 = vld [vmem:[#allocation3 + $0x54] sm:$0xff]  }
 0x817   : > { %20322 = vmatprep.subr.bf16.mxu1 %v22453_v29  ;;  %v14582_v43 = vshrl.u32 %v22463_v9, 16 }
 0x819   : > { %20227 = vmatmul.mubr.bf16.gmra.mrb[128].mxu1 %v22431_v61  ;;  %v14570_v61 = vshll.u32 %v22462_v56, 16 }
 0x81a   : > { %20230 = vmatprep.mubr.bf16.mxu1 %v22432_v8  ;;  %v22474_v8 = vld [vmem:[%s26755_s7 + $0x168] sm:$0xff]  }
 0x821   : > { %20231 = vmatmul.mubr.bf16.gmra.mrb[132].mxu1 %v22434_v4  ;;  %v14557_v4 = vsel %vm3246_vm1, %v14552_v1, %v14556_v40 }
 0x822   : > { %20234 = vmatprep.mubr.bf16.mxu1 %v22435_v36 }
 0x829   : > { %20235 = vmatmul.mubr.bf16.gmra.mrb[136].mxu1 %v22437_v0  ;;  %v14578_v0 = vshll.u32 %v22463_v9, 16  ;;  %v22476_v9 = vld [vmem:[#allocation3 + $0xa4] sm:$0xff]  }
 0x82a   : > { %20238 = vmatprep.mubr.bf16.mxu1 %v22438_v24  ;;  %v14572_v24 = vrot.slane %v14570_v61, 1 }
 0x831   : > { %20239 = vmatmul.mubr.bf16.gmra.mrb[140].mxu1 %v22439_v26  ;;  %v22464_v26 = vld [vmem:[#allocation3 + $0x5c] sm:$0xff]  }
 0x832   : > { %20242 = vmatprep.mubr.bf16.mxu1 %v22440_v15  ;;  %v22477_v15 = vld [vmem:[%s26755_s7 + $0x170] sm:$0xff]  }
 0x839   : > { %20243 = vmatmul.mubr.bf16.gmra.mrb[144].mxu1 %v22442_v31  ;;  %v14566_v31 = vshrl.u32 %v22460_v44, 16  ;;  %v14622_v44 = vshrl.u32 %v22470_v38, 16 }
 0x83a   : > { %20246 = vmatprep.mubr.bf16.mxu1 %v22443_v11  ;;  %v14574_v11 = vshrl.u32 %v22462_v56, 16 }
 0x83b   : > { %v14568_v20 = vor.u32 %v14566_v31, %v14564_v2 }
 0x83c   : > { %v14576_v30 = vor.u32 %v14574_v11, %v14572_v24  ;;  %v22479_v11 = vld [vmem:[#allocation3 + $0xb4] sm:$0xff]  }
 0x841   : > { %20247 = vmatmul.mubr.bf16.gmra.mrb[148].mxu1 %v22445_v58  ;;  %v14580_v58 = vrot.slane %v14578_v0, 1 }
 0x842   : > { %20250 = vmatprep.mubr.bf16.mxu1 %v22446_v16  ;;  %v22465_v16 = vld [vmem:[#allocation3 + $0x64] sm:$0xff]  }
 0x843   : > { %v14581_v49 = vsel %vm3246_vm1, %v14576_v30, %v14580_v58  ;;  %v14594_v50 = vshll.u32 %v22465_v16, 16  ;;  %v14598_v14 = vshrl.u32 %v22465_v16, 16 }
 0x845   : > { %v14596_v12 = vrot.slane %v14594_v50, 1  ;;  %v14662_v50 = vshrl.u32 %v22476_v9, 16 }
 0x849   : > { %20251 = vmatmul.mubr.bf16.gmra.mrb[152].mxu1 %v22447_v54  ;;  %v14586_v54 = vshll.u32 %v22464_v26, 16 }
 0x84a   : > { %20254 = vmatprep.mubr.bf16.mxu1 %v22448_v47  ;;  %v14573_v47 = vsel %vm3246_vm1, %v14568_v20, %v14572_v24  ;;  %v22478_v24 = vld [vmem:[#allocation3 + $0xac] sm:$0xff]  }
 0x84b   : > { %v14588_v60 = vrot.slane %v14586_v54, 1  ;;  %v14666_v20 = vshll.u32 %v22478_v24, 16 }
 0x851   : > { %20255 = vmatmul.mubr.bf16.gmra.mrb[156].mxu1 %v22450_v22  ;;  %v14590_v22 = vshrl.u32 %v22464_v26, 16  ;;  %v14646_v26 = vshrl.u32 %v22473_v48, 16 }
 0x852   : > { %20274 = vmatprep.mubr.bf16.mxu1 %v14517_v3  ;;  %v14584_v3 = vor.u32 %v14582_v43, %v14580_v58  ;;  %v22481_v43 = vld [vmem:[#allocation3 + $0xc4] sm:$0xff]  }
 0x853   : > { %v14592_v21 = vor.u32 %v14590_v22, %v14588_v60  ;;  %v14690_v55 = vshll.u32 %v22481_v43, 16  ;;  %v14694_v19 = vshrl.u32 %v22481_v43, 16 }
 0x854   : > { %v14589_v7 = vsel %vm3246_vm1, %v14584_v3, %v14588_v60  ;;  %v14670_v60 = vshrl.u32 %v22478_v24, 16  ;;  %v22495_v24 = vld [vmem:[#allocation3 + $0x4c] sm:$0xff]  }
 0x855   : > { %v14597_v33 = vsel %vm3246_vm1, %v14592_v21, %v14596_v12  ;;  %v14692_v38 = vrot.slane %v14690_v55, 1 }
 0x859   : > { %20275 = vmatmul.mubr.bf16.vlgmr.msra.gmra.mrb[112].mxu1 %v14525_v52  ;;  %v14600_v52 = vor.u32 %v14598_v14, %v14596_v12 }
 0x85a   : > { %20323 = vmatpush3.bf16.msra.mxu1 %v22453_v29  ;;  %20278 = vmatprep.mubr.bf16.mxu1 %v14533_v10  ;;  %v14560_v29 = vor.u32 %v14558_v42, %v14556_v40  ;;  %v14608_v10 = vor.u32 %v14606_v63, %v14604_v28  ;;  %v14642_v40 = vshll.u32 %v22473_v48, 16  ;;  %v14638_v42 = vshrl.u32 %v22472_v62, 16  ;;  %v22488_v48 = vld [vmem:[#allocation3 + $0x24] sm:$0xff]  }
 0x85b   : > { %20324 = vmatprep.subr.bf16.mxu1 %v22458_v18  ;;  %v14605_v46 = vsel %vm3246_vm1, %v14600_v52, %v14604_v28 }
 0x85c   : > { %v14565_v36 = vsel %vm3246_vm1, %v14560_v29, %v14564_v2  ;;  %v14613_v35 = vsel %vm3246_vm1, %v14608_v10, %v14612_v37  ;;  %v14644_v2 = vrot.slane %v14642_v40, 1  ;;  %v22485_v10 = vld [vmem:[#allocation3 + $0x14] sm:$0xff]  }
 0x85e   : > { %20325 = vmatpush3.bf16.msra.mxu1 %v22458_v18  ;;  %v22471_v18 = vld [vmem:[#allocation3 + $0x84] sm:$0xff]   ;;  %v14648_v58 = vor.u32 %v14646_v26, %v14644_v2 }
 0x85f   : > { %20326 = vmatprep.subr.bf16.mxu1 %v22461_v51  ;;  %v14630_v53 = vshrl.u32 %v22471_v18, 16 }
 0x861   : > { %20279 = vmatmul.mubr.bf16.gmra.mrb[116].mxu1 %v14541_v41  ;;  %v14634_v41 = vshll.u32 %v22472_v62, 16 }
 0x862   : > { %20282 = vmatprep.mubr.bf16.mxu1 %v14549_v27  ;;  %20327 = vmatpush3.bf16.msra.mxu1 %v22461_v51  ;;  %v14626_v51 = vshll.u32 %v22471_v18, 16  ;;  %v14621_v27 = vsel %vm3246_vm1, %v14616_v45, %v14620_v57  ;;  %v14698_v18 = vshll.u32 %v22483_v23, 16 }
 0x863   : > { %20328 = vmatprep.subr.bf16.mxu1 %v22466_v39  ;;  %v14636_v56 = vrot.slane %v14634_v41, 1  ;;  %v22491_v41 = vld [vmem:[%s26755_s7 + $0x188] sm:$0xff]  }
 0x864   : > { %v14628_v6 = vrot.slane %v14626_v51, 1  ;;  %v14700_v51 = vrot.slane %v14698_v18, 1 }
 0x865   : > { %v14640_v29 = vor.u32 %v14638_v42, %v14636_v56 }
 0x866   : > { %20329 = vmatpush3.bf16.msra.mxu1 %v22466_v39  ;;  %v14624_v39 = vor.u32 %v14622_v44, %v14620_v57  ;;  %v14632_v1 = vor.u32 %v14630_v53, %v14628_v6  ;;  %v15333_v57 = vrot.slane %v22485_v10, 1  ;;  %v22487_v44 = vld [vmem:[#allocation3 + $0x1c] sm:$0xff]  }
 0x867   : > { %20330 = vmatprep.subr.bf16.mxu1 %v22469_v59  ;;  %v15335_v45 = vrot.slane %v22487_v44, 1  ;;  %v22508_v10 = vld [vmem:[#allocation3 + $0x9c] sm:$0xff]   ;;  %v22512_v44 = vld [vmem:[#allocation3 + $0xb4] sm:$0xff]  }
 0x868   : > { %v14629_v25 = vsel %vm3246_vm1, %v14624_v39, %v14628_v6  ;;  %v15337_v39 = vrot.slane %v22488_v48, 1  ;;  %v15373_v48 = vrot.slane %v22512_v44, 1 }
 0x869   : > { %20283 = vmatmul.mubr.bf16.gmra.mrb[120].mxu1 %v14557_v4  ;;  %v14645_v4 = vsel %vm3246_vm1, %v14640_v29, %v14644_v2  ;;  %v22499_v2 = vld [vmem:[%s26755_s7 + $0x198] sm:$0xff]   ;;  %v22493_v29 = vld [vmem:[#allocation3 + $0x44] sm:$0xff]  }
 0x86a   : > { %20286 = vmatprep.mubr.bf16.mxu1 %v14565_v36  ;;  %20331 = vmatpush3.bf16.msra.mxu1 %v22469_v59  ;;  %v22475_v59 = vld [vmem:[#allocation3 + $0x9c] sm:$0xff]   ;;  %v14658_v36 = vshll.u32 %v22476_v9, 16  ;;  %v15338_v40 = vsel %vm4431_vm0, %v15335_v45, %v15337_v39 }
 0x86b   : > { %20332 = vmatprep.subr.bf16.mxu1 %v22474_v8  ;;  %v14650_v61 = vshll.u32 %v22475_v59, 16 }
 0x86c   : > { %v14660_v31 = vrot.slane %v14658_v36, 1  ;;  %v22507_v36 = vld [vmem:[%s26755_s7 + $0x1a8] sm:$0xff]  }
 0x86d   : > { %v14652_v0 = vrot.slane %v14650_v61, 1  ;;  %v22502_v61 = vld [vmem:[%s26755_s7 + $0x1a0] sm:$0xff]  }
 0x86e   : > { %20333 = vmatpush3.bf16.msra.mxu1 %v22474_v8  ;;  %v14637_v8 = vsel %vm3246_vm1, %v14632_v1, %v14636_v56  ;;  %v14664_v22 = vor.u32 %v14662_v50, %v14660_v31  ;;  %v22490_v56 = vld [vmem:[#allocation3 + $0x34] sm:$0xff]   ;;  %v22492_v1 = vld [vmem:[#allocation3 + $0x3c] sm:$0xff]  }
 0x86f   : > { %20334 = vmatprep.subr.bf16.mxu1 %v22477_v15  ;;  %v14653_v30 = vsel %vm3246_vm1, %v14648_v58, %v14652_v0  ;;  %v15341_v42 = vrot.slane %v22490_v56, 1 }
 0x871   : > { %20287 = vmatmul.mubr.bf16.gmra.mrb[124].mxu1 %v14573_v47  ;;  %v14668_v47 = vrot.slane %v14666_v20, 1 }
 0x872   : > { %20290 = vmatprep.mubr.bf16.mxu1 %v14581_v49  ;;  %20335 = vmatpush3.bf16.msra.mxu1 %v22477_v15  ;;  %v14654_v15 = vshrl.u32 %v22475_v59, 16  ;;  %v22480_v49 = vld [vmem:[#allocation3 + $0xbc] sm:$0xff]   ;;  %v22494_v59 = vld [vmem:[%s26755_s7 + $0x190] sm:$0xff]  }
 0x873   : > { %20336 = vmatprep.subr.bf16.mxu1 %v22482_v17  ;;  %v14672_v12 = vor.u32 %v14670_v60, %v14668_v47  ;;  %v14682_v34 = vshll.u32 %v22480_v49, 16  ;;  %v14669_v3 = vsel %vm3246_vm1, %v14664_v22, %v14668_v47  ;;  %v14686_v28 = vshrl.u32 %v22480_v49, 16  ;;  %v26473_v47 = vld [vmem:[%s26755_s7 + $0x1c0] sm:$0xff]  }
 0x874   : > { %v14656_v16 = vor.u32 %v14654_v15, %v14652_v0  ;;  %v22496_v15 = vld [vmem:[#allocation3 + $0x54] sm:$0xff]  }
 0x875   : > { %v15349_v58 = vrot.slane %v22496_v15, 1  ;;  %v22501_v22 = vld [vmem:[#allocation3 + $0x74] sm:$0xff]   ;;  %v22525_v15 = vld [vmem:[#allocation3 + $0x48] sm:$0xff]  }
 0x876   : > { %20337 = vmatpush3.bf16.msra.mxu1 %v22482_v17  ;;  %v14661_v54 = vsel %vm3246_vm1, %v14656_v16, %v14660_v31  ;;  %v14674_v17 = vshll.u32 %v22479_v11, 16  ;;  %v22510_v31 = vld [vmem:[%s26755_s7 + $0x1b0] sm:$0xff]   ;;  %v22515_v16 = vld [vmem:[%s26755_s7 + $0x1b8] sm:$0xff]  }
 0x877   : > { %20386 = vmatprep.subr.bf16.mxu1 %v26421_v32 }
 0x878   : > { %v14676_v5 = vrot.slane %v14674_v17, 1  ;;  %v22498_v17 = vld [vmem:[#allocation3 + $0x64] sm:$0xff]  }
 0x879   : > { %20291 = vmatmul.mubr.bf16.gmra.mrb[128].mxu1 %v14589_v7  ;;  %v14684_v7 = vrot.slane %v14682_v34, 1  ;;  %v15353_v50 = vrot.slane %v22498_v17, 1  ;;  %v15357_v34 = vrot.slane %v22501_v22, 1  ;;  %v22532_v17 = vld [vmem:[#allocation3 + $0x70] sm:$0xff]   ;;  %v22541_v22 = vld [vmem:[#allocation3 + $0xa8] sm:$0xff]  }
 0x87a   : > { %20294 = vmatprep.mubr.bf16.mxu1 %v14597_v33  ;;  %v14677_v21 = vsel %vm3246_vm1, %v14672_v12, %v14676_v5  ;;  %v14678_v33 = vshrl.u32 %v22479_v11, 16  ;;  %v15347_v11 = vrot.slane %v22495_v24, 1  ;;  %v22524_v24 = vld [vmem:[#allocation3 + $0x40] sm:$0xff]  }
 0x87b   : > { %v14688_v63 = vor.u32 %v14686_v28, %v14684_v7 }
 0x87c   : > { %v14680_v14 = vor.u32 %v14678_v33, %v14676_v5  ;;  %v22500_v5 = vld [vmem:[#allocation3 + $0x6c] sm:$0xff]  }
 0x87d   : > { %v14693_v52 = vsel %vm3246_vm1, %v14688_v63, %v14692_v38  ;;  %v15355_v12 = vrot.slane %v22500_v5, 1  ;;  %v22506_v63 = vld [vmem:[#allocation3 + $0x94] sm:$0xff]  }
 0x87e   : > { %v14685_v37 = vsel %vm3246_vm1, %v14680_v14, %v14684_v7  ;;  %v22504_v7 = vld [vmem:[#allocation3 + $0x84] sm:$0xff]   ;;  %v15365_v18 = vrot.slane %v22506_v63, 1  ;;  %v22538_v5 = vld [vmem:[#allocation3 + $0x98] sm:$0xff]  }
 0x87f   : > { %v15358_v55 = vsel %vm4431_vm0, %v15355_v12, %v15357_v34  ;;  %v15361_v23 = vrot.slane %v22504_v7, 1 }
 0x881   : > { %20295 = vmatmul.mubr.bf16.gmra.mrb[132].mxu1 %v14605_v46  ;;  %v22484_v46 = vld [vmem:[#allocation3 + $0xc] sm:$0xfe]  }
 0x882   : > { %20298 = vmatprep.mubr.bf16.mxu1 %v14613_v35  ;;  %v14696_v35 = vor.u32 %v14694_v19, %v14692_v38  ;;  %v15332_v62 = vrot.slane %v22484_v46, 1  ;;  %v22505_v38 = vld [vmem:[#allocation3 + $0x8c] sm:$0xff]   ;;  %v22509_v46 = vld [vmem:[#allocation3 + $0xa4] sm:$0xff]  }
 0x884   : > { %v14701_v13 = vsel %vm3246_vm1, %v14696_v35, %v14700_v51  ;;  %v15334_v6 = vsel %vm4431_vm0, %v15332_v62, %v15333_v57  ;;  %v15367_v35 = vrot.slane %v22508_v10, 1  ;;  %v15369_v51 = vrot.slane %v22509_v46, 1  ;;  %v22511_v62 = vld [vmem:[#allocation3 + $0xac] sm:$0xff]  }
 0x889   : > { %20299 = vmatmul.mubr.bf16.gmra.mrb[136].mxu1 %v14621_v27  ;;  %v15336_v27 = vsel %vm4431_vm0, %v15333_v57, %v15335_v45  ;;  %v15368_v57 = vsel %vm4431_vm0, %v15365_v18, %v15367_v35 }
 0x88a   : > { %20302 = vmatprep.mubr.bf16.mxu1 %v14629_v25  ;;  %v22489_v25 = vld [vmem:[#allocation3 + $0x2c] sm:$0xff]  }
 0x88b   : > { %v15339_v53 = vrot.slane %v22489_v25, 1 }
 0x88d   : > { %v15340_v9 = vsel %vm4431_vm0, %v15337_v39, %v15339_v53  ;;  %v22513_v39 = vld [vmem:[#allocation3 + $0xbc] sm:$0xff]  }
 0x88e   : > { %v15375_v25 = vrot.slane %v22513_v39, 1  ;;  %v22556_v39 = vld [vmem:[%s26755_s7 + $0x208] sm:$0xff]  }
 0x890   : > { %v15376_v56 = vsel %vm4431_vm0, %v15373_v48, %v15375_v25 }
 0x891   : > { %20303 = vmatmul.mubr.bf16.gmra.mrb[140].mxu1 %v14637_v8  ;;  %v15343_v8 = vrot.slane %v22492_v1, 1  ;;  %v22519_v1 = vld [vmem:[#allocation3 + $0x20] sm:$0xff]  }
 0x892   : > { %20306 = vmatprep.mubr.bf16.mxu1 %v14645_v4  ;;  %v15345_v4 = vrot.slane %v22493_v29, 1  ;;  %v22520_v29 = vld [vmem:[#allocation3 + $0x28] sm:$0xff]  }
 0x893   : > { %v15344_v0 = vsel %vm4431_vm0, %v15341_v42, %v15343_v8 }
 0x894   : > { %v15346_v26 = vsel %vm4431_vm0, %v15343_v8, %v15345_v4  ;;  %v15348_v20 = vsel %vm4431_vm0, %v15345_v4, %v15347_v11  ;;  %v22521_v8 = vld [vmem:[#allocation3 + $0x30] sm:$0xff]  }
 0x895   : > { %v22531_v4 = vld [vmem:[%s26755_s7 + $0x1d8] sm:$0xff]  }
 0x899   : > { %20307 = vmatmul.mubr.bf16.gmra.mrb[144].mxu1 %v14653_v30  ;;  %v22497_v30 = vld [vmem:[#allocation3 + $0x5c] sm:$0xff]  }
 0x89a   : > { %20310 = vmatprep.mubr.bf16.mxu1 %v14661_v54  ;;  %v15350_v54 = vsel %vm4431_vm0, %v15347_v11, %v15349_v58  ;;  %v15351_v49 = vrot.slane %v22497_v30, 1  ;;  %v22527_v11 = vld [vmem:[#allocation3 + $0x50] sm:$0xff]   ;;  %v22529_v30 = vld [vmem:[#allocation3 + $0x60] sm:$0xff]  }
 0x89c   : > { %v15352_v60 = vsel %vm4431_vm0, %v15349_v58, %v15351_v49  ;;  %v15354_v43 = vsel %vm4431_vm0, %v15351_v49, %v15353_v50  ;;  %v22547_v58 = vld [vmem:[%s26755_s7 + $0x1f8] sm:$0xff]   ;;  %v22535_v49 = vld [vmem:[#allocation3 + $0x80] sm:$0xff]  }
 0x8a1   : > { %20311 = vmatmul.mubr.bf16.gmra.mrb[148].mxu1 %v14669_v3  ;;  %v15356_v3 = vsel %vm4431_vm0, %v15353_v50, %v15355_v12  ;;  %v22536_v50 = vld [vmem:[#allocation3 + $0x88] sm:$0xff]   ;;  %v22543_v12 = vld [vmem:[#allocation3 + $0xb0] sm:$0xff]  }
 0x8a2   : > { %20314 = vmatprep.mubr.bf16.mxu1 %v14677_v21  ;;  %v22503_v21 = vld [vmem:[#allocation3 + $0x7c] sm:$0xff]  }
 0x8a3   : > { %v15359_v33 = vrot.slane %v22503_v21, 1  ;;  %v22550_v21 = vld [vmem:[#allocation3 + $0x20] sm:$0xff]  }
 0x8a5   : > { %v15360_v28 = vsel %vm4431_vm0, %v15357_v34, %v15359_v33  ;;  %v15362_v14 = vsel %vm4431_vm0, %v15359_v33, %v15361_v23  ;;  %v22544_v34 = vld [vmem:[#allocation3 + $0xb8] sm:$0xff]   ;;  %v22546_v33 = vld [vmem:[#allocation3 + $0xc8] sm:$0xff]  }
 0x8a9   : > { %20315 = vmatmul.mubr.bf16.gmra.mrb[152].mxu1 %v14685_v37  ;;  %v15363_v37 = vrot.slane %v22505_v38, 1  ;;  %v22552_v38 = vld [vmem:[#allocation3 + $0x28] sm:$0xff]  }
 0x8aa   : > { %20318 = vmatprep.mubr.bf16.mxu1 %v14693_v52  ;;  %v16653_v10 = vshll.u32 %v22552_v38, 16 }
 0x8ab   : > { %v15364_v52 = vsel %vm4431_vm0, %v15361_v23, %v15363_v37  ;;  %v15366_v19 = vsel %vm4431_vm0, %v15363_v37, %v15365_v18  ;;  %v16645_v23 = vshll.u32 %v22550_v21, 16  ;;  %v22553_v18 = vld [vmem:[#allocation3 + $0x30] sm:$0xff]  }
 0x8ac   : > { %v16661_v46 = vshll.u32 %v22553_v18, 16 }
 0x8ad   : > { %v16647_v37 = vrot.slane %v16645_v23, 1 }
 0x8ae   : > { %v16663_v44 = vrot.slane %v16661_v46, 1 }
 0x8b1   : > { %20319 = vmatmul.mubr.bf16.gmra.mrb[156].mxu1 %v14701_v13  ;;  %v15370_v13 = vsel %vm4431_vm0, %v15367_v35, %v15369_v51  ;;  %v22554_v35 = vld [vmem:[#allocation3 + $0x38] sm:$0xff]  }
 0x8b2   : > { %20338 = vmatprep.mubr.bf16.mxu1 %v15334_v6  ;;  %v15371_v6 = vrot.slane %v22511_v62, 1 }
 0x8b4   : > { %v15372_v45 = vsel %vm4431_vm0, %v15369_v51, %v15371_v6  ;;  %v16649_v51 = vshrl.u32 %v22550_v21, 16  ;;  %v22563_v21 = vld [vmem:[#allocation3 + $0x70] sm:$0xff]  }
 0x8b6   : > { %v16651_v62 = vor.u32 %v16649_v51, %v16647_v37 }
 0x8b9   : > { %20339 = vmatmul.mubr.bf16.vlgmr.msra.gmra.mrb[112].mxu1 %v15336_v27  ;;  %v22514_v27 = vld [vmem:[#allocation3 + $0xc4] sm:$0xff]  }
 0x8ba   : > { %20387 = vmatpush3.bf16.msra.mxu1 %v26421_v32  ;;  %20342 = vmatprep.mubr.bf16.mxu1 %v15338_v40  ;;  %v15342_v32 = vsel %vm4431_vm0, %v15339_v53, %v15341_v42  ;;  %v15377_v40 = vrot.slane %v22514_v27, 1 }
 0x8bb   : > { %20388 = vmatprep.subr.bf16.mxu1 %v22491_v41 }
 0x8bc   : > { %v15378_v53 = vsel %vm4431_vm0, %v15375_v25, %v15377_v40 }
 0x8be   : > { %20389 = vmatpush3.bf16.msra.mxu1 %v22491_v41  ;;  %v15374_v41 = vsel %vm4431_vm0, %v15371_v6, %v15373_v48  ;;  %v16669_v6 = vshll.u32 %v22554_v35, 16  ;;  %v22555_v48 = vld [vmem:[#allocation3 + $0x40] sm:$0xff]  }
 0x8bf   : > { %20390 = vmatprep.subr.bf16.mxu1 %v22494_v59 }
 0x8c0   : > { %v16671_v25 = vrot.slane %v16669_v6, 1 }
 0x8c1   : > { %20343 = vmatmul.mubr.bf16.gmra.mrb[116].mxu1 %v15340_v9  ;;  %v22517_v9 = vld [vmem:[#allocation3 + $0x18] sm:$0xff]  }
 0x8c2   : > { %20346 = vmatprep.mubr.bf16.mxu1 %v15342_v32  ;;  %20391 = vmatpush3.bf16.msra.mxu1 %v22494_v59  ;;  %v22516_v59 = vld [vmem:[#allocation3 + $0xcc] ss:$0 sps:$4 sm:$0x11]   ;;  %v22523_v32 = vld [vmem:[%s26755_s7 + $0x1c8] sm:$0xff]  }
 0x8c3   : > { %20392 = vmatprep.subr.bf16.mxu1 %v22499_v2  ;;  %v15379_v42 = vrot.slane %v22516_v59, 1  ;;  %v22557_v59 = vld [vmem:[#allocation3 + $0x48] sm:$0xff]  }
 0x8c6   : > { %20393 = vmatpush3.bf16.msra.mxu1 %v22499_v2  ;;  %v15380_v2 = vsel %vm4431_vm0, %v15377_v40, %v15379_v42  ;;  %v16677_v40 = vshll.u32 %v22555_v48, 16  ;;  %v16665_v42 = vshrl.u32 %v22553_v18, 16 }
 0x8c7   : > { %20394 = vmatprep.subr.bf16.mxu1 %v22502_v61 }
 0x8c9   : > { %20347 = vmatmul.mubr.bf16.gmra.mrb[120].mxu1 %v15344_v0  ;;  %v22534_v0 = vld [vmem:[%s26755_s7 + $0x1e0] sm:$0xff]  }
 0x8ca   : > { %20350 = vmatprep.mubr.bf16.mxu1 %v15346_v26  ;;  %20395 = vmatpush3.bf16.msra.mxu1 %v22502_v61  ;;  %v22526_v61 = vld [vmem:[%s26755_s7 + $0x1d0] sm:$0xff]   ;;  %v22539_v26 = vld [vmem:[%s26755_s7 + $0x1e8] sm:$0xff]  }
 0x8cb   : > { %20396 = vmatprep.subr.bf16.mxu1 %v22507_v36 }
 0x8ce   : > { %20397 = vmatpush3.bf16.msra.mxu1 %v22507_v36  ;;  %v22522_v36 = vld [vmem:[#allocation3 + $0x38] sm:$0xff]  }
 0x8cf   : > { %20398 = vmatprep.subr.bf16.mxu1 %v22510_v31 }
 0x8d1   : > { %20351 = vmatmul.mubr.bf16.gmra.mrb[124].mxu1 %v15348_v20  ;;  %v22551_v20 = vld [vmem:[%s26755_s7 + $0x200] sm:$0xff]  }
 0x8d2   : > { %20354 = vmatprep.mubr.bf16.mxu1 %v15350_v54  ;;  %20399 = vmatpush3.bf16.msra.mxu1 %v22510_v31  ;;  %v22542_v31 = vld [vmem:[%s26755_s7 + $0x1f0] sm:$0xff]  }
 0x8d3   : > { %20400 = vmatprep.subr.bf16.mxu1 %v22515_v16  ;;  %v22530_v54 = vld [vmem:[#allocation3 + $0x68] sm:$0xff]  }
 0x8d6   : > { %20401 = vmatpush3.bf16.msra.mxu1 %v22515_v16  ;;  %v22528_v16 = vld [vmem:[#allocation3 + $0x58] sm:$0xff]  }
 0x8d7   : > { %20450 = vmatprep.subr.bf16.mxu1 %v26473_v47 }
 0x8d9   : > { %20355 = vmatmul.mubr.bf16.gmra.mrb[128].mxu1 %v15352_v60  ;;  %v22537_v60 = vld [vmem:[#allocation3 + $0x90] sm:$0xff]  }
 0x8da   : > { %20358 = vmatprep.mubr.bf16.mxu1 %v15354_v43  ;;  %v22540_v43 = vld [vmem:[#allocation3 + $0xa0] sm:$0xff]  }
 0x8e1   : > { %20359 = vmatmul.mubr.bf16.gmra.mrb[132].mxu1 %v15356_v3  ;;  %v22549_v3 = vld [vmem:[#allocation3 + $0x18] sm:$0xff]  }
 0x8e2   : > { %20362 = vmatprep.mubr.bf16.mxu1 %v15358_v55  ;;  %v22545_v55 = vld [vmem:[#allocation3 + $0xc0] sm:$0xff]   ;;  %v16640_v7 = vshll.u32 %v22549_v3, 16  ;;  %v16638_v63 = vshrl.u32 %v22549_v3, 16 }
 0x8e9   : > { %20363 = vmatmul.mubr.bf16.gmra.mrb[136].mxu1 %v15360_v28  ;;  %v16642_v28 = vrot.slane %v16640_v7, 1  ;;  %v22580_v7 = vld [vmem:[%s26755_s7 + $0x238] sm:$0xff]  }
 0x8ea   : > { %20366 = vmatprep.mubr.bf16.mxu1 %v15362_v14  ;;  %v22548_v14 = vld [vmem:[#allocation3 + $0xd0] sm:$0xff]  }
 0x8f1   : > { %20367 = vmatmul.mubr.bf16.gmra.mrb[140].mxu1 %v15364_v52  ;;  %v16643_v52 = vor.u32 %v16642_v28, %v16638_v63  ;;  %v22565_v63 = vld [vmem:[#allocation3 + $0x78] sm:$0xff]  }
 0x8f2   : > { %20370 = vmatprep.mubr.bf16.mxu1 %v15366_v19  ;;  %v16733_v46 = vshll.u32 %v22565_v63, 16  ;;  %v16737_v6 = vshrl.u32 %v22565_v63, 16 }
 0x8f3   : > { %v16648_v19 = vsel %vm3246_vm1, %v16643_v52, %v16647_v37 }
 0x8f9   : > { %20371 = vmatmul.mubr.bf16.gmra.mrb[144].mxu1 %v15368_v57  ;;  %v16655_v57 = vrot.slane %v16653_v10, 1  ;;  %v22566_v10 = vld [vmem:[#allocation3 + $0x80] sm:$0xff]  }
 0x8fa   : > { %20374 = vmatprep.mubr.bf16.mxu1 %v15370_v13  ;;  %v16657_v13 = vshrl.u32 %v22552_v38, 16  ;;  %v16725_v38 = vshll.u32 %v22563_v21, 16 }
 0x8fc   : > { %v16727_v52 = vrot.slane %v16725_v38, 1 }
 0x901   : > { %20375 = vmatmul.mubr.bf16.gmra.mrb[148].mxu1 %v15372_v45  ;;  %v16659_v45 = vor.u32 %v16657_v13, %v16655_v57  ;;  %v22568_v13 = vld [vmem:[#allocation3 + $0x88] sm:$0xff]  }
 0x902   : > { %20378 = vmatprep.mubr.bf16.mxu1 %v15374_v41  ;;  %v16656_v41 = vsel %vm3246_vm1, %v16651_v62, %v16655_v57  ;;  %v16741_v57 = vshll.u32 %v22566_v10, 16  ;;  %v16735_v62 = vrot.slane %v16733_v46, 1 }
 0x903   : > { %v16664_v27 = vsel %vm3246_vm1, %v16659_v45, %v16663_v44  ;;  %v22569_v45 = vld [vmem:[#allocation3 + $0x90] sm:$0xff]  }
 0x909   : > { %20379 = vmatmul.mubr.bf16.gmra.mrb[152].mxu1 %v15376_v56  ;;  %v16673_v56 = vshrl.u32 %v22554_v35, 16 }
 0x90a   : > { %20382 = vmatprep.mubr.bf16.mxu1 %v15378_v53  ;;  %v22559_v53 = vld [vmem:[%s26755_s7 + $0x210] sm:$0xff]  }
 0x911   : > { %20383 = vmatmul.mubr.bf16.gmra.mrb[156].mxu1 %v15380_v2  ;;  %v16675_v2 = vor.u32 %v16673_v56, %v16671_v25  ;;  %v16757_v56 = vshll.u32 %v22569_v45, 16 }
 0x912   : > { %20402 = vmatprep.mubr.bf16.mxu1 %v22517_v9  ;;  %v16679_v9 = vrot.slane %v16677_v40, 1 }
 0x919   : > { %20403 = vmatmul.mubr.bf16.vlgmr.msra.gmra.mrb[112].mxu1 %v22519_v1  ;;  %v22558_v1 = vld [vmem:[#allocation3 + $0x50] sm:$0xff]  }
 0x91a   : > { %20451 = vmatpush3.bf16.msra.mxu1 %v26473_v47  ;;  %20406 = vmatprep.mubr.bf16.mxu1 %v22520_v29  ;;  %v22533_v47 = vld [vmem:[#allocation3 + $0x78] sm:$0xff]   ;;  %v16685_v29 = vshll.u32 %v22557_v59, 16 }
 0x91b   : > { %20452 = vmatprep.subr.bf16.mxu1 %v22523_v32 }
 0x91e   : > { %20453 = vmatpush3.bf16.msra.mxu1 %v22523_v32  ;;  %v16667_v32 = vor.u32 %v16665_v42, %v16663_v44  ;;  %v16729_v44 = vshrl.u32 %v22563_v21, 16 }
 0x91f   : > { %20454 = vmatprep.subr.bf16.mxu1 %v22526_v61 }
 0x921   : > { %20407 = vmatmul.mubr.bf16.gmra.mrb[116].mxu1 %v22521_v8  ;;  %v16672_v8 = vsel %vm3246_vm1, %v16667_v32, %v16671_v25 }
 0x922   : > { %20410 = vmatprep.mubr.bf16.mxu1 %v22522_v36  ;;  %20455 = vmatpush3.bf16.msra.mxu1 %v22526_v61  ;;  %v22564_v61 = vld [vmem:[%s26755_s7 + $0x218] sm:$0xff]   ;;  %v16693_v36 = vshll.u32 %v22558_v1, 16 }
 0x923   : > { %20456 = vmatprep.subr.bf16.mxu1 %v22531_v4 }
 0x926   : > { %20457 = vmatpush3.bf16.msra.mxu1 %v22531_v4  ;;  %v16680_v4 = vsel %vm3246_vm1, %v16675_v2, %v16679_v9 }
 0x927   : > { %20458 = vmatprep.subr.bf16.mxu1 %v22534_v0 }
 0x929   : > { %20411 = vmatmul.mubr.bf16.gmra.mrb[120].mxu1 %v22524_v24  ;;  %v22560_v24 = vld [vmem:[#allocation3 + $0x58] sm:$0xff]  }
 0x92a   : > { %20414 = vmatprep.mubr.bf16.mxu1 %v22525_v15  ;;  %20459 = vmatpush3.bf16.msra.mxu1 %v22534_v0  ;;  %v16687_v0 = vrot.slane %v16685_v29, 1  ;;  %v16681_v15 = vshrl.u32 %v22555_v48, 16  ;;  %v16743_v48 = vrot.slane %v16741_v57, 1  ;;  %v22571_v29 = vld [vmem:[#allocation3 + $0xa0] sm:$0xff]  }
 0x92b   : > { %20460 = vmatprep.subr.bf16.mxu1 %v22539_v26 }
 0x92e   : > { %20461 = vmatpush3.bf16.msra.mxu1 %v22539_v26  ;;  %v22567_v26 = vld [vmem:[%s26755_s7 + $0x220] sm:$0xff]  }
 0x92f   : > { %20462 = vmatprep.subr.bf16.mxu1 %v22542_v31 }
 0x931   : > { %20415 = vmatmul.mubr.bf16.gmra.mrb[124].mxu1 %v22527_v11  ;;  %v16695_v11 = vrot.slane %v16693_v36, 1 }
 0x932   : > { %20418 = vmatprep.mubr.bf16.mxu1 %v22528_v16  ;;  %20463 = vmatpush3.bf16.msra.mxu1 %v22542_v31  ;;  %v16689_v31 = vshrl.u32 %v22557_v59, 16  ;;  %v16683_v16 = vor.u32 %v16681_v15, %v16679_v9  ;;  %v22570_v59 = vld [vmem:[#allocation3 + $0x98] sm:$0xff]   ;;  %v16753_v9 = vshrl.u32 %v22568_v13, 16  ;;  %v16761_v15 = vshrl.u32 %v22569_v45, 16 }
 0x933   : > { %20464 = vmatprep.subr.bf16.mxu1 %v22547_v58  ;;  %v16765_v32 = vshll.u32 %v22570_v59, 16 }
 0x935   : > { %v16767_v36 = vrot.slane %v16765_v32, 1 }
 0x936   : > { %20465 = vmatpush3.bf16.msra.mxu1 %v22547_v58  ;;  %v22561_v58 = vld [vmem:[#allocation3 + $0x60] sm:$0xff]  }
 0x937   : > { %20514 = vmatprep.subr.bf16.mxu1 %v22551_v20  ;;  %v16713_v37 = vshrl.u32 %v22561_v58, 16 }
 0x939   : > { %20419 = vmatmul.mubr.bf16.gmra.mrb[128].mxu1 %v22529_v30  ;;  %v16701_v30 = vshll.u32 %v22560_v24, 16 }
 0x93a   : > { %20422 = vmatprep.mubr.bf16.mxu1 %v22530_v54  ;;  %v22572_v54 = vld [vmem:[%s26755_s7 + $0x228] sm:$0xff]  }
 0x941   : > { %20423 = vmatmul.mubr.bf16.gmra.mrb[132].mxu1 %v22532_v17  ;;  %v16688_v17 = vsel %vm3246_vm1, %v16683_v16, %v16687_v0 }
 0x942   : > { %20426 = vmatprep.mubr.bf16.mxu1 %v22533_v47 }
 0x949   : > { %20427 = vmatmul.mubr.bf16.gmra.mrb[136].mxu1 %v22535_v49  ;;  %v16709_v49 = vshll.u32 %v22561_v58, 16  ;;  %v22574_v58 = vld [vmem:[#allocation3 + $0xb0] sm:$0xff]  }
 0x94a   : > { %20430 = vmatprep.mubr.bf16.mxu1 %v22536_v50  ;;  %v22562_v50 = vld [vmem:[#allocation3 + $0x68] sm:$0xff]  }
 0x94b   : > { %v16717_v3 = vshll.u32 %v22562_v50, 16 }
 0x94d   : > { %v16719_v28 = vrot.slane %v16717_v3, 1 }
 0x951   : > { %20431 = vmatmul.mubr.bf16.gmra.mrb[140].mxu1 %v22537_v60  ;;  %v16697_v60 = vshrl.u32 %v22558_v1, 16  ;;  %v16759_v1 = vrot.slane %v16757_v56, 1 }
 0x952   : > { %20434 = vmatprep.mubr.bf16.mxu1 %v22538_v5  ;;  %v16703_v5 = vrot.slane %v16701_v30, 1 }
 0x953   : > { %v16763_v16 = vor.u32 %v16761_v15, %v16759_v1 }
 0x955   : > { %v16768_v30 = vsel %vm3246_vm1, %v16763_v16, %v16767_v36 }
 0x959   : > { %20435 = vmatmul.mubr.bf16.gmra.mrb[144].mxu1 %v22540_v43  ;;  %v22575_v43 = vld [vmem:[%s26755_s7 + $0x230] sm:$0xff]  }
 0x95a   : > { %20438 = vmatprep.mubr.bf16.mxu1 %v22541_v22  ;;  %v16699_v22 = vor.u32 %v16697_v60, %v16695_v11 }
 0x961   : > { %20439 = vmatmul.mubr.bf16.gmra.mrb[148].mxu1 %v22543_v12  ;;  %v16705_v12 = vshrl.u32 %v22560_v24, 16  ;;  %v16769_v24 = vshrl.u32 %v22570_v59, 16 }
 0x962   : > { %20442 = vmatprep.mubr.bf16.mxu1 %v22544_v34  ;;  %v16711_v34 = vrot.slane %v16709_v49, 1  ;;  %v22576_v49 = vld [vmem:[#allocation3 + $0xb8] sm:$0xff]  }
 0x963   : > { %v16801_v38 = vshrl.u32 %v22576_v49, 16 }
 0x969   : > { %20443 = vmatmul.mubr.bf16.gmra.mrb[152].mxu1 %v22545_v55  ;;  %v16707_v55 = vor.u32 %v16705_v12, %v16703_v5 }
 0x96a   : > { %20446 = vmatprep.mubr.bf16.mxu1 %v22546_v33  ;;  %v16704_v33 = vsel %vm3246_vm1, %v16699_v22, %v16703_v5 }
 0x96b   : > { %v16712_v23 = vsel %vm3246_vm1, %v16707_v55, %v16711_v34 }
 0x971   : > { %20447 = vmatmul.mubr.bf16.gmra.mrb[156].mxu1 %v22548_v14  ;;  %v16721_v14 = vshrl.u32 %v22562_v50, 16  ;;  %v16777_v50 = vshrl.u32 %v22571_v29, 16 }
 0x972   : > { %20466 = vmatprep.mubr.bf16.mxu1 %v16648_v19  ;;  %v16715_v19 = vor.u32 %v16713_v37, %v16711_v34  ;;  %v16797_v34 = vshll.u32 %v22576_v49, 16  ;;  %v22579_v37 = vld [vmem:[#allocation3 + $0xd0] sm:$0xff]  }
 0x973   : > { %v16723_v18 = vor.u32 %v16721_v14, %v16719_v28  ;;  %v16821_v46 = vshll.u32 %v22579_v37, 16 }
 0x974   : > { %v16720_v35 = vsel %vm3246_vm1, %v16715_v19, %v16719_v28 }
 0x975   : > { %v16728_v51 = vsel %vm3246_vm1, %v16723_v18, %v16727_v52 }
 0x979   : > { %20467 = vmatmul.mubr.bf16.vlgmr.msra.gmra.mrb[112].mxu1 %v16656_v41  ;;  %v16739_v41 = vor.u32 %v16737_v6, %v16735_v62  ;;  %v16825_v6 = vshrl.u32 %v22579_v37, 16 }
 0x97a   : > { %20515 = vmatpush3.bf16.msra.mxu1 %v22551_v20  ;;  %20470 = vmatprep.mubr.bf16.mxu1 %v16664_v27  ;;  %v16691_v20 = vor.u32 %v16689_v31, %v16687_v0  ;;  %v16749_v27 = vshll.u32 %v22568_v13, 16  ;;  %v16773_v0 = vshll.u32 %v22571_v29, 16  ;;  %v16771_v31 = vor.u32 %v16769_v24, %v16767_v36 }
 0x97b   : > { %20516 = vmatprep.subr.bf16.mxu1 %v22556_v39  ;;  %v16744_v40 = vsel %vm3246_vm1, %v16739_v41, %v16743_v48  ;;  %v22583_v41 = vld [vmem:[#allocation3 + $0x20] sm:$0xff]  }
 0x97c   : > { %v16696_v47 = vsel %vm3246_vm1, %v16691_v20, %v16695_v11  ;;  %v16751_v42 = vrot.slane %v16749_v27, 1  ;;  %v16775_v11 = vrot.slane %v16773_v0, 1  ;;  %v17464_v56 = vrot.slane %v22583_v41, 1 }
 0x97e   : > { %20517 = vmatpush3.bf16.msra.mxu1 %v22556_v39  ;;  %v16731_v39 = vor.u32 %v16729_v44, %v16727_v52  ;;  %v16779_v22 = vor.u32 %v16777_v50, %v16775_v11  ;;  %v16823_v44 = vrot.slane %v16821_v46, 1  ;;  %v22592_v50 = vld [vmem:[#allocation3 + $0x68] sm:$0xff]  }
 0x97f   : > { %20518 = vmatprep.subr.bf16.mxu1 %v22559_v53 }
 0x980   : > { %v16736_v25 = vsel %vm3246_vm1, %v16731_v39, %v16735_v62  ;;  %v16827_v27 = vor.u32 %v16825_v6, %v16823_v44 }
 0x981   : > { %20471 = vmatmul.mubr.bf16.gmra.mrb[116].mxu1 %v16672_v8 }
 0x982   : > { %20474 = vmatprep.mubr.bf16.mxu1 %v16680_v4  ;;  %20519 = vmatpush3.bf16.msra.mxu1 %v22559_v53  ;;  %v16745_v53 = vshrl.u32 %v22566_v10, 16 }
 0x983   : > { %20520 = vmatprep.subr.bf16.mxu1 %v22564_v61 }
 0x984   : > { %v16747_v2 = vor.u32 %v16745_v53, %v16743_v48 }
 0x986   : > { %20521 = vmatpush3.bf16.msra.mxu1 %v22564_v61  ;;  %v16755_v61 = vor.u32 %v16753_v9, %v16751_v42  ;;  %v16752_v8 = vsel %vm3246_vm1, %v16747_v2, %v16751_v42  ;;  %v22584_v42 = vld [vmem:[#allocation3 + $0x28] sm:$0xff]   ;;  %v22585_v9 = vld [vmem:[#allocation3 + $0x30] sm:$0xff]  }
 0x987   : > { %20522 = vmatprep.subr.bf16.mxu1 %v22567_v26  ;;  %v17468_v32 = vrot.slane %v22585_v9, 1 }
 0x988   : > { %v16760_v4 = vsel %vm3246_vm1, %v16755_v61, %v16759_v1  ;;  %v17466_v1 = vrot.slane %v22584_v42, 1  ;;  %v22586_v61 = vld [vmem:[#allocation3 + $0x38] sm:$0xff]  }
 0x989   : > { %20475 = vmatmul.mubr.bf16.gmra.mrb[120].mxu1 %v16688_v17  ;;  %v16789_v17 = vshll.u32 %v22574_v58, 16  ;;  %v17470_v36 = vrot.slane %v22586_v61, 1  ;;  %v26589_v61 = vld [vmem:[%s26756_s8] ss:$0 sm:$0xff] }
 0x98a   : > { %20478 = vmatprep.mubr.bf16.mxu1 %v16696_v47  ;;  %20523 = vmatpush3.bf16.msra.mxu1 %v22567_v26  ;;  %v22573_v26 = vld [vmem:[#allocation3 + $0xa8] sm:$0xff]   ;;  %v17467_v29 = vsel %vm4431_vm0, %v17464_v56, %v17466_v1 }
 0x98b   : > { %20524 = vmatprep.subr.bf16.mxu1 %v22572_v54  ;;  %v16781_v20 = vshll.u32 %v22573_v26, 16  ;;  %v16785_v60 = vshrl.u32 %v22573_v26, 16  ;;  %v16791_v5 = vrot.slane %v16789_v17, 1  ;;  %v17471_v24 = vsel %vm4431_vm0, %v17468_v32, %v17470_v36  ;;  %v22588_v26 = vld [vmem:[#allocation3 + $0x48] sm:$0xff]  }
 0x98d   : > { %v16783_v47 = vrot.slane %v16781_v20, 1  ;;  %v22590_v20 = vld [vmem:[#allocation3 + $0x58] sm:$0xff]  }
 0x98e   : > { %20525 = vmatpush3.bf16.msra.mxu1 %v22572_v54  ;;  %v16776_v54 = vsel %vm3246_vm1, %v16771_v31, %v16775_v11  ;;  %v22589_v31 = vld [vmem:[#allocation3 + $0x50] sm:$0xff]   ;;  %v17474_v11 = vrot.slane %v22588_v26, 1  ;;  %v17478_v17 = vrot.slane %v22590_v20, 1 }
 0x98f   : > { %20526 = vmatprep.subr.bf16.mxu1 %v22575_v43  ;;  %v16787_v12 = vor.u32 %v16785_v60, %v16783_v47  ;;  %v16784_v3 = vsel %vm3246_vm1, %v16779_v22, %v16783_v47 }
 0x991   : > { %20479 = vmatmul.mubr.bf16.gmra.mrb[124].mxu1 %v16704_v33  ;;  %v16792_v21 = vsel %vm3246_vm1, %v16787_v12, %v16791_v5  ;;  %v16793_v33 = vshrl.u32 %v22574_v58, 16  ;;  %v17476_v58 = vrot.slane %v22589_v31, 1 }
 0x992   : > { %20482 = vmatprep.mubr.bf16.mxu1 %v16712_v23  ;;  %20527 = vmatpush3.bf16.msra.mxu1 %v22575_v43  ;;  %v22577_v43 = vld [vmem:[#allocation3 + $0xc0] sm:$0xff]   ;;  %v16799_v23 = vrot.slane %v16797_v34, 1  ;;  %v22594_v34 = vld [vmem:[#allocation3 + $0x78] sm:$0xff]  }
 0x993   : > { %20528 = vmatprep.subr.bf16.mxu1 %v22580_v7  ;;  %v16805_v55 = vshll.u32 %v22577_v43, 16  ;;  %v16795_v28 = vor.u32 %v16793_v33, %v16791_v5  ;;  %v17479_v49 = vsel %vm4431_vm0, %v17476_v58, %v17478_v17  ;;  %v22593_v5 = vld [vmem:[#allocation3 + $0x70] sm:$0xff]  }
 0x994   : > { %v16803_v18 = vor.u32 %v16801_v38, %v16799_v23  ;;  %v17484_v22 = vrot.slane %v22593_v5, 1  ;;  %v22597_v38 = vld [vmem:[#allocation3 + $0x90] sm:$0xff]  }
 0x995   : > { %v16807_v14 = vrot.slane %v16805_v55, 1  ;;  %v16800_v52 = vsel %vm3246_vm1, %v16795_v28, %v16799_v23  ;;  %v17486_v55 = vrot.slane %v22594_v34, 1  ;;  %v22596_v23 = vld [vmem:[#allocation3 + $0x88] sm:$0xff]  }
 0x996   : > { %20529 = vmatpush3.bf16.msra.mxu1 %v22580_v7  ;;  %v22578_v7 = vld [vmem:[#allocation3 + $0xc8] sm:$0xff]  }
 0x997   : > { %v16813_v63 = vshll.u32 %v22578_v7, 16  ;;  %v16808_v10 = vsel %vm3246_vm1, %v16803_v18, %v16807_v14  ;;  %v16817_v57 = vshrl.u32 %v22578_v7, 16  ;;  %v17487_v33 = vsel %vm4431_vm0, %v17484_v22, %v17486_v55  ;;  %v22598_v18 = vld [vmem:[#allocation3 + $0x98] sm:$0xff]  }
 0x999   : > { %20483 = vmatmul.mubr.bf16.gmra.mrb[128].mxu1 %v16720_v35  ;;  %v16815_v19 = vrot.slane %v16813_v63, 1  ;;  %v16809_v35 = vshrl.u32 %v22577_v43, 16  ;;  %v17482_v43 = vrot.slane %v22592_v50, 1  ;;  %v17492_v63 = vrot.slane %v22597_v38, 1 }
 0x99a   : > { %20486 = vmatprep.mubr.bf16.mxu1 %v16728_v51  ;;  %v22581_v51 = vld [vmem:[#allocation3 + $0xd8] ss:$0 sps:$4 sm:$0x11]  }
 0x99b   : > { %v16811_v62 = vor.u32 %v16809_v35, %v16807_v14  ;;  %v16819_v13 = vor.u32 %v16817_v57, %v16815_v19  ;;  %v16829_v48 = vshll.u32 %v22581_v51, 16  ;;  %v17490_v14 = vrot.slane %v22596_v23, 1  ;;  %v22600_v51 = vld [vmem:[#allocation3 + $0xa8] sm:$0xff]  }
 0x99d   : > { %v16816_v45 = vsel %vm3246_vm1, %v16811_v62, %v16815_v19  ;;  %v16824_v39 = vsel %vm3246_vm1, %v16819_v13, %v16823_v44  ;;  %v17494_v19 = vrot.slane %v22598_v18, 1  ;;  %v22601_v62 = vld [vmem:[#allocation3 + $0xb0] sm:$0xff]   ;;  %v17498_v13 = vrot.slane %v22600_v51, 1 }
 0x99e   : > { %v17500_v44 = vrot.slane %v22601_v62, 1 }
 0x99f   : > { %v17495_v35 = vsel %vm4431_vm0, %v17492_v63, %v17494_v19 }
 0x9a1   : > { %20487 = vmatmul.mubr.bf16.gmra.mrb[132].mxu1 %v16736_v25  ;;  %v16831_v25 = vrot.slane %v16829_v48, 1  ;;  %v22602_v48 = vld [vmem:[#allocation3 + $0xb8] sm:$0xff]  }
 0x9a2   : > { %20490 = vmatprep.mubr.bf16.mxu1 %v16744_v40  ;;  %v22582_v40 = vld [vmem:[#allocation3 + $0x18] sm:$0xfe]   ;;  %v17502_v41 = vrot.slane %v22602_v48, 1 }
 0x9a3   : > { %v16832_v59 = vsel %vm3246_vm1, %v16827_v27, %v16831_v25  ;;  %v17463_v53 = vrot.slane %v22582_v40, 1  ;;  %v22604_v40 = vld [vmem:[#allocation3 + $0xc8] sm:$0xff]  }
 0x9a4   : > { %v17503_v25 = vsel %vm4431_vm0, %v17500_v44, %v17502_v41 }
 0x9a5   : > { %v17465_v2 = vsel %vm4431_vm0, %v17463_v53, %v17464_v56  ;;  %v17506_v53 = vrot.slane %v22604_v40, 1 }
 0x9a9   : > { %20491 = vmatmul.mubr.bf16.gmra.mrb[136].mxu1 %v16752_v8  ;;  %v17469_v8 = vsel %vm4431_vm0, %v17466_v1, %v17468_v32 }
 0x9aa   : > { %20494 = vmatprep.mubr.bf16.mxu1 %v16760_v4  ;;  %v22587_v4 = vld [vmem:[#allocation3 + $0x40] sm:$0xff]  }
 0x9ab   : > { %v17472_v0 = vrot.slane %v22587_v4, 1 }
 0x9ad   : > { %v17473_v15 = vsel %vm4431_vm0, %v17470_v36, %v17472_v0  ;;  %v17475_v16 = vsel %vm4431_vm0, %v17472_v0, %v17474_v11  ;;  %v26594_v36 = vld [vmem:[%s26757_s9] ss:$0 sm:$0xff] }
 0x9b1   : > { %20495 = vmatmul.mubr.bf16.gmra.mrb[140].mxu1 %v16768_v30  ;;  %v17477_v30 = vsel %vm4431_vm0, %v17474_v11, %v17476_v58 }
 0x9b2   : > { %20498 = vmatprep.mubr.bf16.mxu1 %v16776_v54  ;;  %v22591_v54 = vld [vmem:[#allocation3 + $0x60] sm:$0xff]  }
 0x9b3   : > { %v17480_v47 = vrot.slane %v22591_v54, 1 }
 0x9b5   : > { %v17481_v60 = vsel %vm4431_vm0, %v17478_v17, %v17480_v47  ;;  %v17483_v12 = vsel %vm4431_vm0, %v17480_v47, %v17482_v43 }
 0x9b9   : > { %20499 = vmatmul.mubr.bf16.gmra.mrb[144].mxu1 %v16784_v3  ;;  %v17485_v3 = vsel %vm4431_vm0, %v17482_v43, %v17484_v22 }
 0x9ba   : > { %20502 = vmatprep.mubr.bf16.mxu1 %v16792_v21  ;;  %v22595_v21 = vld [vmem:[#allocation3 + $0x80] sm:$0xff]  }
 0x9bb   : > { %v17488_v7 = vrot.slane %v22595_v21, 1 }
 0x9bd   : > { %v17489_v28 = vsel %vm4431_vm0, %v17486_v55, %v17488_v7  ;;  %v17491_v37 = vsel %vm4431_vm0, %v17488_v7, %v17490_v14 }
 0x9c1   : > { %20503 = vmatmul.mubr.bf16.gmra.mrb[148].mxu1 %v16800_v52  ;;  %v17493_v52 = vsel %vm4431_vm0, %v17490_v14, %v17492_v63 }
 0x9c2   : > { %20506 = vmatprep.mubr.bf16.mxu1 %v16808_v10  ;;  %v22599_v10 = vld [vmem:[#allocation3 + $0xa0] sm:$0xff]  }
 0x9c3   : > { %v17496_v46 = vrot.slane %v22599_v10, 1 }
 0x9c5   : > { %v17497_v57 = vsel %vm4431_vm0, %v17494_v19, %v17496_v46  ;;  %v17499_v6 = vsel %vm4431_vm0, %v17496_v46, %v17498_v13 }
 0x9c9   : > { %20507 = vmatmul.mubr.bf16.gmra.mrb[152].mxu1 %v16816_v45  ;;  %v17501_v45 = vsel %vm4431_vm0, %v17498_v13, %v17500_v44 }
 0x9ca   : > { %20510 = vmatprep.mubr.bf16.mxu1 %v16824_v39  ;;  %v22603_v39 = vld [vmem:[#allocation3 + $0xc0] sm:$0xff]  }
 0x9cb   : > { %v17504_v27 = vrot.slane %v22603_v39, 1 }
 0x9cd   : > { %v17505_v56 = vsel %vm4431_vm0, %v17502_v41, %v17504_v27  ;;  %v17507_v9 = vsel %vm4431_vm0, %v17504_v27, %v17506_v53 }
 0x9d1   : > { %20511 = vmatmul.mubr.bf16.gmra.mrb[156].mxu1 %v16832_v59  ;;  %v22605_v59 = vld [vmem:[#allocation3 + $0xd0] sm:$0xff]  }
 0x9d2   : > { %20530 = vmatprep.mubr.bf16.mxu1 %v17465_v2  ;;  %v17508_v42 = vrot.slane %v22605_v59, 1  ;;  %v22606_v2 = vld [vmem:[#allocation3 + $0xd8] ss:$0 sps:$4 sm:$0x11]  }
 0x9d3   : > { %v17510_v32 = vrot.slane %v22606_v2, 1 }
 0x9d4   : > { %v17509_v1 = vsel %vm4431_vm0, %v17506_v53, %v17508_v42 }
 0x9d9   : > { %20531 = vmatmul.mubr.bf16.vlgmr.msra.gmra.mrb[112].mxu1 %v17467_v29  ;;  %v17511_v29 = vsel %vm4431_vm0, %v17508_v42, %v17510_v32 }
 0x9da   : > { %20534 = vmatprep.mubr.bf16.mxu1 %v17469_v8 }
 0x9e1   : > { %20535 = vmatmul.mubr.bf16.gmra.mrb[116].mxu1 %v17471_v24 }
 0x9e2   : > { %20538 = vmatprep.mubr.bf16.mxu1 %v17473_v15 }
 0x9e9   : > { %20539 = vmatmul.mubr.bf16.gmra.mrb[120].mxu1 %v17475_v16 }
 0x9ea   : > { %20542 = vmatprep.mubr.bf16.mxu1 %v17477_v30 }
 0x9f1   : > { %20543 = vmatmul.mubr.bf16.gmra.mrb[124].mxu1 %v17479_v49 }
 0x9f2   : > { %20546 = vmatprep.mubr.bf16.mxu1 %v17481_v60 }
 0x9f9   : > { %20547 = vmatmul.mubr.bf16.gmra.mrb[128].mxu1 %v17483_v12 }
 0x9fa   : > { %20550 = vmatprep.mubr.bf16.mxu1 %v17485_v3 }
 0xa01   : > { %20551 = vmatmul.mubr.bf16.gmra.mrb[132].mxu1 %v17487_v33 }
 0xa02   : > { %20554 = vmatprep.mubr.bf16.mxu1 %v17489_v28 }
 0xa09   : > { %20555 = vmatmul.mubr.bf16.gmra.mrb[136].mxu1 %v17491_v37 }
 0xa0a   : > { %20558 = vmatprep.mubr.bf16.mxu1 %v17493_v52 }
 0xa11   : > { %20559 = vmatmul.mubr.bf16.gmra.mrb[140].mxu1 %v17495_v35 }
 0xa12   : > { %20562 = vmatprep.mubr.bf16.mxu1 %v17497_v57 }
 0xa19   : > { %20563 = vmatmul.mubr.bf16.gmra.mrb[144].mxu1 %v17499_v6 }
 0xa1a   : > { %20566 = vmatprep.mubr.bf16.mxu1 %v17501_v45 }
 0xa21   : > { %20567 = vmatmul.mubr.bf16.gmra.mrb[148].mxu1 %v17503_v25 }
 0xa22   : > { %20570 = vmatprep.mubr.bf16.mxu1 %v17505_v56 }
 0xa29   : > { %20571 = vmatmul.mubr.bf16.gmra.mrb[152].mxu1 %v17507_v9 }
 0xa2a   : > { %20574 = vmatprep.mubr.bf16.mxu1 %v17509_v1 }
 0xa31   : > { %20575 = vmatmul.mubr.bf16.gmra.mrb[156].mxu1 %v17511_v29 }
 0xaac   : > { %v20532_v8 = vpop.f32.mrb[112].mxu1 }
 0xaad   : > { %v17618_v4 = vpop.f32.mrb[113].mxu1 }
 0xaae   : > { %v17944_v0 = vmul.f32 %v26589_v61, %v17618_v4  ;;  %v20533_v24 = vpop.f32.mrb[114].mxu1 }
 0xaaf   : > { %v17946_v26 = vmul.f32 %v20533_v24, %v26589_v61  ;;  %v17621_v15 = vpop.f32.mrb[115].mxu1 }
 0xab0   : > { %v17983_v31 = vadd.f32 %v26594_v36, %v17944_v0  ;;  %v17945_v11 = vmul.f32 %v26589_v61, %v17621_v15 }
 0xab1   : > { %v17985_v58 = vadd.f32 %v26594_v36, %v17946_v26 }
 0xab2   : > { %v18015_v16 = vmax.f32 %v17983_v31, 0.0  ;;  %v17984_v20 = vadd.f32 %v26594_v36, %v17945_v11 }
 0xab3   : > { %v18017_v30 = vmax.f32 %v17985_v58, 0.0 }
 0xab4   : > { %18047 = vst [vmem:[%s26604_s30] sm:$0xff] %v18015_v16  ;;  %v18016_v54 = vmax.f32 %v17984_v20, 0.0  ;;  %v20536_v17 = vpop.f32.mrb[116].mxu1 }
 0xab5   : > { %19644 = vst [vmem:[%s26604_s30 + $0x10] sm:$0xff] %v18017_v30  ;;  %v17948_v47 = vmul.f32 %v20536_v17, %v26589_v61  ;;  %v17634_v49 = vpop.f32.mrb[117].mxu1 }
 0xab6   : > { %18048 = vst [vmem:[%s26604_s30 + $0x8] sm:$0xff] %v18016_v54  ;;  %v17947_v50 = vmul.f32 %v26589_v61, %v17634_v49  ;;  %v20537_v60 = vpop.f32.mrb[118].mxu1 }
 0xab7   : > { %v17987_v5 = vadd.f32 %v26594_v36, %v17948_v47  ;;  %v17949_v43 = vmul.f32 %v20537_v60, %v26589_v61  ;;  %v17637_v22 = vpop.f32.mrb[119].mxu1 }
 0xab8   : > { %v17986_v12 = vadd.f32 %v26594_v36, %v17947_v50 }
 0xab9   : > { %v18019_v34 = vmax.f32 %v17987_v5, 0.0  ;;  %v17988_v3 = vadd.f32 %v26594_v36, %v17949_v43 }
 0xaba   : > { %v18018_v21 = vmax.f32 %v17986_v12, 0.0 }
 0xabb   : > { %19646 = vst [vmem:[%s26604_s30 + $0x20] sm:$0xff] %v18019_v34  ;;  %v18020_v55 = vmax.f32 %v17988_v3, 0.0 }
 0xabc   : > { %19645 = vst [vmem:[%s26604_s30 + $0x18] sm:$0xff] %v18018_v21  ;;  %v20540_v7 = vpop.f32.mrb[120].mxu1 }
 0xabd   : > { %19647 = vst [vmem:[%s26604_s30 + $0x28] sm:$0xff] %v18020_v55  ;;  %v17951_v33 = vmul.f32 %v20540_v7, %v26589_v61  ;;  %v17650_v23 = vpop.f32.mrb[121].mxu1 }
 0xabe   : > { %v20541_v28 = vpop.f32.mrb[122].mxu1 }
 0xabf   : > { %v17990_v38 = vadd.f32 %v26594_v36, %v17951_v33  ;;  %v17653_v14 = vpop.f32.mrb[123].mxu1 }
 0xac0   : > { %v17950_v63 = vmul.f32 %v26589_v61, %v17653_v14 }
 0xac1   : > { %v18022_v37 = vmax.f32 %v17990_v38, 0.0 }
 0xac2   : > { %v17989_v18 = vadd.f32 %v26594_v36, %v17950_v63 }
 0xac3   : > { %19649 = vst [vmem:[%s26604_s30 + $0x38] sm:$0xff] %v18022_v37 }
 0xac4   : > { %v18021_v52 = vmax.f32 %v17989_v18, 0.0  ;;  %v20544_v10 = vpop.f32.mrb[124].mxu1 }
 0xac5   : > { %v17666_v19 = vpop.f32.mrb[125].mxu1 }
 0xac6   : > { %19648 = vst [vmem:[%s26604_s30 + $0x30] sm:$0xff] %v18021_v52  ;;  %v17952_v46 = vmul.f32 %v26589_v61, %v17666_v19  ;;  %v20545_v35 = vpop.f32.mrb[126].mxu1 }
 0xac7   : > { %v17954_v51 = vmul.f32 %v20545_v35, %v26589_v61  ;;  %v17669_v57 = vpop.f32.mrb[127].mxu1 }
 0xac8   : > { %v17991_v62 = vadd.f32 %v26594_v36, %v17952_v46  ;;  %v17953_v13 = vmul.f32 %v26589_v61, %v17669_v57 }
 0xac9   : > { %v17993_v44 = vadd.f32 %v26594_v36, %v17954_v51 }
 0xaca   : > { %v18023_v6 = vmax.f32 %v17991_v62, 0.0  ;;  %v17992_v48 = vadd.f32 %v26594_v36, %v17953_v13 }
 0xacb   : > { %v18025_v45 = vmax.f32 %v17993_v44, 0.0 }
 0xacc   : > { %19650 = vst [vmem:[%s26604_s30 + $0x40] sm:$0xff] %v18023_v6  ;;  %v18024_v39 = vmax.f32 %v17992_v48, 0.0  ;;  %v20548_v41 = vpop.f32.mrb[128].mxu1 }
 0xacd   : > { %19652 = vst [vmem:[%s26604_s30 + $0x50] sm:$0xff] %v18025_v45  ;;  %v17956_v27 = vmul.f32 %v20548_v41, %v26589_v61  ;;  %v17682_v25 = vpop.f32.mrb[129].mxu1 }
 0xace   : > { %19651 = vst [vmem:[%s26604_s30 + $0x48] sm:$0xff] %v18024_v39  ;;  %v17955_v40 = vmul.f32 %v26589_v61, %v17682_v25  ;;  %v20549_v56 = vpop.f32.mrb[130].mxu1 }
 0xacf   : > { %v17995_v59 = vadd.f32 %v26594_v36, %v17956_v27  ;;  %v17957_v53 = vmul.f32 %v20549_v56, %v26589_v61  ;;  %v17685_v42 = vpop.f32.mrb[131].mxu1 }
 0xad0   : > { %v17994_v2 = vadd.f32 %v26594_v36, %v17955_v40 }
 0xad1   : > { %v18027_v9 = vmax.f32 %v17995_v59, 0.0  ;;  %v17996_v1 = vadd.f32 %v26594_v36, %v17957_v53 }
 0xad2   : > { %v18026_v32 = vmax.f32 %v17994_v2, 0.0 }
 0xad3   : > { %19654 = vst [vmem:[%s26604_s30 + $0x60] sm:$0xff] %v18027_v9  ;;  %v18028_v29 = vmax.f32 %v17996_v1, 0.0 }
 0xad4   : > { %19653 = vst [vmem:[%s26604_s30 + $0x58] sm:$0xff] %v18026_v32  ;;  %v20552_v8 = vpop.f32.mrb[132].mxu1 }
 0xad5   : > { %19655 = vst [vmem:[%s26604_s30 + $0x68] sm:$0xff] %v18028_v29  ;;  %v17959_v4 = vmul.f32 %v20552_v8, %v26589_v61  ;;  %v17698_v0 = vpop.f32.mrb[133].mxu1 }
 0xad6   : > { %v20553_v24 = vpop.f32.mrb[134].mxu1 }
 0xad7   : > { %v17998_v26 = vadd.f32 %v26594_v36, %v17959_v4  ;;  %v17701_v15 = vpop.f32.mrb[135].mxu1 }
 0xad8   : > { %v17958_v31 = vmul.f32 %v26589_v61, %v17701_v15 }
 0xad9   : > { %v18030_v11 = vmax.f32 %v17998_v26, 0.0 }
 0xada   : > { %v17997_v58 = vadd.f32 %v26594_v36, %v17958_v31 }
 0xadb   : > { %19657 = vst [vmem:[%s26604_s30 + $0x78] sm:$0xff] %v18030_v11 }
 0xadc   : > { %v18029_v16 = vmax.f32 %v17997_v58, 0.0  ;;  %v20556_v20 = vpop.f32.mrb[136].mxu1 }
 0xadd   : > { %v17714_v30 = vpop.f32.mrb[137].mxu1 }
 0xade   : > { %19656 = vst [vmem:[%s26604_s30 + $0x70] sm:$0xff] %v18029_v16  ;;  %v17960_v54 = vmul.f32 %v26589_v61, %v17714_v30  ;;  %v20557_v17 = vpop.f32.mrb[138].mxu1 }
 0xadf   : > { %v17962_v47 = vmul.f32 %v20557_v17, %v26589_v61  ;;  %v17717_v49 = vpop.f32.mrb[139].mxu1 }
 0xae0   : > { %v17999_v50 = vadd.f32 %v26594_v36, %v17960_v54  ;;  %v17961_v60 = vmul.f32 %v26589_v61, %v17717_v49 }
 0xae1   : > { %v18001_v5 = vadd.f32 %v26594_v36, %v17962_v47 }
 0xae2   : > { %v18031_v43 = vmax.f32 %v17999_v50, 0.0  ;;  %v18000_v22 = vadd.f32 %v26594_v36, %v17961_v60 }
 0xae3   : > { %v18033_v12 = vmax.f32 %v18001_v5, 0.0 }
 0xae4   : > { %19658 = vst [vmem:[%s26604_s30 + $0x80] sm:$0xff] %v18031_v43  ;;  %v18032_v34 = vmax.f32 %v18000_v22, 0.0  ;;  %v20560_v3 = vpop.f32.mrb[140].mxu1 }
 0xae5   : > { %19660 = vst [vmem:[%s26604_s30 + $0x90] sm:$0xff] %v18033_v12  ;;  %v17964_v21 = vmul.f32 %v20560_v3, %v26589_v61  ;;  %v17730_v55 = vpop.f32.mrb[141].mxu1 }
 0xae6   : > { %19659 = vst [vmem:[%s26604_s30 + $0x88] sm:$0xff] %v18032_v34  ;;  %v17963_v7 = vmul.f32 %v26589_v61, %v17730_v55  ;;  %v20561_v33 = vpop.f32.mrb[142].mxu1 }
 0xae7   : > { %v18003_v23 = vadd.f32 %v26594_v36, %v17964_v21  ;;  %v17965_v28 = vmul.f32 %v20561_v33, %v26589_v61  ;;  %v17733_v38 = vpop.f32.mrb[143].mxu1 }
 0xae8   : > { %v18002_v14 = vadd.f32 %v26594_v36, %v17963_v7 }
 0xae9   : > { %v18035_v63 = vmax.f32 %v18003_v23, 0.0  ;;  %v18004_v37 = vadd.f32 %v26594_v36, %v17965_v28 }
 0xaea   : > { %v18034_v18 = vmax.f32 %v18002_v14, 0.0 }
 0xaeb   : > { %19662 = vst [vmem:[%s26604_s30 + $0xa0] sm:$0xff] %v18035_v63  ;;  %v18036_v52 = vmax.f32 %v18004_v37, 0.0 }
 0xaec   : > { %19661 = vst [vmem:[%s26604_s30 + $0x98] sm:$0xff] %v18034_v18  ;;  %v20564_v10 = vpop.f32.mrb[144].mxu1 }
 0xaed   : > { %19663 = vst [vmem:[%s26604_s30 + $0xa8] sm:$0xff] %v18036_v52  ;;  %v17967_v19 = vmul.f32 %v20564_v10, %v26589_v61  ;;  %v17746_v46 = vpop.f32.mrb[145].mxu1 }
 0xaee   : > { %v20565_v35 = vpop.f32.mrb[146].mxu1 }
 0xaef   : > { %v18006_v51 = vadd.f32 %v26594_v36, %v17967_v19  ;;  %v17749_v57 = vpop.f32.mrb[147].mxu1 }
 0xaf0   : > { %v17966_v62 = vmul.f32 %v26589_v61, %v17749_v57 }
 0xaf1   : > { %v18038_v13 = vmax.f32 %v18006_v51, 0.0 }
 0xaf2   : > { %v18005_v44 = vadd.f32 %v26594_v36, %v17966_v62 }
 0xaf3   : > { %19665 = vst [vmem:[%s26604_s30 + $0xb8] sm:$0xff] %v18038_v13 }
 0xaf4   : > { %v18037_v6 = vmax.f32 %v18005_v44, 0.0  ;;  %v20568_v48 = vpop.f32.mrb[148].mxu1 }
 0xaf5   : > { %v17762_v45 = vpop.f32.mrb[149].mxu1 }
 0xaf6   : > { %19664 = vst [vmem:[%s26604_s30 + $0xb0] sm:$0xff] %v18037_v6  ;;  %v17968_v39 = vmul.f32 %v26589_v61, %v17762_v45  ;;  %v20569_v41 = vpop.f32.mrb[150].mxu1 }
 0xaf7   : > { %v17970_v27 = vmul.f32 %v20569_v41, %v26589_v61  ;;  %v17765_v25 = vpop.f32.mrb[151].mxu1 }
 0xaf8   : > { %v18007_v40 = vadd.f32 %v26594_v36, %v17968_v39  ;;  %v17969_v56 = vmul.f32 %v26589_v61, %v17765_v25 }
 0xaf9   : > { %v18009_v59 = vadd.f32 %v26594_v36, %v17970_v27 }
 0xafa   : > { %v18039_v53 = vmax.f32 %v18007_v40, 0.0  ;;  %v18008_v42 = vadd.f32 %v26594_v36, %v17969_v56 }
 0xafb   : > { %v18041_v2 = vmax.f32 %v18009_v59, 0.0 }
 0xafc   : > { %19666 = vst [vmem:[%s26604_s30 + $0xc0] sm:$0xff] %v18039_v53  ;;  %v18040_v9 = vmax.f32 %v18008_v42, 0.0  ;;  %v20572_v1 = vpop.f32.mrb[152].mxu1 }
 0xafd   : > { %19668 = vst [vmem:[%s26604_s30 + $0xd0] sm:$0xff] %v18041_v2  ;;  %v17972_v32 = vmul.f32 %v20572_v1, %v26589_v61  ;;  %v17778_v29 = vpop.f32.mrb[153].mxu1 }
 0xafe   : > { %19667 = vst [vmem:[%s26604_s30 + $0xc8] sm:$0xff] %v18040_v9  ;;  %v17971_v8 = vmul.f32 %v26589_v61, %v17778_v29  ;;  %v20573_v4 = vpop.f32.mrb[154].mxu1 }
 0xaff   : > { %v18011_v0 = vadd.f32 %v26594_v36, %v17972_v32  ;;  %v17973_v24 = vmul.f32 %v20573_v4, %v26589_v61  ;;  %v17781_v26 = vpop.f32.mrb[155].mxu1 }
 0xb00   : > { %v18010_v15 = vadd.f32 %v26594_v36, %v17971_v8 }
 0xb01   : > { %v18043_v31 = vmax.f32 %v18011_v0, 0.0  ;;  %v18012_v11 = vadd.f32 %v26594_v36, %v17973_v24 }
 0xb02   : > { %v18042_v58 = vmax.f32 %v18010_v15, 0.0 }
 0xb03   : > { %19670 = vst [vmem:[%s26604_s30 + $0xe0] sm:$0xff] %v18043_v31  ;;  %v18044_v16 = vmax.f32 %v18012_v11, 0.0 }
 0xb04   : > { %19669 = vst [vmem:[%s26604_s30 + $0xd8] sm:$0xff] %v18042_v58  ;;  %v20576_v20 = vpop.f32.mrb[156].mxu1 }
 0xb05   : > { %19671 = vst [vmem:[%s26604_s30 + $0xe8] sm:$0xff] %v18044_v16  ;;  %v17975_v30 = vmul.f32 %v20576_v20, %v26589_v61  ;;  %v17794_v54 = vpop.f32.mrb[157].mxu1 }
 0xb06   : > { %v20577_v17 = vpop.f32.mrb[158].mxu1 }
 0xb07   : > { %v18014_v47 = vadd.f32 %v26594_v36, %v17975_v30  ;;  %v17797_v49 = vpop.f32.mrb[159].mxu1 }
 0xb08   : > { %v17974_v50 = vmul.f32 %v26589_v61, %v17797_v49 }
 0xb09   : > { %v18046_v60 = vmax.f32 %v18014_v47, 0.0 }
 0xb0a   : > { %v18013_v5 = vadd.f32 %v26594_v36, %v17974_v50 }
 0xb0b   : > { %19673 = vst [vmem:[%s26604_s30 + $0xf8] sm:$0xff] %v18046_v60 }
 0xb0c   : > { %v18045_v43 = vmax.f32 %v18013_v5, 0.0 }
 0xb0e   : > { %19672 = vst [vmem:[%s26604_s30 + $0xf0] sm:$0xff] %v18045_v43 }
 0xb0f   : > { %22720 = shalt.err (!%p22717_p3)
}
 0xb10   : > { %s22721_s26 = scalar_lea.hbm %s26700_s22, 4096  ;;  %s22725_s30 = scalar_lea.hbm %s26758_s10, 8192 }
 0xb11   : > { %p22722_p4 = scmp.ne.s32.totalorder %s26700_s22, %s22721_s26  ;;  %p22726_p9 = scmp.lt.u32.totalorder %s26700_s22, %s26758_s10 }
 0xb12   : > { %p22727_p10 = scmp.lt.u32.totalorder %s22725_s30, %s22721_s26  ;;  %p22729_p12 = scmp.lt.u32.totalorder %s22721_s26, %s26700_s22 }
 0xb13   : > { %p22723_p7 = pnand %p22722_p4, %p22869_p5 }
 0xb14   : > { %p22728_p11 = por %p22727_p10, %p22726_p9 }
 0xb15   : > { %p22724_p8 = pneg %p22723_p7 }
 0xb16   : > { %p22730_p13 = por %p22729_p12, %p22728_p11 }
 0xb18   : > { %p22731_p0 = pnand %p22730_p13, %p22724_p8 }
 0xb1a   : > { %22734 = shalt.err (!%p22731_p0)
}
 0xb1b   : > { %s22774_s21 = smov 128   ;;  %s22775_s17 = smov 8  }
 0xb1c   : > { %21698 = dma.vmem_to_hbm [thread:$0]  (%p22869_p5), %s26702_s12, 4096, %s26700_s22, %s26707_s25, %s22774_s21, %s22774_s21, %s22775_s17  }
 0xb1d PF: > { %p21704_p1 = scmp.ge.s32.totalorder %s22769_s16, 2  ;;  %s18123_s18 = sand.u32 1, %s22757_s13  }
 0xb1e   : > { %s18124_s27 = scalar_lea.sflag [#allocation6], %s18123_s18 }
 0xb1f   : > { %p21701_p2 = pnand %p21704_p1, %p22873_p6 }
 0xb21   : > { %22752 = dma.done.wait (!%p21701_p2), %s18124_s27, 4096  }
 0xb22   : > { %22754 = vsyncadd (!%p21701_p2), %s18124_s27, 4294963200  ;;  %s27018_s28 = sld [smem:[#allocation8_spill]]  ;;  %s27019_s15 = sld [smem:[#allocation9_spill]] }
 0xb23   : > { %p20_p3 = scmp.ge.s32.totalorder %s22856_s19, 4   ;;  %s27020_s13 = smov %s22761_s14 }
 0xb24   : > { %s27022_s16 = smov %s22856_s19 }
 0xb25   :  { %22 = sbr.rel (!%p20_p3) target bundleno = 3 (0x3), region = 145 }
 0xb28   : > { %s27021_s14 = smov %s27018_s28 }
 0xb2c   :  { %18129 = vsyncpa [#allocation6], 1 }
 0xb2d   :  { %18131 = vsyncpa [#allocation6 + $0x1], 1 }

</bundles_post_ra>
